<compile_context>
chip_gen: v5e
topology: v5e:2x2
jax: 0.10.0
libtpu: 0.0.40
codegen_flags: <defaults>
</compile_context>

<pallas_src>
import functools

import jax
import jax.numpy as jnp
from jax.experimental import pallas as pl
from jax.experimental.pallas import tpu as pltpu

LANE = 128                      # lane width / Cout padding target
TM = 256                        # row tile along M = B*H*W
VMEM_LIMIT = 32 * 1024 * 1024   # safe on v5e/v6e (128 MiB) and v7x (64 MiB)


def _round_up(x, m):
    return ((x + m - 1) // m) * m


# ----------------------------------------------------------------------------
# Kernel 1: fused matmul + bias + optional ReLU (generic im2col conv)
# ----------------------------------------------------------------------------
def _mm_bias_act_kernel(a_ref, w_ref, b_ref, o_ref, *, act):
    acc = jnp.dot(a_ref[...], w_ref[...], preferred_element_type=jnp.float32)
    acc = acc + b_ref[...]                      # (1, Cp) broadcasts over rows
    if act == "relu":
        acc = jnp.maximum(acc, 0.0)
    o_ref[...] = acc.astype(o_ref.dtype)


def matmul_bias_act(a, w, b=None, act=None, out_dtype=jnp.bfloat16):
    """a: (M, K), w: (K, Cout), b: (Cout,)|None -> (M, Cp) lane-dense (Cp=128k)."""
    M, K = a.shape
    Cout = w.shape[1]
    Cp = _round_up(Cout, LANE)
    a16 = a.astype(jnp.bfloat16)
    w16 = jnp.pad(w, ((0, 0), (0, Cp - Cout))).astype(jnp.bfloat16)
    bias = jnp.zeros((Cout,), jnp.float32) if b is None else b.astype(jnp.float32)
    bp = jnp.pad(bias, (0, Cp - Cout)).reshape(1, Cp)

    return pl.pallas_call(
        functools.partial(_mm_bias_act_kernel, act=act),
        out_shape=jax.ShapeDtypeStruct((M, Cp), out_dtype),
        grid_spec=pltpu.PrefetchScalarGridSpec(
            num_scalar_prefetch=0,
            grid=(pl.cdiv(M, TM),),
            in_specs=[
                pl.BlockSpec((TM, K), lambda i: (i, 0)),
                pl.BlockSpec((K, Cp), lambda i: (0, 0)),   # grid-invariant weight
                pl.BlockSpec((1, Cp), lambda i: (0, 0)),   # grid-invariant bias
            ],
            out_specs=pl.BlockSpec((TM, Cp), lambda i: (i, 0)),
        ),
        compiler_params=pltpu.CompilerParams(
            dimension_semantics=("parallel",),
            vmem_limit_bytes=VMEM_LIMIT),
    )(a16, w16, bp)


# ----------------------------------------------------------------------------
# im2col in NHWC; K zero-padded to a lane multiple inside the concat
# ----------------------------------------------------------------------------
def _im2col_nhwc(x, ksize):
    B, H, W, C = x.shape
    p = ksize // 2
    xp = jnp.pad(x, ((0, 0), (p, p), (p, p), (0, 0)))
    cols = [xp[:, dy:dy + H, dx:dx + W, :]
            for dy in range(ksize) for dx in range(ksize)]
    K = ksize * ksize * C
    Kp = _round_up(K, LANE)
    if Kp > K:
        cols.append(jnp.zeros((B, H, W, Kp - K), x.dtype))
    return jnp.concatenate(cols, axis=-1), K, Kp            # (B,H,W,Kp)


def conv2d_nhwc(x, w, b=None, act=None, keep_padded=False,
                out_dtype=jnp.bfloat16):
    """'same' conv, stride 1. x: (B,H,W,Cin); w: torch layout (Cout,Cin,kh,kw)."""
    B, H, W, Cin = x.shape
    Cout, _, kh, kw = w.shape
    if kh == 1 and kw == 1:
        a = x.reshape(B * H * W, Cin)
        wmat = w.reshape(Cout, Cin).T
    else:
        cols, K, Kp = _im2col_nhwc(x, kh)
        a = cols.reshape(B * H * W, Kp)
        wmat = jnp.transpose(w, (2, 3, 1, 0)).reshape(K, Cout)
        wmat = jnp.pad(wmat, ((0, Kp - K), (0, 0)))
    out = matmul_bias_act(a, wmat, b, act, out_dtype)        # (M, Cp)
    Cp = out.shape[1]
    if keep_padded:
        return out.reshape(B, H, W, Cp)                      # padded chans are 0
    return out[:, :Cout].reshape(B, H, W, Cout)


# ----------------------------------------------------------------------------
# Kernel 2: 3x3 conv fused with global average pool (accumulator pattern)
# ----------------------------------------------------------------------------
def _conv_avgpool_kernel(a_ref, w_ref, b_ref, o_ref, *, hw, tm):
    j = pl.program_id(0)

    @pl.when(j == 0)
    def _():
        o_ref[...] = jnp.zeros_like(o_ref)

    a = a_ref[...]                                           # (B, TM, Kp) bf16
    bsz, tmb, kp = a.shape
    acc = jnp.dot(a.reshape(bsz * tmb, kp), w_ref[...],
                  preferred_element_type=jnp.float32)
    acc = acc.reshape(bsz, tmb, -1)                          # (B, TM, Cp)
    row = jax.lax.broadcasted_iota(jnp.int32, acc.shape, 1) + j * tm
    acc = jnp.where(row < hw, acc, 0.0)                      # mask ragged block
    o_ref[...] += jnp.sum(acc, axis=1)                       # (B, Cp)

    @pl.when(j == pl.num_programs(0) - 1)
    def _():
        o_ref[...] = o_ref[...] * (1.0 / hw) + b_ref[...]


def conv3x3_global_avg(x, w, b):
    """mean_{h,w} (conv3x3(x) + bias)  ->  (B, Cp) f32 (cols >= Cout are zero)."""
    B, H, W, Cin = x.shape
    Cout = w.shape[0]
    Cp = _round_up(Cout, LANE)
    cols, K, Kp = _im2col_nhwc(x, 3)
    a = cols.reshape(B, H * W, Kp).astype(jnp.bfloat16)
    wmat = jnp.transpose(w, (2, 3, 1, 0)).reshape(K, Cout)
    wmat = jnp.pad(wmat, ((0, Kp - K), (0, Cp - Cout))).astype(jnp.bfloat16)
    bp = jnp.pad(b.astype(jnp.float32), (0, Cp - Cout)).reshape(1, Cp)
    HW = H * W

    return pl.pallas_call(
        functools.partial(_conv_avgpool_kernel, hw=HW, tm=TM),
        out_shape=jax.ShapeDtypeStruct((B, Cp), jnp.float32),
        grid_spec=pltpu.PrefetchScalarGridSpec(
            num_scalar_prefetch=0,
            grid=(pl.cdiv(HW, TM),),
            in_specs=[
                pl.BlockSpec((B, TM, Kp), lambda j: (0, j, 0)),
                pl.BlockSpec((Kp, Cp), lambda j: (0, 0)),
                pl.BlockSpec((1, Cp), lambda j: (0, 0)),
            ],
            out_specs=pl.BlockSpec((B, Cp), lambda j: (0, 0)),
        ),
        compiler_params=pltpu.CompilerParams(
            dimension_semantics=("arbitrary",),
            vmem_limit_bytes=VMEM_LIMIT),
    )(a, wmat, bp)


# ----------------------------------------------------------------------------
# Kernel 3: squeeze-excite fc  (Linear -> ReLU -> Linear -> Sigmoid), one block
# ----------------------------------------------------------------------------
def _se_fc_kernel(x_ref, w1_ref, w2_ref, o_ref):
    h = jnp.maximum(
        jnp.dot(x_ref[...], w1_ref[...], preferred_element_type=jnp.float32), 0.0)
    y = jnp.dot(h, w2_ref[...], preferred_element_type=jnp.float32)
    o_ref[...] = jax.nn.sigmoid(y)


def se_fc(pooled_p, w1, w2):
    """pooled_p: (B, Cp) zero-padded past channel; w1: (R,C), w2: (C,R) torch."""
    B, Cp = pooled_p.shape
    R, C = w1.shape
    w1p = jnp.zeros((Cp, Cp), jnp.float32).at[:C, :R].set(w1.T)
    w2p = jnp.zeros((Cp, Cp), jnp.float32).at[:R, :C].set(w2.T)
    return pl.pallas_call(
        _se_fc_kernel,
        out_shape=jax.ShapeDtypeStruct((B, Cp), jnp.float32),
    )(pooled_p, w1p, w2p)


# ----------------------------------------------------------------------------
# Kernel 4: per-batch channel scale * 1x1 conv2 (64->1) * tanh(abs(.))
#   y[b,t] = tanh(| sum_c m_fea[b,t,c] * s[b,c] * w2[c] |)
# ----------------------------------------------------------------------------
def _scale_proj_tanh_kernel(m_ref, v_ref, o_ref):
    m = m_ref[...].astype(jnp.float32)                       # (B, TM, Cp)
    v = v_ref[...]                                           # (B, Cp) f32
    y = jnp.sum(m * v[:, None, :], axis=-1)                  # (B, TM) lane reduce
    o_ref[...] = jnp.tanh(jnp.abs(y))


def scale_proj_tanh(m_fea_p, v):
    B, HW, Cp = m_fea_p.shape
    return pl.pallas_call(
        _scale_proj_tanh_kernel,
        out_shape=jax.ShapeDtypeStruct((B, HW), jnp.float32),
        grid_spec=pltpu.PrefetchScalarGridSpec(
            num_scalar_prefetch=0,
            grid=(pl.cdiv(HW, TM),),
            in_specs=[
                pl.BlockSpec((B, TM, Cp), lambda j: (0, j, 0)),
                pl.BlockSpec((B, Cp), lambda j: (0, 0)),
            ],
            out_specs=pl.BlockSpec((B, TM), lambda j: (0, j)),
        ),
        compiler_params=pltpu.CompilerParams(
            dimension_semantics=("parallel",),
            vmem_limit_bytes=VMEM_LIMIT),
    )(m_fea_p, v)


# ----------------------------------------------------------------------------
# SoftBinary.forward
# ----------------------------------------------------------------------------
def soft_binary(params, bmask, feaL, feaR, training=False, key=None):
    """Inputs NCHW f32: bmask (B,1,H,W), feaL/feaR (B,cin,H,W) -> (B,1,H,W)."""
    # single NCHW -> NHWC transpose (+ bf16 cast) at the boundary
    bm = jnp.transpose(bmask, (0, 2, 3, 1)).astype(jnp.bfloat16)
    fl = jnp.transpose(feaL, (0, 2, 3, 1)).astype(jnp.bfloat16)
    fr = jnp.transpose(feaR, (0, 2, 3, 1)).astype(jnp.bfloat16)
    B, H, W, _ = bm.shape

    # m_fea = conv1(bmask): 7x7 + ReLU, 3x3 + ReLU, 1x1 (all bias-free)
    x = conv2d_nhwc(bm, params['conv1_0_w'], act="relu")
    x = conv2d_nhwc(x, params['conv1_1_w'], act="relu")
    m_fea_p = conv2d_nhwc(x, params['conv1_2_w'], act=None, keep_padded=True)

    # att conv on cat(feaL, feaR) fused with the global average pool
    att_in = jnp.concatenate([fl, fr], axis=-1)
    pooled_p = conv3x3_global_avg(att_in, params['att_w'], params['att_b'])

    # squeeze-excite fc (sigmoid channel scale), stays in padded-channel space
    s_p = se_fc(pooled_p, params['fc1_w'], params['fc2_w'])              # (B, Cp)

    # fold conv2 (1x1, 64->1, no bias) into the per-batch channel vector
    Cp = s_p.shape[1]
    w2c = params['conv2_w'].reshape(-1)
    v = s_p * jnp.pad(w2c, (0, Cp - w2c.shape[0]))[None, :]              # (B, Cp)

    y = scale_proj_tanh(m_fea_p.reshape(B, H * W, Cp), v)                # (B, HW)
    out = y.reshape(B, 1, H, W)

    if training:
        # TODO(synk): training-mode uniform noise uses jax.random glue, not pltpu PRNG.
        out = out + (jax.random.uniform(key, out.shape, jnp.float32) - 0.5) / 100.0
    return out


# ----------------------------------------------------------------------------
# Pure-JAX reference (same bf16 rounding points) for a correctness check
# ----------------------------------------------------------------------------
def _reference_forward(params, bmask, feaL, feaR):
    def conv(x, w, b=None):
        y = jax.lax.conv_general_dilated(
            x.astype(jnp.bfloat16), w.astype(jnp.bfloat16),
            window_strides=(1, 1), padding="SAME",
            dimension_numbers=("NCHW", "OIHW", "NCHW"),
            preferred_element_type=jnp.float32)
        if b is not None:
            y = y + b[None, :, None, None]
        return y

    m = jax.nn.relu(conv(bmask, params['conv1_0_w']))
    m = jax.nn.relu(conv(m, params['conv1_1_w']))
    m = conv(m, params['conv1_2_w'])
    m = m.astype(jnp.bfloat16).astype(jnp.float32)          # kernel stores bf16

    x = conv(jnp.concatenate([feaL, feaR], axis=1), params['att_w'], params['att_b'])
    x = jnp.mean(x, axis=(2, 3))                            # (B, 64)
    x = jax.nn.relu(x @ params['fc1_w'].T)
    s = jax.nn.sigmoid(x @ params['fc2_w'].T)               # (B, 64)

    x = m * s[:, :, None, None]
    x = jnp.sum(x * params['conv2_w'].reshape(1, -1, 1, 1), axis=1, keepdims=True)
    return jnp.tanh(jnp.abs(x))


# ----------------------------------------------------------------------------
# Deterministic parameters (shapes from SoftBinary.__init__, torch layouts)
# ----------------------------------------------------------------------------
def init_params(key, cin, channel=64, reduction=8, dilate=7):
    ks = jax.random.split(key, 8)

    def w_init(k, shape, fan_in):
        return jax.random.normal(k, shape, jnp.float32) / jnp.sqrt(float(fan_in))

    return {
        'conv1_0_w': w_init(ks[0], (channel, 1, dilate, dilate), dilate * dilate),
        'conv1_1_w': w_init(ks[1], (channel, channel, 3, 3), 9 * channel),
        'conv1_2_w': w_init(ks[2], (channel, channel, 1, 1), channel),
        'att_w':     w_init(ks[3], (channel, cin * 2, 3, 3), 9 * cin * 2),
        'att_b':     jax.random.normal(ks[4], (channel,), jnp.float32) * 0.05,
        'fc1_w':     w_init(ks[5], (channel // reduction, channel), channel),
        'fc2_w':     w_init(ks[6], (channel, channel // reduction), channel // reduction),
        'conv2_w':   w_init(ks[7], (1, channel, 1, 1), channel),
    }


# ----------------------------------------------------------------------------
if __name__ == "__main__":
    key = jax.random.PRNGKey(0)
    kb, kl, kr, kp = jax.random.split(key, 4)
    B, cin, H, W = 2, 35, 16, 16

    bmask = jax.nn.sigmoid(jax.random.normal(kb, (B, 1, H, W), jnp.float32))
    feaL = jax.random.normal(kl, (B, cin, H, W), jnp.float32)
    feaR = jax.random.normal(kr, (B, cin, H, W), jnp.float32)
    params = init_params(kp, cin)

    out = jax.jit(soft_binary)(params, bmask, feaL, feaR)
    out = jax.block_until_ready(out)

    assert out.shape == (B, 1, H, W)
    assert bool(jnp.all(jnp.isfinite(out)))

    ref = jax.block_until_ready(jax.jit(_reference_forward)(params, bmask, feaL, feaR))
    err = float(jnp.max(jnp.abs(out - ref)))
    assert err < 2e-2, f"mismatch vs reference: {err}"

    print("KERNEL_OK")
</pallas_src>

<mosaic_0001>
module attributes {stable_mosaic.version = 11 : i64} {
  func.func @_mm_bias_act_kernel(%arg0: i32, %arg1: memref<256x128xbf16, #tpu.memory_space<vmem>>, %arg2: memref<128x128xbf16, #tpu.memory_space<vmem>>, %arg3: memref<1x128xf32, #tpu.memory_space<vmem>>, %arg4: memref<256x128xbf16, #tpu.memory_space<vmem>>) attributes {dimension_semantics = [#tpu.dimension_semantics<parallel>], iteration_bounds = array<i64: 2>, scalar_prefetch = 0 : i64, scratch_operands = 0 : i64, tpu.core_type = #tpu.core_type<tc>, window_params = [{transform_indices = @transform_0, window_bounds = array<i64: 256, 128>}, {pipeline_mode = #tpu.pipeline_mode<synchronous>, transform_indices = @transform_1, window_bounds = array<i64: 128, 128>}, {pipeline_mode = #tpu.pipeline_mode<synchronous>, transform_indices = @transform_2, window_bounds = array<i64: 1, 128>}, {transform_indices = @transform_3, window_bounds = array<i64: 256, 128>}]} {
    %c0 = arith.constant 0 : index
    %c0_0 = arith.constant 0 : index
    %0 = vector.load %arg1[%c0, %c0_0] : memref<256x128xbf16, #tpu.memory_space<vmem>>, vector<256x128xbf16>
    %c0_1 = arith.constant 0 : index
    %c0_2 = arith.constant 0 : index
    %1 = vector.load %arg2[%c0_1, %c0_2] : memref<128x128xbf16, #tpu.memory_space<vmem>>, vector<128x128xbf16>
    %cst = arith.constant dense<0.000000e+00> : vector<256x128xf32>
    %2 = tpu.matmul %0, %1, %cst {dimension_numbers = #tpu.dot_dimension_numbers<[1], [0], [0], [1], [0, 0, 1, 1], [], []>} : vector<256x128xbf16>, vector<128x128xbf16>, vector<256x128xf32> -> vector<256x128xf32>
    %c0_3 = arith.constant 0 : index
    %c0_4 = arith.constant 0 : index
    %3 = vector.load %arg3[%c0_3, %c0_4] : memref<1x128xf32, #tpu.memory_space<vmem>>, vector<1x128xf32>
    %4 = vector.broadcast %3 : vector<1x128xf32> to vector<256x128xf32>
    %5 = arith.addf %2, %4 : vector<256x128xf32>
    %cst_5 = arith.constant 0.000000e+00 : f32
    %6 = vector.broadcast %cst_5 : f32 to vector<256x128xf32>
    %7 = arith.maximumf %5, %6 : vector<256x128xf32>
    %8 = arith.truncf %7 : vector<256x128xf32> to vector<256x128xbf16>
    %c0_6 = arith.constant 0 : index
    %c0_7 = arith.constant 0 : index
    %9 = vector.load %arg4[%c0_6, %c0_7] : memref<256x128xbf16, #tpu.memory_space<vmem>>, vector<256x128xbf16>
    tpu.vector_store %arg4[%c0_6, %c0_7], %8 {strides = array<i32>} : memref<256x128xbf16, #tpu.memory_space<vmem>>, vector<256x128xbf16>,
    return
  }
  func.func @transform_0(%arg0: i32) -> (i32, i32) {
    %c0_i32 = arith.constant 0 : i32
    %c0_i32_0 = arith.constant 0 : i32
    return %arg0, %c0_i32 : i32, i32
  }
  func.func @transform_1(%arg0: i32) -> (i32, i32) {
    %c0_i32 = arith.constant 0 : i32
    %c0_i32_0 = arith.constant 0 : i32
    %c0_i32_1 = arith.constant 0 : i32
    return %c0_i32, %c0_i32_0 : i32, i32
  }
  func.func @transform_2(%arg0: i32) -> (i32, i32) {
    %c0_i32 = arith.constant 0 : i32
    %c0_i32_0 = arith.constant 0 : i32
    %c0_i32_1 = arith.constant 0 : i32
    return %c0_i32, %c0_i32_0 : i32, i32
  }
  func.func @transform_3(%arg0: i32) -> (i32, i32) {
    %c0_i32 = arith.constant 0 : i32
    %c0_i32_0 = arith.constant 0 : i32
    return %arg0, %c0_i32 : i32, i32
  }
}

module attributes {stable_mosaic.version = 11 : i64} {
  func.func @_mm_bias_act_kernel(%arg0: i32, %arg1: memref<256x64xbf16, #tpu.memory_space<vmem>>, %arg2: memref<64x128xbf16, #tpu.memory_space<vmem>>, %arg3: memref<1x128xf32, #tpu.memory_space<vmem>>, %arg4: memref<256x128xbf16, #tpu.memory_space<vmem>>) attributes {dimension_semantics = [#tpu.dimension_semantics<parallel>], iteration_bounds = array<i64: 2>, scalar_prefetch = 0 : i64, scratch_operands = 0 : i64, tpu.core_type = #tpu.core_type<tc>, window_params = [{transform_indices = @transform_0, window_bounds = array<i64: 256, 64>}, {pipeline_mode = #tpu.pipeline_mode<synchronous>, transform_indices = @transform_1, window_bounds = array<i64: 64, 128>}, {pipeline_mode = #tpu.pipeline_mode<synchronous>, transform_indices = @transform_2, window_bounds = array<i64: 1, 128>}, {transform_indices = @transform_3, window_bounds = array<i64: 256, 128>}]} {
    %c0 = arith.constant 0 : index
    %c0_0 = arith.constant 0 : index
    %0 = vector.load %arg1[%c0, %c0_0] : memref<256x64xbf16, #tpu.memory_space<vmem>>, vector<256x64xbf16>
    %c0_1 = arith.constant 0 : index
    %c0_2 = arith.constant 0 : index
    %1 = vector.load %arg2[%c0_1, %c0_2] : memref<64x128xbf16, #tpu.memory_space<vmem>>, vector<64x128xbf16>
    %cst = arith.constant dense<0.000000e+00> : vector<256x128xf32>
    %2 = tpu.matmul %0, %1, %cst {dimension_numbers = #tpu.dot_dimension_numbers<[1], [0], [0], [1], [0, 0, 1, 1], [], []>} : vector<256x64xbf16>, vector<64x128xbf16>, vector<256x128xf32> -> vector<256x128xf32>
    %c0_3 = arith.constant 0 : index
    %c0_4 = arith.constant 0 : index
    %3 = vector.load %arg3[%c0_3, %c0_4] : memref<1x128xf32, #tpu.memory_space<vmem>>, vector<1x128xf32>
    %4 = vector.broadcast %3 : vector<1x128xf32> to vector<256x128xf32>
    %5 = arith.addf %2, %4 : vector<256x128xf32>
    %6 = arith.truncf %5 : vector<256x128xf32> to vector<256x128xbf16>
    %c0_5 = arith.constant 0 : index
    %c0_6 = arith.constant 0 : index
    %7 = vector.load %arg4[%c0_5, %c0_6] : memref<256x128xbf16, #tpu.memory_space<vmem>>, vector<256x128xbf16>
    tpu.vector_store %arg4[%c0_5, %c0_6], %6 {strides = array<i32>} : memref<256x128xbf16, #tpu.memory_space<vmem>>, vector<256x128xbf16>,
    return
  }
  func.func @transform_0(%arg0: i32) -> (i32, i32) {
    %c0_i32 = arith.constant 0 : i32
    %c0_i32_0 = arith.constant 0 : i32
    return %arg0, %c0_i32 : i32, i32
  }
  func.func @transform_1(%arg0: i32) -> (i32, i32) {
    %c0_i32 = arith.constant 0 : i32
    %c0_i32_0 = arith.constant 0 : i32
    %c0_i32_1 = arith.constant 0 : i32
    return %c0_i32, %c0_i32_0 : i32, i32
  }
  func.func @transform_2(%arg0: i32) -> (i32, i32) {
    %c0_i32 = arith.constant 0 : i32
    %c0_i32_0 = arith.constant 0 : i32
    %c0_i32_1 = arith.constant 0 : i32
    return %c0_i32, %c0_i32_0 : i32, i32
  }
  func.func @transform_3(%arg0: i32) -> (i32, i32) {
    %c0_i32 = arith.constant 0 : i32
    %c0_i32_0 = arith.constant 0 : i32
    return %arg0, %c0_i32 : i32, i32
  }
}

module attributes {stable_mosaic.version = 11 : i64} {
  func.func @_mm_bias_act_kernel(%arg0: i32, %arg1: memref<256x640xbf16, #tpu.memory_space<vmem>>, %arg2: memref<640x128xbf16, #tpu.memory_space<vmem>>, %arg3: memref<1x128xf32, #tpu.memory_space<vmem>>, %arg4: memref<256x128xbf16, #tpu.memory_space<vmem>>) attributes {dimension_semantics = [#tpu.dimension_semantics<parallel>], iteration_bounds = array<i64: 2>, scalar_prefetch = 0 : i64, scratch_operands = 0 : i64, tpu.core_type = #tpu.core_type<tc>, window_params = [{transform_indices = @transform_0, window_bounds = array<i64: 256, 640>}, {pipeline_mode = #tpu.pipeline_mode<synchronous>, transform_indices = @transform_1, window_bounds = array<i64: 640, 128>}, {pipeline_mode = #tpu.pipeline_mode<synchronous>, transform_indices = @transform_2, window_bounds = array<i64: 1, 128>}, {transform_indices = @transform_3, window_bounds = array<i64: 256, 128>}]} {
    %c0 = arith.constant 0 : index
    %c0_0 = arith.constant 0 : index
    %0 = vector.load %arg1[%c0, %c0_0] : memref<256x640xbf16, #tpu.memory_space<vmem>>, vector<256x640xbf16>
    %c0_1 = arith.constant 0 : index
    %c0_2 = arith.constant 0 : index
    %1 = vector.load %arg2[%c0_1, %c0_2] : memref<640x128xbf16, #tpu.memory_space<vmem>>, vector<640x128xbf16>
    %cst = arith.constant dense<0.000000e+00> : vector<256x128xf32>
    %2 = tpu.matmul %0, %1, %cst {dimension_numbers = #tpu.dot_dimension_numbers<[1], [0], [0], [1], [0, 0, 1, 1], [], []>} : vector<256x640xbf16>, vector<640x128xbf16>, vector<256x128xf32> -> vector<256x128xf32>
    %c0_3 = arith.constant 0 : index
    %c0_4 = arith.constant 0 : index
    %3 = vector.load %arg3[%c0_3, %c0_4] : memref<1x128xf32, #tpu.memory_space<vmem>>, vector<1x128xf32>
    %4 = vector.broadcast %3 : vector<1x128xf32> to vector<256x128xf32>
    %5 = arith.addf %2, %4 : vector<256x128xf32>
    %cst_5 = arith.constant 0.000000e+00 : f32
    %6 = vector.broadcast %cst_5 : f32 to vector<256x128xf32>
    %7 = arith.maximumf %5, %6 : vector<256x128xf32>
    %8 = arith.truncf %7 : vector<256x128xf32> to vector<256x128xbf16>
    %c0_6 = arith.constant 0 : index
    %c0_7 = arith.constant 0 : index
    %9 = vector.load %arg4[%c0_6, %c0_7] : memref<256x128xbf16, #tpu.memory_space<vmem>>, vector<256x128xbf16>
    tpu.vector_store %arg4[%c0_6, %c0_7], %8 {strides = array<i32>} : memref<256x128xbf16, #tpu.memory_space<vmem>>, vector<256x128xbf16>,
    return
  }
  func.func @transform_0(%arg0: i32) -> (i32, i32) {
    %c0_i32 = arith.constant 0 : i32
    %c0_i32_0 = arith.constant 0 : i32
    return %arg0, %c0_i32 : i32, i32
  }
  func.func @transform_1(%arg0: i32) -> (i32, i32) {
    %c0_i32 = arith.constant 0 : i32
    %c0_i32_0 = arith.constant 0 : i32
    %c0_i32_1 = arith.constant 0 : i32
    return %c0_i32, %c0_i32_0 : i32, i32
  }
  func.func @transform_2(%arg0: i32) -> (i32, i32) {
    %c0_i32 = arith.constant 0 : i32
    %c0_i32_0 = arith.constant 0 : i32
    %c0_i32_1 = arith.constant 0 : i32
    return %c0_i32, %c0_i32_0 : i32, i32
  }
  func.func @transform_3(%arg0: i32) -> (i32, i32) {
    %c0_i32 = arith.constant 0 : i32
    %c0_i32_0 = arith.constant 0 : i32
    return %arg0, %c0_i32 : i32, i32
  }
}

module attributes {stable_mosaic.version = 11 : i64} {
  func.func @_conv_avgpool_kernel(%arg0: i32, %arg1: memref<2x256x640xbf16, #tpu.memory_space<vmem>>, %arg2: memref<640x128xbf16, #tpu.memory_space<vmem>>, %arg3: memref<1x128xf32, #tpu.memory_space<vmem>>, %arg4: memref<2x128xf32, #tpu.memory_space<vmem>>) attributes {dimension_semantics = [#tpu.dimension_semantics<arbitrary>], iteration_bounds = array<i64: 1>, scalar_prefetch = 0 : i64, scratch_operands = 0 : i64, tpu.core_type = #tpu.core_type<tc>, window_params = [{transform_indices = @transform_0, window_bounds = array<i64: 2, 256, 640>}, {pipeline_mode = #tpu.pipeline_mode<synchronous>, transform_indices = @transform_1, window_bounds = array<i64: 640, 128>}, {pipeline_mode = #tpu.pipeline_mode<synchronous>, transform_indices = @transform_2, window_bounds = array<i64: 1, 128>}, {pipeline_mode = #tpu.pipeline_mode<synchronous>, transform_indices = @transform_3, window_bounds = array<i64: 2, 128>}]} {
    %c0_i32 = arith.constant 0 : i32
    %0 = arith.cmpi eq, %arg0, %c0_i32 : i32
    %1 = arith.extui %0 : i1 to i32
    %c0_i32_0 = arith.constant 0 : i32
    %2 = arith.cmpi ne, %1, %c0_i32_0 : i32
    scf.if %2 {
      %cst_14 = arith.constant 0.000000e+00 : f32
      %23 = vector.broadcast %cst_14 : f32 to vector<2x128xf32>
      %c0_15 = arith.constant 0 : index
      %c0_16 = arith.constant 0 : index
      %24 = vector.load %arg4[%c0_15, %c0_16] : memref<2x128xf32, #tpu.memory_space<vmem>>, vector<2x128xf32>
      tpu.vector_store %arg4[%c0_15, %c0_16], %23 {strides = array<i32>} : memref<2x128xf32, #tpu.memory_space<vmem>>, vector<2x128xf32>,
    } else {
    }
    %c0 = arith.constant 0 : index
    %c0_1 = arith.constant 0 : index
    %c0_2 = arith.constant 0 : index
    %3 = vector.load %arg1[%c0, %c0_1, %c0_2] : memref<2x256x640xbf16, #tpu.memory_space<vmem>>, vector<2x256x640xbf16>
    %4 = vector.shape_cast %3 : vector<2x256x640xbf16> to vector<512x640xbf16>
    %c0_3 = arith.constant 0 : index
    %c0_4 = arith.constant 0 : index
    %5 = vector.load %arg2[%c0_3, %c0_4] : memref<640x128xbf16, #tpu.memory_space<vmem>>, vector<640x128xbf16>
    %cst = arith.constant dense<0.000000e+00> : vector<512x128xf32>
    %6 = tpu.matmul %4, %5, %cst {dimension_numbers = #tpu.dot_dimension_numbers<[1], [0], [0], [1], [0, 0, 1, 1], [], []>} : vector<512x640xbf16>, vector<640x128xbf16>, vector<512x128xf32> -> vector<512x128xf32>
    %7 = vector.shape_cast %6 : vector<512x128xf32> to vector<2x256x128xf32>
    %8 = tpu.iota {dimensions = array<i32: 1>} : vector<2x256x128xi32>
    %c256_i32 = arith.constant 256 : i32
    %9 = arith.muli %arg0, %c256_i32 : i32
    %10 = vector.broadcast %9 : i32 to vector<2x256x128xi32>
    %11 = arith.addi %8, %10 : vector<2x256x128xi32>
    %c256_i32_5 = arith.constant 256 : i32
    %12 = vector.broadcast %c256_i32_5 : i32 to vector<2x256x128xi32>
    %13 = arith.cmpi slt, %11, %12 : vector<2x256x128xi32>
    %cst_6 = arith.constant 0.000000e+00 : f32
    %14 = vector.broadcast %cst_6 : f32 to vector<2x256x128xf32>
    %15 = arith.select %13, %7, %14 : vector<2x256x128xi1>, vector<2x256x128xf32>
    %c0_7 = arith.constant 0 : index
    %c0_8 = arith.constant 0 : index
    %16 = vector.load %arg4[%c0_7, %c0_8] : memref<2x128xf32, #tpu.memory_space<vmem>>, vector<2x128xf32>
    %cst_9 = arith.constant dense<0.000000e+00> : vector<2x128xf32>
    %17 = vector.multi_reduction <add>, %15, %cst_9 [1] : vector<2x256x128xf32> to vector<2x128xf32>
    %18 = arith.addf %16, %17 : vector<2x128xf32>
    %c0_10 = arith.constant 0 : index
    %c0_11 = arith.constant 0 : index
    %19 = vector.load %arg4[%c0_10, %c0_11] : memref<2x128xf32, #tpu.memory_space<vmem>>, vector<2x128xf32>
    tpu.vector_store %arg4[%c0_10, %c0_11], %18 {strides = array<i32>} : memref<2x128xf32, #tpu.memory_space<vmem>>, vector<2x128xf32>,
    %c0_i32_12 = arith.constant 0 : i32
    %20 = arith.cmpi eq, %arg0, %c0_i32_12 : i32
    %21 = arith.extui %20 : i1 to i32
    %c0_i32_13 = arith.constant 0 : i32
    %22 = arith.cmpi ne, %21, %c0_i32_13 : i32
    scf.if %22 {
      %c0_14 = arith.constant 0 : index
      %c0_15 = arith.constant 0 : index
      %23 = vector.load %arg4[%c0_14, %c0_15] : memref<2x128xf32, #tpu.memory_space<vmem>>, vector<2x128xf32>
      %cst_16 = arith.constant 3.906250e-03 : f32
      %24 = vector.broadcast %cst_16 : f32 to vector<2x128xf32>
      %25 = arith.mulf %23, %24 : vector<2x128xf32>
      %c0_17 = arith.constant 0 : index
      %c0_18 = arith.constant 0 : index
      %26 = vector.load %arg3[%c0_17, %c0_18] : memref<1x128xf32, #tpu.memory_space<vmem>>, vector<1x128xf32>
      %27 = vector.broadcast %26 : vector<1x128xf32> to vector<2x128xf32>
      %28 = arith.addf %25, %27 : vector<2x128xf32>
      %c0_19 = arith.constant 0 : index
      %c0_20 = arith.constant 0 : index
      %29 = vector.load %arg4[%c0_19, %c0_20] : memref<2x128xf32, #tpu.memory_space<vmem>>, vector<2x128xf32>
      tpu.vector_store %arg4[%c0_19, %c0_20], %28 {strides = array<i32>} : memref<2x128xf32, #tpu.memory_space<vmem>>, vector<2x128xf32>,
    } else {
    }
    return
  }
  func.func @transform_0(%arg0: i32) -> (i32, i32, i32) {
    %c0_i32 = arith.constant 0 : i32
    %c0_i32_0 = arith.constant 0 : i32
    %c0_i32_1 = arith.constant 0 : i32
    return %c0_i32, %arg0, %c0_i32_0 : i32, i32, i32
  }
  func.func @transform_1(%arg0: i32) -> (i32, i32) {
    %c0_i32 = arith.constant 0 : i32
    %c0_i32_0 = arith.constant 0 : i32
    %c0_i32_1 = arith.constant 0 : i32
    return %c0_i32, %c0_i32_0 : i32, i32
  }
  func.func @transform_2(%arg0: i32) -> (i32, i32) {
    %c0_i32 = arith.constant 0 : i32
    %c0_i32_0 = arith.constant 0 : i32
    %c0_i32_1 = arith.constant 0 : i32
    return %c0_i32, %c0_i32_0 : i32, i32
  }
  func.func @transform_3(%arg0: i32) -> (i32, i32) {
    %c0_i32 = arith.constant 0 : i32
    %c0_i32_0 = arith.constant 0 : i32
    %c0_i32_1 = arith.constant 0 : i32
    return %c0_i32, %c0_i32_0 : i32, i32
  }
}

module attributes {stable_mosaic.version = 11 : i64} {
  func.func @_se_fc_kernel(%arg0: memref<2x128xf32, #tpu.memory_space<vmem>>, %arg1: memref<128x128xf32, #tpu.memory_space<vmem>>, %arg2: memref<128x128xf32, #tpu.memory_space<vmem>>, %arg3: memref<2x128xf32, #tpu.memory_space<vmem>>) attributes {dimension_semantics = [], scalar_prefetch = 0 : i64, scratch_operands = 0 : i64, tpu.core_type = #tpu.core_type<tc>} {
    %c0 = arith.constant 0 : index
    %c0_0 = arith.constant 0 : index
    %0 = vector.load %arg0[%c0, %c0_0] : memref<2x128xf32, #tpu.memory_space<vmem>>, vector<2x128xf32>
    %c0_1 = arith.constant 0 : index
    %c0_2 = arith.constant 0 : index
    %1 = vector.load %arg1[%c0_1, %c0_2] : memref<128x128xf32, #tpu.memory_space<vmem>>, vector<128x128xf32>
    %cst = arith.constant dense<0.000000e+00> : vector<2x128xf32>
    %2 = tpu.matmul %0, %1, %cst {dimension_numbers = #tpu.dot_dimension_numbers<[1], [0], [0], [1], [0, 0, 1, 1], [], []>} : vector<2x128xf32>, vector<128x128xf32>, vector<2x128xf32> -> vector<2x128xf32>
    %cst_3 = arith.constant 0.000000e+00 : f32
    %3 = vector.broadcast %cst_3 : f32 to vector<2x128xf32>
    %4 = arith.maximumf %2, %3 : vector<2x128xf32>
    %c0_4 = arith.constant 0 : index
    %c0_5 = arith.constant 0 : index
    %5 = vector.load %arg2[%c0_4, %c0_5] : memref<128x128xf32, #tpu.memory_space<vmem>>, vector<128x128xf32>
    %cst_6 = arith.constant dense<0.000000e+00> : vector<2x128xf32>
    %6 = tpu.matmul %4, %5, %cst_6 {dimension_numbers = #tpu.dot_dimension_numbers<[1], [0], [0], [1], [0, 0, 1, 1], [], []>} : vector<2x128xf32>, vector<128x128xf32>, vector<2x128xf32> -> vector<2x128xf32>
    %7 = arith.negf %6 : vector<2x128xf32>
    %8 = math.exp %7 : vector<2x128xf32>
    %cst_7 = arith.constant 1.000000e+00 : f32
    %9 = vector.broadcast %cst_7 : f32 to vector<2x128xf32>
    %10 = arith.addf %9, %8 : vector<2x128xf32>
    %11 = arith.divf %9, %10 : vector<2x128xf32>
    %c0_8 = arith.constant 0 : index
    %c0_9 = arith.constant 0 : index
    %12 = vector.load %arg3[%c0_8, %c0_9] : memref<2x128xf32, #tpu.memory_space<vmem>>, vector<2x128xf32>
    tpu.vector_store %arg3[%c0_8, %c0_9], %11 {strides = array<i32>} : memref<2x128xf32, #tpu.memory_space<vmem>>, vector<2x128xf32>,
    return
  }
}

module attributes {stable_mosaic.version = 11 : i64} {
  func.func @_scale_proj_tanh_kernel(%arg0: i32, %arg1: memref<2x256x128xbf16, #tpu.memory_space<vmem>>, %arg2: memref<2x128xf32, #tpu.memory_space<vmem>>, %arg3: memref<2x256xf32, #tpu.memory_space<vmem>>) attributes {dimension_semantics = [#tpu.dimension_semantics<parallel>], iteration_bounds = array<i64: 1>, scalar_prefetch = 0 : i64, scratch_operands = 0 : i64, tpu.core_type = #tpu.core_type<tc>, window_params = [{transform_indices = @transform_0, window_bounds = array<i64: 2, 256, 128>}, {pipeline_mode = #tpu.pipeline_mode<synchronous>, transform_indices = @transform_1, window_bounds = array<i64: 2, 128>}, {transform_indices = @transform_2, window_bounds = array<i64: 2, 256>}]} {
    %c0 = arith.constant 0 : index
    %c0_0 = arith.constant 0 : index
    %c0_1 = arith.constant 0 : index
    %0 = vector.load %arg1[%c0, %c0_0, %c0_1] : memref<2x256x128xbf16, #tpu.memory_space<vmem>>, vector<2x256x128xbf16>
    %1 = arith.extf %0 : vector<2x256x128xbf16> to vector<2x256x128xf32>
    %c0_2 = arith.constant 0 : index
    %c0_3 = arith.constant 0 : index
    %2 = vector.load %arg2[%c0_2, %c0_3] : memref<2x128xf32, #tpu.memory_space<vmem>>, vector<2x128xf32>
    %3 = vector.shape_cast %2 : vector<2x128xf32> to vector<2x1x128xf32>
    %4 = vector.broadcast %3 : vector<2x1x128xf32> to vector<2x256x128xf32>
    %5 = arith.mulf %1, %4 : vector<2x256x128xf32>
    %cst = arith.constant dense<0.000000e+00> : vector<2x256xf32>
    %6 = vector.multi_reduction <add>, %5, %cst [2] : vector<2x256x128xf32> to vector<2x256xf32>
    %7 = math.absf %6 : vector<2x256xf32>
    %8 = math.tanh %7 : vector<2x256xf32>
    %c0_4 = arith.constant 0 : index
    %c0_5 = arith.constant 0 : index
    %9 = vector.load %arg3[%c0_4, %c0_5] : memref<2x256xf32, #tpu.memory_space<vmem>>, vector<2x256xf32>
    tpu.vector_store %arg3[%c0_4, %c0_5], %8 {strides = array<i32>} : memref<2x256xf32, #tpu.memory_space<vmem>>, vector<2x256xf32>,
    return
  }
  func.func @transform_0(%arg0: i32) -> (i32, i32, i32) {
    %c0_i32 = arith.constant 0 : i32
    %c0_i32_0 = arith.constant 0 : i32
    %c0_i32_1 = arith.constant 0 : i32
    return %c0_i32, %arg0, %c0_i32_0 : i32, i32, i32
  }
  func.func @transform_1(%arg0: i32) -> (i32, i32) {
    %c0_i32 = arith.constant 0 : i32
    %c0_i32_0 = arith.constant 0 : i32
    %c0_i32_1 = arith.constant 0 : i32
    return %c0_i32, %c0_i32_0 : i32, i32
  }
  func.func @transform_2(%arg0: i32) -> (i32, i32) {
    %c0_i32 = arith.constant 0 : i32
    %c0_i32_0 = arith.constant 0 : i32
    return %c0_i32, %arg0 : i32, i32
  }
}

</mosaic_0001>

<bundles_post_ra>
// kernel: soft_binary.6
= control target key start
LH: loop header
LB: loop body
LE: loop exit
PB: predicated region body
PF: predicated region fallthrough
CT: control target
= control target key end

     0   :  { %s898_s12 = smov 0   ;;  %s1019_s0 = inlined_call_operand.vmem [shape: bf16[512,128], index: 0, kind: input, shape index: {}]   ;;  %s1020_s1 = inlined_call_operand.vmem [shape: bf16[128,128], index: 1, kind: input, shape index: {}]   ;;  %s1021_s2 = inlined_call_operand.vmem [shape: f32[1,128], index: 2, kind: input, shape index: {}]   ;;  %s1022_s3 = inlined_call_operand.vmem [shape: bf16[512,128], index: 3, kind: output, shape index: {}]  }
   0x1 LB: > { %s611_s13 = sadd.s32 4294967295, %s876_s12   ;;  %p615_p0 = scmp.ge.s32.totalorder %s876_s12, 1  ;;  %s876_s12 = sphi %s898_s12, %s13_s12  }
   0x2   : > { %p138_p1 = scmp.lt.s32.totalorder %s876_s12, 3 }
   0x4   : > { %p139_p2 = pnand %p615_p0, %p138_p1 }
   0x5   : > { %s616_s22 = sshll.u32 (!%p139_p2), %s611_s13, 5 }
   0x6   : > { %142 = sbr.rel (%p139_p2) target bundleno = 240 (0xf0), region = 32  ;;  %p163_p3 = scmp.lt.s32.totalorder (!%p139_p2), %s616_s22, 63 }
   0xb   : > { %v741_v0 = vld [vmem:[%s1020_s1 + $0x38] sm:$0xff]  ;;  %v740_v1 = vld [vmem:[%s1020_s1 + $0x30] sm:$0xff]  ;;  %v739_v2 = vld [vmem:[%s1020_s1 + $0x28] sm:$0xff]  ;;  %s1024_s22 = smov (!%p163_p3, %s616_s22), 63 }
   0xc   : > { %370 = vmatpush.bf16.msra.mxu0 %v741_v0  ;;  %837 = vmatpush.bf16.msra.mxu1 %v741_v0  ;;  %v738_v3 = vld [vmem:[%s1020_s1 + $0x20] sm:$0xff]  ;;  %v737_v4 = vld [vmem:[%s1020_s1 + $0x18] sm:$0xff]  ;;  %v736_v5 = vld [vmem:[%s1020_s1 + $0x10] sm:$0xff]  ;;  %s617_s29 = sshll.u32 %s1024_s22, 2 }
   0xd   : > { %838 = vmatpush.bf16.msra.mxu2 %v741_v0  ;;  %839 = vmatpush.bf16.msra.mxu3 %v741_v0  ;;  %v735_v6 = vld [vmem:[%s1020_s1 + $0x8] sm:$0xff]  ;;  %v734_v7 = vld [vmem:[%s1020_s1] sm:$0xff]  ;;  %s938_s7 = scalar_lea.vmem %s1019_s0, %s617_s29  ;;  %s970_s13 = scalar_lea.vmem %s1022_s3, %s617_s29 }
   0xe   : > { %v718_v8 = vld [vmem:[%s938_s7] sm:$0xff]  ;;  %v719_v12 = vld [vmem:[%s938_s7 + $0x8] sm:$0xff]  ;;  %v720_v16 = vld [vmem:[%s938_s7 + $0x10] sm:$0xff] }
   0xf   : > { %v722_v9 = vld [vmem:[%s938_s7 + $0x20] sm:$0xff]  ;;  %v723_v13 = vld [vmem:[%s938_s7 + $0x28] sm:$0xff]  ;;  %v724_v17 = vld [vmem:[%s938_s7 + $0x30] sm:$0xff] }
  0x10   : > { %371 = vmatpush.bf16.msra.mxu0 %v740_v1  ;;  %840 = vmatpush.bf16.msra.mxu1 %v740_v1  ;;  %v726_v10 = vld [vmem:[%s938_s7 + $0x40] sm:$0xff]  ;;  %v727_v14 = vld [vmem:[%s938_s7 + $0x48] sm:$0xff]  ;;  %v728_v18 = vld [vmem:[%s938_s7 + $0x50] sm:$0xff] }
  0x11   : > { %841 = vmatpush.bf16.msra.mxu2 %v740_v1  ;;  %842 = vmatpush.bf16.msra.mxu3 %v740_v1  ;;  %v730_v11 = vld [vmem:[%s938_s7 + $0x60] sm:$0xff]  ;;  %v731_v15 = vld [vmem:[%s938_s7 + $0x68] sm:$0xff]  ;;  %v732_v19 = vld [vmem:[%s938_s7 + $0x70] sm:$0xff] }
  0x12   : > { %v721_v20 = vld [vmem:[%s938_s7 + $0x18] sm:$0xff]  ;;  %v959_v26 = vld [vmem:[%s1021_s2] ss:$0 sm:$0xff] }
  0x13   : > { %v725_v21 = vld [vmem:[%s938_s7 + $0x38] sm:$0xff] }
  0x14   : > { %372 = vmatpush.bf16.msra.mxu0 %v739_v2  ;;  %843 = vmatpush.bf16.msra.mxu1 %v739_v2  ;;  %v729_v22 = vld [vmem:[%s938_s7 + $0x58] sm:$0xff] }
  0x15   : > { %844 = vmatpush.bf16.msra.mxu2 %v739_v2  ;;  %845 = vmatpush.bf16.msra.mxu3 %v739_v2  ;;  %v733_v23 = vld [vmem:[%s938_s7 + $0x78] sm:$0xff] }
  0x18   : > { %373 = vmatpush.bf16.msra.mxu0 %v738_v3  ;;  %846 = vmatpush.bf16.msra.mxu1 %v738_v3 }
  0x19   : > { %847 = vmatpush.bf16.msra.mxu2 %v738_v3  ;;  %848 = vmatpush.bf16.msra.mxu3 %v738_v3 }
  0x1c   : > { %374 = vmatpush.bf16.msra.mxu0 %v737_v4  ;;  %849 = vmatpush.bf16.msra.mxu1 %v737_v4 }
  0x1d   : > { %850 = vmatpush.bf16.msra.mxu2 %v737_v4  ;;  %851 = vmatpush.bf16.msra.mxu3 %v737_v4 }
  0x20   : > { %375 = vmatpush.bf16.msra.mxu0 %v736_v5  ;;  %852 = vmatpush.bf16.msra.mxu1 %v736_v5 }
  0x21   : > { %853 = vmatpush.bf16.msra.mxu2 %v736_v5  ;;  %854 = vmatpush.bf16.msra.mxu3 %v736_v5 }
  0x24   : > { %376 = vmatpush.bf16.msra.mxu0 %v735_v6  ;;  %855 = vmatpush.bf16.msra.mxu1 %v735_v6 }
  0x25   : > { %856 = vmatpush.bf16.msra.mxu2 %v735_v6  ;;  %857 = vmatpush.bf16.msra.mxu3 %v735_v6 }
  0x28   : > { %377 = vmatpush.bf16.msra.mxu0 %v734_v7  ;;  %858 = vmatpush.bf16.msra.mxu1 %v734_v7 }
  0x29   : > { %859 = vmatpush.bf16.msra.mxu2 %v734_v7  ;;  %860 = vmatpush.bf16.msra.mxu3 %v734_v7 }
  0x2b   : > { %378 = vmatmul.bf16.vlgmr.msra.gmra.mxu0 %v718_v8  ;;  %398 = vmatmul.bf16.vlgmr.msra.gmra.mxu1 %v722_v9 }
  0x2c   : > { %418 = vmatmul.bf16.vlgmr.msra.gmra.mxu2 %v726_v10  ;;  %438 = vmatmul.bf16.vlgmr.msra.gmra.mxu3 %v730_v11 }
  0x3b   : > { %383 = vmatmul.bf16.gmra.mxu0 %v719_v12  ;;  %403 = vmatmul.bf16.gmra.mxu1 %v723_v13 }
  0x3c   : > { %423 = vmatmul.bf16.gmra.mxu2 %v727_v14  ;;  %443 = vmatmul.bf16.gmra.mxu3 %v731_v15 }
  0x4b   : > { %388 = vmatmul.bf16.gmra.mxu0 %v720_v16  ;;  %408 = vmatmul.bf16.gmra.mxu1 %v724_v17 }
  0x4c   : > { %428 = vmatmul.bf16.gmra.mxu2 %v728_v18  ;;  %448 = vmatmul.bf16.gmra.mxu3 %v732_v19 }
  0x5b   : > { %393 = vmatmul.bf16.gmra.mxu0 %v721_v20  ;;  %413 = vmatmul.bf16.gmra.mxu1 %v725_v21 }
  0x5c   : > { %433 = vmatmul.bf16.gmra.mxu2 %v729_v22  ;;  %453 = vmatmul.bf16.gmra.mxu3 %v733_v23 }
  0xa8   : > { %v379_v24 = vpop.f32.mrf.mxu0  ;;  %v399_v25 = vpop.f32.mrf.mxu1 }
  0xa9   : > { %v380_v27 = vadd.f32 %v959_v26, %v379_v24  ;;  %v400_v28 = vadd.f32 %v959_v26, %v399_v25 }
  0xab   : > { %v459_v35 = vmax.f32 %v380_v27, 0.0  ;;  %v467_v36 = vmax.f32 %v400_v28, 0.0 }
  0xaf   : > { %v419_v29 = vpop.f32.mrf.mxu2  ;;  %v439_v30 = vpop.f32.mrf.mxu3 }
  0xb0   : > { %v381_v31 = vpop.f32.mrf.mxu0  ;;  %v401_v32 = vpop.f32.mrf.mxu1  ;;  %v420_v41 = vadd.f32 %v959_v26, %v419_v29  ;;  %v440_v42 = vadd.f32 %v959_v26, %v439_v30 }
  0xb1   : > { %v382_v33 = vadd.f32 %v959_v26, %v381_v31  ;;  %v402_v34 = vadd.f32 %v959_v26, %v401_v32 }
  0xb2   : > { %v475_v49 = vmax.f32 %v420_v41, 0.0  ;;  %v483_v50 = vmax.f32 %v440_v42, 0.0 }
  0xb3   : > { %v460_v37 = vmax.f32 %v382_v33, 0.0  ;;  %v468_v38 = vmax.f32 %v402_v34, 0.0 }
  0xb5   : > { %v745_v39 = vpack.c.bf16 %v460_v37, %v459_v35  ;;  %v765_v40 = vpack.c.bf16 %v468_v38, %v467_v36 }
  0xb7   : > { %746 = vst [vmem:[%s970_s13] sm:$0xff] %v745_v39   ;;  %v421_v43 = vpop.f32.mrf.mxu2  ;;  %v441_v44 = vpop.f32.mrf.mxu3 }
  0xb8   : > { %825 = vst [vmem:[%s970_s13 + $0x20] sm:$0xff] %v765_v40   ;;  %v422_v45 = vadd.f32 %v959_v26, %v421_v43  ;;  %v442_v46 = vadd.f32 %v959_v26, %v441_v44  ;;  %v384_v47 = vpop.f32.mrf.mxu0  ;;  %v404_v48 = vpop.f32.mrf.mxu1 }
  0xb9   : > { %v385_v55 = vadd.f32 %v959_v26, %v384_v47  ;;  %v405_v56 = vadd.f32 %v959_v26, %v404_v48 }
  0xba   : > { %v476_v51 = vmax.f32 %v422_v45, 0.0  ;;  %v484_v52 = vmax.f32 %v442_v46, 0.0 }
  0xbb   : > { %v461_v63 = vmax.f32 %v385_v55, 0.0  ;;  %v469_v0 = vmax.f32 %v405_v56, 0.0 }
  0xbc   : > { %v785_v53 = vpack.c.bf16 %v476_v51, %v475_v49  ;;  %v805_v54 = vpack.c.bf16 %v484_v52, %v483_v50 }
  0xbe   : > { %829 = vst [vmem:[%s970_s13 + $0x40] sm:$0xff] %v785_v53  }
  0xbf   : > { %833 = vst [vmem:[%s970_s13 + $0x60] sm:$0xff] %v805_v54   ;;  %v424_v57 = vpop.f32.mrf.mxu2  ;;  %v444_v58 = vpop.f32.mrf.mxu3 }
  0xc0   : > { %v386_v59 = vpop.f32.mrf.mxu0  ;;  %v406_v60 = vpop.f32.mrf.mxu1  ;;  %v425_v5 = vadd.f32 %v959_v26, %v424_v57  ;;  %v445_v6 = vadd.f32 %v959_v26, %v444_v58 }
  0xc1   : > { %v387_v61 = vadd.f32 %v959_v26, %v386_v59  ;;  %v407_v62 = vadd.f32 %v959_v26, %v406_v60 }
  0xc2   : > { %v477_v13 = vmax.f32 %v425_v5, 0.0  ;;  %v485_v14 = vmax.f32 %v445_v6, 0.0 }
  0xc3   : > { %v462_v1 = vmax.f32 %v387_v61, 0.0  ;;  %v470_v2 = vmax.f32 %v407_v62, 0.0 }
  0xc5   : > { %v750_v3 = vpack.c.bf16 %v462_v1, %v461_v63  ;;  %v770_v4 = vpack.c.bf16 %v470_v2, %v469_v0 }
  0xc7   : > { %822 = vst [vmem:[%s970_s13 + $0x8] sm:$0xff] %v750_v3   ;;  %v426_v7 = vpop.f32.mrf.mxu2  ;;  %v446_v8 = vpop.f32.mrf.mxu3 }
  0xc8   : > { %826 = vst [vmem:[%s970_s13 + $0x28] sm:$0xff] %v770_v4   ;;  %v427_v9 = vadd.f32 %v959_v26, %v426_v7  ;;  %v447_v10 = vadd.f32 %v959_v26, %v446_v8  ;;  %v389_v11 = vpop.f32.mrf.mxu0  ;;  %v409_v12 = vpop.f32.mrf.mxu1 }
  0xc9   : > { %v390_v19 = vadd.f32 %v959_v26, %v389_v11  ;;  %v410_v20 = vadd.f32 %v959_v26, %v409_v12 }
  0xca   : > { %v478_v15 = vmax.f32 %v427_v9, 0.0  ;;  %v486_v16 = vmax.f32 %v447_v10, 0.0 }
  0xcb   : > { %v463_v28 = vmax.f32 %v390_v19, 0.0  ;;  %v471_v29 = vmax.f32 %v410_v20, 0.0 }
  0xcc   : > { %v790_v17 = vpack.c.bf16 %v478_v15, %v477_v13  ;;  %v810_v18 = vpack.c.bf16 %v486_v16, %v485_v14 }
  0xce   : > { %830 = vst [vmem:[%s970_s13 + $0x48] sm:$0xff] %v790_v17  }
  0xcf   : > { %834 = vst [vmem:[%s970_s13 + $0x68] sm:$0xff] %v810_v18   ;;  %v429_v21 = vpop.f32.mrf.mxu2  ;;  %v449_v22 = vpop.f32.mrf.mxu3 }
  0xd0   : > { %v391_v23 = vpop.f32.mrf.mxu0  ;;  %v411_v24 = vpop.f32.mrf.mxu1  ;;  %v430_v34 = vadd.f32 %v959_v26, %v429_v21  ;;  %v450_v35 = vadd.f32 %v959_v26, %v449_v22 }
  0xd1   : > { %v392_v25 = vadd.f32 %v959_v26, %v391_v23  ;;  %v412_v27 = vadd.f32 %v959_v26, %v411_v24 }
  0xd2   : > { %v479_v42 = vmax.f32 %v430_v34, 0.0  ;;  %v487_v43 = vmax.f32 %v450_v35, 0.0 }
  0xd3   : > { %v464_v30 = vmax.f32 %v392_v25, 0.0  ;;  %v472_v31 = vmax.f32 %v412_v27, 0.0 }
  0xd5   : > { %v755_v32 = vpack.c.bf16 %v464_v30, %v463_v28  ;;  %v775_v33 = vpack.c.bf16 %v472_v31, %v471_v29 }
  0xd7   : > { %823 = vst [vmem:[%s970_s13 + $0x10] sm:$0xff] %v755_v32   ;;  %v431_v36 = vpop.f32.mrf.mxu2  ;;  %v451_v37 = vpop.f32.mrf.mxu3 }
  0xd8   : > { %827 = vst [vmem:[%s970_s13 + $0x30] sm:$0xff] %v775_v33   ;;  %v432_v38 = vadd.f32 %v959_v26, %v431_v36  ;;  %v452_v39 = vadd.f32 %v959_v26, %v451_v37  ;;  %v394_v40 = vpop.f32.mrf.mxu0  ;;  %v414_v41 = vpop.f32.mrf.mxu1 }
  0xd9   : > { %v395_v48 = vadd.f32 %v959_v26, %v394_v40  ;;  %v415_v49 = vadd.f32 %v959_v26, %v414_v41 }
  0xda   : > { %v480_v44 = vmax.f32 %v432_v38, 0.0  ;;  %v488_v45 = vmax.f32 %v452_v39, 0.0 }
  0xdb   : > { %v465_v56 = vmax.f32 %v395_v48, 0.0  ;;  %v473_v57 = vmax.f32 %v415_v49, 0.0 }
  0xdc   : > { %v795_v46 = vpack.c.bf16 %v480_v44, %v479_v42  ;;  %v815_v47 = vpack.c.bf16 %v488_v45, %v487_v43 }
  0xde   : > { %831 = vst [vmem:[%s970_s13 + $0x50] sm:$0xff] %v795_v46  }
  0xdf   : > { %835 = vst [vmem:[%s970_s13 + $0x70] sm:$0xff] %v815_v47   ;;  %v434_v50 = vpop.f32.mrf.mxu2  ;;  %v454_v51 = vpop.f32.mrf.mxu3 }
  0xe0   : > { %v396_v52 = vpop.f32.mrf.mxu0  ;;  %v416_v53 = vpop.f32.mrf.mxu1  ;;  %v435_v62 = vadd.f32 %v959_v26, %v434_v50  ;;  %v455_v63 = vadd.f32 %v959_v26, %v454_v51 }
  0xe1   : > { %v397_v54 = vadd.f32 %v959_v26, %v396_v52  ;;  %v417_v55 = vadd.f32 %v959_v26, %v416_v53 }
  0xe2   : > { %v481_v4 = vmax.f32 %v435_v62, 0.0  ;;  %v489_v5 = vmax.f32 %v455_v63, 0.0 }
  0xe3   : > { %v466_v58 = vmax.f32 %v397_v54, 0.0  ;;  %v474_v59 = vmax.f32 %v417_v55, 0.0 }
  0xe5   : > { %v760_v60 = vpack.c.bf16 %v466_v58, %v465_v56  ;;  %v780_v61 = vpack.c.bf16 %v474_v59, %v473_v57 }
  0xe7   : > { %824 = vst [vmem:[%s970_s13 + $0x18] sm:$0xff] %v760_v60   ;;  %v436_v0 = vpop.f32.mrf.mxu2  ;;  %v456_v1 = vpop.f32.mrf.mxu3 }
  0xe8   : > { %828 = vst [vmem:[%s970_s13 + $0x38] sm:$0xff] %v780_v61   ;;  %v437_v2 = vadd.f32 %v959_v26, %v436_v0  ;;  %v457_v3 = vadd.f32 %v959_v26, %v456_v1 }
  0xea   : > { %v482_v6 = vmax.f32 %v437_v2, 0.0  ;;  %v490_v7 = vmax.f32 %v457_v3, 0.0 }
  0xec   : > { %v800_v8 = vpack.c.bf16 %v482_v6, %v481_v4  ;;  %v820_v9 = vpack.c.bf16 %v490_v7, %v489_v5 }
  0xee   : > { %832 = vst [vmem:[%s970_s13 + $0x58] sm:$0xff] %v800_v8  }
  0xef   : > { %836 = vst [vmem:[%s970_s13 + $0x78] sm:$0xff] %v820_v9  }
  0xf0 PF: > { %s13_s12 = sadd.s32 1, %s876_s12  }
  0xf1   : > { %p10_p4 = scmp.ge.s32.totalorder %s13_s12, 4  }
  0xf3   :  { %12 = sbr.rel (!%p10_p4) target bundleno = 1 (0x1), region = 62 }

// kernel: soft_binary.8
= control target key start
LH: loop header
LB: loop body
LE: loop exit
PB: predicated region body
PF: predicated region fallthrough
CT: control target
= control target key end

     0   :  { %s852_s12 = smov 0   ;;  %s977_s0 = inlined_call_operand.vmem [shape: bf16[512,64], index: 0, kind: input, shape index: {}]   ;;  %s978_s1 = inlined_call_operand.vmem [shape: bf16[64,128], index: 1, kind: input, shape index: {}]   ;;  %s979_s2 = inlined_call_operand.vmem [shape: f32[1,128], index: 2, kind: input, shape index: {}]   ;;  %s980_s3 = inlined_call_operand.vmem [shape: bf16[512,128], index: 3, kind: output, shape index: {}]  }
   0x1 LB: > { %s581_s13 = sadd.s32 4294967295, %s830_s12   ;;  %p585_p0 = scmp.ge.s32.totalorder %s830_s12, 1  ;;  %s830_s12 = sphi %s852_s12, %s13_s12  }
   0x2   : > { %p138_p1 = scmp.lt.s32.totalorder %s830_s12, 3 }
   0x4   : > { %p139_p2 = pnand %p585_p0, %p138_p1 }
   0x5   : > { %s586_s16 = sshll.u32 (!%p139_p2), %s581_s13, 5 }
   0x6   : > { %142 = sbr.rel (%p139_p2) target bundleno = 222 (0xde), region = 32  ;;  %p163_p3 = scmp.lt.s32.totalorder (!%p139_p2), %s586_s16, 63 }
   0xb   : > { %v707_v0 = vld [vmem:[%s978_s1 + $0x18] sm:$0xff]  ;;  %v706_v1 = vld [vmem:[%s978_s1 + $0x10] sm:$0xff]  ;;  %s982_s16 = smov (!%p163_p3, %s586_s16), 63  ;;  %v705_v2 = vld [vmem:[%s978_s1 + $0x8] sm:$0xff]  ;;  %vm323_vm0 = vcmask 523264  }
   0xc   : > { %376 = vmatpush.bf16.msra.mxu0 %v707_v0  ;;  %803 = vmatpush.bf16.msra.mxu1 %v707_v0  ;;  %s587_s21 = sshll.u32 %s982_s16, 2  ;;  %v704_v3 = vld [vmem:[%s978_s1] sm:$0xff] }
   0xd   : > { %804 = vmatpush.bf16.msra.mxu2 %v707_v0  ;;  %805 = vmatpush.bf16.msra.mxu3 %v707_v0  ;;  %s880_s26 = scalar_lea.vmem %s977_s0, %s587_s21  ;;  %v917_v22 = vld [vmem:[%s979_s2] ss:$0 sm:$0xff]  ;;  %s928_s4 = scalar_lea.vmem %s980_s3, %s587_s21 }
   0xe   : > { %v688_v4 = vld [vmem:[%s880_s26] sm:$0xff]  ;;  %v689_v8 = vld [vmem:[%s880_s26 + $0x8] sm:$0xff]  ;;  %v690_v12 = vld [vmem:[%s880_s26 + $0x10] sm:$0xff] }
   0xf   : > { %v692_v5 = vld [vmem:[%s880_s26 + $0x20] sm:$0xff]  ;;  %v693_v9 = vld [vmem:[%s880_s26 + $0x28] sm:$0xff]  ;;  %v694_v13 = vld [vmem:[%s880_s26 + $0x30] sm:$0xff] }
  0x10   : > { %377 = vmatpush.bf16.msra.mxu0 %v706_v1  ;;  %806 = vmatpush.bf16.msra.mxu1 %v706_v1  ;;  %v696_v6 = vld [vmem:[%s880_s26 + $0x40] sm:$0xff]  ;;  %v697_v10 = vld [vmem:[%s880_s26 + $0x48] sm:$0xff]  ;;  %v698_v14 = vld [vmem:[%s880_s26 + $0x50] sm:$0xff] }
  0x11   : > { %807 = vmatpush.bf16.msra.mxu2 %v706_v1  ;;  %808 = vmatpush.bf16.msra.mxu3 %v706_v1  ;;  %v700_v7 = vld [vmem:[%s880_s26 + $0x60] sm:$0xff]  ;;  %v701_v11 = vld [vmem:[%s880_s26 + $0x68] sm:$0xff]  ;;  %v702_v15 = vld [vmem:[%s880_s26 + $0x70] sm:$0xff] }
  0x12   : > { %v691_v16 = vld [vmem:[%s880_s26 + $0x18] sm:$0xff] }
  0x13   : > { %v695_v17 = vld [vmem:[%s880_s26 + $0x38] sm:$0xff] }
  0x14   : > { %378 = vmatpush.bf16.msra.mxu0 %v705_v2  ;;  %809 = vmatpush.bf16.msra.mxu1 %v705_v2  ;;  %v699_v18 = vld [vmem:[%s880_s26 + $0x58] sm:$0xff] }
  0x15   : > { %810 = vmatpush.bf16.msra.mxu2 %v705_v2  ;;  %811 = vmatpush.bf16.msra.mxu3 %v705_v2  ;;  %v703_v19 = vld [vmem:[%s880_s26 + $0x78] sm:$0xff] }
  0x18   : > { %379 = vmatpush.bf16.msra.mxu0 %v704_v3  ;;  %812 = vmatpush.bf16.msra.mxu1 %v704_v3 }
  0x19   : > { %813 = vmatpush.bf16.msra.mxu2 %v704_v3  ;;  %814 = vmatpush.bf16.msra.mxu3 %v704_v3 }
  0x1b   : > { %670 = vmatmul.msk.bf16.vlgmr.msra.gmra.mxu0 %vm323_vm0, %v688_v4  ;;  %674 = vmatmul.msk.bf16.vlgmr.msra.gmra.mxu1 %vm323_vm0, %v692_v5 }
  0x1c   : > { %678 = vmatmul.msk.bf16.vlgmr.msra.gmra.mxu2 %vm323_vm0, %v696_v6  ;;  %682 = vmatmul.msk.bf16.vlgmr.msra.gmra.mxu3 %vm323_vm0, %v700_v7 }
  0x2b   : > { %671 = vmatmul.msk.bf16.gmra.mxu0 %vm323_vm0, %v689_v8  ;;  %675 = vmatmul.msk.bf16.gmra.mxu1 %vm323_vm0, %v693_v9 }
  0x2c   : > { %679 = vmatmul.msk.bf16.gmra.mxu2 %vm323_vm0, %v697_v10  ;;  %683 = vmatmul.msk.bf16.gmra.mxu3 %vm323_vm0, %v701_v11 }
  0x3b   : > { %672 = vmatmul.msk.bf16.gmra.mxu0 %vm323_vm0, %v690_v12  ;;  %676 = vmatmul.msk.bf16.gmra.mxu1 %vm323_vm0, %v694_v13 }
  0x3c   : > { %680 = vmatmul.msk.bf16.gmra.mxu2 %vm323_vm0, %v698_v14  ;;  %684 = vmatmul.msk.bf16.gmra.mxu3 %vm323_vm0, %v702_v15 }
  0x4b   : > { %673 = vmatmul.msk.bf16.gmra.mxu0 %vm323_vm0, %v691_v16  ;;  %677 = vmatmul.msk.bf16.gmra.mxu1 %vm323_vm0, %v695_v17 }
  0x4c   : > { %681 = vmatmul.msk.bf16.gmra.mxu2 %vm323_vm0, %v699_v18  ;;  %685 = vmatmul.msk.bf16.gmra.mxu3 %vm323_vm0, %v703_v19 }
  0x98   : > { %v381_v20 = vpop.f32.mrf.mxu0  ;;  %v401_v21 = vpop.f32.mrf.mxu1 }
  0x99   : > { %v382_v27 = vadd.f32 %v917_v22, %v381_v20  ;;  %v402_v28 = vadd.f32 %v917_v22, %v401_v21 }
  0x9f   : > { %v421_v23 = vpop.f32.mrf.mxu2  ;;  %v441_v24 = vpop.f32.mrf.mxu3 }
  0xa0   : > { %v383_v25 = vpop.f32.mrf.mxu0  ;;  %v403_v26 = vpop.f32.mrf.mxu1  ;;  %v422_v35 = vadd.f32 %v917_v22, %v421_v23  ;;  %v442_v36 = vadd.f32 %v917_v22, %v441_v24 }
  0xa1   : > { %v384_v29 = vadd.f32 %v917_v22, %v383_v25  ;;  %v404_v30 = vadd.f32 %v917_v22, %v403_v26 }
  0xa3   : > { %v711_v31 = vpack.c.bf16 %v384_v29, %v382_v27  ;;  %v731_v32 = vpack.c.bf16 %v404_v30, %v402_v28 }
  0xa5   : > { %712 = vst [vmem:[%s928_s4] sm:$0xff] %v711_v31  }
  0xa6   : > { %791 = vst [vmem:[%s928_s4 + $0x20] sm:$0xff] %v731_v32  }
  0xa7   : > { %v423_v33 = vpop.f32.mrf.mxu2  ;;  %v443_v34 = vpop.f32.mrf.mxu3 }
  0xa8   : > { %v424_v37 = vadd.f32 %v917_v22, %v423_v33  ;;  %v444_v38 = vadd.f32 %v917_v22, %v443_v34  ;;  %v386_v39 = vpop.f32.mrf.mxu0  ;;  %v406_v40 = vpop.f32.mrf.mxu1 }
  0xa9   : > { %v387_v47 = vadd.f32 %v917_v22, %v386_v39  ;;  %v407_v48 = vadd.f32 %v917_v22, %v406_v40 }
  0xaa   : > { %v751_v41 = vpack.c.bf16 %v424_v37, %v422_v35  ;;  %v771_v42 = vpack.c.bf16 %v444_v38, %v442_v36 }
  0xac   : > { %795 = vst [vmem:[%s928_s4 + $0x40] sm:$0xff] %v751_v41  }
  0xad   : > { %799 = vst [vmem:[%s928_s4 + $0x60] sm:$0xff] %v771_v42  }
  0xaf   : > { %v426_v43 = vpop.f32.mrf.mxu2  ;;  %v446_v44 = vpop.f32.mrf.mxu3 }
  0xb0   : > { %v388_v45 = vpop.f32.mrf.mxu0  ;;  %v408_v46 = vpop.f32.mrf.mxu1  ;;  %v427_v55 = vadd.f32 %v917_v22, %v426_v43  ;;  %v447_v56 = vadd.f32 %v917_v22, %v446_v44 }
  0xb1   : > { %v389_v49 = vadd.f32 %v917_v22, %v388_v45  ;;  %v409_v50 = vadd.f32 %v917_v22, %v408_v46 }
  0xb3   : > { %v716_v51 = vpack.c.bf16 %v389_v49, %v387_v47  ;;  %v736_v52 = vpack.c.bf16 %v409_v50, %v407_v48 }
  0xb5   : > { %788 = vst [vmem:[%s928_s4 + $0x8] sm:$0xff] %v716_v51  }
  0xb6   : > { %792 = vst [vmem:[%s928_s4 + $0x28] sm:$0xff] %v736_v52  }
  0xb7   : > { %v428_v53 = vpop.f32.mrf.mxu2  ;;  %v448_v54 = vpop.f32.mrf.mxu3 }
  0xb8   : > { %v429_v57 = vadd.f32 %v917_v22, %v428_v53  ;;  %v449_v58 = vadd.f32 %v917_v22, %v448_v54  ;;  %v391_v59 = vpop.f32.mrf.mxu0  ;;  %v411_v60 = vpop.f32.mrf.mxu1 }
  0xb9   : > { %v392_v3 = vadd.f32 %v917_v22, %v391_v59  ;;  %v412_v4 = vadd.f32 %v917_v22, %v411_v60 }
  0xba   : > { %v756_v61 = vpack.c.bf16 %v429_v57, %v427_v55  ;;  %v776_v62 = vpack.c.bf16 %v449_v58, %v447_v56 }
  0xbc   : > { %796 = vst [vmem:[%s928_s4 + $0x48] sm:$0xff] %v756_v61  }
  0xbd   : > { %800 = vst [vmem:[%s928_s4 + $0x68] sm:$0xff] %v776_v62  }
  0xbf   : > { %v431_v63 = vpop.f32.mrf.mxu2  ;;  %v451_v0 = vpop.f32.mrf.mxu3 }
  0xc0   : > { %v393_v1 = vpop.f32.mrf.mxu0  ;;  %v413_v2 = vpop.f32.mrf.mxu1  ;;  %v432_v11 = vadd.f32 %v917_v22, %v431_v63  ;;  %v452_v12 = vadd.f32 %v917_v22, %v451_v0 }
  0xc1   : > { %v394_v5 = vadd.f32 %v917_v22, %v393_v1  ;;  %v414_v6 = vadd.f32 %v917_v22, %v413_v2 }
  0xc3   : > { %v721_v7 = vpack.c.bf16 %v394_v5, %v392_v3  ;;  %v741_v8 = vpack.c.bf16 %v414_v6, %v412_v4 }
  0xc5   : > { %789 = vst [vmem:[%s928_s4 + $0x10] sm:$0xff] %v721_v7  }
  0xc6   : > { %793 = vst [vmem:[%s928_s4 + $0x30] sm:$0xff] %v741_v8  }
  0xc7   : > { %v433_v9 = vpop.f32.mrf.mxu2  ;;  %v453_v10 = vpop.f32.mrf.mxu3 }
  0xc8   : > { %v434_v13 = vadd.f32 %v917_v22, %v433_v9  ;;  %v454_v14 = vadd.f32 %v917_v22, %v453_v10  ;;  %v396_v15 = vpop.f32.mrf.mxu0  ;;  %v416_v16 = vpop.f32.mrf.mxu1 }
  0xc9   : > { %v397_v24 = vadd.f32 %v917_v22, %v396_v15  ;;  %v417_v25 = vadd.f32 %v917_v22, %v416_v16 }
  0xca   : > { %v761_v17 = vpack.c.bf16 %v434_v13, %v432_v11  ;;  %v781_v18 = vpack.c.bf16 %v454_v14, %v452_v12 }
  0xcc   : > { %797 = vst [vmem:[%s928_s4 + $0x50] sm:$0xff] %v761_v17  }
  0xcd   : > { %801 = vst [vmem:[%s928_s4 + $0x70] sm:$0xff] %v781_v18  }
  0xcf   : > { %v436_v19 = vpop.f32.mrf.mxu2  ;;  %v456_v20 = vpop.f32.mrf.mxu3 }
  0xd0   : > { %v398_v21 = vpop.f32.mrf.mxu0  ;;  %v418_v23 = vpop.f32.mrf.mxu1  ;;  %v437_v32 = vadd.f32 %v917_v22, %v436_v19  ;;  %v457_v33 = vadd.f32 %v917_v22, %v456_v20 }
  0xd1   : > { %v399_v26 = vadd.f32 %v917_v22, %v398_v21  ;;  %v419_v27 = vadd.f32 %v917_v22, %v418_v23 }
  0xd3   : > { %v726_v28 = vpack.c.bf16 %v399_v26, %v397_v24  ;;  %v746_v29 = vpack.c.bf16 %v419_v27, %v417_v25 }
  0xd5   : > { %790 = vst [vmem:[%s928_s4 + $0x18] sm:$0xff] %v726_v28  }
  0xd6   : > { %794 = vst [vmem:[%s928_s4 + $0x38] sm:$0xff] %v746_v29  }
  0xd7   : > { %v438_v30 = vpop.f32.mrf.mxu2  ;;  %v458_v31 = vpop.f32.mrf.mxu3 }
  0xd8   : > { %v439_v34 = vadd.f32 %v917_v22, %v438_v30  ;;  %v459_v35 = vadd.f32 %v917_v22, %v458_v31 }
  0xda   : > { %v766_v36 = vpack.c.bf16 %v439_v34, %v437_v32  ;;  %v786_v37 = vpack.c.bf16 %v459_v35, %v457_v33 }
  0xdc   : > { %798 = vst [vmem:[%s928_s4 + $0x58] sm:$0xff] %v766_v36  }
  0xdd   : > { %802 = vst [vmem:[%s928_s4 + $0x78] sm:$0xff] %v786_v37  }
  0xde PF: > { %s13_s12 = sadd.s32 1, %s830_s12  }
  0xdf   : > { %p10_p4 = scmp.ge.s32.totalorder %s13_s12, 4  }
  0xe1   :  { %12 = sbr.rel (!%p10_p4) target bundleno = 1 (0x1), region = 62 }

// kernel: soft_binary.7
= control target key start
LH: loop header
LB: loop body
LE: loop exit
PB: predicated region body
PF: predicated region fallthrough
CT: control target
= control target key end

     0   :  { %s2378_s12 = smov 0   ;;  %s2832_s0 = inlined_call_operand.vmem [shape: bf16[512,640], index: 0, kind: input, shape index: {}]   ;;  %s2833_s1 = inlined_call_operand.vmem [shape: bf16[640,128], index: 1, kind: input, shape index: {}]   ;;  %s2834_s2 = inlined_call_operand.vmem [shape: f32[1,128], index: 2, kind: input, shape index: {}]   ;;  %s2835_s3 = inlined_call_operand.vmem [shape: bf16[512,128], index: 3, kind: output, shape index: {}]  }
   0x1 LB: > { %s1610_s13 = sadd.s32 4294967295, %s2356_s12   ;;  %p1614_p0 = scmp.ge.s32.totalorder %s2356_s12, 1  ;;  %s2356_s12 = sphi %s2378_s12, %s13_s12  }
   0x2   : > { %p139_p1 = scmp.lt.s32.totalorder %s2356_s12, 3 }
   0x4   : > { %p140_p2 = pnand %p1614_p0, %p139_p1 }
   0x5   : > { %s1615_s20 = sshll.u32 (!%p140_p2), %s1610_s13, 5 }
   0x6   : > { %143 = sbr.rel (%p140_p2) target bundleno = 498 (0x1f2), region = 32  ;;  %p165_p3 = scmp.lt.s32.totalorder (!%p140_p2), %s1615_s20, 63 }
   0xb   : > { %v2188_v0 = vld [vmem:[%s2833_s1 + $0x38] sm:$0xff]  ;;  %v2187_v1 = vld [vmem:[%s2833_s1 + $0x30] sm:$0xff]  ;;  %v2186_v2 = vld [vmem:[%s2833_s1 + $0x28] sm:$0xff]  ;;  %s2837_s20 = smov (!%p165_p3, %s1615_s20), 63 }
   0xc   : > { %2316 = vmatpush.bf16.msra.mxu1 %v2188_v0  ;;  %2317 = vmatpush.bf16.msra.mxu2 %v2188_v0  ;;  %v2185_v3 = vld [vmem:[%s2833_s1 + $0x20] sm:$0xff]  ;;  %v2184_v4 = vld [vmem:[%s2833_s1 + $0x18] sm:$0xff]  ;;  %v2183_v5 = vld [vmem:[%s2833_s1 + $0x10] sm:$0xff]  ;;  %s2340_s27 = smul.u32 20, %s2837_s20  ;;  %s1618_s28 = sshll.u32 %s2837_s20, 2 }
   0xd   : > { %2318 = vmatpush.bf16.msra.mxu3 %v2188_v0  ;;  %1013 = vmatpush.bf16.msra.mxu0 %v2188_v0  ;;  %v2182_v6 = vld [vmem:[%s2833_s1 + $0x8] sm:$0xff]  ;;  %v2181_v7 = vld [vmem:[%s2833_s1] sm:$0xff]  ;;  %v2204_v16 = vld [vmem:[%s2833_s1 + $0xb8] sm:$0xff]  ;;  %s2729_s4 = scalar_lea.vmem %s2835_s3, %s1618_s28 }
   0xe   : > { %s2413_s5 = scalar_lea.vmem %s2832_s0, %s2340_s27  ;;  %v2212_v17 = vld [vmem:[%s2833_s1 + $0xf8] sm:$0xff]  ;;  %v2203_v24 = vld [vmem:[%s2833_s1 + $0xb0] sm:$0xff]  ;;  %v2202_v28 = vld [vmem:[%s2833_s1 + $0xa8] sm:$0xff] }
   0xf   : > { %v1701_v8 = vld [vmem:[%s2413_s5 + $0xa0] sm:$0xf]  ;;  %v2123_v9 = vld [vmem:[%s2413_s5 + $0xb0] sm:$0xf0]  ;;  %v2196_v22 = vld [vmem:[%s2833_s1 + $0x78] sm:$0xff] }
  0x10   : > { %2319 = vmatpush.bf16.msra.mxu1 %v2187_v1  ;;  %2320 = vmatpush.bf16.msra.mxu2 %v2187_v1  ;;  %v1781_v10 = vld [vmem:[%s2413_s5 + $0x140] sm:$0xf]  ;;  %v2143_v11 = vld [vmem:[%s2413_s5 + $0x150] sm:$0xf0]  ;;  %v1702_v18 = vor.u32 %v2123_v9, %v1701_v8  ;;  %v2220_v23 = vld [vmem:[%s2833_s1 + $0x138] sm:$0xff] }
  0x11   : > { %2321 = vmatpush.bf16.msra.mxu3 %v2187_v1  ;;  %1014 = vmatpush.bf16.msra.mxu0 %v2187_v1  ;;  %v1861_v12 = vld [vmem:[%s2413_s5 + $0x1e0] sm:$0xf]  ;;  %v2163_v13 = vld [vmem:[%s2413_s5 + $0x1f0] sm:$0xf0]  ;;  %v1782_v19 = vor.u32 %v2143_v11, %v1781_v10  ;;  %v2210_v29 = vld [vmem:[%s2833_s1 + $0xe8] sm:$0xff] }
  0x12   : > { %v1621_v14 = vld [vmem:[%s2413_s5] sm:$0xf]  ;;  %v2103_v15 = vld [vmem:[%s2413_s5 + $0x10] sm:$0xf0]  ;;  %v1862_v20 = vor.u32 %v2163_v13, %v1861_v12  ;;  %v2194_v30 = vld [vmem:[%s2833_s1 + $0x68] sm:$0xff] }
  0x13   : > { %v1622_v21 = vor.u32 %v2103_v15, %v1621_v14  ;;  %v2211_v25 = vld [vmem:[%s2833_s1 + $0xf0] sm:$0xff]  ;;  %v2218_v31 = vld [vmem:[%s2833_s1 + $0x128] sm:$0xff]  ;;  %v2201_v33 = vld [vmem:[%s2833_s1 + $0xa0] sm:$0xff] }
  0x14   : > { %2322 = vmatpush.bf16.msra.mxu1 %v2186_v2  ;;  %2323 = vmatpush.bf16.msra.mxu2 %v2186_v2  ;;  %v2195_v26 = vld [vmem:[%s2833_s1 + $0x70] sm:$0xff]  ;;  %v1721_v32 = vld [vmem:[%s2413_s5 + $0xc8] sm:$0xf]  ;;  %v2209_v34 = vld [vmem:[%s2833_s1 + $0xe0] sm:$0xff] }
  0x15   : > { %2324 = vmatpush.bf16.msra.mxu3 %v2186_v2  ;;  %1015 = vmatpush.bf16.msra.mxu0 %v2186_v2  ;;  %v2219_v27 = vld [vmem:[%s2833_s1 + $0x130] sm:$0xff]  ;;  %v2128_v35 = vld [vmem:[%s2413_s5 + $0xd8] sm:$0xf0]  ;;  %v1801_v36 = vld [vmem:[%s2413_s5 + $0x168] sm:$0xf] }
  0x16   : > { %v2148_v37 = vld [vmem:[%s2413_s5 + $0x178] sm:$0xf0]  ;;  %v1881_v38 = vld [vmem:[%s2413_s5 + $0x208] sm:$0xf]  ;;  %v2193_v42 = vld [vmem:[%s2833_s1 + $0x60] sm:$0xff]  ;;  %v1722_v46 = vor.u32 %v2128_v35, %v1721_v32 }
  0x17   : > { %v2168_v39 = vld [vmem:[%s2413_s5 + $0x218] sm:$0xf0]  ;;  %v1641_v40 = vld [vmem:[%s2413_s5 + $0x28] sm:$0xf]  ;;  %v2217_v43 = vld [vmem:[%s2833_s1 + $0x120] sm:$0xff]  ;;  %v1802_v47 = vor.u32 %v2148_v37, %v1801_v36 }
  0x18   : > { %2325 = vmatpush.bf16.msra.mxu1 %v2185_v3  ;;  %2326 = vmatpush.bf16.msra.mxu2 %v2185_v3  ;;  %v2108_v41 = vld [vmem:[%s2413_s5 + $0x38] sm:$0xf0]  ;;  %v1882_v48 = vor.u32 %v2168_v39, %v1881_v38  ;;  %v2199_v52 = vld [vmem:[%s2833_s1 + $0x90] sm:$0xff]  ;;  %v2198_v56 = vld [vmem:[%s2833_s1 + $0x88] sm:$0xff] }
  0x19   : > { %2327 = vmatpush.bf16.msra.mxu3 %v2185_v3  ;;  %1016 = vmatpush.bf16.msra.mxu0 %v2185_v3  ;;  %v2200_v44 = vld [vmem:[%s2833_s1 + $0x98] sm:$0xff]  ;;  %v1642_v49 = vor.u32 %v2108_v41, %v1641_v40  ;;  %v2207_v53 = vld [vmem:[%s2833_s1 + $0xd0] sm:$0xff]  ;;  %v2206_v57 = vld [vmem:[%s2833_s1 + $0xc8] sm:$0xff] }
  0x1a   : > { %v2208_v45 = vld [vmem:[%s2833_s1 + $0xd8] sm:$0xff]  ;;  %v2191_v54 = vld [vmem:[%s2833_s1 + $0x50] sm:$0xff]  ;;  %v2190_v58 = vld [vmem:[%s2833_s1 + $0x48] sm:$0xff] }
  0x1b   : > { %v2192_v50 = vld [vmem:[%s2833_s1 + $0x58] sm:$0xff]  ;;  %v2215_v55 = vld [vmem:[%s2833_s1 + $0x110] sm:$0xff]  ;;  %v2214_v59 = vld [vmem:[%s2833_s1 + $0x108] sm:$0xff] }
  0x1c   : > { %2328 = vmatpush.bf16.msra.mxu1 %v2184_v4  ;;  %2329 = vmatpush.bf16.msra.mxu2 %v2184_v4  ;;  %v2216_v51 = vld [vmem:[%s2833_s1 + $0x118] sm:$0xff]  ;;  %v1741_v60 = vld [vmem:[%s2413_s5 + $0xf0] sm:$0xf]  ;;  %v2197_v61 = vld [vmem:[%s2833_s1 + $0x80] sm:$0xff] }
  0x1d   : > { %2330 = vmatpush.bf16.msra.mxu3 %v2184_v4  ;;  %1017 = vmatpush.bf16.msra.mxu0 %v2184_v4  ;;  %v2205_v62 = vld [vmem:[%s2833_s1 + $0xc0] sm:$0xff]  ;;  %v1821_v0 = vld [vmem:[%s2413_s5 + $0x190] sm:$0xf]  ;;  %v1761_v12 = vld [vmem:[%s2413_s5 + $0x118] sm:$0xf] }
  0x1e   : > { %v2133_v63 = vld [vmem:[%s2413_s5 + $0x100] sm:$0xf0]  ;;  %v1901_v2 = vld [vmem:[%s2413_s5 + $0x230] sm:$0xf]  ;;  %v2138_v13 = vld [vmem:[%s2413_s5 + $0x128] sm:$0xf0] }
  0x1f   : > { %v2153_v1 = vld [vmem:[%s2413_s5 + $0x1a0] sm:$0xf0]  ;;  %v1661_v4 = vld [vmem:[%s2413_s5 + $0x50] sm:$0xf]  ;;  %v1742_v8 = vor.u32 %v2133_v63, %v1741_v60  ;;  %v1841_v14 = vld [vmem:[%s2413_s5 + $0x1b8] sm:$0xf] }
  0x20   : > { %2331 = vmatpush.bf16.msra.mxu1 %v2183_v5  ;;  %2332 = vmatpush.bf16.msra.mxu2 %v2183_v5  ;;  %v2173_v3 = vld [vmem:[%s2413_s5 + $0x240] sm:$0xf0]  ;;  %v1822_v9 = vor.u32 %v2153_v1, %v1821_v0  ;;  %v2158_v15 = vld [vmem:[%s2413_s5 + $0x1c8] sm:$0xf0]  ;;  %v1643_v37 = vld [vmem:[%s2413_s5 + $0x3c] sm:$0xf0] }
  0x21   : > { %2333 = vmatpush.bf16.msra.mxu3 %v2183_v5  ;;  %1018 = vmatpush.bf16.msra.mxu0 %v2183_v5  ;;  %v2113_v5 = vld [vmem:[%s2413_s5 + $0x60] sm:$0xf0]  ;;  %v1902_v10 = vor.u32 %v2173_v3, %v1901_v2  ;;  %v2106_v36 = vld [vmem:[%s2413_s5 + $0x2c] sm:$0xf]  ;;  %v1649_v38 = vld [vmem:[%s2413_s5 + $0x30] sm:$0xf] }
  0x22   : > { %v1662_v11 = vor.u32 %v2113_v5, %v1661_v4  ;;  %v2109_v39 = vld [vmem:[%s2413_s5 + $0x40] sm:$0xf0]  ;;  %v2107_v40 = vld [vmem:[%s2413_s5 + $0x34] sm:$0xf]  ;;  %v1651_v41 = vld [vmem:[%s2413_s5 + $0x44] sm:$0xf0] }
  0x23   : > { %v2116_v60 = vld [vmem:[%s2413_s5 + $0x7c] sm:$0xf]  ;;  %v2119_v63 = vld [vmem:[%s2413_s5 + $0x90] sm:$0xf0]  ;;  %v2117_v0 = vld [vmem:[%s2413_s5 + $0x84] sm:$0xf] }
  0x24   : > { %2334 = vmatpush.bf16.msra.mxu1 %v2182_v6  ;;  %2335 = vmatpush.bf16.msra.mxu2 %v2182_v6  ;;  %v1691_v1 = vld [vmem:[%s2413_s5 + $0x94] sm:$0xf0]  ;;  %v1697_v2 = vld [vmem:[%s2413_s5 + $0x88] sm:$0xf]  ;;  %v2120_v3 = vld [vmem:[%s2413_s5 + $0x98] sm:$0xf0] }
  0x25   : > { %2336 = vmatpush.bf16.msra.mxu3 %v2182_v6  ;;  %1019 = vmatpush.bf16.msra.mxu0 %v2182_v6  ;;  %v2189_v6 = vld [vmem:[%s2833_s1 + $0x40] sm:$0xff] }
  0x28   : > { %2337 = vmatpush.bf16.msra.mxu1 %v2181_v7  ;;  %2338 = vmatpush.bf16.msra.mxu2 %v2181_v7 }
  0x29   : > { %2339 = vmatpush.bf16.msra.mxu3 %v2181_v7  ;;  %1020 = vmatpush.bf16.msra.mxu0 %v2181_v7  ;;  %v2213_v7 = vld [vmem:[%s2833_s1 + $0x100] sm:$0xff] }
  0x2b   : > { %1041 = vmatmul.bf16.vlgmr.msra.gmra.mxu1 %v1702_v18  ;;  %1061 = vmatmul.bf16.vlgmr.msra.gmra.mxu2 %v1782_v19  ;;  %v1681_v18 = vld [vmem:[%s2413_s5 + $0x78] sm:$0xf]  ;;  %v2118_v19 = vld [vmem:[%s2413_s5 + $0x88] sm:$0xf0] }
  0x2c   : > { %1191 = vmatpush.bf16.msrb.mxu2 %v2204_v16  ;;  %1081 = vmatmul.bf16.vlgmr.msra.gmra.mxu3 %v1862_v20  ;;  %v1921_v16 = vld [vmem:[%s2413_s5 + $0x258] sm:$0xf]  ;;  %v1762_v20 = vor.u32 %v2138_v13, %v1761_v12  ;;  %v2124_v12 = vld [vmem:[%s2413_s5 + $0xb8] sm:$0xf0]  ;;  %v2122_v13 = vld [vmem:[%s2413_s5 + $0xac] sm:$0xf] }
  0x2d   : > { %1280 = vmatpush.bf16.msrb.mxu3 %v2212_v17  ;;  %1021 = vmatmul.bf16.vlgmr.msra.gmra.mxu0 %v1622_v21  ;;  %v2178_v17 = vld [vmem:[%s2413_s5 + $0x268] sm:$0xf0]  ;;  %v1842_v21 = vor.u32 %v2158_v15, %v1841_v14  ;;  %v1711_v14 = vld [vmem:[%s2413_s5 + $0xbc] sm:$0xf0]  ;;  %v1717_v15 = vld [vmem:[%s2413_s5 + $0xb0] sm:$0xf] }
  0x2e   : > { %1102 = vmatpush.bf16.msrb.mxu1 %v2196_v22  ;;  %1369 = vmatpush.bf16.msrb.mxu0 %v2220_v23  ;;  %v1922_v22 = vor.u32 %v2178_v17, %v1921_v16  ;;  %v1682_v23 = vor.u32 %v2118_v19, %v1681_v18  ;;  %v2125_v16 = vld [vmem:[%s2413_s5 + $0xc0] sm:$0xf0] }
  0x30   : > { %1192 = vmatpush.bf16.msrb.mxu2 %v2203_v24  ;;  %v2101_v24 = vld [vmem:[%s2413_s5 + $0x4] sm:$0xf] }
  0x31   : > { %1281 = vmatpush.bf16.msrb.mxu3 %v2211_v25  ;;  %v1623_v25 = vld [vmem:[%s2413_s5 + $0x14] sm:$0xf0] }
  0x32   : > { %1103 = vmatpush.bf16.msrb.mxu1 %v2195_v26  ;;  %1370 = vmatpush.bf16.msrb.mxu0 %v2219_v27  ;;  %v1629_v26 = vld [vmem:[%s2413_s5 + $0x8] sm:$0xf]  ;;  %v2104_v27 = vld [vmem:[%s2413_s5 + $0x18] sm:$0xf0]  ;;  %v1626_v32 = vor.u32 %v2101_v24, %v1623_v25 }
  0x34   : > { %1193 = vmatpush.bf16.msrb.mxu2 %v2202_v28  ;;  %v2102_v28 = vld [vmem:[%s2413_s5 + $0xc] sm:$0xf] }
  0x35   : > { %1282 = vmatpush.bf16.msrb.mxu3 %v2210_v29  ;;  %v1631_v29 = vld [vmem:[%s2413_s5 + $0x1c] sm:$0xf0] }
  0x36   : > { %1104 = vmatpush.bf16.msrb.mxu1 %v2194_v30  ;;  %1371 = vmatpush.bf16.msrb.mxu0 %v2218_v31  ;;  %v1637_v30 = vld [vmem:[%s2413_s5 + $0x10] sm:$0xf]  ;;  %v2105_v31 = vld [vmem:[%s2413_s5 + $0x20] sm:$0xf0] }
  0x37   : > { %v1638_v35 = vor.u32 %v2105_v31, %v1637_v30  ;;  %v2126_v31 = vld [vmem:[%s2413_s5 + $0xcc] sm:$0xf] }
  0x38   : > { %1194 = vmatpush.bf16.msrb.mxu2 %v2201_v33  ;;  %v1630_v33 = vor.u32 %v2104_v27, %v1629_v26 }
  0x39   : > { %1283 = vmatpush.bf16.msrb.mxu3 %v2209_v34  ;;  %v1634_v34 = vor.u32 %v2102_v28, %v1631_v29 }
  0x3a   : > { %1105 = vmatpush.bf16.msrb.mxu1 %v2193_v42  ;;  %1372 = vmatpush.bf16.msrb.mxu0 %v2217_v43  ;;  %v1657_v42 = vld [vmem:[%s2413_s5 + $0x38] sm:$0xf]  ;;  %v2110_v43 = vld [vmem:[%s2413_s5 + $0x48] sm:$0xf0] }
  0x3b   : > { %1046 = vmatmul.bf16.gmra.mxu1 %v1722_v46  ;;  %1066 = vmatmul.bf16.gmra.mxu2 %v1802_v47  ;;  %v1654_v46 = vor.u32 %v2107_v40, %v1651_v41  ;;  %v1658_v47 = vor.u32 %v2110_v43, %v1657_v42 }
  0x3c   : > { %1195 = vmatpush.bf16.msrb.mxu2 %v2200_v44  ;;  %1086 = vmatmul.bf16.gmra.mxu3 %v1882_v48  ;;  %v1646_v44 = vor.u32 %v2106_v36, %v1643_v37  ;;  %v2111_v48 = vld [vmem:[%s2413_s5 + $0x54] sm:$0xf]  ;;  %v1731_v36 = vld [vmem:[%s2413_s5 + $0xe4] sm:$0xf0]  ;;  %v1737_v37 = vld [vmem:[%s2413_s5 + $0xd8] sm:$0xf] }
  0x3d   : > { %1284 = vmatpush.bf16.msrb.mxu3 %v2208_v45  ;;  %1026 = vmatmul.bf16.gmra.mxu0 %v1642_v49  ;;  %v1650_v45 = vor.u32 %v2109_v39, %v1649_v38  ;;  %v1663_v49 = vld [vmem:[%s2413_s5 + $0x64] sm:$0xf0]  ;;  %v2130_v38 = vld [vmem:[%s2413_s5 + $0xe8] sm:$0xf0] }
  0x3e   : > { %1106 = vmatpush.bf16.msrb.mxu1 %v2192_v50  ;;  %1373 = vmatpush.bf16.msrb.mxu0 %v2216_v51  ;;  %v1669_v50 = vld [vmem:[%s2413_s5 + $0x58] sm:$0xf]  ;;  %v2114_v51 = vld [vmem:[%s2413_s5 + $0x68] sm:$0xf0] }
  0x40   : > { %1196 = vmatpush.bf16.msrb.mxu2 %v2199_v52  ;;  %v2112_v52 = vld [vmem:[%s2413_s5 + $0x5c] sm:$0xf] }
  0x41   : > { %1285 = vmatpush.bf16.msrb.mxu3 %v2207_v53  ;;  %v1671_v53 = vld [vmem:[%s2413_s5 + $0x6c] sm:$0xf0] }
  0x42   : > { %1107 = vmatpush.bf16.msrb.mxu1 %v2191_v54  ;;  %1374 = vmatpush.bf16.msrb.mxu0 %v2215_v55  ;;  %v1677_v54 = vld [vmem:[%s2413_s5 + $0x60] sm:$0xf]  ;;  %v2115_v55 = vld [vmem:[%s2413_s5 + $0x70] sm:$0xf0] }
  0x44   : > { %1197 = vmatpush.bf16.msrb.mxu2 %v2198_v56  ;;  %v1666_v56 = vor.u32 %v2111_v48, %v1663_v49 }
  0x45   : > { %1286 = vmatpush.bf16.msrb.mxu3 %v2206_v57  ;;  %v1670_v57 = vor.u32 %v2114_v51, %v1669_v50 }
  0x46   : > { %1108 = vmatpush.bf16.msrb.mxu1 %v2190_v58  ;;  %1375 = vmatpush.bf16.msrb.mxu0 %v2214_v59  ;;  %v1674_v58 = vor.u32 %v2112_v52, %v1671_v53  ;;  %v1678_v59 = vor.u32 %v2115_v55, %v1677_v54 }
  0x48   : > { %1198 = vmatpush.bf16.msrb.mxu2 %v2197_v61  ;;  %v1683_v61 = vld [vmem:[%s2413_s5 + $0x8c] sm:$0xf0] }
  0x49   : > { %1287 = vmatpush.bf16.msrb.mxu3 %v2205_v62  ;;  %v1689_v62 = vld [vmem:[%s2413_s5 + $0x80] sm:$0xf]  ;;  %v1686_v4 = vor.u32 %v2116_v60, %v1683_v61  ;;  %v2134_v60 = vld [vmem:[%s2413_s5 + $0x108] sm:$0xf0]  ;;  %v2132_v61 = vld [vmem:[%s2413_s5 + $0xfc] sm:$0xf] }
  0x4a   : > { %1109 = vmatpush.bf16.msrb.mxu1 %v2189_v6  ;;  %1376 = vmatpush.bf16.msrb.mxu0 %v2213_v7  ;;  %v1690_v5 = vor.u32 %v2119_v63, %v1689_v62  ;;  %v1694_v6 = vor.u32 %v2117_v0, %v1691_v1  ;;  %v1698_v7 = vor.u32 %v2120_v3, %v1697_v2  ;;  %v1751_v62 = vld [vmem:[%s2413_s5 + $0x10c] sm:$0xf0]  ;;  %v1757_v63 = vld [vmem:[%s2413_s5 + $0x100] sm:$0xf]  ;;  %v2135_v0 = vld [vmem:[%s2413_s5 + $0x110] sm:$0xf0] }
  0x4b   : > { %1051 = vmatmul.bf16.gmra.mxu1 %v1742_v8  ;;  %1071 = vmatmul.bf16.gmra.mxu2 %v1822_v9  ;;  %v2581_v8 = vld [vmem:[%s2834_s2] ss:$0 sm:$0xff]  ;;  %v2121_v9 = vld [vmem:[%s2413_s5 + $0xa4] sm:$0xf] }
  0x4c   : > { %1091 = vmatmul.bf16.gmra.mxu3 %v1902_v10  ;;  %v1703_v10 = vld [vmem:[%s2413_s5 + $0xb4] sm:$0xf0] }
  0x4d   : > { %1031 = vmatmul.bf16.gmra.mxu0 %v1662_v11  ;;  %v1709_v11 = vld [vmem:[%s2413_s5 + $0xa8] sm:$0xf]  ;;  %v1706_v17 = vor.u32 %v2121_v9, %v1703_v10  ;;  %v1754_v9 = vor.u32 %v2132_v61, %v1751_v62  ;;  %v1758_v10 = vor.u32 %v2135_v0, %v1757_v63  ;;  %v1783_v61 = vld [vmem:[%s2413_s5 + $0x154] sm:$0xf0]  ;;  %v2144_v63 = vld [vmem:[%s2413_s5 + $0x158] sm:$0xf0] }
  0x4e   : > { %v1710_v18 = vor.u32 %v2124_v12, %v1709_v11  ;;  %v1789_v62 = vld [vmem:[%s2413_s5 + $0x148] sm:$0xf]  ;;  %v2142_v0 = vld [vmem:[%s2413_s5 + $0x14c] sm:$0xf] }
  0x5b   : > { %1056 = vmatmul.bf16.gmra.mxu1 %v1762_v20  ;;  %1076 = vmatmul.bf16.gmra.mxu2 %v1842_v21  ;;  %v1714_v20 = vor.u32 %v2122_v13, %v1711_v14  ;;  %v1718_v21 = vor.u32 %v2125_v16, %v1717_v15 }
  0x5c   : > { %1096 = vmatmul.bf16.gmra.mxu3 %v1922_v22 }
  0x5d   : > { %1036 = vmatmul.bf16.gmra.mxu0 %v1682_v23 }
  0x6b   : > { %1110 = vmatmul.bf16.vlgmr.msrb.gmra.mxu1 %v1626_v32  ;;  %1199 = vmatmul.bf16.vlgmr.msrb.gmra.mxu2 %v1630_v33  ;;  %v1723_v32 = vld [vmem:[%s2413_s5 + $0xdc] sm:$0xf0]  ;;  %v1729_v33 = vld [vmem:[%s2413_s5 + $0xd0] sm:$0xf] }
  0x6c   : > { %1288 = vmatmul.bf16.vlgmr.msrb.gmra.mxu3 %v1634_v34  ;;  %v2129_v34 = vld [vmem:[%s2413_s5 + $0xe0] sm:$0xf0]  ;;  %v1726_v42 = vor.u32 %v2126_v31, %v1723_v32  ;;  %v1771_v31 = vld [vmem:[%s2413_s5 + $0x134] sm:$0xf0]  ;;  %v1777_v32 = vld [vmem:[%s2413_s5 + $0x128] sm:$0xf] }
  0x6d   : > { %1377 = vmatmul.bf16.vlgmr.msrb.gmra.mxu0 %v1638_v35  ;;  %v2127_v35 = vld [vmem:[%s2413_s5 + $0xd4] sm:$0xf]  ;;  %v1730_v43 = vor.u32 %v2129_v34, %v1729_v33  ;;  %v2140_v33 = vld [vmem:[%s2413_s5 + $0x138] sm:$0xf0] }
  0x7b   : > { %1115 = vmatmul.bf16.gmra.mxu1 %v1646_v44  ;;  %1204 = vmatmul.bf16.gmra.mxu2 %v1650_v45 }
  0x7c   : > { %1293 = vmatmul.bf16.gmra.mxu3 %v1654_v46  ;;  %v1734_v46 = vor.u32 %v2127_v35, %v1731_v36 }
  0x7d   : > { %1382 = vmatmul.bf16.gmra.mxu0 %v1658_v47  ;;  %v1738_v47 = vor.u32 %v2130_v38, %v1737_v37 }
  0x8b   : > { %1120 = vmatmul.bf16.gmra.mxu1 %v1666_v56  ;;  %1209 = vmatmul.bf16.gmra.mxu2 %v1670_v57  ;;  %v2131_v57 = vld [vmem:[%s2413_s5 + $0xf4] sm:$0xf] }
  0x8c   : > { %1298 = vmatmul.bf16.gmra.mxu3 %v1674_v58  ;;  %v1743_v58 = vld [vmem:[%s2413_s5 + $0x104] sm:$0xf0] }
  0x8d   : > { %1387 = vmatmul.bf16.gmra.mxu0 %v1678_v59  ;;  %v1749_v59 = vld [vmem:[%s2413_s5 + $0xf8] sm:$0xf] }
  0x9b   : > { %1125 = vmatmul.bf16.gmra.mxu1 %v1686_v4  ;;  %1214 = vmatmul.bf16.gmra.mxu2 %v1690_v5  ;;  %v1746_v4 = vor.u32 %v2131_v57, %v1743_v58  ;;  %v1750_v5 = vor.u32 %v2134_v60, %v1749_v59  ;;  %v2141_v60 = vld [vmem:[%s2413_s5 + $0x144] sm:$0xf] }
  0x9c   : > { %1303 = vmatmul.bf16.gmra.mxu3 %v1694_v6 }
  0x9d   : > { %1392 = vmatmul.bf16.gmra.mxu0 %v1698_v7 }
  0xa8   : > { %v1042_v19 = vpop.f32.mrf.mxu1 }
  0xa9   : > { %v2592_v22 = vadd.f32 %v2581_v8, %v1042_v19 }
  0xaa   : > { %v2594_v23 = vpop.f32.mrf.mxu0 }
  0xab   : > { %1130 = vmatmul.bf16.gmra.mxu1 %v1706_v17  ;;  %1219 = vmatmul.bf16.gmra.mxu2 %v1710_v18 }
  0xac   : > { %1308 = vmatmul.bf16.gmra.mxu3 %v1714_v20  ;;  %v2136_v20 = vld [vmem:[%s2413_s5 + $0x11c] sm:$0xf] }
  0xad   : > { %1397 = vmatmul.bf16.gmra.mxu0 %v1718_v21  ;;  %v1763_v21 = vld [vmem:[%s2413_s5 + $0x12c] sm:$0xf0] }
  0xae   : > { %v1062_v24 = vpop.f32.mrf.mxu2  ;;  %v1766_v37 = vor.u32 %v2136_v20, %v1763_v21 }
  0xaf   : > { %v2597_v25 = vadd.f32 %v2581_v8, %v1062_v24  ;;  %v1082_v26 = vpop.f32.mrf.mxu3  ;;  %v1769_v24 = vld [vmem:[%s2413_s5 + $0x120] sm:$0xf] }
  0xb0   : > { %v2600_v27 = vadd.f32 %v2581_v8, %v1082_v26  ;;  %v1044_v28 = vpop.f32.mrf.mxu1  ;;  %v2139_v26 = vld [vmem:[%s2413_s5 + $0x130] sm:$0xf0] }
  0xb1   : > { %v2603_v29 = vadd.f32 %v2581_v8, %v1044_v28  ;;  %v2137_v28 = vld [vmem:[%s2413_s5 + $0x124] sm:$0xf]  ;;  %v1770_v38 = vor.u32 %v2139_v26, %v1769_v24  ;;  %v1023_v26 = vadd.f32 %v2581_v8, %v2594_v23  ;;  %v1811_v23 = vld [vmem:[%s2413_s5 + $0x184] sm:$0xf0] }
  0xb2   : > { %v2605_v30 = vpop.f32.mrf.mxu0 }
  0xb6   : > { %v1064_v39 = vpop.f32.mrf.mxu2 }
  0xb7   : > { %v2616_v40 = vadd.f32 %v2581_v8, %v1064_v39  ;;  %v1084_v41 = vpop.f32.mrf.mxu3 }
  0xb8   : > { %v2619_v44 = vadd.f32 %v2581_v8, %v1084_v41  ;;  %v1047_v45 = vpop.f32.mrf.mxu1 }
  0xb9   : > { %v2622_v48 = vadd.f32 %v2581_v8, %v1047_v45 }
  0xba   : > { %v2624_v49 = vpop.f32.mrf.mxu0 }
  0xbb   : > { %1135 = vmatmul.bf16.gmra.mxu1 %v1726_v42  ;;  %1224 = vmatmul.bf16.gmra.mxu2 %v1730_v43  ;;  %v1774_v42 = vor.u32 %v2137_v28, %v1771_v31  ;;  %v1778_v43 = vor.u32 %v2140_v33, %v1777_v32 }
  0xbc   : > { %1313 = vmatmul.bf16.gmra.mxu3 %v1734_v46 }
  0xbd   : > { %1402 = vmatmul.bf16.gmra.mxu0 %v1738_v47 }
  0xbe   : > { %v1067_v50 = vpop.f32.mrf.mxu2 }
  0xbf   : > { %v2627_v51 = vadd.f32 %v2581_v8, %v1067_v50  ;;  %v1087_v52 = vpop.f32.mrf.mxu3 }
  0xc0   : > { %v2630_v53 = vadd.f32 %v2581_v8, %v1087_v52  ;;  %v1049_v54 = vpop.f32.mrf.mxu1 }
  0xc1   : > { %v2633_v55 = vadd.f32 %v2581_v8, %v1049_v54 }
  0xc2   : > { %v2635_v56 = vpop.f32.mrf.mxu0 }
  0xc6   : > { %v1069_v1 = vpop.f32.mrf.mxu2 }
  0xc7   : > { %v2646_v2 = vadd.f32 %v2581_v8, %v1069_v1  ;;  %v1089_v3 = vpop.f32.mrf.mxu3  ;;  %v1791_v1 = vld [vmem:[%s2413_s5 + $0x15c] sm:$0xf0] }
  0xc8   : > { %v2649_v6 = vadd.f32 %v2581_v8, %v1089_v3  ;;  %v1052_v7 = vpop.f32.mrf.mxu1  ;;  %v1797_v3 = vld [vmem:[%s2413_s5 + $0x150] sm:$0xf]  ;;  %v1794_v20 = vor.u32 %v2142_v0, %v1791_v1 }
  0xc9   : > { %v2652_v11 = vadd.f32 %v2581_v8, %v1052_v7 }
  0xca   : > { %v2654_v12 = vpop.f32.mrf.mxu0 }
  0xcb   : > { %1140 = vmatmul.bf16.gmra.mxu1 %v1746_v4  ;;  %1229 = vmatmul.bf16.gmra.mxu2 %v1750_v5  ;;  %v2145_v4 = vld [vmem:[%s2413_s5 + $0x160] sm:$0xf0] }
  0xcc   : > { %1318 = vmatmul.bf16.gmra.mxu3 %v1754_v9  ;;  %v1798_v21 = vor.u32 %v2145_v4, %v1797_v3 }
  0xcd   : > { %1407 = vmatmul.bf16.gmra.mxu0 %v1758_v10  ;;  %v1786_v10 = vor.u32 %v2141_v60, %v1783_v61  ;;  %v1817_v60 = vld [vmem:[%s2413_s5 + $0x178] sm:$0xf]  ;;  %v2150_v61 = vld [vmem:[%s2413_s5 + $0x188] sm:$0xf0] }
  0xce   : > { %v1072_v13 = vpop.f32.mrf.mxu2 }
  0xcf   : > { %v2657_v14 = vadd.f32 %v2581_v8, %v1072_v13  ;;  %v1092_v15 = vpop.f32.mrf.mxu3  ;;  %v1790_v13 = vor.u32 %v2144_v63, %v1789_v62 }
  0xd0   : > { %v2660_v16 = vadd.f32 %v2581_v8, %v1092_v15  ;;  %v1054_v17 = vpop.f32.mrf.mxu1 }
  0xd1   : > { %v2663_v18 = vadd.f32 %v2581_v8, %v1054_v17 }
  0xd2   : > { %v2665_v19 = vpop.f32.mrf.mxu0 }
  0xd6   : > { %v1074_v34 = vpop.f32.mrf.mxu2 }
  0xd7   : > { %v2676_v35 = vadd.f32 %v2581_v8, %v1074_v34  ;;  %v1094_v36 = vpop.f32.mrf.mxu3 }
  0xd8   : > { %v2679_v39 = vadd.f32 %v2581_v8, %v1094_v36  ;;  %v1057_v41 = vpop.f32.mrf.mxu1 }
  0xd9   : > { %v2682_v45 = vadd.f32 %v2581_v8, %v1057_v41  ;;  %v1803_v41 = vld [vmem:[%s2413_s5 + $0x17c] sm:$0xf0] }
  0xda   : > { %v2684_v46 = vpop.f32.mrf.mxu0 }
  0xdb   : > { %1145 = vmatmul.bf16.gmra.mxu1 %v1766_v37  ;;  %1234 = vmatmul.bf16.gmra.mxu2 %v1770_v38  ;;  %v1025_v37 = vadd.f32 %v2581_v8, %v2605_v30  ;;  %v2146_v38 = vld [vmem:[%s2413_s5 + $0x16c] sm:$0xf] }
  0xdc   : > { %1323 = vmatmul.bf16.gmra.mxu3 %v1774_v42  ;;  %v1809_v42 = vld [vmem:[%s2413_s5 + $0x170] sm:$0xf]  ;;  %v1806_v1 = vor.u32 %v2146_v38, %v1803_v41  ;;  %v1823_v38 = vld [vmem:[%s2413_s5 + $0x1a4] sm:$0xf0]  ;;  %v1829_v41 = vld [vmem:[%s2413_s5 + $0x198] sm:$0xf] }
  0xdd   : > { %1412 = vmatmul.bf16.gmra.mxu0 %v1778_v43  ;;  %v2149_v43 = vld [vmem:[%s2413_s5 + $0x180] sm:$0xf0] }
  0xde   : > { %v1077_v47 = vpop.f32.mrf.mxu2  ;;  %v1810_v3 = vor.u32 %v2149_v43, %v1809_v42  ;;  %v2154_v42 = vld [vmem:[%s2413_s5 + $0x1a8] sm:$0xf0]  ;;  %v2152_v43 = vld [vmem:[%s2413_s5 + $0x19c] sm:$0xf] }
  0xdf   : > { %v2687_v50 = vadd.f32 %v2581_v8, %v1077_v47  ;;  %v1097_v52 = vpop.f32.mrf.mxu3  ;;  %v2147_v47 = vld [vmem:[%s2413_s5 + $0x174] sm:$0xf] }
  0xe0   : > { %v2690_v54 = vadd.f32 %v2581_v8, %v1097_v52  ;;  %v1059_v57 = vpop.f32.mrf.mxu1 }
  0xe1   : > { %v2693_v58 = vadd.f32 %v2581_v8, %v1059_v57 }
  0xe2   : > { %v2695_v59 = vpop.f32.mrf.mxu0 }
  0xe6   : > { %v1079_v5 = vpop.f32.mrf.mxu2 }
  0xe7   : > { %v2706_v7 = vadd.f32 %v2581_v8, %v1079_v5  ;;  %v1099_v9 = vpop.f32.mrf.mxu3  ;;  %v1814_v5 = vor.u32 %v2147_v47, %v1811_v23  ;;  %v1837_v23 = vld [vmem:[%s2413_s5 + $0x1a0] sm:$0xf] }
  0xe8   : > { %v2709_v15 = vadd.f32 %v2581_v8, %v1099_v9  ;;  %v1111_v17 = vpop.f32.mrf.mxu1  ;;  %v1818_v9 = vor.u32 %v2150_v61, %v1817_v60  ;;  %v2155_v60 = vld [vmem:[%s2413_s5 + $0x1b0] sm:$0xf0] }
  0xe9   : > { %v1112_v31 = vadd.f32 %v1111_v17, %v1023_v26 }
  0xea   : > { %v1378_v24 = vpop.f32.mrf.mxu0 }
  0xeb   : > { %1150 = vmatmul.bf16.gmra.mxu1 %v1786_v10  ;;  %1239 = vmatmul.bf16.gmra.mxu2 %v1790_v13 }
  0xec   : > { %1328 = vmatmul.bf16.gmra.mxu3 %v1794_v20  ;;  %v1028_v20 = vadd.f32 %v2581_v8, %v2624_v49 }
  0xed   : > { %1417 = vmatmul.bf16.gmra.mxu0 %v1798_v21 }
  0xee   : > { %v1200_v28 = vpop.f32.mrf.mxu2 }
  0xef   : > { %v1289_v32 = vpop.f32.mrf.mxu3  ;;  %v1201_v34 = vadd.f32 %v1200_v28, %v1112_v31 }
  0xf0   : > { %v1113_v33 = vpop.f32.mrf.mxu1 }
  0xf1   : > { %v1290_v52 = vadd.f32 %v1289_v32, %v1201_v34  ;;  %v1114_v57 = vadd.f32 %v1113_v33, %v1025_v37  ;;  %v2151_v37 = vld [vmem:[%s2413_s5 + $0x194] sm:$0xf] }
  0xf2   : > { %v1380_v36 = vpop.f32.mrf.mxu0 }
  0xf3   : > { %v1379_v30 = vadd.f32 %v1378_v24, %v1290_v52 }
  0xf5   : > { %v1458_v21 = vmax.f32 %v1379_v30, 0.0 }
  0xf6   : > { %v1202_v62 = vpop.f32.mrf.mxu2 }
  0xf7   : > { %v1203_v63 = vadd.f32 %v1202_v62, %v1114_v57  ;;  %v1291_v0 = vpop.f32.mrf.mxu3  ;;  %v1831_v57 = vld [vmem:[%s2413_s5 + $0x1ac] sm:$0xf0] }
  0xf8   : > { %v1116_v4 = vpop.f32.mrf.mxu1 }
  0xf9   : > { %v1292_v10 = vadd.f32 %v1291_v0, %v1203_v63  ;;  %v1117_v31 = vadd.f32 %v1116_v4, %v1028_v20  ;;  %v1826_v0 = vor.u32 %v2151_v37, %v1823_v38  ;;  %v1834_v4 = vor.u32 %v2152_v43, %v1831_v57  ;;  %v2159_v37 = vld [vmem:[%s2413_s5 + $0x1d0] sm:$0xf0]  ;;  %v2157_v38 = vld [vmem:[%s2413_s5 + $0x1c4] sm:$0xf]  ;;  %v1851_v43 = vld [vmem:[%s2413_s5 + $0x1d4] sm:$0xf0] }
  0xfa   : > { %v1383_v13 = vpop.f32.mrf.mxu0 }
  0xfb   : > { %v1381_v17 = vadd.f32 %v1380_v36, %v1292_v10  ;;  %1155 = vmatmul.bf16.gmra.mxu1 %v1806_v1  ;;  %1244 = vmatmul.bf16.gmra.mxu2 %v1810_v3  ;;  %v1030_v36 = vadd.f32 %v2581_v8, %v2635_v56  ;;  %v1830_v1 = vor.u32 %v2154_v42, %v1829_v41 }
  0xfc   : > { %1333 = vmatmul.bf16.gmra.mxu3 %v1814_v5  ;;  %v1838_v5 = vor.u32 %v2155_v60, %v1837_v23 }
  0xfd   : > { %1422 = vmatmul.bf16.gmra.mxu0 %v1818_v9  ;;  %v1459_v26 = vmax.f32 %v1381_v17, 0.0  ;;  %v1033_v17 = vadd.f32 %v2581_v8, %v2654_v12  ;;  %v1849_v12 = vld [vmem:[%s2413_s5 + $0x1c0] sm:$0xf] }
  0xfe   : > { %v1205_v24 = vpop.f32.mrf.mxu2 }
  0xff   : > { %v2224_v28 = vpack.c.bf16 %v1459_v26, %v1458_v21  ;;  %v1294_v32 = vpop.f32.mrf.mxu3  ;;  %v1206_v49 = vadd.f32 %v1205_v24, %v1117_v31 }
 0x100   : > { %v1118_v33 = vpop.f32.mrf.mxu1 }
 0x101   : > { %2225 = vst [vmem:[%s2729_s4] sm:$0xff] %v2224_v28   ;;  %v1295_v47 = vadd.f32 %v1294_v32, %v1206_v49  ;;  %v1119_v52 = vadd.f32 %v1118_v33, %v1030_v36  ;;  %v1035_v49 = vadd.f32 %v2581_v8, %v2665_v19  ;;  %v1843_v36 = vld [vmem:[%s2413_s5 + $0x1cc] sm:$0xf0] }
 0x102   : > { %v1385_v34 = vpop.f32.mrf.mxu0 }
 0x103   : > { %v1384_v9 = vadd.f32 %v1383_v13, %v1295_v47  ;;  %v1857_v47 = vld [vmem:[%s2413_s5 + $0x1c8] sm:$0xf] }
 0x105   : > { %v1460_v20 = vmax.f32 %v1384_v9, 0.0  ;;  %v1038_v9 = vadd.f32 %v2581_v8, %v2684_v46  ;;  %v1869_v46 = vld [vmem:[%s2413_s5 + $0x1e8] sm:$0xf] }
 0x106   : > { %v1207_v61 = vpop.f32.mrf.mxu2 }
 0x107   : > { %v1208_v62 = vadd.f32 %v1207_v61, %v1119_v52  ;;  %v1296_v63 = vpop.f32.mrf.mxu3  ;;  %v2160_v52 = vld [vmem:[%s2413_s5 + $0x1d8] sm:$0xf0] }
 0x108   : > { %v1121_v3 = vpop.f32.mrf.mxu1 }
 0x109   : > { %v1297_v56 = vadd.f32 %v1296_v63, %v1208_v62  ;;  %v1122_v24 = vadd.f32 %v1121_v3, %v1033_v17  ;;  %v1850_v62 = vor.u32 %v2159_v37, %v1849_v12  ;;  %v1871_v12 = vld [vmem:[%s2413_s5 + $0x1fc] sm:$0xf0]  ;;  %v1877_v37 = vld [vmem:[%s2413_s5 + $0x1f0] sm:$0xf] }
 0x10a   : > { %v1388_v30 = vpop.f32.mrf.mxu0 }
 0x10b   : > { %v1386_v10 = vadd.f32 %v1385_v34, %v1297_v56  ;;  %1160 = vmatmul.bf16.gmra.mxu1 %v1826_v0  ;;  %1249 = vmatmul.bf16.gmra.mxu2 %v1830_v1  ;;  %v2156_v34 = vld [vmem:[%s2413_s5 + $0x1bc] sm:$0xf]  ;;  %v1854_v0 = vor.u32 %v2157_v38, %v1851_v43  ;;  %v1858_v1 = vor.u32 %v2160_v52, %v1857_v47  ;;  %v2165_v38 = vld [vmem:[%s2413_s5 + $0x200] sm:$0xf0] }
 0x10c   : > { %1338 = vmatmul.bf16.gmra.mxu3 %v1834_v4  ;;  %v1846_v61 = vor.u32 %v2156_v34, %v1843_v36 }
 0x10d   : > { %1427 = vmatmul.bf16.gmra.mxu0 %v1838_v5  ;;  %v1461_v21 = vmax.f32 %v1386_v10, 0.0 }
 0x10e   : > { %v1210_v26 = vpop.f32.mrf.mxu2 }
 0x10f   : > { %v2229_v13 = vpack.c.bf16 %v1461_v21, %v1460_v20  ;;  %v1299_v28 = vpop.f32.mrf.mxu3  ;;  %v1211_v32 = vadd.f32 %v1210_v26, %v1122_v24 }
 0x110   : > { %v1123_v31 = vpop.f32.mrf.mxu1 }
 0x111   : > { %2301 = vst [vmem:[%s2729_s4 + $0x8] sm:$0xff] %v2229_v13   ;;  %v1300_v41 = vadd.f32 %v1299_v28, %v1211_v32  ;;  %v1124_v42 = vadd.f32 %v1123_v31, %v1035_v49  ;;  %v1040_v28 = vadd.f32 %v2581_v8, %v2695_v59  ;;  %v2161_v31 = vld [vmem:[%s2413_s5 + $0x1e4] sm:$0xf]  ;;  %v1863_v32 = vld [vmem:[%s2413_s5 + $0x1f4] sm:$0xf0] }
 0x112   : > { %v1390_v33 = vpop.f32.mrf.mxu0  ;;  %v2162_v49 = vld [vmem:[%s2413_s5 + $0x1ec] sm:$0xf]  ;;  %v1866_v47 = vor.u32 %v2161_v31, %v1863_v32 }
 0x113   : > { %v1389_v3 = vadd.f32 %v1388_v30, %v1300_v41  ;;  %v2170_v31 = vld [vmem:[%s2413_s5 + $0x228] sm:$0xf0] }
 0x115   : > { %v1462_v56 = vmax.f32 %v1389_v3, 0.0 }
 0x116   : > { %v1212_v57 = vpop.f32.mrf.mxu2 }
 0x117   : > { %v1213_v23 = vadd.f32 %v1212_v57, %v1124_v42  ;;  %v1301_v60 = vpop.f32.mrf.mxu3 }
 0x118   : > { %v1126_v63 = vpop.f32.mrf.mxu1 }
 0x119   : > { %v1302_v19 = vadd.f32 %v1301_v60, %v1213_v23  ;;  %v1127_v20 = vadd.f32 %v1126_v63, %v1038_v9  ;;  %v1874_v23 = vor.u32 %v2162_v49, %v1871_v12  ;;  %v1878_v60 = vor.u32 %v2165_v38, %v1877_v37 }
 0x11a   : > { %v1393_v4 = vpop.f32.mrf.mxu0 }
 0x11b   : > { %v1391_v5 = vadd.f32 %v1390_v33, %v1302_v19  ;;  %1165 = vmatmul.bf16.gmra.mxu1 %v1846_v61  ;;  %1254 = vmatmul.bf16.gmra.mxu2 %v1850_v62  ;;  %v2164_v33 = vld [vmem:[%s2413_s5 + $0x1f8] sm:$0xf0] }
 0x11c   : > { %1343 = vmatmul.bf16.gmra.mxu3 %v1854_v0  ;;  %v1870_v52 = vor.u32 %v2164_v33, %v1869_v46 }
 0x11d   : > { %1432 = vmatmul.bf16.gmra.mxu0 %v1858_v1  ;;  %v1463_v10 = vmax.f32 %v1391_v5, 0.0 }
 0x11e   : > { %v1215_v17 = vpop.f32.mrf.mxu2 }
 0x11f   : > { %v2234_v30 = vpack.c.bf16 %v1463_v10, %v1462_v56  ;;  %v1304_v21 = vpop.f32.mrf.mxu3  ;;  %v1216_v13 = vadd.f32 %v1215_v17, %v1127_v20  ;;  %v2166_v10 = vld [vmem:[%s2413_s5 + $0x20c] sm:$0xf]  ;;  %v1883_v17 = vld [vmem:[%s2413_s5 + $0x21c] sm:$0xf0]  ;;  %v2169_v20 = vld [vmem:[%s2413_s5 + $0x220] sm:$0xf0] }
 0x120   : > { %v1128_v26 = vpop.f32.mrf.mxu1 }
 0x121   : > { %2302 = vst [vmem:[%s2729_s4 + $0x10] sm:$0xff] %v2234_v30   ;;  %v1305_v34 = vadd.f32 %v1304_v21, %v1216_v13  ;;  %v1129_v36 = vadd.f32 %v1128_v26, %v1040_v28  ;;  %v1889_v30 = vld [vmem:[%s2413_s5 + $0x210] sm:$0xf]  ;;  %v2167_v21 = vld [vmem:[%s2413_s5 + $0x214] sm:$0xf] }
 0x122   : > { %v1395_v24 = vpop.f32.mrf.mxu0  ;;  %v1897_v28 = vld [vmem:[%s2413_s5 + $0x218] sm:$0xf]  ;;  %v1890_v49 = vor.u32 %v2169_v20, %v1889_v30 }
 0x123   : > { %v1394_v8 = vadd.f32 %v1393_v4, %v1305_v34  ;;  %v1898_v12 = vor.u32 %v2170_v31, %v1897_v28 }
 0x125   : > { %v1464_v63 = vmax.f32 %v1394_v8, 0.0 }
 0x126   : > { %v1217_v41 = vpop.f32.mrf.mxu2 }
 0x127   : > { %v1218_v42 = vadd.f32 %v1217_v41, %v1129_v36  ;;  %v1306_v43 = vpop.f32.mrf.mxu3 }
 0x128   : > { %v1131_v57 = vpop.f32.mrf.mxu1 }
 0x129   : > { %v1307_v59 = vadd.f32 %v1306_v43, %v1218_v42  ;;  %v1132_v19 = vadd.f32 %v1131_v57, %v2592_v22  ;;  %v1886_v22 = vor.u32 %v2166_v10, %v1883_v17 }
 0x12a   : > { %v1398_v61 = vpop.f32.mrf.mxu0 }
 0x12b   : > { %v1396_v62 = vadd.f32 %v1395_v24, %v1307_v59  ;;  %1170 = vmatmul.bf16.gmra.mxu1 %v1866_v47  ;;  %1259 = vmatmul.bf16.gmra.mxu2 %v1870_v52  ;;  %v1891_v24 = vld [vmem:[%s2413_s5 + $0x224] sm:$0xf0] }
 0x12c   : > { %1348 = vmatmul.bf16.gmra.mxu3 %v1874_v23  ;;  %v1894_v36 = vor.u32 %v2167_v21, %v1891_v24 }
 0x12d   : > { %1437 = vmatmul.bf16.gmra.mxu0 %v1878_v60  ;;  %v1465_v0 = vmax.f32 %v1396_v62, 0.0  ;;  %v1903_v62 = vld [vmem:[%s2413_s5 + $0x244] sm:$0xf0] }
 0x12e   : > { %v1220_v1 = vpop.f32.mrf.mxu2 }
 0x12f   : > { %v2239_v3 = vpack.c.bf16 %v1465_v0, %v1464_v63  ;;  %v1309_v4 = vpop.f32.mrf.mxu3  ;;  %v1221_v9 = vadd.f32 %v1220_v1, %v1132_v19  ;;  %v1909_v63 = vld [vmem:[%s2413_s5 + $0x238] sm:$0xf]  ;;  %v2174_v0 = vld [vmem:[%s2413_s5 + $0x248] sm:$0xf0]  ;;  %v2172_v1 = vld [vmem:[%s2413_s5 + $0x23c] sm:$0xf] }
 0x130   : > { %v1133_v5 = vpop.f32.mrf.mxu1  ;;  %v1910_v30 = vor.u32 %v2174_v0, %v1909_v63 }
 0x131   : > { %2303 = vst [vmem:[%s2729_s4 + $0x18] sm:$0xff] %v2239_v3   ;;  %v1310_v26 = vadd.f32 %v1309_v4, %v1221_v9  ;;  %v1134_v13 = vadd.f32 %v1133_v5, %v2603_v29  ;;  %v1911_v4 = vld [vmem:[%s2413_s5 + $0x24c] sm:$0xf0]  ;;  %v1917_v5 = vld [vmem:[%s2413_s5 + $0x240] sm:$0xf] }
 0x132   : > { %v1400_v56 = vpop.f32.mrf.mxu0  ;;  %v2175_v9 = vld [vmem:[%s2413_s5 + $0x250] sm:$0xf0]  ;;  %v1914_v21 = vor.u32 %v2172_v1, %v1911_v4 }
 0x133   : > { %v1399_v37 = vadd.f32 %v1398_v61, %v1310_v26  ;;  %v2171_v61 = vld [vmem:[%s2413_s5 + $0x234] sm:$0xf]  ;;  %v1918_v26 = vor.u32 %v2175_v9, %v1917_v5 }
 0x135   : > { %v1466_v29 = vmax.f32 %v1399_v37, 0.0  ;;  %v2176_v37 = vld [vmem:[%s2413_s5 + $0x25c] sm:$0xf] }
 0x136   : > { %v1222_v32 = vpop.f32.mrf.mxu2 }
 0x137   : > { %v1223_v46 = vadd.f32 %v1222_v32, %v1134_v13  ;;  %v1311_v33 = vpop.f32.mrf.mxu3 }
 0x138   : > { %v1136_v34 = vpop.f32.mrf.mxu1 }
 0x139   : > { %v1312_v38 = vadd.f32 %v1311_v33, %v1223_v46  ;;  %v1137_v57 = vadd.f32 %v1136_v34, %v2622_v48  ;;  %v1906_v48 = vor.u32 %v2171_v61, %v1903_v62 }
 0x13a   : > { %v1403_v41 = vpop.f32.mrf.mxu0 }
 0x13b   : > { %v1401_v42 = vadd.f32 %v1400_v56, %v1312_v38  ;;  %1175 = vmatmul.bf16.gmra.mxu1 %v1886_v22  ;;  %1264 = vmatmul.bf16.gmra.mxu2 %v1890_v49  ;;  %v1923_v38 = vld [vmem:[%s2413_s5 + $0x26c] sm:$0xf0] }
 0x13c   : > { %1353 = vmatmul.bf16.gmra.mxu3 %v1894_v36 }
 0x13d   : > { %1442 = vmatmul.bf16.gmra.mxu0 %v1898_v12  ;;  %v1467_v43 = vmax.f32 %v1401_v42, 0.0  ;;  %v2179_v42 = vld [vmem:[%s2413_s5 + $0x270] sm:$0xf0] }
 0x13e   : > { %v1225_v47 = vpop.f32.mrf.mxu2 }
 0x13f   : > { %v2244_v52 = vpack.c.bf16 %v1467_v43, %v1466_v29  ;;  %v1314_v23 = vpop.f32.mrf.mxu3  ;;  %v1226_v8 = vadd.f32 %v1225_v47, %v1137_v57  ;;  %v2177_v29 = vld [vmem:[%s2413_s5 + $0x264] sm:$0xf]  ;;  %v1937_v57 = vld [vmem:[%s2413_s5 + $0x268] sm:$0xf] }
 0x140   : > { %v1138_v60 = vpop.f32.mrf.mxu1 }
 0x141   : > { %2304 = vst [vmem:[%s2729_s4 + $0x20] sm:$0xff] %v2244_v52   ;;  %v1315_v3 = vadd.f32 %v1314_v23, %v1226_v8  ;;  %v1139_v19 = vadd.f32 %v1138_v60, %v2633_v55  ;;  %v1931_v52 = vld [vmem:[%s2413_s5 + $0x274] sm:$0xf0]  ;;  %v2180_v23 = vld [vmem:[%s2413_s5 + $0x278] sm:$0xf0] }
 0x142   : > { %v1405_v59 = vpop.f32.mrf.mxu0  ;;  %v1934_v63 = vor.u32 %v2177_v29, %v1931_v52  ;;  %v1938_v0 = vor.u32 %v2180_v23, %v1937_v57 }
 0x143   : > { %v1404_v13 = vadd.f32 %v1403_v41, %v1315_v3  ;;  %v1929_v41 = vld [vmem:[%s2413_s5 + $0x260] sm:$0xf] }
 0x144   : > { %v1930_v61 = vor.u32 %v2179_v42, %v1929_v41 }
 0x145   : > { %v1468_v55 = vmax.f32 %v1404_v13, 0.0 }
 0x146   : > { %v1227_v56 = vpop.f32.mrf.mxu2 }
 0x147   : > { %v1228_v10 = vadd.f32 %v1227_v56, %v1139_v19  ;;  %v1316_v17 = vpop.f32.mrf.mxu3 }
 0x148   : > { %v1141_v20 = vpop.f32.mrf.mxu1 }
 0x149   : > { %v1317_v24 = vadd.f32 %v1316_v17, %v1228_v10  ;;  %v1142_v22 = vadd.f32 %v1141_v20, %v2652_v11  ;;  %v1926_v11 = vor.u32 %v2176_v37, %v1923_v38 }
 0x14a   : > { %v1408_v28 = vpop.f32.mrf.mxu0 }
 0x14b   : > { %v1406_v31 = vadd.f32 %v1405_v59, %v1317_v24  ;;  %1180 = vmatmul.bf16.gmra.mxu1 %v1906_v48  ;;  %1269 = vmatmul.bf16.gmra.mxu2 %v1910_v30 }
 0x14c   : > { %1358 = vmatmul.bf16.gmra.mxu3 %v1914_v21 }
 0x14d   : > { %1447 = vmatmul.bf16.gmra.mxu0 %v1918_v26  ;;  %v1469_v32 = vmax.f32 %v1406_v31, 0.0 }
 0x14e   : > { %v1230_v46 = vpop.f32.mrf.mxu2 }
 0x14f   : > { %v2249_v33 = vpack.c.bf16 %v1469_v32, %v1468_v55  ;;  %v1319_v49 = vpop.f32.mrf.mxu3  ;;  %v1231_v36 = vadd.f32 %v1230_v46, %v1142_v22 }
 0x150   : > { %v1143_v34 = vpop.f32.mrf.mxu1 }
 0x151   : > { %2305 = vst [vmem:[%s2729_s4 + $0x28] sm:$0xff] %v2249_v33   ;;  %v1320_v43 = vadd.f32 %v1319_v49, %v1231_v36  ;;  %v1144_v47 = vadd.f32 %v1143_v34, %v2663_v18 }
 0x152   : > { %v1410_v12 = vpop.f32.mrf.mxu0 }
 0x153   : > { %v1409_v1 = vadd.f32 %v1408_v28, %v1320_v43 }
 0x155   : > { %v1470_v18 = vmax.f32 %v1409_v1, 0.0 }
 0x156   : > { %v1232_v60 = vpop.f32.mrf.mxu2 }
 0x157   : > { %v1233_v8 = vadd.f32 %v1232_v60, %v1144_v47  ;;  %v1321_v59 = vpop.f32.mrf.mxu3 }
 0x158   : > { %v1146_v62 = vpop.f32.mrf.mxu1 }
 0x159   : > { %v1322_v3 = vadd.f32 %v1321_v59, %v1233_v8  ;;  %v1147_v10 = vadd.f32 %v1146_v62, %v2682_v45 }
 0x15a   : > { %v1413_v19 = vpop.f32.mrf.mxu0 }
 0x15b   : > { %v1411_v4 = vadd.f32 %v1410_v12, %v1322_v3  ;;  %1185 = vmatmul.bf16.gmra.mxu1 %v1926_v11  ;;  %1274 = vmatmul.bf16.gmra.mxu2 %v1930_v61 }
 0x15c   : > { %1363 = vmatmul.bf16.gmra.mxu3 %v1934_v63 }
 0x15d   : > { %1452 = vmatmul.bf16.gmra.mxu0 %v1938_v0  ;;  %v1471_v5 = vmax.f32 %v1411_v4, 0.0 }
 0x15e   : > { %v1235_v9 = vpop.f32.mrf.mxu2 }
 0x15f   : > { %v2254_v56 = vpack.c.bf16 %v1471_v5, %v1470_v18  ;;  %v1324_v17 = vpop.f32.mrf.mxu3  ;;  %v1236_v30 = vadd.f32 %v1235_v9, %v1147_v10 }
 0x160   : > { %v1148_v48 = vpop.f32.mrf.mxu1 }
 0x161   : > { %2306 = vst [vmem:[%s2729_s4 + $0x30] sm:$0xff] %v2254_v56   ;;  %v1325_v21 = vadd.f32 %v1324_v17, %v1236_v30  ;;  %v1149_v26 = vadd.f32 %v1148_v48, %v2693_v58 }
 0x162   : > { %v1415_v20 = vpop.f32.mrf.mxu0 }
 0x163   : > { %v1414_v55 = vadd.f32 %v1413_v19, %v1325_v21 }
 0x165   : > { %v1472_v22 = vmax.f32 %v1414_v55, 0.0 }
 0x166   : > { %v1237_v13 = vpop.f32.mrf.mxu2 }
 0x167   : > { %v1238_v24 = vadd.f32 %v1237_v13, %v1149_v26  ;;  %v1326_v28 = vpop.f32.mrf.mxu3 }
 0x168   : > { %v1151_v31 = vpop.f32.mrf.mxu1 }
 0x169   : > { %v1327_v32 = vadd.f32 %v1326_v28, %v1238_v24  ;;  %v1152_v36 = vadd.f32 %v1151_v31, %v2597_v25 }
 0x16a   : > { %v1418_v46 = vpop.f32.mrf.mxu0 }
 0x16b   : > { %v1416_v33 = vadd.f32 %v1415_v20, %v1327_v32 }
 0x16d   : > { %v1473_v49 = vmax.f32 %v1416_v33, 0.0 }
 0x16e   : > { %v1240_v45 = vpop.f32.mrf.mxu2 }
 0x16f   : > { %v2259_v34 = vpack.c.bf16 %v1473_v49, %v1472_v22  ;;  %v1329_v12 = vpop.f32.mrf.mxu3  ;;  %v1241_v38 = vadd.f32 %v1240_v45, %v1152_v36 }
 0x170   : > { %v1153_v37 = vpop.f32.mrf.mxu1 }
 0x171   : > { %2307 = vst [vmem:[%s2729_s4 + $0x38] sm:$0xff] %v2259_v34   ;;  %v1330_v41 = vadd.f32 %v1329_v12, %v1241_v38  ;;  %v1154_v42 = vadd.f32 %v1153_v37, %v2616_v40 }
 0x172   : > { %v1420_v58 = vpop.f32.mrf.mxu0 }
 0x173   : > { %v1419_v57 = vadd.f32 %v1418_v46, %v1330_v41 }
 0x175   : > { %v1474_v59 = vmax.f32 %v1419_v57, 0.0 }
 0x176   : > { %v1242_v29 = vpop.f32.mrf.mxu2 }
 0x177   : > { %v1243_v43 = vadd.f32 %v1242_v29, %v1154_v42  ;;  %v1331_v47 = vpop.f32.mrf.mxu3 }
 0x178   : > { %v1156_v52 = vpop.f32.mrf.mxu1 }
 0x179   : > { %v1332_v23 = vadd.f32 %v1331_v47, %v1243_v43  ;;  %v1157_v62 = vadd.f32 %v1156_v52, %v2627_v51 }
 0x17a   : > { %v1423_v60 = vpop.f32.mrf.mxu0 }
 0x17b   : > { %v1421_v8 = vadd.f32 %v1420_v58, %v1332_v23 }
 0x17d   : > { %v1475_v11 = vmax.f32 %v1421_v8, 0.0 }
 0x17e   : > { %v1245_v25 = vpop.f32.mrf.mxu2 }
 0x17f   : > { %v2264_v61 = vpack.c.bf16 %v1475_v11, %v1474_v59  ;;  %v1334_v63 = vpop.f32.mrf.mxu3  ;;  %v1246_v1 = vadd.f32 %v1245_v25, %v1157_v62 }
 0x180   : > { %v1158_v0 = vpop.f32.mrf.mxu1 }
 0x181   : > { %2308 = vst [vmem:[%s2729_s4 + $0x40] sm:$0xff] %v2264_v61   ;;  %v1335_v3 = vadd.f32 %v1334_v63, %v1246_v1  ;;  %v1159_v19 = vadd.f32 %v1158_v0, %v2646_v2 }
 0x182   : > { %v1425_v40 = vpop.f32.mrf.mxu0 }
 0x183   : > { %v1424_v56 = vadd.f32 %v1423_v60, %v1335_v3 }
 0x185   : > { %v1476_v30 = vmax.f32 %v1424_v56, 0.0 }
 0x186   : > { %v1247_v4 = vpop.f32.mrf.mxu2 }
 0x187   : > { %v1248_v18 = vadd.f32 %v1247_v4, %v1159_v19  ;;  %v1336_v5 = vpop.f32.mrf.mxu3 }
 0x188   : > { %v1161_v9 = vpop.f32.mrf.mxu1 }
 0x189   : > { %v1337_v10 = vadd.f32 %v1336_v5, %v1248_v18  ;;  %v1162_v26 = vadd.f32 %v1161_v9, %v2657_v14 }
 0x18a   : > { %v1428_v17 = vpop.f32.mrf.mxu0 }
 0x18b   : > { %v1426_v48 = vadd.f32 %v1425_v40, %v1337_v10 }
 0x18d   : > { %v1477_v20 = vmax.f32 %v1426_v48, 0.0 }
 0x18e   : > { %v1250_v51 = vpop.f32.mrf.mxu2 }
 0x18f   : > { %v2269_v21 = vpack.c.bf16 %v1477_v20, %v1476_v30  ;;  %v1339_v13 = vpop.f32.mrf.mxu3  ;;  %v1251_v28 = vadd.f32 %v1250_v51, %v1162_v26 }
 0x190   : > { %v1163_v24 = vpop.f32.mrf.mxu1 }
 0x191   : > { %2309 = vst [vmem:[%s2729_s4 + $0x48] sm:$0xff] %v2269_v21   ;;  %v1340_v31 = vadd.f32 %v1339_v13, %v1251_v28  ;;  %v1164_v55 = vadd.f32 %v1163_v24, %v2676_v35 }
 0x192   : > { %v1430_v2 = vpop.f32.mrf.mxu0 }
 0x193   : > { %v1429_v49 = vadd.f32 %v1428_v17, %v1340_v31 }
 0x195   : > { %v1478_v12 = vmax.f32 %v1429_v49, 0.0 }
 0x196   : > { %v1252_v32 = vpop.f32.mrf.mxu2 }
 0x197   : > { %v1253_v46 = vadd.f32 %v1252_v32, %v1164_v55  ;;  %v1341_v33 = vpop.f32.mrf.mxu3 }
 0x198   : > { %v1166_v22 = vpop.f32.mrf.mxu1 }
 0x199   : > { %v1342_v45 = vadd.f32 %v1341_v33, %v1253_v46  ;;  %v1167_v58 = vadd.f32 %v1166_v22, %v2687_v50 }
 0x19a   : > { %v1433_v34 = vpop.f32.mrf.mxu0 }
 0x19b   : > { %v1431_v36 = vadd.f32 %v1430_v2, %v1342_v45 }
 0x19d   : > { %v1479_v37 = vmax.f32 %v1431_v36, 0.0 }
 0x19e   : > { %v1255_v14 = vpop.f32.mrf.mxu2 }
 0x19f   : > { %v2274_v38 = vpack.c.bf16 %v1479_v37, %v1478_v12  ;;  %v1344_v41 = vpop.f32.mrf.mxu3  ;;  %v1256_v29 = vadd.f32 %v1255_v14, %v1167_v58 }
 0x1a0   : > { %v1168_v42 = vpop.f32.mrf.mxu1 }
 0x1a1   : > { %2310 = vst [vmem:[%s2729_s4 + $0x50] sm:$0xff] %v2274_v38   ;;  %v1345_v43 = vadd.f32 %v1344_v41, %v1256_v29  ;;  %v1169_v47 = vadd.f32 %v1168_v42, %v2706_v7 }
 0x1a2   : > { %v1435_v35 = vpop.f32.mrf.mxu0 }
 0x1a3   : > { %v1434_v8 = vadd.f32 %v1433_v34, %v1345_v43 }
 0x1a5   : > { %v1480_v61 = vmax.f32 %v1434_v8, 0.0 }
 0x1a6   : > { %v1257_v52 = vpop.f32.mrf.mxu2 }
 0x1a7   : > { %v1258_v57 = vadd.f32 %v1257_v52, %v1169_v47  ;;  %v1346_v23 = vpop.f32.mrf.mxu3 }
 0x1a8   : > { %v1171_v60 = vpop.f32.mrf.mxu1 }
 0x1a9   : > { %v1347_v59 = vadd.f32 %v1346_v23, %v1258_v57  ;;  %v1172_v0 = vadd.f32 %v1171_v60, %v2600_v27 }
 0x1aa   : > { %v1438_v11 = vpop.f32.mrf.mxu0 }
 0x1ab   : > { %v1436_v25 = vadd.f32 %v1435_v35, %v1347_v59 }
 0x1ad   : > { %v1481_v62 = vmax.f32 %v1436_v25, 0.0 }
 0x1ae   : > { %v1260_v50 = vpop.f32.mrf.mxu2 }
 0x1af   : > { %v2279_v63 = vpack.c.bf16 %v1481_v62, %v1480_v61  ;;  %v1349_v1 = vpop.f32.mrf.mxu3  ;;  %v1261_v3 = vadd.f32 %v1260_v50, %v1172_v0 }
 0x1b0   : > { %v1173_v40 = vpop.f32.mrf.mxu1 }
 0x1b1   : > { %2311 = vst [vmem:[%s2729_s4 + $0x58] sm:$0xff] %v2279_v63   ;;  %v1350_v19 = vadd.f32 %v1349_v1, %v1261_v3  ;;  %v1174_v4 = vadd.f32 %v1173_v40, %v2619_v44 }
 0x1b2   : > { %v1440_v7 = vpop.f32.mrf.mxu0 }
 0x1b3   : > { %v1439_v10 = vadd.f32 %v1438_v11, %v1350_v19 }
 0x1b5   : > { %v1482_v20 = vmax.f32 %v1439_v10, 0.0 }
 0x1b6   : > { %v1262_v18 = vpop.f32.mrf.mxu2 }
 0x1b7   : > { %v1263_v5 = vadd.f32 %v1262_v18, %v1174_v4  ;;  %v1351_v9 = vpop.f32.mrf.mxu3 }
 0x1b8   : > { %v1176_v56 = vpop.f32.mrf.mxu1 }
 0x1b9   : > { %v1352_v17 = vadd.f32 %v1351_v9, %v1263_v5  ;;  %v1177_v26 = vadd.f32 %v1176_v56, %v2630_v53 }
 0x1ba   : > { %v1443_v48 = vpop.f32.mrf.mxu0 }
 0x1bb   : > { %v1441_v30 = vadd.f32 %v1440_v7, %v1352_v17 }
 0x1bd   : > { %v1483_v51 = vmax.f32 %v1441_v30, 0.0 }
 0x1be   : > { %v1265_v27 = vpop.f32.mrf.mxu2 }
 0x1bf   : > { %v2284_v21 = vpack.c.bf16 %v1483_v51, %v1482_v20  ;;  %v1354_v13 = vpop.f32.mrf.mxu3  ;;  %v1266_v28 = vadd.f32 %v1265_v27, %v1177_v26 }
 0x1c0   : > { %v1178_v24 = vpop.f32.mrf.mxu1 }
 0x1c1   : > { %2312 = vst [vmem:[%s2729_s4 + $0x60] sm:$0xff] %v2284_v21   ;;  %v1355_v2 = vadd.f32 %v1354_v13, %v1266_v28  ;;  %v1179_v31 = vadd.f32 %v1178_v24, %v2649_v6 }
 0x1c2   : > { %v1445_v44 = vpop.f32.mrf.mxu0 }
 0x1c3   : > { %v1444_v22 = vadd.f32 %v1443_v48, %v1355_v2 }
 0x1c5   : > { %v1484_v36 = vmax.f32 %v1444_v22, 0.0 }
 0x1c6   : > { %v1267_v55 = vpop.f32.mrf.mxu2 }
 0x1c7   : > { %v1268_v32 = vadd.f32 %v1267_v55, %v1179_v31  ;;  %v1356_v46 = vpop.f32.mrf.mxu3 }
 0x1c8   : > { %v1181_v33 = vpop.f32.mrf.mxu1 }
 0x1c9   : > { %v1357_v49 = vadd.f32 %v1356_v46, %v1268_v32  ;;  %v1182_v14 = vadd.f32 %v1181_v33, %v2660_v16 }
 0x1ca   : > { %v1448_v34 = vpop.f32.mrf.mxu0 }
 0x1cb   : > { %v1446_v45 = vadd.f32 %v1445_v44, %v1357_v49 }
 0x1cd   : > { %v1485_v12 = vmax.f32 %v1446_v45, 0.0 }
 0x1ce   : > { %v1270_v53 = vpop.f32.mrf.mxu2 }
 0x1cf   : > { %v2289_v37 = vpack.c.bf16 %v1485_v12, %v1484_v36  ;;  %v1359_v38 = vpop.f32.mrf.mxu3  ;;  %v1271_v41 = vadd.f32 %v1270_v53, %v1182_v14 }
 0x1d0   : > { %v1183_v58 = vpop.f32.mrf.mxu1 }
 0x1d1   : > { %2313 = vst [vmem:[%s2729_s4 + $0x68] sm:$0xff] %v2289_v37   ;;  %v1360_v6 = vadd.f32 %v1359_v38, %v1271_v41  ;;  %v1184_v42 = vadd.f32 %v1183_v58, %v2679_v39 }
 0x1d2   : > { %v1450_v29 = vpop.f32.mrf.mxu0 }
 0x1d3   : > { %v1449_v57 = vadd.f32 %v1448_v34, %v1360_v6 }
 0x1d5   : > { %v1486_v8 = vmax.f32 %v1449_v57, 0.0 }
 0x1d6   : > { %v1272_v35 = vpop.f32.mrf.mxu2 }
 0x1d7   : > { %v1273_v43 = vadd.f32 %v1272_v35, %v1184_v42  ;;  %v1361_v47 = vpop.f32.mrf.mxu3 }
 0x1d8   : > { %v1186_v52 = vpop.f32.mrf.mxu1 }
 0x1d9   : > { %v1362_v23 = vadd.f32 %v1361_v47, %v1273_v43  ;;  %v1187_v25 = vadd.f32 %v1186_v52, %v2690_v54 }
 0x1da   : > { %v1453_v62 = vpop.f32.mrf.mxu0 }
 0x1db   : > { %v1451_v60 = vadd.f32 %v1450_v29, %v1362_v23 }
 0x1dd   : > { %v1487_v59 = vmax.f32 %v1451_v60, 0.0 }
 0x1de   : > { %v1275_v11 = vpop.f32.mrf.mxu2 }
 0x1df   : > { %v2294_v16 = vpack.c.bf16 %v1487_v59, %v1486_v8  ;;  %v1364_v61 = vpop.f32.mrf.mxu3  ;;  %v1276_v39 = vadd.f32 %v1275_v11, %v1187_v25 }
 0x1e0   : > { %v1188_v50 = vpop.f32.mrf.mxu1 }
 0x1e1   : > { %2314 = vst [vmem:[%s2729_s4 + $0x70] sm:$0xff] %v2294_v16   ;;  %v1365_v63 = vadd.f32 %v1364_v61, %v1276_v39  ;;  %v1189_v0 = vadd.f32 %v1188_v50, %v2709_v15 }
 0x1e2   : > { %v1455_v4 = vpop.f32.mrf.mxu0 }
 0x1e3   : > { %v1454_v7 = vadd.f32 %v1453_v62, %v1365_v63 }
 0x1e5   : > { %v1488_v5 = vmax.f32 %v1454_v7, 0.0 }
 0x1e6   : > { %v1277_v1 = vpop.f32.mrf.mxu2 }
 0x1e7   : > { %v1278_v40 = vadd.f32 %v1277_v1, %v1189_v0  ;;  %v1366_v3 = vpop.f32.mrf.mxu3 }
 0x1e9   : > { %v1367_v19 = vadd.f32 %v1366_v3, %v1278_v40 }
 0x1eb   : > { %v1456_v18 = vadd.f32 %v1455_v4, %v1367_v19 }
 0x1ed   : > { %v1489_v9 = vmax.f32 %v1456_v18, 0.0 }
 0x1ef   : > { %v2299_v56 = vpack.c.bf16 %v1489_v9, %v1488_v5 }
 0x1f1   : > { %2315 = vst [vmem:[%s2729_s4 + $0x78] sm:$0xff] %v2299_v56  }
 0x1f2 PF: > { %s13_s12 = sadd.s32 1, %s2356_s12  }
 0x1f3   : > { %p10_p4 = scmp.ge.s32.totalorder %s13_s12, 4  }
 0x1f5   :  { %12 = sbr.rel (!%p10_p4) target bundleno = 1 (0x1), region = 62 }

// kernel: soft_binary.10
= control target key start
LH: loop header
LB: loop body
LE: loop exit
PB: predicated region body
PF: predicated region fallthrough
CT: control target
= control target key end

     0   :  { %s239_s1 = inlined_call_operand.vmem [shape: f32[128,128], index: 1, kind: input, shape index: {}]   ;;  %s240_s2 = inlined_call_operand.vmem [shape: f32[128,128], index: 2, kind: input, shape index: {}]   ;;  %s241_s0 = inlined_call_operand.vmem [shape: f32[2,128], index: 0, kind: input, shape index: {}]   ;;  %s242_s3 = inlined_call_operand.vmem [shape: f32[2,128], index: 3, kind: output, shape index: {}]  }
   0x1   :  { %v30_v0 = vld [vmem:[%s239_s1 + $0x78] sm:$0xff]  ;;  %v29_v1 = vld [vmem:[%s239_s1 + $0x70] sm:$0xff]  ;;  %v28_v2 = vld [vmem:[%s239_s1 + $0x68] sm:$0xff] }
   0x2   :  { %31 = vmatpush.msra.mxu0 %v30_v0  ;;  %v27_v3 = vld [vmem:[%s239_s1 + $0x60] sm:$0xff]  ;;  %v67_v4 = vld [vmem:[%s240_s2 + $0x78] sm:$0xff]  ;;  %v66_v6 = vld [vmem:[%s240_s2 + $0x70] sm:$0xff] }
   0x3   :  { %v26_v5 = vld [vmem:[%s239_s1 + $0x58] sm:$0xff]  ;;  %68 = vmatpush.msra.mxu1 %v67_v4  ;;  %v65_v7 = vld [vmem:[%s240_s2 + $0x68] sm:$0xff]  ;;  %v25_v8 = vld [vmem:[%s239_s1 + $0x50] sm:$0xff] }
   0x4   :  { %32 = vmatpush.msra.mxu0 %v29_v1  ;;  %v64_v9 = vld [vmem:[%s240_s2 + $0x60] sm:$0xff]  ;;  %v24_v10 = vld [vmem:[%s239_s1 + $0x48] sm:$0xff]  ;;  %v63_v11 = vld [vmem:[%s240_s2 + $0x58] sm:$0xff] }
   0x5   :  { %69 = vmatpush.msra.mxu1 %v66_v6  ;;  %v23_v12 = vld [vmem:[%s239_s1 + $0x40] sm:$0xff]  ;;  %v62_v13 = vld [vmem:[%s240_s2 + $0x50] sm:$0xff]  ;;  %v22_v14 = vld [vmem:[%s239_s1 + $0x38] sm:$0xff] }
   0x6   :  { %33 = vmatpush.msra.mxu0 %v28_v2  ;;  %v61_v15 = vld [vmem:[%s240_s2 + $0x48] sm:$0xff]  ;;  %v21_v16 = vld [vmem:[%s239_s1 + $0x30] sm:$0xff]  ;;  %v60_v17 = vld [vmem:[%s240_s2 + $0x40] sm:$0xff] }
   0x7   :  { %70 = vmatpush.msra.mxu1 %v65_v7  ;;  %v20_v18 = vld [vmem:[%s239_s1 + $0x28] sm:$0xff]  ;;  %v59_v19 = vld [vmem:[%s240_s2 + $0x38] sm:$0xff]  ;;  %v19_v20 = vld [vmem:[%s239_s1 + $0x20] sm:$0xff] }
   0x8   :  { %34 = vmatpush.msra.mxu0 %v27_v3  ;;  %v58_v21 = vld [vmem:[%s240_s2 + $0x30] sm:$0xff]  ;;  %v18_v22 = vld [vmem:[%s239_s1 + $0x18] sm:$0xff]  ;;  %v57_v23 = vld [vmem:[%s240_s2 + $0x28] sm:$0xff] }
   0x9   :  { %71 = vmatpush.msra.mxu1 %v64_v9  ;;  %v17_v24 = vld [vmem:[%s239_s1 + $0x10] sm:$0xff]  ;;  %v56_v25 = vld [vmem:[%s240_s2 + $0x20] sm:$0xff]  ;;  %v16_v26 = vld [vmem:[%s239_s1 + $0x8] sm:$0xff] }
   0xa   :  { %35 = vmatpush.msra.mxu0 %v26_v5  ;;  %v55_v27 = vld [vmem:[%s240_s2 + $0x18] sm:$0xff]  ;;  %v15_v28 = vld [vmem:[%s239_s1] sm:$0xff]  ;;  %v54_v30 = vld [vmem:[%s240_s2 + $0x10] sm:$0xff] }
   0xb   :  { %72 = vmatpush.msra.mxu1 %v63_v11  ;;  %v14_v29 = vld [vmem:[%s241_s0] sm:$0x3]  ;;  %v53_v31 = vld [vmem:[%s240_s2 + $0x8] sm:$0xff] }
   0xc   :  { %36 = vmatpush.msra.mxu0 %v25_v8  ;;  %v52_v32 = vld [vmem:[%s240_s2] sm:$0xff] }
   0xd   :  { %73 = vmatpush.msra.mxu1 %v62_v13 }
   0xe   :  { %37 = vmatpush.msra.mxu0 %v24_v10 }
   0xf   :  { %74 = vmatpush.msra.mxu1 %v61_v15 }
  0x10   :  { %38 = vmatpush.msra.mxu0 %v23_v12 }
  0x11   :  { %75 = vmatpush.msra.mxu1 %v60_v17 }
  0x12   :  { %39 = vmatpush.msra.mxu0 %v22_v14 }
  0x13   :  { %76 = vmatpush.msra.mxu1 %v59_v19 }
  0x14   :  { %40 = vmatpush.msra.mxu0 %v21_v16 }
  0x15   :  { %77 = vmatpush.msra.mxu1 %v58_v21 }
  0x16   :  { %41 = vmatpush.msra.mxu0 %v20_v18 }
  0x17   :  { %78 = vmatpush.msra.mxu1 %v57_v23 }
  0x18   :  { %42 = vmatpush.msra.mxu0 %v19_v20 }
  0x19   :  { %79 = vmatpush.msra.mxu1 %v56_v25 }
  0x1a   :  { %43 = vmatpush.msra.mxu0 %v18_v22 }
  0x1b   :  { %80 = vmatpush.msra.mxu1 %v55_v27 }
  0x1c   :  { %44 = vmatpush.msra.mxu0 %v17_v24 }
  0x1d   :  { %81 = vmatpush.msra.mxu1 %v54_v30 }
  0x1e   :  { %45 = vmatpush.msra.mxu0 %v16_v26 }
  0x1f   :  { %82 = vmatpush.msra.mxu1 %v53_v31 }
  0x20   :  { %46 = vmatpush.msra.mxu0 %v15_v28 }
  0x21   :  { %47 = vmatmul.f32.vlgmr.msra.gmra.mxu0 %v14_v29  ;;  %83 = vmatpush.msra.mxu1 %v52_v32 }
  0x9e   :  { %v48_v33 = vpop.f32.mrf.mxu0 }
  0x9f   :  { %v51_v34 = vmax.f32 %v48_v33, 0.0 }
  0xa1   :  { %84 = vmatmul.f32.vlgmr.msra.gmra.mxu1 %v51_v34 }
 0x11e   :  { %v85_v35 = vpop.f32.mrf.mxu1 }
 0x11f   :  { %v112_v36 = vmul.f32 -1.442695, %v85_v35 }
 0x121   :  { %113 = vpow2.f32 %v112_v36 }
 0x127   :  { %v114_v37 = vpop.eup %113 }
 0x128   :  { %v91_v38 = vadd.f32 1.0, %v114_v37 }
 0x12a   :  { %115 = vrcp.f32 %v91_v38  ;;  %v103_v42 = vand.u32 2147483648, %v91_v38  ;;  %v101_v44 = vand.u32 2147483647, %v91_v38  ;;  %vm97_vm1 = vweird.f32 %v91_v38 }
 0x12c   :  { %v104_v46 = vor.u32 1.1754944e-38, %v103_v42  ;;  %vm102_vm3 = vcmp.eq.f32.partialorder %v101_v44, 8.507059e+37 }
 0x130   :  { %v116_v39 = vpop.eup %115 }
 0x131   :  { %v93_v40 = vmul.f32 %v116_v39, %v91_v38  ;;  %vm98_vm0 = vweird.f32 %v116_v39 }
 0x132   :  { %vm99_vm2 = vmor %vm97_vm1, %vm98_vm0 }
 0x133   :  { %v94_v41 = vsub.f32 1.0, %v93_v40 }
 0x135   :  { %v95_v43 = vmul.f32 %v116_v39, %v94_v41 }
 0x137   :  { %v96_v45 = vadd.f32 %v116_v39, %v95_v43 }
 0x139   :  { %v100_v47 = vsel %vm99_vm2, %v116_v39, %v96_v45 }
 0x13a   :  { %v105_v48 = vsel %vm102_vm3, %v104_v46, %v100_v47 }
 0x13b   :  { %107 = vst [vmem:[%s242_s3] sm:$0x3] %v105_v48 }

// kernel: soft_binary.9
= control target key start
LH: loop header
LB: loop body
LE: loop exit
PB: predicated region body
PF: predicated region fallthrough
CT: control target
= control target key end

     0   :  { %vm2448_vm0 = vcmask 1041409   ;;  %s4809_s1 = inlined_call_operand.vmem [shape: bf16[640,128], index: 1, kind: input, shape index: {}]   ;;  %s4810_s0 = inlined_call_operand.vmem [shape: bf16[2,256,640], index: 0, kind: input, shape index: {}]   ;;  %s4811_s2 = inlined_call_operand.vmem [shape: f32[1,128], index: 2, kind: input, shape index: {}]   ;;  %s4812_s3 = inlined_call_operand.vmem [shape: f32[2,128], index: 3, kind: output, shape index: {}]  }
   0x1   :  { %v3435_v0 = vld [vmem:[%s4809_s1 + $0x38] sm:$0xff]  ;;  %v3434_v1 = vld [vmem:[%s4809_s1 + $0x30] sm:$0xff]  ;;  %v3433_v2 = vld [vmem:[%s4809_s1 + $0x28] sm:$0xff] }
   0x2   :  { %3468 = vmatpush.bf16.msra.mxu1 %v3435_v0  ;;  %3469 = vmatpush.bf16.msra.mxu2 %v3435_v0  ;;  %v3432_v3 = vld [vmem:[%s4809_s1 + $0x20] sm:$0xff]  ;;  %v3431_v4 = vld [vmem:[%s4809_s1 + $0x18] sm:$0xff]  ;;  %v3430_v5 = vld [vmem:[%s4809_s1 + $0x10] sm:$0xff] }
   0x3   :  { %3470 = vmatpush.bf16.msra.mxu3 %v3435_v0  ;;  %1363 = vmatpush.bf16.msra.mxu0 %v3435_v0  ;;  %v3429_v6 = vld [vmem:[%s4809_s1 + $0x8] sm:$0xff]  ;;  %v3428_v7 = vld [vmem:[%s4809_s1] sm:$0xff]  ;;  %v3310_v9 = vld [vmem:[%s4810_s0 + $0x150] sm:$0xf0] }
   0x4   :  { %v2630_v8 = vld [vmem:[%s4810_s0 + $0x140] sm:$0xf]  ;;  %v3350_v11 = vld [vmem:[%s4810_s0 + $0x290] sm:$0xf0]  ;;  %v3451_v16 = vld [vmem:[%s4809_s1 + $0xb8] sm:$0xff] }
   0x5   :  { %v2790_v10 = vld [vmem:[%s4810_s0 + $0x280] sm:$0xf]  ;;  %v3390_v13 = vld [vmem:[%s4810_s0 + $0x3d0] sm:$0xf0]  ;;  %v3459_v17 = vld [vmem:[%s4809_s1 + $0xf8] sm:$0xff]  ;;  %v2631_v18 = vor.u32 %v3310_v9, %v2630_v8 }
   0x6   :  { %3471 = vmatpush.bf16.msra.mxu1 %v3434_v1  ;;  %3472 = vmatpush.bf16.msra.mxu2 %v3434_v1  ;;  %v2950_v12 = vld [vmem:[%s4810_s0 + $0x3c0] sm:$0xf]  ;;  %v3270_v15 = vld [vmem:[%s4810_s0 + $0x10] sm:$0xf0]  ;;  %v2791_v19 = vor.u32 %v3350_v11, %v2790_v10  ;;  %v3443_v22 = vld [vmem:[%s4809_s1 + $0x78] sm:$0xff] }
   0x7   :  { %3473 = vmatpush.bf16.msra.mxu3 %v3434_v1  ;;  %1364 = vmatpush.bf16.msra.mxu0 %v3434_v1  ;;  %v2470_v14 = vld [vmem:[%s4810_s0] sm:$0xf]  ;;  %v2951_v20 = vor.u32 %v3390_v13, %v2950_v12  ;;  %v3467_v23 = vld [vmem:[%s4809_s1 + $0x138] sm:$0xff]  ;;  %v3450_v24 = vld [vmem:[%s4809_s1 + $0xb0] sm:$0xff] }
   0x8   :  { %v2471_v21 = vor.u32 %v3270_v15, %v2470_v14  ;;  %v3458_v25 = vld [vmem:[%s4809_s1 + $0xf0] sm:$0xff]  ;;  %v3449_v28 = vld [vmem:[%s4809_s1 + $0xa8] sm:$0xff]  ;;  %v3315_v33 = vld [vmem:[%s4810_s0 + $0x178] sm:$0xf0] }
   0x9   :  { %v3442_v26 = vld [vmem:[%s4809_s1 + $0x70] sm:$0xff]  ;;  %v3457_v29 = vld [vmem:[%s4809_s1 + $0xe8] sm:$0xff]  ;;  %v3355_v35 = vld [vmem:[%s4810_s0 + $0x2b8] sm:$0xf0] }
   0xa   :  { %3474 = vmatpush.bf16.msra.mxu1 %v3433_v2  ;;  %3475 = vmatpush.bf16.msra.mxu2 %v3433_v2  ;;  %v3466_v27 = vld [vmem:[%s4809_s1 + $0x130] sm:$0xff]  ;;  %v3441_v30 = vld [vmem:[%s4809_s1 + $0x68] sm:$0xff]  ;;  %v3395_v37 = vld [vmem:[%s4810_s0 + $0x3f8] sm:$0xf0] }
   0xb   :  { %3476 = vmatpush.bf16.msra.mxu3 %v3433_v2  ;;  %1365 = vmatpush.bf16.msra.mxu0 %v3433_v2  ;;  %v3465_v31 = vld [vmem:[%s4809_s1 + $0x128] sm:$0xff]  ;;  %v3275_v39 = vld [vmem:[%s4810_s0 + $0x38] sm:$0xf0]  ;;  %v3448_v44 = vld [vmem:[%s4809_s1 + $0xa0] sm:$0xff] }
   0xc   :  { %v2650_v32 = vld [vmem:[%s4810_s0 + $0x168] sm:$0xf]  ;;  %v3456_v45 = vld [vmem:[%s4809_s1 + $0xe0] sm:$0xff]  ;;  %v2670_v48 = vld [vmem:[%s4810_s0 + $0x190] sm:$0xf] }
   0xd   :  { %v2810_v34 = vld [vmem:[%s4810_s0 + $0x2a8] sm:$0xf]  ;;  %v2651_v40 = vor.u32 %v3315_v33, %v2650_v32  ;;  %v3440_v46 = vld [vmem:[%s4809_s1 + $0x60] sm:$0xff]  ;;  %v2830_v50 = vld [vmem:[%s4810_s0 + $0x2d0] sm:$0xf] }
   0xe   :  { %3477 = vmatpush.bf16.msra.mxu1 %v3432_v3  ;;  %3478 = vmatpush.bf16.msra.mxu2 %v3432_v3  ;;  %v2970_v36 = vld [vmem:[%s4810_s0 + $0x3e8] sm:$0xf]  ;;  %v2811_v41 = vor.u32 %v3355_v35, %v2810_v34  ;;  %v3464_v47 = vld [vmem:[%s4809_s1 + $0x120] sm:$0xff]  ;;  %v2990_v52 = vld [vmem:[%s4810_s0 + $0x410] sm:$0xf] }
   0xf   :  { %3479 = vmatpush.bf16.msra.mxu3 %v3432_v3  ;;  %1366 = vmatpush.bf16.msra.mxu0 %v3432_v3  ;;  %v2490_v38 = vld [vmem:[%s4810_s0 + $0x28] sm:$0xf]  ;;  %v2971_v42 = vor.u32 %v3395_v37, %v2970_v36  ;;  %v3320_v49 = vld [vmem:[%s4810_s0 + $0x1a0] sm:$0xf0]  ;;  %v2510_v54 = vld [vmem:[%s4810_s0 + $0x50] sm:$0xf] }
  0x10   :  { %v2491_v43 = vor.u32 %v3275_v39, %v2490_v38  ;;  %v3360_v51 = vld [vmem:[%s4810_s0 + $0x2e0] sm:$0xf0]  ;;  %v2671_v56 = vor.u32 %v3320_v49, %v2670_v48  ;;  %v3447_v60 = vld [vmem:[%s4809_s1 + $0x98] sm:$0xff]  ;;  %v3325_v1 = vld [vmem:[%s4810_s0 + $0x1c8] sm:$0xf0] }
  0x11   :  { %v3400_v53 = vld [vmem:[%s4810_s0 + $0x420] sm:$0xf0]  ;;  %v2831_v57 = vor.u32 %v3360_v51, %v2830_v50  ;;  %v3455_v61 = vld [vmem:[%s4809_s1 + $0xd8] sm:$0xff]  ;;  %v3365_v3 = vld [vmem:[%s4810_s0 + $0x308] sm:$0xf0] }
  0x12   :  { %3480 = vmatpush.bf16.msra.mxu1 %v3431_v4  ;;  %3481 = vmatpush.bf16.msra.mxu2 %v3431_v4  ;;  %v3280_v55 = vld [vmem:[%s4810_s0 + $0x60] sm:$0xf0]  ;;  %v2991_v58 = vor.u32 %v3400_v53, %v2990_v52  ;;  %v3439_v62 = vld [vmem:[%s4809_s1 + $0x58] sm:$0xff]  ;;  %v3446_v12 = vld [vmem:[%s4809_s1 + $0x90] sm:$0xff] }
  0x13   :  { %3482 = vmatpush.bf16.msra.mxu3 %v3431_v4  ;;  %1367 = vmatpush.bf16.msra.mxu0 %v3431_v4  ;;  %v2511_v59 = vor.u32 %v3280_v55, %v2510_v54  ;;  %v3463_v63 = vld [vmem:[%s4809_s1 + $0x118] sm:$0xff]  ;;  %v3454_v13 = vld [vmem:[%s4809_s1 + $0xd0] sm:$0xff]  ;;  %v2730_v32 = vld [vmem:[%s4810_s0 + $0x208] sm:$0xf] }
  0x14   :  { %v2690_v0 = vld [vmem:[%s4810_s0 + $0x1b8] sm:$0xf]  ;;  %v3438_v14 = vld [vmem:[%s4809_s1 + $0x50] sm:$0xff]  ;;  %v3335_v33 = vld [vmem:[%s4810_s0 + $0x218] sm:$0xf0] }
  0x15   :  { %v2850_v2 = vld [vmem:[%s4810_s0 + $0x2f8] sm:$0xf]  ;;  %v2691_v8 = vor.u32 %v3325_v1, %v2690_v0  ;;  %v3462_v15 = vld [vmem:[%s4809_s1 + $0x110] sm:$0xff]  ;;  %v2890_v34 = vld [vmem:[%s4810_s0 + $0x348] sm:$0xf] }
  0x16   :  { %3483 = vmatpush.bf16.msra.mxu1 %v3430_v5  ;;  %3484 = vmatpush.bf16.msra.mxu2 %v3430_v5  ;;  %v3010_v4 = vld [vmem:[%s4810_s0 + $0x438] sm:$0xf]  ;;  %v2851_v9 = vor.u32 %v3365_v3, %v2850_v2  ;;  %v3375_v35 = vld [vmem:[%s4810_s0 + $0x358] sm:$0xf0]  ;;  %v3050_v36 = vld [vmem:[%s4810_s0 + $0x488] sm:$0xf] }
  0x17   :  { %3485 = vmatpush.bf16.msra.mxu3 %v3430_v5  ;;  %1368 = vmatpush.bf16.msra.mxu0 %v3430_v5  ;;  %v3405_v5 = vld [vmem:[%s4810_s0 + $0x448] sm:$0xf0]  ;;  %v3415_v37 = vld [vmem:[%s4810_s0 + $0x498] sm:$0xf0]  ;;  %v2570_v38 = vld [vmem:[%s4810_s0 + $0xc8] sm:$0xf] }
  0x18   :  { %v3011_v10 = vor.u32 %v3405_v5, %v3010_v4  ;;  %v3295_v39 = vld [vmem:[%s4810_s0 + $0xd8] sm:$0xf0]  ;;  %v2750_v48 = vld [vmem:[%s4810_s0 + $0x230] sm:$0xf]  ;;  %v3340_v49 = vld [vmem:[%s4810_s0 + $0x240] sm:$0xf0] }
  0x19   :  { %v2910_v50 = vld [vmem:[%s4810_s0 + $0x370] sm:$0xf]  ;;  %v3380_v51 = vld [vmem:[%s4810_s0 + $0x380] sm:$0xf0]  ;;  %v3090_v0 = vld [vmem:[%s4810_s0 + $0x4d8] sm:$0xf] }
  0x1a   :  { %3486 = vmatpush.bf16.msra.mxu1 %v3429_v6  ;;  %3487 = vmatpush.bf16.msra.mxu2 %v3429_v6  ;;  %v3070_v52 = vld [vmem:[%s4810_s0 + $0x4b0] sm:$0xf]  ;;  %v3420_v53 = vld [vmem:[%s4810_s0 + $0x4c0] sm:$0xf0]  ;;  %v3425_v1 = vld [vmem:[%s4810_s0 + $0x4e8] sm:$0xf0] }
  0x1b   :  { %3488 = vmatpush.bf16.msra.mxu3 %v3429_v6  ;;  %1369 = vmatpush.bf16.msra.mxu0 %v3429_v6  ;;  %v2530_v6 = vld [vmem:[%s4810_s0 + $0x78] sm:$0xf]  ;;  %v2590_v54 = vld [vmem:[%s4810_s0 + $0xf0] sm:$0xf]  ;;  %v3300_v55 = vld [vmem:[%s4810_s0 + $0x100] sm:$0xf0] }
  0x1c   :  { %v2610_v2 = vld [vmem:[%s4810_s0 + $0x118] sm:$0xf]  ;;  %v3305_v3 = vld [vmem:[%s4810_s0 + $0x128] sm:$0xf0] }
  0x1e   :  { %3489 = vmatpush.bf16.msra.mxu1 %v3428_v7  ;;  %3490 = vmatpush.bf16.msra.mxu2 %v3428_v7 }
  0x1f   :  { %3491 = vmatpush.bf16.msra.mxu3 %v3428_v7  ;;  %1370 = vmatpush.bf16.msra.mxu0 %v3428_v7  ;;  %v3285_v7 = vld [vmem:[%s4810_s0 + $0x88] sm:$0xf0] }
  0x20   :  { %v2531_v11 = vor.u32 %v3285_v7, %v2530_v6  ;;  %v3091_v6 = vor.u32 %v3425_v1, %v3090_v0  ;;  %v2611_v7 = vor.u32 %v3305_v3, %v2610_v2  ;;  %v3283_v2 = vld [vmem:[%s4810_s0 + $0x7c] sm:$0xf]  ;;  %v2532_v3 = vld [vmem:[%s4810_s0 + $0x8c] sm:$0xf0] }
  0x21   :  { %1411 = vmatmul.bf16.vlgmr.msra.gmra.mxu1 %v2631_v18  ;;  %1451 = vmatmul.bf16.vlgmr.msra.gmra.mxu2 %v2791_v19  ;;  %v2870_v18 = vld [vmem:[%s4810_s0 + $0x320] sm:$0xf]  ;;  %v3370_v19 = vld [vmem:[%s4810_s0 + $0x330] sm:$0xf0] }
  0x22   :  { %1701 = vmatpush.bf16.msrb.mxu2 %v3451_v16  ;;  %1491 = vmatmul.bf16.vlgmr.msra.gmra.mxu3 %v2951_v20  ;;  %v2710_v16 = vld [vmem:[%s4810_s0 + $0x1e0] sm:$0xf] }
  0x23   :  { %1870 = vmatpush.bf16.msrb.mxu3 %v3459_v17  ;;  %1371 = vmatmul.bf16.vlgmr.msra.gmra.mxu0 %v2471_v21  ;;  %v3330_v17 = vld [vmem:[%s4810_s0 + $0x1f0] sm:$0xf0]  ;;  %v3030_v20 = vld [vmem:[%s4810_s0 + $0x460] sm:$0xf] }
  0x24   :  { %1532 = vmatpush.bf16.msrb.mxu1 %v3443_v22  ;;  %2039 = vmatpush.bf16.msrb.mxu0 %v3467_v23  ;;  %v3410_v21 = vld [vmem:[%s4810_s0 + $0x470] sm:$0xf0]  ;;  %v2550_v22 = vld [vmem:[%s4810_s0 + $0xa0] sm:$0xf] }
  0x25   :  { %v3290_v23 = vld [vmem:[%s4810_s0 + $0xb0] sm:$0xf0] }
  0x26   :  { %1702 = vmatpush.bf16.msrb.mxu2 %v3450_v24  ;;  %v2711_v24 = vor.u32 %v3330_v17, %v2710_v16 }
  0x27   :  { %1871 = vmatpush.bf16.msrb.mxu3 %v3458_v25  ;;  %v2871_v25 = vor.u32 %v3370_v19, %v2870_v18 }
  0x28   :  { %1533 = vmatpush.bf16.msrb.mxu1 %v3442_v26  ;;  %2040 = vmatpush.bf16.msrb.mxu0 %v3466_v27  ;;  %v3031_v26 = vor.u32 %v3410_v21, %v3030_v20  ;;  %v2551_v27 = vor.u32 %v3290_v23, %v2550_v22 }
  0x2a   :  { %1703 = vmatpush.bf16.msrb.mxu2 %v3449_v28  ;;  %v3445_v28 = vld [vmem:[%s4809_s1 + $0x88] sm:$0xff] }
  0x2b   :  { %1872 = vmatpush.bf16.msrb.mxu3 %v3457_v29  ;;  %v3453_v29 = vld [vmem:[%s4809_s1 + $0xc8] sm:$0xff] }
  0x2c   :  { %1534 = vmatpush.bf16.msrb.mxu1 %v3441_v30  ;;  %2041 = vmatpush.bf16.msrb.mxu0 %v3465_v31  ;;  %v3437_v30 = vld [vmem:[%s4809_s1 + $0x48] sm:$0xff] }
  0x2d   :  { %v3461_v31 = vld [vmem:[%s4809_s1 + $0x108] sm:$0xff] }
  0x2e   :  { %1704 = vmatpush.bf16.msrb.mxu2 %v3448_v44  ;;  %v3444_v44 = vld [vmem:[%s4809_s1 + $0x80] sm:$0xff] }
  0x2f   :  { %1873 = vmatpush.bf16.msrb.mxu3 %v3456_v45  ;;  %v3452_v45 = vld [vmem:[%s4809_s1 + $0xc0] sm:$0xff] }
  0x30   :  { %1535 = vmatpush.bf16.msrb.mxu1 %v3440_v46  ;;  %2042 = vmatpush.bf16.msrb.mxu0 %v3464_v47  ;;  %v3436_v46 = vld [vmem:[%s4809_s1 + $0x40] sm:$0xff] }
  0x31   :  { %1416 = vmatmul.bf16.gmra.mxu1 %v2651_v40  ;;  %1456 = vmatmul.bf16.gmra.mxu2 %v2811_v41  ;;  %v2731_v40 = vor.u32 %v3335_v33, %v2730_v32  ;;  %v2891_v41 = vor.u32 %v3375_v35, %v2890_v34  ;;  %v3460_v47 = vld [vmem:[%s4809_s1 + $0x100] sm:$0xff]  ;;  %v2506_v32 = vld [vmem:[%s4810_s0 + $0x38] sm:$0xf]  ;;  %v3277_v33 = vld [vmem:[%s4810_s0 + $0x48] sm:$0xf0] }
  0x32   :  { %1496 = vmatmul.bf16.gmra.mxu3 %v2971_v42  ;;  %1705 = vmatpush.bf16.msrb.mxu2 %v3447_v60  ;;  %v3051_v42 = vor.u32 %v3415_v37, %v3050_v36  ;;  %v2770_v60 = vld [vmem:[%s4810_s0 + $0x258] sm:$0xf] }
  0x33   :  { %1376 = vmatmul.bf16.gmra.mxu0 %v2491_v43  ;;  %1874 = vmatpush.bf16.msrb.mxu3 %v3455_v61  ;;  %v2571_v43 = vor.u32 %v3295_v39, %v2570_v38  ;;  %v3345_v61 = vld [vmem:[%s4810_s0 + $0x268] sm:$0xf0] }
  0x34   :  { %1536 = vmatpush.bf16.msrb.mxu1 %v3439_v62  ;;  %2043 = vmatpush.bf16.msrb.mxu0 %v3463_v63  ;;  %v2930_v62 = vld [vmem:[%s4810_s0 + $0x398] sm:$0xf]  ;;  %v3385_v63 = vld [vmem:[%s4810_s0 + $0x3a8] sm:$0xf0]  ;;  %v2771_v4 = vor.u32 %v3345_v61, %v2770_v60 }
  0x35   :  { %v2931_v5 = vor.u32 %v3385_v63, %v2930_v62 }
  0x36   :  { %1706 = vmatpush.bf16.msrb.mxu2 %v3446_v12  ;;  %v3269_v12 = vld [vmem:[%s4810_s0 + $0xc] sm:$0xf] }
  0x37   :  { %1875 = vmatpush.bf16.msrb.mxu3 %v3454_v13  ;;  %v2480_v13 = vld [vmem:[%s4810_s0 + $0x1c] sm:$0xf0] }
  0x38   :  { %1537 = vmatpush.bf16.msrb.mxu1 %v3438_v14  ;;  %2044 = vmatpush.bf16.msrb.mxu0 %v3462_v15  ;;  %v2486_v14 = vld [vmem:[%s4810_s0 + $0x10] sm:$0xf]  ;;  %v3272_v15 = vld [vmem:[%s4810_s0 + $0x20] sm:$0xf0]  ;;  %v2483_v19 = vor.u32 %v3269_v12, %v2480_v13  ;;  %v2535_v12 = vor.u32 %v3283_v2, %v2532_v3 }
  0x39   :  { %v2487_v20 = vor.u32 %v3272_v15, %v2486_v14  ;;  %v2578_v2 = vld [vmem:[%s4810_s0 + $0xd0] sm:$0xf]  ;;  %v3296_v3 = vld [vmem:[%s4810_s0 + $0xe0] sm:$0xf0] }
  0x3a   :  { %1707 = vmatpush.bf16.msrb.mxu2 %v3445_v28  ;;  %v2498_v28 = vld [vmem:[%s4810_s0 + $0x30] sm:$0xf] }
  0x3b   :  { %1876 = vmatpush.bf16.msrb.mxu3 %v3453_v29  ;;  %v3276_v29 = vld [vmem:[%s4810_s0 + $0x40] sm:$0xf0] }
  0x3c   :  { %1538 = vmatpush.bf16.msrb.mxu1 %v3437_v30  ;;  %2045 = vmatpush.bf16.msrb.mxu0 %v3461_v31  ;;  %v3274_v30 = vld [vmem:[%s4810_s0 + $0x34] sm:$0xf]  ;;  %v2500_v31 = vld [vmem:[%s4810_s0 + $0x44] sm:$0xf0]  ;;  %v2499_v37 = vor.u32 %v3276_v29, %v2498_v28  ;;  %v3288_v28 = vld [vmem:[%s4810_s0 + $0xa4] sm:$0xf] }
  0x3d   :  { %v2503_v39 = vor.u32 %v3274_v30, %v2500_v31  ;;  %v2552_v29 = vld [vmem:[%s4810_s0 + $0xb4] sm:$0xf0]  ;;  %v2558_v30 = vld [vmem:[%s4810_s0 + $0xa8] sm:$0xf]  ;;  %v3291_v31 = vld [vmem:[%s4810_s0 + $0xb8] sm:$0xf0] }
  0x3e   :  { %1708 = vmatpush.bf16.msrb.mxu2 %v3444_v44 }
  0x3f   :  { %1877 = vmatpush.bf16.msrb.mxu3 %v3452_v45 }
  0x40   :  { %1539 = vmatpush.bf16.msrb.mxu1 %v3436_v46  ;;  %2046 = vmatpush.bf16.msrb.mxu0 %v3460_v47  ;;  %v3278_v46 = vld [vmem:[%s4810_s0 + $0x54] sm:$0xf]  ;;  %v2512_v47 = vld [vmem:[%s4810_s0 + $0x64] sm:$0xf0] }
  0x41   :  { %1421 = vmatmul.bf16.gmra.mxu1 %v2671_v56  ;;  %1461 = vmatmul.bf16.gmra.mxu2 %v2831_v57  ;;  %v2751_v56 = vor.u32 %v3340_v49, %v2750_v48  ;;  %v2911_v57 = vor.u32 %v3380_v51, %v2910_v50  ;;  %v2518_v48 = vld [vmem:[%s4810_s0 + $0x58] sm:$0xf]  ;;  %v3281_v49 = vld [vmem:[%s4810_s0 + $0x68] sm:$0xf0]  ;;  %v3279_v50 = vld [vmem:[%s4810_s0 + $0x5c] sm:$0xf] }
  0x42   :  { %1501 = vmatmul.bf16.gmra.mxu3 %v2991_v58  ;;  %v3071_v58 = vor.u32 %v3420_v53, %v3070_v52  ;;  %v2520_v51 = vld [vmem:[%s4810_s0 + $0x6c] sm:$0xf0]  ;;  %v2526_v52 = vld [vmem:[%s4810_s0 + $0x60] sm:$0xf]  ;;  %v3282_v53 = vld [vmem:[%s4810_s0 + $0x70] sm:$0xf0] }
  0x43   :  { %1381 = vmatmul.bf16.gmra.mxu0 %v2511_v59  ;;  %v2591_v59 = vor.u32 %v3300_v55, %v2590_v54  ;;  %v2527_v60 = vor.u32 %v3282_v53, %v2526_v52 }
  0x51   :  { %1426 = vmatmul.bf16.gmra.mxu1 %v2691_v8  ;;  %1466 = vmatmul.bf16.gmra.mxu2 %v2851_v9  ;;  %v3268_v8 = vld [vmem:[%s4810_s0 + $0x4] sm:$0xf]  ;;  %v2472_v9 = vld [vmem:[%s4810_s0 + $0x14] sm:$0xf0] }
  0x52   :  { %1506 = vmatmul.bf16.gmra.mxu3 %v3011_v10  ;;  %v2478_v10 = vld [vmem:[%s4810_s0 + $0x8] sm:$0xf]  ;;  %v2475_v16 = vor.u32 %v3268_v8, %v2472_v9  ;;  %v3287_v9 = vld [vmem:[%s4810_s0 + $0x98] sm:$0xf0] }
  0x53   :  { %1386 = vmatmul.bf16.gmra.mxu0 %v2531_v11  ;;  %v3271_v11 = vld [vmem:[%s4810_s0 + $0x18] sm:$0xf0]  ;;  %v2546_v8 = vld [vmem:[%s4810_s0 + $0x88] sm:$0xf] }
  0x54   :  { %v2479_v17 = vor.u32 %v3271_v11, %v2478_v10 }
  0x61   :  { %1431 = vmatmul.bf16.gmra.mxu1 %v2711_v24  ;;  %1471 = vmatmul.bf16.gmra.mxu2 %v2871_v25 }
  0x62   :  { %1511 = vmatmul.bf16.gmra.mxu3 %v3031_v26  ;;  %v3273_v26 = vld [vmem:[%s4810_s0 + $0x2c] sm:$0xf] }
  0x63   :  { %1391 = vmatmul.bf16.gmra.mxu0 %v2551_v27  ;;  %v2492_v27 = vld [vmem:[%s4810_s0 + $0x3c] sm:$0xf0] }
  0x64   :  { %v2495_v36 = vor.u32 %v3273_v26, %v2492_v27 }
  0x71   :  { %1436 = vmatmul.bf16.gmra.mxu1 %v2731_v40  ;;  %1476 = vmatmul.bf16.gmra.mxu2 %v2891_v41  ;;  %v2507_v40 = vor.u32 %v3277_v33, %v2506_v32  ;;  %v3289_v32 = vld [vmem:[%s4810_s0 + $0xac] sm:$0xf]  ;;  %v2560_v33 = vld [vmem:[%s4810_s0 + $0xbc] sm:$0xf0] }
  0x72   :  { %1516 = vmatmul.bf16.gmra.mxu3 %v3051_v42 }
  0x73   :  { %1396 = vmatmul.bf16.gmra.mxu0 %v2571_v43 }
  0x81   :  { %1441 = vmatmul.bf16.gmra.mxu1 %v2751_v56  ;;  %1481 = vmatmul.bf16.gmra.mxu2 %v2911_v57  ;;  %v2515_v56 = vor.u32 %v3278_v46, %v2512_v47  ;;  %v2519_v57 = vor.u32 %v3281_v49, %v2518_v48  ;;  %v2555_v46 = vor.u32 %v3288_v28, %v2552_v29 }
  0x82   :  { %1521 = vmatmul.bf16.gmra.mxu3 %v3071_v58  ;;  %v2559_v47 = vor.u32 %v3291_v31, %v2558_v30  ;;  %v2563_v49 = vor.u32 %v3289_v32, %v2560_v33 }
  0x83   :  { %1401 = vmatmul.bf16.gmra.mxu0 %v2591_v59  ;;  %v2523_v59 = vor.u32 %v3279_v50, %v2520_v51 }
  0x91   :  { %1446 = vmatmul.bf16.gmra.mxu1 %v2771_v4  ;;  %1486 = vmatmul.bf16.gmra.mxu2 %v2931_v5  ;;  %v2538_v4 = vld [vmem:[%s4810_s0 + $0x80] sm:$0xf]  ;;  %v3286_v5 = vld [vmem:[%s4810_s0 + $0x90] sm:$0xf0] }
  0x92   :  { %1526 = vmatmul.bf16.gmra.mxu3 %v3091_v6  ;;  %v3284_v6 = vld [vmem:[%s4810_s0 + $0x84] sm:$0xf]  ;;  %v2539_v13 = vor.u32 %v3286_v5, %v2538_v4  ;;  %v3294_v4 = vld [vmem:[%s4810_s0 + $0xd4] sm:$0xf]  ;;  %v2580_v5 = vld [vmem:[%s4810_s0 + $0xe4] sm:$0xf0] }
  0x93   :  { %1406 = vmatmul.bf16.gmra.mxu0 %v2611_v7  ;;  %v2540_v7 = vld [vmem:[%s4810_s0 + $0x94] sm:$0xf0] }
  0x94   :  { %v2543_v15 = vor.u32 %v3284_v6, %v2540_v7  ;;  %v2586_v6 = vld [vmem:[%s4810_s0 + $0xd8] sm:$0xf]  ;;  %v3297_v7 = vld [vmem:[%s4810_s0 + $0xe8] sm:$0xf0] }
  0x95   :  { %v2587_v28 = vor.u32 %v3297_v7, %v2586_v6 }
  0x9e   :  { %v3851_v18 = vpop.f32.mrf.mxu1 }
  0xa0   :  { %v3853_v21 = vpop.f32.mrf.mxu0 }
  0xa1   :  { %1540 = vmatmul.bf16.vlgmr.msrb.gmra.mxu1 %v2475_v16  ;;  %1709 = vmatmul.bf16.vlgmr.msrb.gmra.mxu2 %v2479_v17  ;;  %v2547_v16 = vor.u32 %v3287_v9, %v2546_v8 }
  0xa2   :  { %1878 = vmatmul.bf16.vlgmr.msrb.gmra.mxu3 %v2483_v19 }
  0xa3   :  { %2047 = vmatmul.bf16.vlgmr.msrb.gmra.mxu0 %v2487_v20 }
  0xa4   :  { %v3855_v22 = vpop.f32.mrf.mxu2 }
  0xa5   :  { %v3857_v23 = vpop.f32.mrf.mxu3 }
  0xa6   :  { %4813 = vst [vmem:[#allocation2_spill] sm:$0xff] %v3857_v23  ;;  %v3859_v24 = vpop.f32.mrf.mxu1 }
  0xa8   :  { %v3861_v25 = vpop.f32.mrf.mxu0 }
  0xac   :  { %v3887_v34 = vpop.f32.mrf.mxu2 }
  0xad   :  { %v3889_v35 = vpop.f32.mrf.mxu3 }
  0xae   :  { %4814 = vst [vmem:[#allocation3_spill] sm:$0xff] %v3889_v35  ;;  %v3891_v38 = vpop.f32.mrf.mxu1 }
  0xb0   :  { %v3893_v41 = vpop.f32.mrf.mxu0 }
  0xb1   :  { %1545 = vmatmul.bf16.gmra.mxu1 %v2495_v36  ;;  %1714 = vmatmul.bf16.gmra.mxu2 %v2499_v37  ;;  %v2566_v36 = vld [vmem:[%s4810_s0 + $0xb0] sm:$0xf]  ;;  %v3292_v37 = vld [vmem:[%s4810_s0 + $0xc0] sm:$0xf0] }
  0xb2   :  { %1883 = vmatmul.bf16.gmra.mxu3 %v2503_v39  ;;  %v2567_v50 = vor.u32 %v3292_v37, %v2566_v36  ;;  %v3298_v36 = vld [vmem:[%s4810_s0 + $0xf4] sm:$0xf]  ;;  %v2592_v37 = vld [vmem:[%s4810_s0 + $0x104] sm:$0xf0] }
  0xb3   :  { %2052 = vmatmul.bf16.gmra.mxu0 %v2507_v40 }
  0xb4   :  { %v3895_v42 = vpop.f32.mrf.mxu2 }
  0xb5   :  { %v3897_v43 = vpop.f32.mrf.mxu3 }
  0xb6   :  { %4815 = vst [vmem:[#allocation4_spill] sm:$0xff] %v3897_v43  ;;  %v3899_v44 = vpop.f32.mrf.mxu1 }
  0xb8   :  { %v3901_v45 = vpop.f32.mrf.mxu0 }
  0xbc   :  { %v3927_v54 = vpop.f32.mrf.mxu2 }
  0xbd   :  { %v3929_v55 = vpop.f32.mrf.mxu3 }
  0xbe   :  { %4816 = vst [vmem:[#allocation5_spill] sm:$0xff] %v3929_v55  ;;  %v3931_v58 = vpop.f32.mrf.mxu1 }
  0xc0   :  { %v3933_v61 = vpop.f32.mrf.mxu0 }
  0xc1   :  { %1550 = vmatmul.bf16.gmra.mxu1 %v2515_v56  ;;  %1719 = vmatmul.bf16.gmra.mxu2 %v2519_v57 }
  0xc2   :  { %1888 = vmatmul.bf16.gmra.mxu3 %v2523_v59  ;;  %v3293_v59 = vld [vmem:[%s4810_s0 + $0xcc] sm:$0xf] }
  0xc3   :  { %2057 = vmatmul.bf16.gmra.mxu0 %v2527_v60  ;;  %v2572_v60 = vld [vmem:[%s4810_s0 + $0xdc] sm:$0xf0] }
  0xc4   :  { %v3935_v62 = vpop.f32.mrf.mxu2 }
  0xc5   :  { %v3937_v63 = vpop.f32.mrf.mxu3 }
  0xc6   :  { %4817 = vst [vmem:[#allocation6_spill] sm:$0xff] %v3937_v63  ;;  %v3939_v0 = vpop.f32.mrf.mxu1 }
  0xc8   :  { %v3941_v1 = vpop.f32.mrf.mxu0 }
  0xcc   :  { %v3967_v10 = vpop.f32.mrf.mxu2 }
  0xcd   :  { %v3969_v11 = vpop.f32.mrf.mxu3 }
  0xce   :  { %4818 = vst [vmem:[#allocation7_spill] sm:$0xff] %v3969_v11  ;;  %v3971_v14 = vpop.f32.mrf.mxu1 }
  0xd0   :  { %v3973_v17 = vpop.f32.mrf.mxu0 }
  0xd1   :  { %1555 = vmatmul.bf16.gmra.mxu1 %v2535_v12  ;;  %1724 = vmatmul.bf16.gmra.mxu2 %v2539_v13  ;;  %v2575_v12 = vor.u32 %v3293_v59, %v2572_v60  ;;  %v2579_v13 = vor.u32 %v3296_v3, %v2578_v2  ;;  %v2606_v59 = vld [vmem:[%s4810_s0 + $0x100] sm:$0xf]  ;;  %v3302_v60 = vld [vmem:[%s4810_s0 + $0x110] sm:$0xf0] }
  0xd2   :  { %1893 = vmatmul.bf16.gmra.mxu3 %v2543_v15 }
  0xd3   :  { %2062 = vmatmul.bf16.gmra.mxu0 %v2547_v16  ;;  %v2583_v16 = vor.u32 %v3294_v4, %v2580_v5  ;;  %v2595_v4 = vor.u32 %v3298_v36, %v2592_v37  ;;  %v3303_v36 = vld [vmem:[%s4810_s0 + $0x11c] sm:$0xf]  ;;  %v2612_v37 = vld [vmem:[%s4810_s0 + $0x12c] sm:$0xf0] }
  0xd4   :  { %v3975_v19 = vpop.f32.mrf.mxu2 }
  0xd5   :  { %v3977_v20 = vpop.f32.mrf.mxu3 }
  0xd6   :  { %4819 = vst [vmem:[#allocation8_spill] sm:$0xff] %v3977_v20  ;;  %v3979_v26 = vpop.f32.mrf.mxu1 }
  0xd8   :  { %v3981_v27 = vpop.f32.mrf.mxu0 }
  0xdc   :  { %v4007_v39 = vpop.f32.mrf.mxu2 }
  0xdd   :  { %4820 = vst [vmem:[#allocation9_spill] sm:$0xff] %v4007_v39  ;;  %v4009_v40 = vpop.f32.mrf.mxu3 }
  0xde   :  { %4821 = vst [vmem:[#allocation10_spill] sm:$0xff] %v4009_v40  ;;  %v4011_v48 = vpop.f32.mrf.mxu1 }
  0xe0   :  { %v4013_v51 = vpop.f32.mrf.mxu0 }
  0xe1   :  { %1560 = vmatmul.bf16.gmra.mxu1 %v2555_v46  ;;  %1729 = vmatmul.bf16.gmra.mxu2 %v2559_v47  ;;  %v2598_v46 = vld [vmem:[%s4810_s0 + $0xf8] sm:$0xf]  ;;  %v3301_v47 = vld [vmem:[%s4810_s0 + $0x108] sm:$0xf0] }
  0xe2   :  { %1898 = vmatmul.bf16.gmra.mxu3 %v2563_v49  ;;  %v3299_v49 = vld [vmem:[%s4810_s0 + $0xfc] sm:$0xf]  ;;  %v2599_v5 = vor.u32 %v3301_v47, %v2598_v46  ;;  %v2618_v46 = vld [vmem:[%s4810_s0 + $0x120] sm:$0xf]  ;;  %v3306_v47 = vld [vmem:[%s4810_s0 + $0x130] sm:$0xf0] }
  0xe3   :  { %2067 = vmatmul.bf16.gmra.mxu0 %v2567_v50  ;;  %v2600_v50 = vld [vmem:[%s4810_s0 + $0x10c] sm:$0xf0] }
  0xe4   :  { %v4015_v52 = vpop.f32.mrf.mxu2  ;;  %v2603_v7 = vor.u32 %v3299_v49, %v2600_v50  ;;  %v3304_v49 = vld [vmem:[%s4810_s0 + $0x124] sm:$0xf]  ;;  %v2620_v50 = vld [vmem:[%s4810_s0 + $0x134] sm:$0xf0] }
  0xe5   :  { %4822 = vst [vmem:[#allocation11_spill] sm:$0xff] %v4015_v52  ;;  %v4017_v53 = vpop.f32.mrf.mxu3 }
  0xe6   :  { %4823 = vst [vmem:[#allocation12_spill] sm:$0xff] %v4017_v53  ;;  %v4019_v56 = vpop.f32.mrf.mxu1 }
  0xe8   :  { %v4021_v57 = vpop.f32.mrf.mxu0 }
  0xec   :  { %v4047_v8 = vpop.f32.mrf.mxu2 }
  0xed   :  { %4824 = vst [vmem:[#allocation13_spill] sm:$0xff] %v4047_v8  ;;  %v4049_v9 = vpop.f32.mrf.mxu3 }
  0xee   :  { %4825 = vst [vmem:[#allocation14_spill] sm:$0xff] %v4049_v9  ;;  %v4051_v15 = vpop.f32.mrf.mxu1 }
  0xf0   :  { %v4053_v29 = vpop.f32.mrf.mxu0 }
  0xf1   :  { %1565 = vmatmul.bf16.gmra.mxu1 %v2575_v12  ;;  %1734 = vmatmul.bf16.gmra.mxu2 %v2579_v13  ;;  %v2607_v12 = vor.u32 %v3302_v60, %v2606_v59  ;;  %v2626_v59 = vld [vmem:[%s4810_s0 + $0x128] sm:$0xf]  ;;  %v3307_v60 = vld [vmem:[%s4810_s0 + $0x138] sm:$0xf0] }
  0xf2   :  { %1903 = vmatmul.bf16.gmra.mxu3 %v2583_v16  ;;  %v2627_v53 = vor.u32 %v3307_v60, %v2626_v59 }
  0xf3   :  { %2072 = vmatmul.bf16.gmra.mxu0 %v2587_v28 }
  0xf4   :  { %v4055_v30 = vpop.f32.mrf.mxu2 }
  0xf5   :  { %4826 = vst [vmem:[#allocation15_spill] sm:$0xff] %v4055_v30  ;;  %v4057_v31 = vpop.f32.mrf.mxu3 }
  0xf6   :  { %4827 = vst [vmem:[#allocation16_spill] sm:$0xff] %v4057_v31  ;;  %v4059_v32 = vpop.f32.mrf.mxu1 }
  0xf8   :  { %v4061_v33 = vpop.f32.mrf.mxu0 }
  0xfc   :  { %v4087_v2 = vpop.f32.mrf.mxu2 }
  0xfd   :  { %4828 = vst [vmem:[#allocation17_spill] sm:$0xff] %v4087_v2  ;;  %v4089_v3 = vpop.f32.mrf.mxu3 }
  0xfe   :  { %4829 = vst [vmem:[#allocation18_spill] sm:$0xff] %v4089_v3  ;;  %v4091_v6 = vpop.f32.mrf.mxu1  ;;  %v2623_v3 = vor.u32 %v3304_v49, %v2620_v50  ;;  %v2646_v49 = vld [vmem:[%s4810_s0 + $0x150] sm:$0xf]  ;;  %v3312_v50 = vld [vmem:[%s4810_s0 + $0x160] sm:$0xf0] }
  0xff   :  { %v2647_v43 = vor.u32 %v3312_v50, %v2646_v49 }
 0x100   :  { %v4093_v13 = vpop.f32.mrf.mxu0 }
 0x101   :  { %1570 = vmatmul.bf16.gmra.mxu1 %v2595_v4  ;;  %1739 = vmatmul.bf16.gmra.mxu2 %v2599_v5 }
 0x102   :  { %1908 = vmatmul.bf16.gmra.mxu3 %v2603_v7  ;;  %v2615_v7 = vor.u32 %v3303_v36, %v2612_v37  ;;  %v3308_v36 = vld [vmem:[%s4810_s0 + $0x144] sm:$0xf]  ;;  %v2632_v37 = vld [vmem:[%s4810_s0 + $0x154] sm:$0xf0] }
 0x103   :  { %2077 = vmatmul.bf16.gmra.mxu0 %v2607_v12  ;;  %v2619_v12 = vor.u32 %v3306_v47, %v2618_v46  ;;  %v3309_v46 = vld [vmem:[%s4810_s0 + $0x14c] sm:$0xf]  ;;  %v2640_v47 = vld [vmem:[%s4810_s0 + $0x15c] sm:$0xf0] }
 0x104   :  { %v4095_v16 = vpop.f32.mrf.mxu2 }
 0x105   :  { %4830 = vst [vmem:[#allocation19_spill] sm:$0xff] %v4095_v16  ;;  %v4097_v28 = vpop.f32.mrf.mxu3 }
 0x106   :  { %4831 = vst [vmem:[#allocation20_spill] sm:$0xff] %v4097_v28  ;;  %v4099_v31 = vpop.f32.mrf.mxu1 }
 0x108   :  { %v4101_v9 = vpop.f32.mrf.mxu0 }
 0x10c   :  { %v4127_v4 = vpop.f32.mrf.mxu2 }
 0x10d   :  { %4832 = vst [vmem:[#allocation21_spill] sm:$0xff] %v4127_v4  ;;  %v4129_v5 = vpop.f32.mrf.mxu3 }
 0x10e   :  { %4833 = vst [vmem:[#allocation22_spill] sm:$0xff] %v4129_v5  ;;  %v4131_v28 = vpop.f32.mrf.mxu1  ;;  %v2643_v5 = vor.u32 %v3309_v46, %v2640_v47 }
 0x110   :  { %v4133_v40 = vpop.f32.mrf.mxu0 }
 0x111   :  { %1575 = vmatmul.bf16.gmra.mxu1 %v2615_v7  ;;  %1744 = vmatmul.bf16.gmra.mxu2 %v2619_v12  ;;  %v2635_v7 = vor.u32 %v3308_v36, %v2632_v37  ;;  %v3313_v36 = vld [vmem:[%s4810_s0 + $0x16c] sm:$0xf]  ;;  %v2652_v37 = vld [vmem:[%s4810_s0 + $0x17c] sm:$0xf0] }
 0x112   :  { %1913 = vmatmul.bf16.gmra.mxu3 %v2623_v3  ;;  %v3311_v3 = vld [vmem:[%s4810_s0 + $0x158] sm:$0xf0] }
 0x113   :  { %2082 = vmatmul.bf16.gmra.mxu0 %v2627_v53  ;;  %v2638_v53 = vld [vmem:[%s4810_s0 + $0x148] sm:$0xf] }
 0x114   :  { %v4135_v20 = vpop.f32.mrf.mxu2  ;;  %v2639_v12 = vor.u32 %v3311_v3, %v2638_v53  ;;  %v2655_v53 = vor.u32 %v3313_v36, %v2652_v37 }
 0x115   :  { %4834 = vst [vmem:[#allocation23_spill] sm:$0xff] %v4135_v20  ;;  %v4137_v11 = vpop.f32.mrf.mxu3 }
 0x116   :  { %4835 = vst [vmem:[#allocation24_spill] sm:$0xff] %v4137_v11  ;;  %v4139_v63 = vpop.f32.mrf.mxu1 }
 0x118   :  { %v4141_v55 = vpop.f32.mrf.mxu0 }
 0x11c   :  { %v4167_v59 = vpop.f32.mrf.mxu2 }
 0x11d   :  { %4836 = vst [vmem:[#allocation25_spill] sm:$0xff] %v4167_v59  ;;  %v4169_v60 = vpop.f32.mrf.mxu3 }
 0x11e   :  { %4837 = vst [vmem:[#allocation26_spill] sm:$0xff] %v4169_v60  ;;  %v1541_v11 = vpop.f32.mrf.mxu1 }
 0x11f   :  { %v1542_v23 = vadd.f32 %v1541_v11, %v3853_v21  ;;  %v3316_v21 = vld [vmem:[%s4810_s0 + $0x180] sm:$0xf0]  ;;  %v2660_v11 = vld [vmem:[%s4810_s0 + $0x184] sm:$0xf0] }
 0x120   :  { %v2048_v35 = vpop.f32.mrf.mxu0 }
 0x121   :  { %1580 = vmatmul.bf16.gmra.mxu1 %v2635_v7  ;;  %1749 = vmatmul.bf16.gmra.mxu2 %v2639_v12 }
 0x122   :  { %1918 = vmatmul.bf16.gmra.mxu3 %v2643_v5 }
 0x123   :  { %2087 = vmatmul.bf16.gmra.mxu0 %v2647_v43  ;;  %v2658_v43 = vld [vmem:[%s4810_s0 + $0x170] sm:$0xf] }
 0x124   :  { %v1710_v20 = vpop.f32.mrf.mxu2  ;;  %v2659_v3 = vor.u32 %v3316_v21, %v2658_v43  ;;  %v3318_v43 = vld [vmem:[%s4810_s0 + $0x194] sm:$0xf]  ;;  %v2680_v21 = vld [vmem:[%s4810_s0 + $0x1ac] sm:$0xf0] }
 0x125   :  { %v1711_v4 = vadd.f32 %v1710_v20, %v1542_v23  ;;  %v1879_v16 = vpop.f32.mrf.mxu3  ;;  %v3314_v23 = vld [vmem:[%s4810_s0 + $0x174] sm:$0xf]  ;;  %v2666_v20 = vld [vmem:[%s4810_s0 + $0x178] sm:$0xf] }
 0x126   :  { %v1543_v2 = vpop.f32.mrf.mxu1  ;;  %v2663_v47 = vor.u32 %v3314_v23, %v2660_v11  ;;  %v2686_v23 = vld [vmem:[%s4810_s0 + $0x1a0] sm:$0xf]  ;;  %v3322_v11 = vld [vmem:[%s4810_s0 + $0x1b0] sm:$0xf0] }
 0x127   :  { %v1880_v30 = vadd.f32 %v1879_v16, %v1711_v4 }
 0x128   :  { %v2050_v59 = vpop.f32.mrf.mxu0 }
 0x129   :  { %v2049_v8 = vadd.f32 %v2048_v35, %v1880_v30  ;;  %v1544_v35 = vadd.f32 %v1543_v2, %v3861_v25  ;;  %v3317_v30 = vld [vmem:[%s4810_s0 + $0x188] sm:$0xf0] }
 0x12a   :  { %v2667_v25 = vor.u32 %v3317_v30, %v2666_v20 }
 0x12c   :  { %v1712_v16 = vpop.f32.mrf.mxu2 }
 0x12d   :  { %v1713_v4 = vadd.f32 %v1712_v16, %v1544_v35  ;;  %v1881_v5 = vpop.f32.mrf.mxu3 }
 0x12e   :  { %v1546_v46 = vpop.f32.mrf.mxu1 }
 0x12f   :  { %v1882_v2 = vadd.f32 %v1881_v5, %v1713_v4  ;;  %v1547_v12 = vadd.f32 %v1546_v46, %v3893_v41  ;;  %v3321_v41 = vld [vmem:[%s4810_s0 + $0x1a8] sm:$0xf0] }
 0x130   :  { %v2053_v49 = vpop.f32.mrf.mxu0 }
 0x131   :  { %v2051_v50 = vadd.f32 %v2050_v59, %v1882_v2  ;;  %1585 = vmatmul.bf16.gmra.mxu1 %v2655_v53  ;;  %1754 = vmatmul.bf16.gmra.mxu2 %v2659_v3  ;;  %v2672_v59 = vld [vmem:[%s4810_s0 + $0x1a4] sm:$0xf0] }
 0x132   :  { %1923 = vmatmul.bf16.gmra.mxu3 %v2663_v47  ;;  %v2675_v5 = vor.u32 %v3318_v43, %v2672_v59 }
 0x133   :  { %2092 = vmatmul.bf16.gmra.mxu0 %v2667_v25  ;;  %v2372_v7 = vadd.f32 %v2051_v50, %v2049_v8  ;;  %v2678_v8 = vld [vmem:[%s4810_s0 + $0x198] sm:$0xf] }
 0x134   :  { %v1715_v60 = vpop.f32.mrf.mxu2  ;;  %v2679_v53 = vor.u32 %v3321_v41, %v2678_v8  ;;  %v3323_v8 = vld [vmem:[%s4810_s0 + $0x1bc] sm:$0xf]  ;;  %v2698_v41 = vld [vmem:[%s4810_s0 + $0x1c0] sm:$0xf] }
 0x135   :  { %v1716_v52 = vadd.f32 %v1715_v60, %v1547_v12  ;;  %v1884_v39 = vpop.f32.mrf.mxu3 }
 0x136   :  { %v1548_v35 = vpop.f32.mrf.mxu1 }
 0x137   :  { %v1885_v16 = vadd.f32 %v1884_v39, %v1716_v52  ;;  %v3319_v39 = vld [vmem:[%s4810_s0 + $0x19c] sm:$0xf]  ;;  %v1549_v60 = vadd.f32 %v1548_v35, %v3901_v45  ;;  %v2687_v45 = vor.u32 %v3322_v11, %v2686_v23  ;;  %v2706_v23 = vld [vmem:[%s4810_s0 + $0x1c8] sm:$0xf] }
 0x138   :  { %v2055_v36 = vpop.f32.mrf.mxu0  ;;  %v2683_v46 = vor.u32 %v3319_v39, %v2680_v21  ;;  %v3324_v39 = vld [vmem:[%s4810_s0 + $0x1c4] sm:$0xf]  ;;  %v2700_v21 = vld [vmem:[%s4810_s0 + $0x1d4] sm:$0xf0]  ;;  %v3327_v11 = vld [vmem:[%s4810_s0 + $0x1d8] sm:$0xf0] }
 0x139   :  { %v2054_v37 = vadd.f32 %v2053_v49, %v1885_v16 }
 0x13b   :  { %v2373_v52 = vadd.f32 %v2372_v7, %v2054_v37 }
 0x13c   :  { %v1717_v20 = vpop.f32.mrf.mxu2 }
 0x13d   :  { %v1718_v30 = vadd.f32 %v1717_v20, %v1549_v60  ;;  %v1886_v4 = vpop.f32.mrf.mxu3 }
 0x13e   :  { %v1551_v3 = vpop.f32.mrf.mxu1 }
 0x13f   :  { %v1887_v47 = vadd.f32 %v1886_v4, %v1718_v30  ;;  %v1552_v50 = vadd.f32 %v1551_v3, %v3933_v61  ;;  %v3326_v61 = vld [vmem:[%s4810_s0 + $0x1d0] sm:$0xf0] }
 0x140   :  { %v2058_v25 = vpop.f32.mrf.mxu0 }
 0x141   :  { %v2056_v2 = vadd.f32 %v2055_v36, %v1887_v47  ;;  %1590 = vmatmul.bf16.gmra.mxu1 %v2675_v5  ;;  %1759 = vmatmul.bf16.gmra.mxu2 %v2679_v53  ;;  %v2692_v36 = vld [vmem:[%s4810_s0 + $0x1cc] sm:$0xf0]  ;;  %v2699_v53 = vor.u32 %v3326_v61, %v2698_v41  ;;  %v3329_v41 = vld [vmem:[%s4810_s0 + $0x1ec] sm:$0xf] }
 0x142   :  { %1928 = vmatmul.bf16.gmra.mxu3 %v2683_v46  ;;  %v2695_v5 = vor.u32 %v3323_v8, %v2692_v36  ;;  %v2703_v46 = vor.u32 %v3324_v39, %v2700_v21  ;;  %v3328_v8 = vld [vmem:[%s4810_s0 + $0x1e4] sm:$0xf]  ;;  %v2718_v36 = vld [vmem:[%s4810_s0 + $0x1e8] sm:$0xf] }
 0x143   :  { %2097 = vmatmul.bf16.gmra.mxu0 %v2687_v45  ;;  %v2374_v49 = vadd.f32 %v2373_v52, %v2056_v2  ;;  %v3332_v21 = vld [vmem:[%s4810_s0 + $0x200] sm:$0xf0] }
 0x144   :  { %v1720_v7 = vpop.f32.mrf.mxu2 }
 0x145   :  { %v1721_v12 = vadd.f32 %v1720_v7, %v1552_v50  ;;  %v1889_v35 = vpop.f32.mrf.mxu3 }
 0x146   :  { %v1553_v16 = vpop.f32.mrf.mxu1 }
 0x147   :  { %v1890_v37 = vadd.f32 %v1889_v35, %v1721_v12  ;;  %v1554_v60 = vadd.f32 %v1553_v16, %v3941_v1  ;;  %v2707_v1 = vor.u32 %v3327_v11, %v2706_v23 }
 0x148   :  { %v2060_v43 = vpop.f32.mrf.mxu0 }
 0x149   :  { %v2059_v59 = vadd.f32 %v2058_v25, %v1890_v37 }
 0x14b   :  { %v2375_v52 = vadd.f32 %v2374_v49, %v2059_v59 }
 0x14c   :  { %v1722_v20 = vpop.f32.mrf.mxu2 }
 0x14d   :  { %v1723_v30 = vadd.f32 %v1722_v20, %v1554_v60  ;;  %v1891_v4 = vpop.f32.mrf.mxu3  ;;  %v2726_v60 = vld [vmem:[%s4810_s0 + $0x1f0] sm:$0xf] }
 0x14e   :  { %v1556_v3 = vpop.f32.mrf.mxu1 }
 0x14f   :  { %v1892_v45 = vadd.f32 %v1891_v4, %v1723_v30  ;;  %v1557_v49 = vadd.f32 %v1556_v3, %v3973_v17  ;;  %v3331_v17 = vld [vmem:[%s4810_s0 + $0x1f8] sm:$0xf0] }
 0x150   :  { %v2063_v47 = vpop.f32.mrf.mxu0  ;;  %v2719_v4 = vor.u32 %v3331_v17, %v2718_v36  ;;  %v2740_v17 = vld [vmem:[%s4810_s0 + $0x224] sm:$0xf0] }
 0x151   :  { %v2061_v25 = vadd.f32 %v2060_v43, %v1892_v45  ;;  %1595 = vmatmul.bf16.gmra.mxu1 %v2695_v5  ;;  %1764 = vmatmul.bf16.gmra.mxu2 %v2699_v53  ;;  %v2712_v43 = vld [vmem:[%s4810_s0 + $0x1f4] sm:$0xf0] }
 0x152   :  { %1933 = vmatmul.bf16.gmra.mxu3 %v2703_v46  ;;  %v2715_v30 = vor.u32 %v3328_v8, %v2712_v43  ;;  %v3334_v8 = vld [vmem:[%s4810_s0 + $0x214] sm:$0xf] }
 0x153   :  { %2102 = vmatmul.bf16.gmra.mxu0 %v2707_v1  ;;  %v2376_v2 = vadd.f32 %v2375_v52, %v2061_v25  ;;  %v2720_v52 = vld [vmem:[%s4810_s0 + $0x1fc] sm:$0xf0] }
 0x154   :  { %v1725_v50 = vpop.f32.mrf.mxu2  ;;  %v2723_v53 = vor.u32 %v3329_v41, %v2720_v52  ;;  %v2746_v41 = vld [vmem:[%s4810_s0 + $0x218] sm:$0xf] }
 0x155   :  { %v1726_v7 = vadd.f32 %v1725_v50, %v1557_v49  ;;  %v1894_v12 = vpop.f32.mrf.mxu3 }
 0x156   :  { %v1558_v35 = vpop.f32.mrf.mxu1 }
 0x157   :  { %v1895_v16 = vadd.f32 %v1894_v12, %v1726_v7  ;;  %v1559_v39 = vadd.f32 %v1558_v35, %v3981_v27  ;;  %v2727_v27 = vor.u32 %v3332_v21, %v2726_v60 }
 0x158   :  { %v2065_v37 = vpop.f32.mrf.mxu0 }
 0x159   :  { %v2064_v59 = vadd.f32 %v2063_v47, %v1895_v16  ;;  %v3333_v16 = vld [vmem:[%s4810_s0 + $0x20c] sm:$0xf] }
 0x15b   :  { %v2377_v61 = vadd.f32 %v2376_v2, %v2064_v59  ;;  %v2738_v59 = vld [vmem:[%s4810_s0 + $0x210] sm:$0xf] }
 0x15c   :  { %v1727_v23 = vpop.f32.mrf.mxu2 }
 0x15d   :  { %v1728_v11 = vadd.f32 %v1727_v23, %v1559_v39  ;;  %v1896_v20 = vpop.f32.mrf.mxu3 }
 0x15e   :  { %v1561_v5 = vpop.f32.mrf.mxu1 }
 0x15f   :  { %v1897_v3 = vadd.f32 %v1896_v20, %v1728_v11  ;;  %v1562_v47 = vadd.f32 %v1561_v5, %v4013_v51  ;;  %v3336_v51 = vld [vmem:[%s4810_s0 + $0x220] sm:$0xf0]  ;;  %v2743_v20 = vor.u32 %v3334_v8, %v2740_v17 }
 0x160   :  { %v2068_v46 = vpop.f32.mrf.mxu0  ;;  %v2739_v23 = vor.u32 %v3336_v51, %v2738_v59  ;;  %v2766_v59 = vld [vmem:[%s4810_s0 + $0x240] sm:$0xf]  ;;  %v3342_v51 = vld [vmem:[%s4810_s0 + $0x250] sm:$0xf0] }
 0x161   :  { %v2066_v1 = vadd.f32 %v2065_v37, %v1897_v3  ;;  %1600 = vmatmul.bf16.gmra.mxu1 %v2715_v30  ;;  %1769 = vmatmul.bf16.gmra.mxu2 %v2719_v4  ;;  %v2732_v37 = vld [vmem:[%s4810_s0 + $0x21c] sm:$0xf0] }
 0x162   :  { %1938 = vmatmul.bf16.gmra.mxu3 %v2723_v53  ;;  %v2735_v21 = vor.u32 %v3333_v16, %v2732_v37  ;;  %v2760_v37 = vld [vmem:[%s4810_s0 + $0x24c] sm:$0xf0] }
 0x163   :  { %2107 = vmatmul.bf16.gmra.mxu0 %v2727_v27  ;;  %v2378_v45 = vadd.f32 %v2377_v61, %v2066_v1  ;;  %v3337_v61 = vld [vmem:[%s4810_s0 + $0x228] sm:$0xf0] }
 0x164   :  { %v1730_v25 = vpop.f32.mrf.mxu2 }
 0x165   :  { %v1731_v2 = vadd.f32 %v1730_v25, %v1562_v47  ;;  %v1899_v49 = vpop.f32.mrf.mxu3 }
 0x166   :  { %v1563_v50 = vpop.f32.mrf.mxu1 }
 0x167   :  { %v1900_v7 = vadd.f32 %v1899_v49, %v1731_v2  ;;  %v1564_v36 = vadd.f32 %v1563_v50, %v4021_v57  ;;  %v2747_v57 = vor.u32 %v3337_v61, %v2746_v41  ;;  %v3338_v49 = vld [vmem:[%s4810_s0 + $0x234] sm:$0xf]  ;;  %v2752_v50 = vld [vmem:[%s4810_s0 + $0x244] sm:$0xf0] }
 0x168   :  { %v2070_v12 = vpop.f32.mrf.mxu0  ;;  %v2755_v17 = vor.u32 %v3338_v49, %v2752_v50  ;;  %v2786_v49 = vld [vmem:[%s4810_s0 + $0x268] sm:$0xf]  ;;  %v3347_v50 = vld [vmem:[%s4810_s0 + $0x278] sm:$0xf0] }
 0x169   :  { %v2069_v35 = vadd.f32 %v2068_v46, %v1900_v7  ;;  %v2758_v7 = vld [vmem:[%s4810_s0 + $0x238] sm:$0xf] }
 0x16b   :  { %v2379_v43 = vadd.f32 %v2378_v45, %v2069_v35 }
 0x16c   :  { %v1732_v39 = vpop.f32.mrf.mxu2 }
 0x16d   :  { %v1733_v52 = vadd.f32 %v1732_v39, %v1564_v36  ;;  %v1901_v60 = vpop.f32.mrf.mxu3 }
 0x16e   :  { %v1566_v11 = vpop.f32.mrf.mxu1 }
 0x16f   :  { %v1902_v30 = vadd.f32 %v1901_v60, %v1733_v52  ;;  %v1567_v27 = vadd.f32 %v1566_v11, %v4053_v29  ;;  %v3341_v29 = vld [vmem:[%s4810_s0 + $0x248] sm:$0xf0] }
 0x170   :  { %v2073_v4 = vpop.f32.mrf.mxu0  ;;  %v2759_v41 = vor.u32 %v3341_v29, %v2758_v7 }
 0x171   :  { %v2071_v5 = vadd.f32 %v2070_v12, %v1902_v30  ;;  %1605 = vmatmul.bf16.gmra.mxu1 %v2735_v21  ;;  %1774 = vmatmul.bf16.gmra.mxu2 %v2739_v23  ;;  %v3339_v12 = vld [vmem:[%s4810_s0 + $0x23c] sm:$0xf] }
 0x172   :  { %1943 = vmatmul.bf16.gmra.mxu3 %v2743_v20  ;;  %v2763_v39 = vor.u32 %v3339_v12, %v2760_v37 }
 0x173   :  { %2112 = vmatmul.bf16.gmra.mxu0 %v2747_v57  ;;  %v2380_v53 = vadd.f32 %v2379_v43, %v2071_v5 }
 0x174   :  { %v1735_v3 = vpop.f32.mrf.mxu2 }
 0x175   :  { %v1736_v46 = vadd.f32 %v1735_v3, %v1567_v27  ;;  %v1904_v1 = vpop.f32.mrf.mxu3  ;;  %v3343_v3 = vld [vmem:[%s4810_s0 + $0x25c] sm:$0xf] }
 0x176   :  { %v1568_v45 = vpop.f32.mrf.mxu1 }
 0x177   :  { %v1905_v47 = vadd.f32 %v1904_v1, %v1736_v46  ;;  %v1569_v16 = vadd.f32 %v1568_v45, %v4061_v33  ;;  %v2767_v33 = vor.u32 %v3342_v51, %v2766_v59  ;;  %v2772_v46 = vld [vmem:[%s4810_s0 + $0x26c] sm:$0xf0]  ;;  %v2778_v1 = vld [vmem:[%s4810_s0 + $0x260] sm:$0xf]  ;;  %v3344_v45 = vld [vmem:[%s4810_s0 + $0x264] sm:$0xf] }
 0x178   :  { %v2075_v25 = vpop.f32.mrf.mxu0 }
 0x179   :  { %v2074_v2 = vadd.f32 %v2073_v4, %v1905_v47 }
 0x17b   :  { %v2381_v35 = vadd.f32 %v2380_v53, %v2074_v2  ;;  %v2780_v2 = vld [vmem:[%s4810_s0 + $0x274] sm:$0xf0] }
 0x17c   :  { %v1737_v8 = vpop.f32.mrf.mxu2  ;;  %v2783_v59 = vor.u32 %v3344_v45, %v2780_v2 }
 0x17d   :  { %v1738_v43 = vadd.f32 %v1737_v8, %v1569_v16  ;;  %v1906_v36 = vpop.f32.mrf.mxu3 }
 0x17e   :  { %v1571_v61 = vpop.f32.mrf.mxu1 }
 0x17f   :  { %v1907_v52 = vadd.f32 %v1906_v36, %v1738_v43  ;;  %v1572_v11 = vadd.f32 %v1571_v61, %v4093_v13  ;;  %v3346_v13 = vld [vmem:[%s4810_s0 + $0x270] sm:$0xf0] }
 0x180   :  { %v2078_v60 = vpop.f32.mrf.mxu0  ;;  %v2779_v16 = vor.u32 %v3346_v13, %v2778_v1 }
 0x181   :  { %v2076_v21 = vadd.f32 %v2075_v25, %v1907_v52  ;;  %1610 = vmatmul.bf16.gmra.mxu1 %v2755_v17  ;;  %1779 = vmatmul.bf16.gmra.mxu2 %v2759_v41 }
 0x182   :  { %1948 = vmatmul.bf16.gmra.mxu3 %v2763_v39 }
 0x183   :  { %2117 = vmatmul.bf16.gmra.mxu0 %v2767_v33  ;;  %v2382_v23 = vadd.f32 %v2381_v35, %v2076_v21  ;;  %v2775_v35 = vor.u32 %v3343_v3, %v2772_v46 }
 0x184   :  { %v1740_v20 = vpop.f32.mrf.mxu2 }
 0x185   :  { %v1741_v57 = vadd.f32 %v1740_v20, %v1572_v11  ;;  %v1909_v30 = vpop.f32.mrf.mxu3  ;;  %v2792_v11 = vld [vmem:[%s4810_s0 + $0x294] sm:$0xf0]  ;;  %v2798_v20 = vld [vmem:[%s4810_s0 + $0x288] sm:$0xf] }
 0x186   :  { %v1573_v4 = vpop.f32.mrf.mxu1 }
 0x187   :  { %v1910_v5 = vadd.f32 %v1909_v30, %v1741_v57  ;;  %v1574_v25 = vadd.f32 %v1573_v4, %v4101_v9  ;;  %v2787_v9 = vor.u32 %v3347_v50, %v2786_v49  ;;  %v3349_v57 = vld [vmem:[%s4810_s0 + $0x28c] sm:$0xf] }
 0x188   :  { %v2080_v53 = vpop.f32.mrf.mxu0 }
 0x189   :  { %v2079_v27 = vadd.f32 %v2078_v60, %v1910_v5  ;;  %v2800_v5 = vld [vmem:[%s4810_s0 + $0x29c] sm:$0xf0] }
 0x18b   :  { %v2383_v47 = vadd.f32 %v2382_v23, %v2079_v27  ;;  %v3348_v23 = vld [vmem:[%s4810_s0 + $0x284] sm:$0xf] }
 0x18c   :  { %v1742_v7 = vpop.f32.mrf.mxu2  ;;  %v3352_v27 = vld [vmem:[%s4810_s0 + $0x2a0] sm:$0xf0]  ;;  %v2795_v13 = vor.u32 %v3348_v23, %v2792_v11 }
 0x18d   :  { %v1743_v29 = vadd.f32 %v1742_v7, %v1574_v25  ;;  %v1911_v12 = vpop.f32.mrf.mxu3  ;;  %v2803_v25 = vor.u32 %v3349_v57, %v2800_v5 }
 0x18e   :  { %v1576_v37 = vpop.f32.mrf.mxu1 }
 0x18f   :  { %v1912_v51 = vadd.f32 %v1911_v12, %v1743_v29  ;;  %v1577_v17 = vadd.f32 %v1576_v37, %v4133_v40  ;;  %v3351_v40 = vld [vmem:[%s4810_s0 + $0x298] sm:$0xf0] }
 0x190   :  { %v2083_v8 = vpop.f32.mrf.mxu0  ;;  %v2799_v45 = vor.u32 %v3351_v40, %v2798_v20 }
 0x191   :  { %v2081_v43 = vadd.f32 %v2080_v53, %v1912_v51  ;;  %1615 = vmatmul.bf16.gmra.mxu1 %v2775_v35  ;;  %1784 = vmatmul.bf16.gmra.mxu2 %v2779_v16  ;;  %v2806_v53 = vld [vmem:[%s4810_s0 + $0x290] sm:$0xf] }
 0x192   :  { %1953 = vmatmul.bf16.gmra.mxu3 %v2783_v59 }
 0x193   :  { %2122 = vmatmul.bf16.gmra.mxu0 %v2787_v9  ;;  %v2384_v36 = vadd.f32 %v2383_v47, %v2081_v43  ;;  %v2812_v43 = vld [vmem:[%s4810_s0 + $0x2bc] sm:$0xf0] }
 0x194   :  { %v1745_v41 = vpop.f32.mrf.mxu2 }
 0x195   :  { %v1746_v61 = vadd.f32 %v1745_v41, %v1577_v17  ;;  %v1914_v39 = vpop.f32.mrf.mxu3  ;;  %v3354_v17 = vld [vmem:[%s4810_s0 + $0x2b4] sm:$0xf] }
 0x196   :  { %v1578_v33 = vpop.f32.mrf.mxu1 }
 0x197   :  { %v1915_v52 = vadd.f32 %v1914_v39, %v1746_v61  ;;  %v1579_v4 = vadd.f32 %v1578_v33, %v4141_v55  ;;  %v2807_v55 = vor.u32 %v3352_v27, %v2806_v53  ;;  %v2820_v39 = vld [vmem:[%s4810_s0 + $0x2c4] sm:$0xf0]  ;;  %v2826_v33 = vld [vmem:[%s4810_s0 + $0x2b8] sm:$0xf] }
 0x198   :  { %v2085_v60 = vpop.f32.mrf.mxu0  ;;  %v2823_v57 = vor.u32 %v3354_v17, %v2820_v39 }
 0x199   :  { %v2084_v21 = vadd.f32 %v2083_v8, %v1915_v52  ;;  %v3353_v8 = vld [vmem:[%s4810_s0 + $0x2ac] sm:$0xf] }
 0x19a   :  { %v3357_v52 = vld [vmem:[%s4810_s0 + $0x2c8] sm:$0xf0]  ;;  %v2815_v11 = vor.u32 %v3353_v8, %v2812_v43 }
 0x19b   :  { %v2385_v30 = vadd.f32 %v2384_v36, %v2084_v21  ;;  %v2818_v36 = vld [vmem:[%s4810_s0 + $0x2b0] sm:$0xf] }
 0x19c   :  { %v1747_v3 = vpop.f32.mrf.mxu2 }
 0x19d   :  { %v1748_v46 = vadd.f32 %v1747_v3, %v1579_v4  ;;  %v1916_v1 = vpop.f32.mrf.mxu3 }
 0x19e   :  { %v1581_v47 = vpop.f32.mrf.mxu1 }
 0x19f   :  { %v1917_v2 = vadd.f32 %v1916_v1, %v1748_v46  ;;  %v1582_v29 = vadd.f32 %v1581_v47, %v3851_v18  ;;  %v3356_v18 = vld [vmem:[%s4810_s0 + $0x2c0] sm:$0xf0] }
 0x1a0   :  { %v2088_v49 = vpop.f32.mrf.mxu0  ;;  %v2819_v20 = vor.u32 %v3356_v18, %v2818_v36 }
 0x1a1   :  { %v2086_v50 = vadd.f32 %v2085_v60, %v1917_v2  ;;  %1620 = vmatmul.bf16.gmra.mxu1 %v2795_v13  ;;  %1789 = vmatmul.bf16.gmra.mxu2 %v2799_v45  ;;  %v2832_v2 = vld [vmem:[%s4810_s0 + $0x2e4] sm:$0xf0] }
 0x1a2   :  { %1958 = vmatmul.bf16.gmra.mxu3 %v2803_v25 }
 0x1a3   :  { %2127 = vmatmul.bf16.gmra.mxu0 %v2807_v55  ;;  %v2386_v7 = vadd.f32 %v2385_v30, %v2086_v50  ;;  %v3358_v55 = vld [vmem:[%s4810_s0 + $0x2d4] sm:$0xf]  ;;  %v3359_v50 = vld [vmem:[%s4810_s0 + $0x2dc] sm:$0xf] }
 0x1a4   :  { %v1750_v12 = vpop.f32.mrf.mxu2 }
 0x1a5   :  { %v1751_v35 = vadd.f32 %v1750_v12, %v1582_v29  ;;  %v1919_v16 = vpop.f32.mrf.mxu3  ;;  %v2840_v12 = vld [vmem:[%s4810_s0 + $0x2ec] sm:$0xf0] }
 0x1a6   :  { %v1583_v37 = vpop.f32.mrf.mxu1  ;;  %v2843_v36 = vor.u32 %v3359_v50, %v2840_v12 }
 0x1a7   :  { %v1920_v59 = vadd.f32 %v1919_v16, %v1751_v35  ;;  %v1584_v61 = vadd.f32 %v1583_v37, %v3859_v24  ;;  %v2827_v24 = vor.u32 %v3357_v52, %v2826_v33  ;;  %v2846_v35 = vld [vmem:[%s4810_s0 + $0x2e0] sm:$0xf]  ;;  %v3362_v16 = vld [vmem:[%s4810_s0 + $0x2f0] sm:$0xf0] }
 0x1a8   :  { %v2090_v9 = vpop.f32.mrf.mxu0 }
 0x1a9   :  { %v2089_v51 = vadd.f32 %v2088_v49, %v1920_v59  ;;  %v2838_v49 = vld [vmem:[%s4810_s0 + $0x2d8] sm:$0xf] }
 0x1ab   :  { %v2387_v41 = vadd.f32 %v2386_v7, %v2089_v51  ;;  %v2835_v51 = vor.u32 %v3358_v55, %v2832_v2 }
 0x1ac   :  { %v1752_v60 = vpop.f32.mrf.mxu2 }
 0x1ad   :  { %v1753_v21 = vadd.f32 %v1752_v60, %v1584_v61  ;;  %v1921_v23 = vpop.f32.mrf.mxu3 }
 0x1ae   :  { %v1586_v40 = vpop.f32.mrf.mxu1 }
 0x1af   :  { %v1922_v30 = vadd.f32 %v1921_v23, %v1753_v21  ;;  %v1587_v27 = vadd.f32 %v1586_v40, %v3891_v38  ;;  %v3361_v38 = vld [vmem:[%s4810_s0 + $0x2e8] sm:$0xf0]  ;;  %v3363_v40 = vld [vmem:[%s4810_s0 + $0x2fc] sm:$0xf] }
 0x1b0   :  { %v2093_v4 = vpop.f32.mrf.mxu0  ;;  %v2839_v8 = vor.u32 %v3361_v38, %v2838_v49 }
 0x1b1   :  { %v2091_v5 = vadd.f32 %v2090_v9, %v1922_v30  ;;  %1625 = vmatmul.bf16.gmra.mxu1 %v2815_v11  ;;  %1794 = vmatmul.bf16.gmra.mxu2 %v2819_v20  ;;  %v3364_v30 = vld [vmem:[%s4810_s0 + $0x304] sm:$0xf] }
 0x1b2   :  { %1963 = vmatmul.bf16.gmra.mxu3 %v2823_v57  ;;  %v2852_v57 = vld [vmem:[%s4810_s0 + $0x30c] sm:$0xf0] }
 0x1b3   :  { %2132 = vmatmul.bf16.gmra.mxu0 %v2827_v24  ;;  %v2388_v53 = vadd.f32 %v2387_v41, %v2091_v5  ;;  %v2858_v24 = vld [vmem:[%s4810_s0 + $0x300] sm:$0xf] }
 0x1b4   :  { %v1755_v3 = vpop.f32.mrf.mxu2 }
 0x1b5   :  { %v1756_v46 = vadd.f32 %v1755_v3, %v1587_v27  ;;  %v1924_v1 = vpop.f32.mrf.mxu3  ;;  %v2866_v27 = vld [vmem:[%s4810_s0 + $0x308] sm:$0xf]  ;;  %v3367_v3 = vld [vmem:[%s4810_s0 + $0x318] sm:$0xf0] }
 0x1b6   :  { %v1588_v13 = vpop.f32.mrf.mxu1 }
 0x1b7   :  { %v1925_v45 = vadd.f32 %v1924_v1, %v1756_v46  ;;  %v1589_v29 = vadd.f32 %v1588_v13, %v3899_v44  ;;  %v2847_v44 = vor.u32 %v3362_v16, %v2846_v35 }
 0x1b8   :  { %v2095_v47 = vpop.f32.mrf.mxu0 }
 0x1b9   :  { %v2094_v25 = vadd.f32 %v2093_v4, %v1925_v45  ;;  %v2855_v45 = vor.u32 %v3363_v40, %v2852_v57 }
 0x1bb   :  { %v2389_v7 = vadd.f32 %v2388_v53, %v2094_v25  ;;  %v2860_v53 = vld [vmem:[%s4810_s0 + $0x314] sm:$0xf0] }
 0x1bc   :  { %v1757_v37 = vpop.f32.mrf.mxu2  ;;  %v2863_v55 = vor.u32 %v3364_v30, %v2860_v53 }
 0x1bd   :  { %v1758_v59 = vadd.f32 %v1757_v37, %v1589_v29  ;;  %v1926_v9 = vpop.f32.mrf.mxu3 }
 0x1be   :  { %v1591_v43 = vpop.f32.mrf.mxu1 }
 0x1bf   :  { %v1927_v18 = vadd.f32 %v1926_v9, %v1758_v59  ;;  %v1592_v39 = vadd.f32 %v1591_v43, %v3931_v58  ;;  %v3366_v58 = vld [vmem:[%s4810_s0 + $0x310] sm:$0xf0]  ;;  %v2878_v43 = vld [vmem:[%s4810_s0 + $0x328] sm:$0xf] }
 0x1c0   :  { %v2098_v17 = vpop.f32.mrf.mxu0 }
 0x1c1   :  { %v2096_v41 = vadd.f32 %v2095_v47, %v1927_v18  ;;  %1630 = vmatmul.bf16.gmra.mxu1 %v2835_v51  ;;  %1799 = vmatmul.bf16.gmra.mxu2 %v2839_v8  ;;  %v2859_v47 = vor.u32 %v3366_v58, %v2858_v24  ;;  %v3368_v51 = vld [vmem:[%s4810_s0 + $0x324] sm:$0xf]  ;;  %v2872_v8 = vld [vmem:[%s4810_s0 + $0x334] sm:$0xf0] }
 0x1c2   :  { %1968 = vmatmul.bf16.gmra.mxu3 %v2843_v36  ;;  %v3369_v36 = vld [vmem:[%s4810_s0 + $0x32c] sm:$0xf] }
 0x1c3   :  { %2137 = vmatmul.bf16.gmra.mxu0 %v2847_v44  ;;  %v2390_v61 = vadd.f32 %v2389_v7, %v2096_v41  ;;  %v2886_v41 = vld [vmem:[%s4810_s0 + $0x330] sm:$0xf] }
 0x1c4   :  { %v1760_v33 = vpop.f32.mrf.mxu2 }
 0x1c5   :  { %v1761_v52 = vadd.f32 %v1760_v33, %v1592_v39  ;;  %v1929_v60 = vpop.f32.mrf.mxu3 }
 0x1c6   :  { %v1593_v21 = vpop.f32.mrf.mxu1 }
 0x1c7   :  { %v1930_v23 = vadd.f32 %v1929_v60, %v1761_v52  ;;  %v1594_v5 = vadd.f32 %v1593_v21, %v3939_v0  ;;  %v2867_v0 = vor.u32 %v3367_v3, %v2866_v27  ;;  %v2875_v60 = vor.u32 %v3368_v51, %v2872_v8 }
 0x1c8   :  { %v2100_v11 = vpop.f32.mrf.mxu0 }
 0x1c9   :  { %v2099_v20 = vadd.f32 %v2098_v17, %v1930_v23  ;;  %v2880_v17 = vld [vmem:[%s4810_s0 + $0x33c] sm:$0xf0] }
 0x1cb   :  { %v2391_v4 = vadd.f32 %v2390_v61, %v2099_v20  ;;  %v3372_v61 = vld [vmem:[%s4810_s0 + $0x340] sm:$0xf0] }
 0x1cc   :  { %v1762_v46 = vpop.f32.mrf.mxu2 }
 0x1cd   :  { %v1763_v1 = vadd.f32 %v1762_v46, %v1594_v5  ;;  %v1931_v13 = vpop.f32.mrf.mxu3 }
 0x1ce   :  { %v1596_v25 = vpop.f32.mrf.mxu1 }
 0x1cf   :  { %v1932_v2 = vadd.f32 %v1931_v13, %v1763_v1  ;;  %v1597_v7 = vadd.f32 %v1596_v25, %v3971_v14  ;;  %v3371_v14 = vld [vmem:[%s4810_s0 + $0x338] sm:$0xf0]  ;;  %v3373_v1 = vld [vmem:[%s4810_s0 + $0x34c] sm:$0xf]  ;;  %v2892_v13 = vld [vmem:[%s4810_s0 + $0x35c] sm:$0xf0] }
 0x1d0   :  { %v2103_v49 = vpop.f32.mrf.mxu0  ;;  %v2879_v21 = vor.u32 %v3371_v14, %v2878_v43 }
 0x1d1   :  { %v2101_v38 = vadd.f32 %v2100_v11, %v1932_v2  ;;  %1635 = vmatmul.bf16.gmra.mxu1 %v2855_v45  ;;  %1804 = vmatmul.bf16.gmra.mxu2 %v2859_v47  ;;  %v2883_v11 = vor.u32 %v3369_v36, %v2880_v17  ;;  %v2898_v45 = vld [vmem:[%s4810_s0 + $0x350] sm:$0xf]  ;;  %v3374_v47 = vld [vmem:[%s4810_s0 + $0x354] sm:$0xf]  ;;  %v2906_v2 = vld [vmem:[%s4810_s0 + $0x358] sm:$0xf] }
 0x1d2   :  { %1973 = vmatmul.bf16.gmra.mxu3 %v2863_v55 }
 0x1d3   :  { %2142 = vmatmul.bf16.gmra.mxu0 %v2867_v0  ;;  %v2392_v50 = vadd.f32 %v2391_v4, %v2101_v38  ;;  %v2900_v0 = vld [vmem:[%s4810_s0 + $0x364] sm:$0xf0] }
 0x1d4   :  { %v1765_v29 = vpop.f32.mrf.mxu2 }
 0x1d5   :  { %v1766_v12 = vadd.f32 %v1765_v29, %v1597_v7  ;;  %v1934_v35 = vpop.f32.mrf.mxu3  ;;  %v2895_v29 = vor.u32 %v3373_v1, %v2892_v13 }
 0x1d6   :  { %v1598_v16 = vpop.f32.mrf.mxu1 }
 0x1d7   :  { %v1935_v37 = vadd.f32 %v1934_v35, %v1766_v12  ;;  %v1599_v18 = vadd.f32 %v1598_v16, %v3979_v26  ;;  %v2887_v26 = vor.u32 %v3372_v61, %v2886_v41  ;;  %v2903_v16 = vor.u32 %v3374_v47, %v2900_v0  ;;  %v3378_v61 = vld [vmem:[%s4810_s0 + $0x374] sm:$0xf]  ;;  %v3383_v0 = vld [vmem:[%s4810_s0 + $0x39c] sm:$0xf] }
 0x1d8   :  { %v2105_v59 = vpop.f32.mrf.mxu0 }
 0x1d9   :  { %v2104_v9 = vadd.f32 %v2103_v49, %v1935_v37  ;;  %v3377_v49 = vld [vmem:[%s4810_s0 + $0x368] sm:$0xf0] }
 0x1db   :  { %v2393_v44 = vadd.f32 %v2392_v50, %v2104_v9 }
 0x1dc   :  { %v1767_v39 = vpop.f32.mrf.mxu2 }
 0x1dd   :  { %v1768_v33 = vadd.f32 %v1767_v39, %v1599_v18  ;;  %v1936_v52 = vpop.f32.mrf.mxu3  ;;  %v2912_v39 = vld [vmem:[%s4810_s0 + $0x384] sm:$0xf0] }
 0x1de   :  { %v1601_v23 = vpop.f32.mrf.mxu1 }
 0x1df   :  { %v1937_v20 = vadd.f32 %v1936_v52, %v1768_v33  ;;  %v1602_v58 = vadd.f32 %v1601_v23, %v4011_v48  ;;  %v3376_v48 = vld [vmem:[%s4810_s0 + $0x360] sm:$0xf0]  ;;  %v2918_v33 = vld [vmem:[%s4810_s0 + $0x378] sm:$0xf]  ;;  %v3379_v52 = vld [vmem:[%s4810_s0 + $0x37c] sm:$0xf] }
 0x1e0   :  { %v2108_v40 = vpop.f32.mrf.mxu0  ;;  %v2899_v12 = vor.u32 %v3376_v48, %v2898_v45  ;;  %v2920_v23 = vld [vmem:[%s4810_s0 + $0x38c] sm:$0xf0] }
 0x1e1   :  { %v2106_v57 = vadd.f32 %v2105_v59, %v1937_v20  ;;  %1640 = vmatmul.bf16.gmra.mxu1 %v2875_v60  ;;  %1809 = vmatmul.bf16.gmra.mxu2 %v2879_v21 }
 0x1e2   :  { %1978 = vmatmul.bf16.gmra.mxu3 %v2883_v11  ;;  %v2926_v11 = vld [vmem:[%s4810_s0 + $0x380] sm:$0xf] }
 0x1e3   :  { %2147 = vmatmul.bf16.gmra.mxu0 %v2887_v26  ;;  %v2394_v24 = vadd.f32 %v2393_v44, %v2106_v57  ;;  %v3382_v26 = vld [vmem:[%s4810_s0 + $0x390] sm:$0xf0] }
 0x1e4   :  { %v1770_v30 = vpop.f32.mrf.mxu2 }
 0x1e5   :  { %v1771_v4 = vadd.f32 %v1770_v30, %v1602_v58  ;;  %v1939_v5 = vpop.f32.mrf.mxu3 }
 0x1e6   :  { %v1603_v53 = vpop.f32.mrf.mxu1 }
 0x1e7   :  { %v1940_v27 = vadd.f32 %v1939_v5, %v1771_v4  ;;  %v1604_v55 = vadd.f32 %v1603_v53, %v4019_v56  ;;  %v2907_v56 = vor.u32 %v3377_v49, %v2906_v2  ;;  %v2923_v4 = vor.u32 %v3379_v52, %v2920_v23  ;;  %v2932_v2 = vld [vmem:[%s4810_s0 + $0x3ac] sm:$0xf0]  ;;  %v2938_v49 = vld [vmem:[%s4810_s0 + $0x3a0] sm:$0xf]  ;;  %v2958_v23 = vld [vmem:[%s4810_s0 + $0x3c8] sm:$0xf] }
 0x1e8   :  { %v2110_v3 = vpop.f32.mrf.mxu0 }
 0x1e9   :  { %v2109_v46 = vadd.f32 %v2108_v40, %v1940_v27 }
 0x1eb   :  { %v2395_v25 = vadd.f32 %v2394_v24, %v2109_v46  ;;  %v2915_v24 = vor.u32 %v3378_v61, %v2912_v39 }
 0x1ec   :  { %v1772_v38 = vpop.f32.mrf.mxu2 }
 0x1ed   :  { %v1773_v50 = vadd.f32 %v1772_v38, %v1604_v55  ;;  %v1941_v7 = vpop.f32.mrf.mxu3  ;;  %v3384_v38 = vld [vmem:[%s4810_s0 + $0x3a4] sm:$0xf] }
 0x1ee   :  { %v1606_v35 = vpop.f32.mrf.mxu1 }
 0x1ef   :  { %v1942_v37 = vadd.f32 %v1941_v7, %v1773_v50  ;;  %v1607_v8 = vadd.f32 %v1606_v35, %v4051_v15  ;;  %v3381_v15 = vld [vmem:[%s4810_s0 + $0x388] sm:$0xf0]  ;;  %v3387_v35 = vld [vmem:[%s4810_s0 + $0x3b8] sm:$0xf0] }
 0x1f0   :  { %v2113_v59 = vpop.f32.mrf.mxu0  ;;  %v2919_v58 = vor.u32 %v3381_v15, %v2918_v33 }
 0x1f1   :  { %v2111_v9 = vadd.f32 %v2110_v3, %v1942_v37  ;;  %1645 = vmatmul.bf16.gmra.mxu1 %v2895_v29  ;;  %1814 = vmatmul.bf16.gmra.mxu2 %v2899_v12  ;;  %v2940_v29 = vld [vmem:[%s4810_s0 + $0x3b4] sm:$0xf0]  ;;  %v2946_v12 = vld [vmem:[%s4810_s0 + $0x3a8] sm:$0xf] }
 0x1f2   :  { %1983 = vmatmul.bf16.gmra.mxu3 %v2903_v16 }
 0x1f3   :  { %2152 = vmatmul.bf16.gmra.mxu0 %v2907_v56  ;;  %v2396_v51 = vadd.f32 %v2395_v25, %v2111_v9 }
 0x1f4   :  { %v1775_v43 = vpop.f32.mrf.mxu2 }
 0x1f5   :  { %v1776_v14 = vadd.f32 %v1775_v43, %v1607_v8  ;;  %v1944_v36 = vpop.f32.mrf.mxu3  ;;  %v2943_v8 = vor.u32 %v3384_v38, %v2940_v29  ;;  %v2972_v38 = vld [vmem:[%s4810_s0 + $0x3fc] sm:$0xf0] }
 0x1f6   :  { %v1608_v44 = vpop.f32.mrf.mxu1 }
 0x1f7   :  { %v1945_v18 = vadd.f32 %v1944_v36, %v1776_v14  ;;  %v1609_v21 = vadd.f32 %v1608_v44, %v4059_v32  ;;  %v2927_v32 = vor.u32 %v3382_v26, %v2926_v11  ;;  %v3389_v11 = vld [vmem:[%s4810_s0 + $0x3cc] sm:$0xf] }
 0x1f8   :  { %v2115_v17 = vpop.f32.mrf.mxu0 }
 0x1f9   :  { %v2114_v41 = vadd.f32 %v2113_v59, %v1945_v18  ;;  %v2935_v59 = vor.u32 %v3383_v0, %v2932_v2 }
 0x1fb   :  { %v2397_v60 = vadd.f32 %v2396_v51, %v2114_v41 }
 0x1fc   :  { %v1777_v20 = vpop.f32.mrf.mxu2 }
 0x1fd   :  { %v1778_v40 = vadd.f32 %v1777_v20, %v1609_v21  ;;  %v1946_v57 = vpop.f32.mrf.mxu3  ;;  %v2952_v21 = vld [vmem:[%s4810_s0 + $0x3d4] sm:$0xf0] }
 0x1fe   :  { %v1611_v30 = vpop.f32.mrf.mxu1 }
 0x1ff   :  { %v1947_v5 = vadd.f32 %v1946_v57, %v1778_v40  ;;  %v1612_v46 = vadd.f32 %v1611_v30, %v4091_v6  ;;  %v3386_v6 = vld [vmem:[%s4810_s0 + $0x3b0] sm:$0xf0]  ;;  %v2960_v40 = vld [vmem:[%s4810_s0 + $0x3dc] sm:$0xf0]  ;;  %v2966_v57 = vld [vmem:[%s4810_s0 + $0x3d0] sm:$0xf] }
 0x200   :  { %v2118_v53 = vpop.f32.mrf.mxu0  ;;  %v2939_v9 = vor.u32 %v3386_v6, %v2938_v49  ;;  %v3393_v6 = vld [vmem:[%s4810_s0 + $0x3ec] sm:$0xf] }
 0x201   :  { %v2116_v27 = vadd.f32 %v2115_v17, %v1947_v5  ;;  %1650 = vmatmul.bf16.gmra.mxu1 %v2915_v24  ;;  %1819 = vmatmul.bf16.gmra.mxu2 %v2919_v58  ;;  %v3392_v24 = vld [vmem:[%s4810_s0 + $0x3e0] sm:$0xf0] }
 0x202   :  { %1988 = vmatmul.bf16.gmra.mxu3 %v2923_v4 }
 0x203   :  { %2157 = vmatmul.bf16.gmra.mxu0 %v2927_v32  ;;  %v2398_v3 = vadd.f32 %v2397_v60, %v2116_v27  ;;  %v3388_v60 = vld [vmem:[%s4810_s0 + $0x3c4] sm:$0xf]  ;;  %v2963_v27 = vor.u32 %v3389_v11, %v2960_v40  ;;  %v3006_v40 = vld [vmem:[%s4810_s0 + $0x420] sm:$0xf] }
 0x204   :  { %v1780_v1 = vpop.f32.mrf.mxu2  ;;  %v2955_v32 = vor.u32 %v3388_v60, %v2952_v21  ;;  %v3398_v60 = vld [vmem:[%s4810_s0 + $0x414] sm:$0xf]  ;;  %v2992_v21 = vld [vmem:[%s4810_s0 + $0x424] sm:$0xf0] }
 0x205   :  { %v1781_v13 = vadd.f32 %v1780_v1, %v1612_v46  ;;  %v1949_v45 = vpop.f32.mrf.mxu3 }
 0x206   :  { %v1613_v48 = vpop.f32.mrf.mxu1 }
 0x207   :  { %v1950_v47 = vadd.f32 %v1949_v45, %v1781_v13  ;;  %v1614_v7 = vadd.f32 %v1613_v48, %v4099_v31  ;;  %v2947_v31 = vor.u32 %v3387_v35, %v2946_v12  ;;  %v2980_v12 = vld [vmem:[%s4810_s0 + $0x404] sm:$0xf0]  ;;  %v2986_v35 = vld [vmem:[%s4810_s0 + $0x3f8] sm:$0xf] }
 0x208   :  { %v2120_v25 = vpop.f32.mrf.mxu0 }
 0x209   :  { %v2119_v55 = vadd.f32 %v2118_v53, %v1950_v47 }
 0x20b   :  { %v2399_v50 = vadd.f32 %v2398_v3, %v2119_v55 }
 0x20c   :  { %v1782_v16 = vpop.f32.mrf.mxu2 }
 0x20d   :  { %v1783_v56 = vadd.f32 %v1782_v16, %v1614_v7  ;;  %v1951_v37 = vpop.f32.mrf.mxu3  ;;  %v3394_v7 = vld [vmem:[%s4810_s0 + $0x3f4] sm:$0xf]  ;;  %v3397_v16 = vld [vmem:[%s4810_s0 + $0x408] sm:$0xf0] }
 0x20e   :  { %v1616_v51 = vpop.f32.mrf.mxu1 }
 0x20f   :  { %v1952_v43 = vadd.f32 %v1951_v37, %v1783_v56  ;;  %v1617_v18 = vadd.f32 %v1616_v51, %v4131_v28  ;;  %v3391_v28 = vld [vmem:[%s4810_s0 + $0x3d8] sm:$0xf0] }
 0x210   :  { %v2123_v14 = vpop.f32.mrf.mxu0  ;;  %v2959_v5 = vor.u32 %v3391_v28, %v2958_v23  ;;  %v2998_v23 = vld [vmem:[%s4810_s0 + $0x418] sm:$0xf]  ;;  %v3399_v28 = vld [vmem:[%s4810_s0 + $0x41c] sm:$0xf] }
 0x211   :  { %v2121_v36 = vadd.f32 %v2120_v25, %v1952_v43  ;;  %1655 = vmatmul.bf16.gmra.mxu1 %v2935_v59  ;;  %1824 = vmatmul.bf16.gmra.mxu2 %v2939_v9  ;;  %v2975_v9 = vor.u32 %v3393_v6, %v2972_v38  ;;  %v3012_v6 = vld [vmem:[%s4810_s0 + $0x44c] sm:$0xf0]  ;;  %v3018_v38 = vld [vmem:[%s4810_s0 + $0x440] sm:$0xf] }
 0x212   :  { %1993 = vmatmul.bf16.gmra.mxu3 %v2943_v8 }
 0x213   :  { %2162 = vmatmul.bf16.gmra.mxu0 %v2947_v31  ;;  %v2400_v44 = vadd.f32 %v2399_v50, %v2121_v36  ;;  %v2978_v50 = vld [vmem:[%s4810_s0 + $0x3f0] sm:$0xf]  ;;  %v2983_v31 = vor.u32 %v3394_v7, %v2980_v12  ;;  %v3026_v12 = vld [vmem:[%s4810_s0 + $0x448] sm:$0xf] }
 0x214   :  { %v1785_v17 = vpop.f32.mrf.mxu2 }
 0x215   :  { %v1786_v41 = vadd.f32 %v1785_v17, %v1617_v18  ;;  %v1954_v61 = vpop.f32.mrf.mxu3 }
 0x216   :  { %v1618_v39 = vpop.f32.mrf.mxu1 }
 0x217   :  { %v1955_v33 = vadd.f32 %v1954_v61, %v1786_v41  ;;  %v1619_v20 = vadd.f32 %v1618_v39, %v4139_v63  ;;  %v2967_v63 = vor.u32 %v3392_v24, %v2966_v57  ;;  %v3402_v57 = vld [vmem:[%s4810_s0 + $0x430] sm:$0xf0] }
 0x218   :  { %v2125_v15 = vpop.f32.mrf.mxu0 }
 0x219   :  { %v2124_v52 = vadd.f32 %v2123_v14, %v1955_v33 }
 0x21b   :  { %v2401_v26 = vadd.f32 %v2400_v44, %v2124_v52 }
 0x21c   :  { %v1787_v58 = vpop.f32.mrf.mxu2 }
 0x21d   :  { %v1788_v30 = vadd.f32 %v1787_v58, %v1619_v20  ;;  %v1956_v4 = vpop.f32.mrf.mxu3  ;;  %v3000_v20 = vld [vmem:[%s4810_s0 + $0x42c] sm:$0xf0] }
 0x21e   :  { %v1621_v53 = vpop.f32.mrf.mxu1 }
 0x21f   :  { %v1957_v3 = vadd.f32 %v1956_v4, %v1788_v30  ;;  %v1622_v45 = vadd.f32 %v1621_v53, %v3855_v22  ;;  %v3396_v22 = vld [vmem:[%s4810_s0 + $0x400] sm:$0xf0]  ;;  %v2995_v4 = vor.u32 %v3398_v60, %v2992_v21  ;;  %v3003_v53 = vor.u32 %v3399_v28, %v3000_v20  ;;  %v3038_v60 = vld [vmem:[%s4810_s0 + $0x468] sm:$0xf]  ;;  %v3409_v21 = vld [vmem:[%s4810_s0 + $0x46c] sm:$0xf] }
 0x220   :  { %v2128_v46 = vpop.f32.mrf.mxu0  ;;  %v2979_v51 = vor.u32 %v3396_v22, %v2978_v50  ;;  %v3404_v50 = vld [vmem:[%s4810_s0 + $0x444] sm:$0xf] }
 0x221   :  { %v2126_v1 = vadd.f32 %v2125_v15, %v1957_v3  ;;  %1660 = vmatmul.bf16.gmra.mxu1 %v2955_v32  ;;  %1829 = vmatmul.bf16.gmra.mxu2 %v2959_v5  ;;  %v3412_v20 = vld [vmem:[%s4810_s0 + $0x480] sm:$0xf0] }
 0x222   :  { %1998 = vmatmul.bf16.gmra.mxu3 %v2963_v27 }
 0x223   :  { %2167 = vmatmul.bf16.gmra.mxu0 %v2967_v63  ;;  %v4587_v13 = vadd.f32 %v2401_v26, %v2126_v1 }
 0x224   :  { %v1790_v48 = vpop.f32.mrf.mxu2 }
 0x225   :  { %v1791_v47 = vadd.f32 %v1790_v48, %v1622_v45  ;;  %v1959_v25 = vpop.f32.mrf.mxu3 }
 0x226   :  { %v1623_v55 = vpop.f32.mrf.mxu1 }
 0x227   :  { %v1960_v0 = vadd.f32 %v1959_v25, %v1791_v47  ;;  %v1624_v29 = vadd.f32 %v1623_v55, %v3887_v34  ;;  %v2987_v34 = vor.u32 %v3397_v16, %v2986_v35  ;;  %v3407_v35 = vld [vmem:[%s4810_s0 + $0x458] sm:$0xf0] }
 0x228   :  { %v2130_v2 = vpop.f32.mrf.mxu0 }
 0x229   :  { %v2129_v49 = vadd.f32 %v2128_v46, %v1960_v0 }
 0x22c   :  { %v1792_v56 = vpop.f32.mrf.mxu2 }
 0x22d   :  { %v1793_v37 = vadd.f32 %v1792_v56, %v1624_v29  ;;  %v1961_v59 = vpop.f32.mrf.mxu3  ;;  %v3020_v29 = vld [vmem:[%s4810_s0 + $0x454] sm:$0xf0] }
 0x22e   :  { %v1626_v8 = vpop.f32.mrf.mxu1 }
 0x22f   :  { %v1962_v43 = vadd.f32 %v1961_v59, %v1793_v37  ;;  %v1627_v18 = vadd.f32 %v1626_v8, %v3895_v42  ;;  %v3401_v42 = vld [vmem:[%s4810_s0 + $0x428] sm:$0xf0]  ;;  %v3023_v8 = vor.u32 %v3404_v50, %v3020_v29  ;;  %v3060_v29 = vld [vmem:[%s4810_s0 + $0x4a4] sm:$0xf0] }
 0x230   :  { %v2133_v14 = vpop.f32.mrf.mxu0  ;;  %v2999_v32 = vor.u32 %v3401_v42, %v2998_v23  ;;  %v4838_v42 = vld [vmem:[#allocation9_spill] sm:$0xff] }
 0x231   :  { %v2131_v36 = vadd.f32 %v2130_v2, %v1962_v43  ;;  %1665 = vmatmul.bf16.gmra.mxu1 %v2975_v9  ;;  %1834 = vmatmul.bf16.gmra.mxu2 %v2979_v51 }
 0x232   :  { %2003 = vmatmul.bf16.gmra.mxu3 %v2983_v31 }
 0x233   :  { %2172 = vmatmul.bf16.gmra.mxu0 %v2987_v34  ;;  %v2409_v44 = vadd.f32 %v2131_v36, %v2129_v49  ;;  %v3403_v49 = vld [vmem:[%s4810_s0 + $0x43c] sm:$0xf] }
 0x234   :  { %v1795_v17 = vpop.f32.mrf.mxu2  ;;  %v3015_v59 = vor.u32 %v3403_v49, %v3012_v6  ;;  %v3052_v49 = vld [vmem:[%s4810_s0 + $0x49c] sm:$0xf0]  ;;  %v3058_v6 = vld [vmem:[%s4810_s0 + $0x490] sm:$0xf] }
 0x235   :  { %v1796_v41 = vadd.f32 %v1795_v17, %v1627_v18  ;;  %v1964_v61 = vpop.f32.mrf.mxu3 }
 0x236   :  { %v1628_v39 = vpop.f32.mrf.mxu1 }
 0x237   :  { %v1965_v33 = vadd.f32 %v1964_v61, %v1796_v41  ;;  %v1629_v26 = vadd.f32 %v1628_v39, %v3927_v54  ;;  %v3007_v54 = vor.u32 %v3402_v57, %v3006_v40 }
 0x238   :  { %v2135_v15 = vpop.f32.mrf.mxu0 }
 0x239   :  { %v2134_v52 = vadd.f32 %v2133_v14, %v1965_v33 }
 0x23b   :  { %v2410_v11 = vadd.f32 %v2409_v44, %v2134_v52  ;;  %v3032_v52 = vld [vmem:[%s4810_s0 + $0x474] sm:$0xf0] }
 0x23c   :  { %v1797_v24 = vpop.f32.mrf.mxu2 }
 0x23d   :  { %v1798_v58 = vadd.f32 %v1797_v24, %v1629_v26  ;;  %v1966_v30 = vpop.f32.mrf.mxu3  ;;  %v3046_v26 = vld [vmem:[%s4810_s0 + $0x470] sm:$0xf] }
 0x23e   :  { %v1631_v5 = vpop.f32.mrf.mxu1 }
 0x23f   :  { %v1967_v27 = vadd.f32 %v1966_v30, %v1798_v58  ;;  %v1632_v1 = vadd.f32 %v1631_v5, %v3935_v62  ;;  %v3406_v62 = vld [vmem:[%s4810_s0 + $0x450] sm:$0xf0]  ;;  %v3047_v5 = vor.u32 %v3412_v20, %v3046_v26  ;;  %v3080_v26 = vld [vmem:[%s4810_s0 + $0x4cc] sm:$0xf0]  ;;  %v3086_v20 = vld [vmem:[%s4810_s0 + $0x4c0] sm:$0xf] }
 0x240   :  { %v2138_v63 = vpop.f32.mrf.mxu0  ;;  %v3019_v9 = vor.u32 %v3406_v62, %v3018_v38  ;;  %v3416_v38 = vld [vmem:[%s4810_s0 + $0x4a0] sm:$0xf0]  ;;  %v3414_v62 = vld [vmem:[%s4810_s0 + $0x494] sm:$0xf] }
 0x241   :  { %v2136_v3 = vadd.f32 %v2135_v15, %v1967_v27  ;;  %1670 = vmatmul.bf16.gmra.mxu1 %v2995_v4  ;;  %1839 = vmatmul.bf16.gmra.mxu2 %v2999_v32  ;;  %v3408_v15 = vld [vmem:[%s4810_s0 + $0x464] sm:$0xf] }
 0x242   :  { %2008 = vmatmul.bf16.gmra.mxu3 %v3003_v53  ;;  %v3035_v58 = vor.u32 %v3408_v15, %v3032_v52  ;;  %v3418_v52 = vld [vmem:[%s4810_s0 + $0x4b4] sm:$0xf] }
 0x243   :  { %2177 = vmatmul.bf16.gmra.mxu0 %v3007_v54  ;;  %v2411_v46 = vadd.f32 %v2410_v11, %v2136_v3  ;;  %v3040_v11 = vld [vmem:[%s4810_s0 + $0x47c] sm:$0xf0]  ;;  %v4839_v3 = vld [vmem:[#allocation11_spill] sm:$0xff] }
 0x244   :  { %v1800_v45 = vpop.f32.mrf.mxu2  ;;  %v3043_v32 = vor.u32 %v3409_v21, %v3040_v11  ;;  %v3421_v21 = vld [vmem:[%s4810_s0 + $0x4c8] sm:$0xf0] }
 0x245   :  { %v1801_v48 = vadd.f32 %v1800_v45, %v1632_v1  ;;  %v1969_v47 = vpop.f32.mrf.mxu3 }
 0x246   :  { %v1633_v25 = vpop.f32.mrf.mxu1 }
 0x247   :  { %v1970_v55 = vadd.f32 %v1969_v47, %v1801_v48  ;;  %v1634_v7 = vadd.f32 %v1633_v25, %v3967_v10  ;;  %v3027_v10 = vor.u32 %v3407_v35, %v3026_v12  ;;  %v3066_v12 = vld [vmem:[%s4810_s0 + $0x498] sm:$0xf]  ;;  %v3417_v35 = vld [vmem:[%s4810_s0 + $0x4a8] sm:$0xf0] }
 0x248   :  { %v2140_v0 = vpop.f32.mrf.mxu0 }
 0x249   :  { %v2139_v2 = vadd.f32 %v2138_v63, %v1970_v55 }
 0x24b   :  { %v2412_v22 = vadd.f32 %v2411_v46, %v2139_v2  ;;  %v3413_v2 = vld [vmem:[%s4810_s0 + $0x48c] sm:$0xf] }
 0x24c   :  { %v1802_v16 = vpop.f32.mrf.mxu2 }
 0x24d   :  { %v1803_v56 = vadd.f32 %v1802_v16, %v1634_v7  ;;  %v1971_v37 = vpop.f32.mrf.mxu3 }
 0x24e   :  { %v1636_v51 = vpop.f32.mrf.mxu1 }
 0x24f   :  { %v1972_v31 = vadd.f32 %v1971_v37, %v1803_v56  ;;  %v1637_v36 = vadd.f32 %v1636_v51, %v3975_v19  ;;  %v3411_v19 = vld [vmem:[%s4810_s0 + $0x478] sm:$0xf0] }
 0x250   :  { %v2143_v34 = vpop.f32.mrf.mxu0  ;;  %v3039_v30 = vor.u32 %v3411_v19, %v3038_v60  ;;  %v3072_v60 = vld [vmem:[%s4810_s0 + $0x4c4] sm:$0xf0]  ;;  %v3078_v19 = vld [vmem:[%s4810_s0 + $0x4b8] sm:$0xf] }
 0x251   :  { %v2141_v43 = vadd.f32 %v2140_v0, %v1972_v31  ;;  %1675 = vmatmul.bf16.gmra.mxu1 %v3015_v59  ;;  %1844 = vmatmul.bf16.gmra.mxu2 %v3019_v9  ;;  %v3055_v59 = vor.u32 %v3413_v2, %v3052_v49  ;;  %v3059_v9 = vor.u32 %v3416_v38, %v3058_v6  ;;  %v3423_v49 = vld [vmem:[%s4810_s0 + $0x4dc] sm:$0xf]  ;;  %v3092_v6 = vld [vmem:[%s4810_s0 + $0x4ec] sm:$0xf0]  ;;  %v3098_v38 = vld [vmem:[%s4810_s0 + $0x4e0] sm:$0xf] }
 0x252   :  { %2013 = vmatmul.bf16.gmra.mxu3 %v3023_v8  ;;  %v3063_v8 = vor.u32 %v3414_v62, %v3060_v29  ;;  %v3426_v62 = vld [vmem:[%s4810_s0 + $0x4f0] sm:$0xf0] }
 0x253   :  { %2182 = vmatmul.bf16.gmra.mxu0 %v3027_v10  ;;  %v2413_v14 = vadd.f32 %v2412_v22, %v2141_v43  ;;  %v4840_v22 = vld [vmem:[#allocation13_spill] sm:$0xff]  ;;  %v3067_v10 = vor.u32 %v3417_v35, %v3066_v12  ;;  %v3106_v35 = vld [vmem:[%s4810_s0 + $0x4e8] sm:$0xf] }
 0x254   :  { %v1805_v44 = vpop.f32.mrf.mxu2  ;;  %v3100_v12 = vld [vmem:[%s4810_s0 + $0x4f4] sm:$0xf0] }
 0x255   :  { %v1806_v18 = vadd.f32 %v1805_v44, %v1637_v36  ;;  %v1974_v17 = vpop.f32.mrf.mxu3  ;;  %v4841_v36 = vld [vmem:[#allocation15_spill] sm:$0xff] }
 0x256   :  { %v1638_v41 = vpop.f32.mrf.mxu1 }
 0x257   :  { %v1975_v61 = vadd.f32 %v1974_v17, %v1806_v18  ;;  %v1639_v28 = vadd.f32 %v1638_v41, %v4838_v42 }
 0x258   :  { %v2145_v39 = vpop.f32.mrf.mxu0 }
 0x259   :  { %v2144_v33 = vadd.f32 %v2143_v34, %v1975_v61 }
 0x25b   :  { %v2414_v23 = vadd.f32 %v2413_v14, %v2144_v33 }
 0x25c   :  { %v1807_v40 = vpop.f32.mrf.mxu2 }
 0x25d   :  { %v1808_v57 = vadd.f32 %v1807_v40, %v1639_v28  ;;  %v1976_v24 = vpop.f32.mrf.mxu3  ;;  %v4842_v28 = vld [vmem:[#allocation17_spill] sm:$0xff]  ;;  %v3422_v40 = vld [vmem:[%s4810_s0 + $0x4d0] sm:$0xf0] }
 0x25e   :  { %v1641_v4 = vpop.f32.mrf.mxu1 }
 0x25f   :  { %v1977_v53 = vadd.f32 %v1976_v24, %v1808_v57  ;;  %v1642_v46 = vadd.f32 %v1641_v4, %v4839_v3  ;;  %v3079_v4 = vor.u32 %v3421_v21, %v3078_v19  ;;  %v4846_v19 = vld [vmem:[#allocation25_spill] sm:$0xff] }
 0x260   :  { %v2148_v54 = vpop.f32.mrf.mxu0 }
 0x261   :  { %v2146_v27 = vadd.f32 %v2145_v39, %v1977_v53  ;;  %1680 = vmatmul.bf16.gmra.mxu1 %v3035_v58  ;;  %1849 = vmatmul.bf16.gmra.mxu2 %v3039_v30  ;;  %v3075_v30 = vor.u32 %v3418_v52, %v3072_v60  ;;  %v3087_v53 = vor.u32 %v3422_v40, %v3086_v20 }
 0x262   :  { %2018 = vmatmul.bf16.gmra.mxu3 %v3043_v32 }
 0x263   :  { %2187 = vmatmul.bf16.gmra.mxu0 %v3047_v5  ;;  %v2415_v63 = vadd.f32 %v2414_v23, %v2146_v27  ;;  %v3419_v23 = vld [vmem:[%s4810_s0 + $0x4bc] sm:$0xf] }
 0x264   :  { %v1810_v1 = vpop.f32.mrf.mxu2  ;;  %v3083_v5 = vor.u32 %v3419_v23, %v3080_v26 }
 0x265   :  { %v1811_v45 = vadd.f32 %v1810_v1, %v1642_v46  ;;  %v1979_v48 = vpop.f32.mrf.mxu3  ;;  %v4843_v46 = vld [vmem:[#allocation19_spill] sm:$0xff] }
 0x266   :  { %v1643_v47 = vpop.f32.mrf.mxu1 }
 0x267   :  { %v1980_v25 = vadd.f32 %v1979_v48, %v1811_v45  ;;  %v1644_v7 = vadd.f32 %v1643_v47, %v4840_v22 }
 0x268   :  { %v2150_v55 = vpop.f32.mrf.mxu0 }
 0x269   :  { %v2149_v0 = vadd.f32 %v2148_v54, %v1980_v25 }
 0x26b   :  { %v2416_v50 = vadd.f32 %v2415_v63, %v2149_v0 }
 0x26c   :  { %v1812_v16 = vpop.f32.mrf.mxu2 }
 0x26d   :  { %v1813_v56 = vadd.f32 %v1812_v16, %v1644_v7  ;;  %v1981_v37 = vpop.f32.mrf.mxu3  ;;  %v4844_v7 = vld [vmem:[#allocation21_spill] sm:$0xff] }
 0x26e   :  { %v1646_v51 = vpop.f32.mrf.mxu1  ;;  %v3427_v16 = vld [vmem:[%s4810_s0 + $0x4f8] sm:$0xf0] }
 0x26f   :  { %v1982_v31 = vadd.f32 %v1981_v37, %v1813_v56  ;;  %v1647_v44 = vadd.f32 %v1646_v51, %v4841_v36  ;;  %v3099_v51 = vor.u32 %v3426_v62, %v3098_v38 }
 0x270   :  { %v2153_v34 = vpop.f32.mrf.mxu0 }
 0x271   :  { %v2151_v43 = vadd.f32 %v2150_v55, %v1982_v31  ;;  %1685 = vmatmul.bf16.gmra.mxu1 %v3055_v59  ;;  %1854 = vmatmul.bf16.gmra.mxu2 %v3059_v9  ;;  %v3095_v9 = vor.u32 %v3423_v49, %v3092_v6  ;;  %v3107_v31 = vor.u32 %v3427_v16, %v3106_v35  ;;  %v4849_v49 = vld [vmem:[#allocation4_spill] sm:$0xff]  ;;  %v4850_v16 = vld [vmem:[#allocation5_spill] sm:$0xff] }
 0x272   :  { %2023 = vmatmul.bf16.gmra.mxu3 %v3063_v8 }
 0x273   :  { %2192 = vmatmul.bf16.gmra.mxu0 %v3067_v10  ;;  %v2417_v14 = vadd.f32 %v2416_v50, %v2151_v43  ;;  %v3424_v50 = vld [vmem:[%s4810_s0 + $0x4e4] sm:$0xf] }
 0x274   :  { %v1815_v18 = vpop.f32.mrf.mxu2  ;;  %v3103_v10 = vor.u32 %v3424_v50, %v3100_v12 }
 0x275   :  { %v1816_v17 = vadd.f32 %v1815_v18, %v1647_v44  ;;  %v1984_v41 = vpop.f32.mrf.mxu3  ;;  %v4845_v44 = vld [vmem:[#allocation23_spill] sm:$0xff] }
 0x276   :  { %v1648_v61 = vpop.f32.mrf.mxu1 }
 0x277   :  { %v1985_v39 = vadd.f32 %v1984_v41, %v1816_v17  ;;  %v1649_v11 = vadd.f32 %v1648_v61, %v4842_v28 }
 0x278   :  { %v2155_v33 = vpop.f32.mrf.mxu0 }
 0x279   :  { %v2154_v15 = vadd.f32 %v2153_v34, %v1985_v39 }
 0x27b   :  { %v2418_v42 = vadd.f32 %v2417_v14, %v2154_v15 }
 0x27c   :  { %v1817_v57 = vpop.f32.mrf.mxu2 }
 0x27d   :  { %v1818_v24 = vadd.f32 %v1817_v57, %v1649_v11  ;;  %v1986_v58 = vpop.f32.mrf.mxu3 }
 0x27e   :  { %v1651_v32 = vpop.f32.mrf.mxu1 }
 0x27f   :  { %v1987_v54 = vadd.f32 %v1986_v58, %v1818_v24  ;;  %v1652_v1 = vadd.f32 %v1651_v32, %v4843_v46  ;;  %v4847_v24 = vld [vmem:[#allocation2_spill] sm:$0xff] }
 0x280   :  { %v2158_v27 = vpop.f32.mrf.mxu0 }
 0x281   :  { %v2156_v63 = vadd.f32 %v2155_v33, %v1987_v54  ;;  %1690 = vmatmul.bf16.gmra.mxu1 %v3075_v30  ;;  %1859 = vmatmul.bf16.gmra.mxu2 %v3079_v4 }
 0x282   :  { %2028 = vmatmul.bf16.gmra.mxu3 %v3083_v5 }
 0x283   :  { %2197 = vmatmul.bf16.gmra.mxu0 %v3087_v53  ;;  %v2419_v3 = vadd.f32 %v2418_v42, %v2156_v63 }
 0x284   :  { %v1820_v45 = vpop.f32.mrf.mxu2 }
 0x285   :  { %v1821_v48 = vadd.f32 %v1820_v45, %v1652_v1  ;;  %v1989_v47 = vpop.f32.mrf.mxu3 }
 0x286   :  { %v1653_v25 = vpop.f32.mrf.mxu1 }
 0x287   :  { %v1990_v55 = vadd.f32 %v1989_v47, %v1821_v48  ;;  %v1654_v29 = vadd.f32 %v1653_v25, %v4844_v7 }
 0x288   :  { %v2160_v0 = vpop.f32.mrf.mxu0 }
 0x289   :  { %v2159_v2 = vadd.f32 %v2158_v27, %v1990_v55 }
 0x28b   :  { %v2420_v22 = vadd.f32 %v2419_v3, %v2159_v2  ;;  %v4848_v3 = vld [vmem:[#allocation3_spill] sm:$0xff] }
 0x28c   :  { %v1822_v56 = vpop.f32.mrf.mxu2 }
 0x28d   :  { %v1823_v37 = vadd.f32 %v1822_v56, %v1654_v29  ;;  %v1991_v59 = vpop.f32.mrf.mxu3 }
 0x28e   :  { %v1656_v8 = vpop.f32.mrf.mxu1 }
 0x28f   :  { %v1992_v34 = vadd.f32 %v1991_v59, %v1823_v37  ;;  %v1657_v18 = vadd.f32 %v1656_v8, %v4845_v44 }
 0x290   :  { %v2163_v43 = vpop.f32.mrf.mxu0 }
 0x291   :  { %v2161_v14 = vadd.f32 %v2160_v0, %v1992_v34  ;;  %1695 = vmatmul.bf16.gmra.mxu1 %v3095_v9  ;;  %1864 = vmatmul.bf16.gmra.mxu2 %v3099_v51 }
 0x292   :  { %2033 = vmatmul.bf16.gmra.mxu3 %v3103_v10 }
 0x293   :  { %2202 = vmatmul.bf16.gmra.mxu0 %v3107_v31  ;;  %v2421_v36 = vadd.f32 %v2420_v22, %v2161_v14 }
 0x294   :  { %v1825_v17 = vpop.f32.mrf.mxu2 }
 0x295   :  { %v1826_v41 = vadd.f32 %v1825_v17, %v1657_v18  ;;  %v1994_v61 = vpop.f32.mrf.mxu3 }
 0x296   :  { %v1658_v39 = vpop.f32.mrf.mxu1 }
 0x297   :  { %v1995_v33 = vadd.f32 %v1994_v61, %v1826_v41  ;;  %v1659_v21 = vadd.f32 %v1658_v39, %v4846_v19 }
 0x298   :  { %v2165_v15 = vpop.f32.mrf.mxu0 }
 0x299   :  { %v2164_v52 = vadd.f32 %v2163_v43, %v1995_v33  ;;  %v4851_v43 = vld [vmem:[#allocation6_spill] sm:$0xff] }
 0x29b   :  { %v2422_v60 = vadd.f32 %v2421_v36, %v2164_v52 }
 0x29c   :  { %v1827_v23 = vpop.f32.mrf.mxu2 }
 0x29d   :  { %v1828_v42 = vadd.f32 %v1827_v23, %v1659_v21  ;;  %v1996_v28 = vpop.f32.mrf.mxu3 }
 0x29e   :  { %v1661_v11 = vpop.f32.mrf.mxu1 }
 0x29f   :  { %v1997_v26 = vadd.f32 %v1996_v28, %v1828_v42  ;;  %v1662_v58 = vadd.f32 %v1661_v11, %v4847_v24 }
 0x2a0   :  { %v2168_v20 = vpop.f32.mrf.mxu0 }
 0x2a1   :  { %v2166_v40 = vadd.f32 %v2165_v15, %v1997_v26 }
 0x2a3   :  { %v2423_v57 = vadd.f32 %v2422_v60, %v2166_v40 }
 0x2a4   :  { %v1830_v30 = vpop.f32.mrf.mxu2 }
 0x2a5   :  { %v1831_v4 = vadd.f32 %v1830_v30, %v1662_v58  ;;  %v1999_v32 = vpop.f32.mrf.mxu3 }
 0x2a6   :  { %v1663_v5 = vpop.f32.mrf.mxu1 }
 0x2a7   :  { %v2000_v53 = vadd.f32 %v1999_v32, %v1831_v4  ;;  %v1664_v46 = vadd.f32 %v1663_v5, %v4848_v3 }
 0x2a8   :  { %v2170_v54 = vpop.f32.mrf.mxu0 }
 0x2a9   :  { %v2169_v27 = vadd.f32 %v2168_v20, %v2000_v53 }
 0x2ab   :  { %v2424_v63 = vadd.f32 %v2423_v57, %v2169_v27 }
 0x2ac   :  { %v1832_v1 = vpop.f32.mrf.mxu2 }
 0x2ad   :  { %v1833_v45 = vadd.f32 %v1832_v1, %v1664_v46  ;;  %v2001_v48 = vpop.f32.mrf.mxu3 }
 0x2ae   :  { %v1666_v47 = vpop.f32.mrf.mxu1 }
 0x2af   :  { %v2002_v25 = vadd.f32 %v2001_v48, %v1833_v45  ;;  %v1667_v6 = vadd.f32 %v1666_v47, %v4849_v49  ;;  %v3494_v48 = vmov 0.0   ;;  %v4852_v47 = vld [vmem:[#allocation7_spill] sm:$0xff] }
 0x2b0   :  { %v2173_v55 = vpop.f32.mrf.mxu0  ;;  %18 = vst [vmem:[%s4812_s3] sm:$0x3] %v3494_v48  ;;  %v4861_v48 = vld [vmem:[#allocation24_spill] sm:$0xff] }
 0x2b1   :  { %v2171_v0 = vadd.f32 %v2170_v54, %v2002_v25 }
 0x2b3   :  { %v2425_v2 = vadd.f32 %v2424_v63, %v2171_v0  ;;  %v4853_v0 = vld [vmem:[#allocation8_spill] sm:$0xff] }
 0x2b4   :  { %v1835_v38 = vpop.f32.mrf.mxu2 }
 0x2b5   :  { %v1836_v62 = vadd.f32 %v1835_v38, %v1667_v6  ;;  %v2004_v50 = vpop.f32.mrf.mxu3  ;;  %v4854_v38 = vld [vmem:[#allocation10_spill] sm:$0xff] }
 0x2b6   :  { %v1668_v22 = vpop.f32.mrf.mxu1 }
 0x2b7   :  { %v2005_v7 = vadd.f32 %v2004_v50, %v1836_v62  ;;  %v1669_v56 = vadd.f32 %v1668_v22, %v4850_v16 }
 0x2b8   :  { %v2175_v29 = vpop.f32.mrf.mxu0 }
 0x2b9   :  { %v2174_v12 = vadd.f32 %v2173_v55, %v2005_v7 }
 0x2bb   :  { %v2426_v35 = vadd.f32 %v2425_v2, %v2174_v12 }
 0x2bc   :  { %v1837_v37 = vpop.f32.mrf.mxu2 }
 0x2bd   :  { %v1838_v59 = vadd.f32 %v1837_v37, %v1669_v56  ;;  %v2006_v9 = vpop.f32.mrf.mxu3 }
 0x2be   :  { %v1671_v51 = vpop.f32.mrf.mxu1 }
 0x2bf   :  { %v2007_v8 = vadd.f32 %v2006_v9, %v1838_v59  ;;  %v1672_v14 = vadd.f32 %v1671_v51, %v4851_v43  ;;  %v4856_v59 = vld [vmem:[#allocation14_spill] sm:$0xff] }
 0x2c0   :  { %v2178_v10 = vpop.f32.mrf.mxu0 }
 0x2c1   :  { %v2176_v31 = vadd.f32 %v2175_v29, %v2007_v8 }
 0x2c3   :  { %v2427_v34 = vadd.f32 %v2426_v35, %v2176_v31  ;;  %v4855_v35 = vld [vmem:[#allocation12_spill] sm:$0xff] }
 0x2c4   :  { %v1840_v36 = vpop.f32.mrf.mxu2  ;;  %v4857_v31 = vld [vmem:[#allocation16_spill] sm:$0xff] }
 0x2c5   :  { %v1841_v44 = vadd.f32 %v1840_v36, %v1672_v14  ;;  %v2009_v18 = vpop.f32.mrf.mxu3 }
 0x2c6   :  { %v1673_v17 = vpop.f32.mrf.mxu1 }
 0x2c7   :  { %v2010_v41 = vadd.f32 %v2009_v18, %v1841_v44  ;;  %v1674_v25 = vadd.f32 %v1673_v17, %v4852_v47  ;;  %v4858_v17 = vld [vmem:[#allocation18_spill] sm:$0xff] }
 0x2c8   :  { %v2180_v61 = vpop.f32.mrf.mxu0 }
 0x2c9   :  { %v2179_v39 = vadd.f32 %v2178_v10, %v2010_v41 }
 0x2cb   :  { %v2428_v33 = vadd.f32 %v2427_v34, %v2179_v39 }
 0x2cc   :  { %v1842_v15 = vpop.f32.mrf.mxu2 }
 0x2cd   :  { %v2011_v52 = vpop.f32.mrf.mxu3  ;;  %v1843_v55 = vadd.f32 %v1842_v15, %v1674_v25 }
 0x2ce   :  { %v1676_v60 = vpop.f32.mrf.mxu1 }
 0x2cf   :  { %v1677_v2 = vadd.f32 %v1676_v60, %v4853_v0  ;;  %v2012_v7 = vadd.f32 %v2011_v52, %v1843_v55 }
 0x2d0   :  { %v2183_v19 = vpop.f32.mrf.mxu0 }
 0x2d1   :  { %v2181_v51 = vadd.f32 %v2180_v61, %v2012_v7 }
 0x2d3   :  { %v2429_v15 = vadd.f32 %v2428_v33, %v2181_v51 }
 0x2d4   :  { %v1845_v21 = vpop.f32.mrf.mxu2 }
 0x2d5   :  { %v2014_v23 = vpop.f32.mrf.mxu3  ;;  %v1846_v6 = vadd.f32 %v1845_v21, %v1677_v2 }
 0x2d6   :  { %v1678_v42 = vpop.f32.mrf.mxu1 }
 0x2d7   :  { %v1679_v62 = vadd.f32 %v1678_v42, %v4854_v38  ;;  %v2015_v56 = vadd.f32 %v2014_v23, %v1846_v6  ;;  %v4859_v42 = vld [vmem:[#allocation20_spill] sm:$0xff] }
 0x2d8   :  { %v2185_v28 = vpop.f32.mrf.mxu0 }
 0x2d9   :  { %v2184_v43 = vadd.f32 %v2183_v19, %v2015_v56 }
 0x2db   :  { %v2430_v61 = vadd.f32 %v2429_v15, %v2184_v43 }
 0x2dc   :  { %v1847_v11 = vpop.f32.mrf.mxu2 }
 0x2dd   :  { %v2016_v26 = vpop.f32.mrf.mxu3  ;;  %v1848_v29 = vadd.f32 %v1847_v11, %v1679_v62 }
 0x2de   :  { %v1681_v20 = vpop.f32.mrf.mxu1 }
 0x2df   :  { %v1682_v16 = vadd.f32 %v1681_v20, %v4855_v35  ;;  %v2017_v8 = vadd.f32 %v2016_v26, %v1848_v29 }
 0x2e0   :  { %v2188_v40 = vpop.f32.mrf.mxu0 }
 0x2e1   :  { %v2186_v52 = vadd.f32 %v2185_v28, %v2017_v8 }
 0x2e4   :  { %v1850_v57 = vpop.f32.mrf.mxu2 }
 0x2e5   :  { %v2019_v24 = vpop.f32.mrf.mxu3  ;;  %v1851_v37 = vadd.f32 %v1850_v57, %v1682_v16 }
 0x2e6   :  { %v1683_v58 = vpop.f32.mrf.mxu1 }
 0x2e7   :  { %v1684_v9 = vadd.f32 %v1683_v58, %v4856_v59  ;;  %v2020_v44 = vadd.f32 %v2019_v24, %v1851_v37  ;;  %v4860_v58 = vld [vmem:[#allocation22_spill] sm:$0xff] }
 0x2e8   :  { %v2190_v30 = vpop.f32.mrf.mxu0 }
 0x2e9   :  { %v2189_v26 = vadd.f32 %v2188_v40, %v2020_v44 }
 0x2ec   :  { %v1852_v4 = vpop.f32.mrf.mxu2 }
 0x2ed   :  { %v2021_v32 = vpop.f32.mrf.mxu3  ;;  %v1853_v10 = vadd.f32 %v1852_v4, %v1684_v9  ;;  %v2431_v4 = vadd.f32 %v2430_v61, %v2186_v52 }
 0x2ee   :  { %v1686_v5 = vpop.f32.mrf.mxu1 }
 0x2ef   :  { %v1687_v34 = vadd.f32 %v1686_v5, %v4857_v31  ;;  %v2022_v21 = vadd.f32 %v2021_v32, %v1853_v10  ;;  %v2432_v33 = vadd.f32 %v2431_v4, %v2189_v26 }
 0x2f0   :  { %v2193_v53 = vpop.f32.mrf.mxu0 }
 0x2f1   :  { %v2191_v5 = vadd.f32 %v2190_v30, %v2022_v21  ;;  %v2403_v30 = vrot.slane %v4587_v13, 4 }
 0x2f3   :  { %v2404_v16 = vadd.f32 %v2403_v30, %v4587_v13  ;;  %v2371_v13 = vld [vmem:[%s4812_s3] sm:$0x3] }
 0x2f4   :  { %v1855_v54 = vpop.f32.mrf.mxu2 }
 0x2f5   :  { %v2024_v27 = vpop.f32.mrf.mxu3  ;;  %v1856_v18 = vadd.f32 %v1855_v54, %v1687_v34 }
 0x2f6   :  { %v1688_v63 = vpop.f32.mrf.mxu1 }
 0x2f7   :  { %v1689_v41 = vadd.f32 %v1688_v63, %v4858_v17  ;;  %v2025_v20 = vadd.f32 %v2024_v27, %v1856_v18 }
 0x2f8   :  { %v2195_v3 = vpop.f32.mrf.mxu0 }
 0x2f9   :  { %v2194_v28 = vadd.f32 %v2193_v53, %v2025_v20 }
 0x2fc   :  { %v1857_v46 = vpop.f32.mrf.mxu2 }
 0x2fd   :  { %v2026_v1 = vpop.f32.mrf.mxu3  ;;  %v1858_v23 = vadd.f32 %v1857_v46, %v1689_v41 }
 0x2fe   :  { %v1691_v45 = vpop.f32.mrf.mxu1 }
 0x2ff   :  { %v1692_v11 = vadd.f32 %v1691_v45, %v4859_v42  ;;  %v2027_v24 = vadd.f32 %v2026_v1, %v1858_v23  ;;  %v2433_v45 = vadd.f32 %v2432_v33, %v2191_v5 }
 0x300   :  { %v2198_v49 = vpop.f32.mrf.mxu0 }
 0x301   :  { %v2196_v0 = vadd.f32 %v2195_v3, %v2027_v24  ;;  %v2434_v2 = vadd.f32 %v2433_v45, %v2194_v28 }
 0x303   :  { %v2435_v1 = vadd.f32 %v2434_v2, %v2196_v0 }
 0x304   :  { %v1860_v50 = vpop.f32.mrf.mxu2 }
 0x305   :  { %v2029_v22 = vpop.f32.mrf.mxu3  ;;  %v1861_v57 = vadd.f32 %v1860_v50, %v1692_v11  ;;  %v4862_v50 = vld [vmem:[#allocation26_spill] sm:$0xff] }
 0x306   :  { %v1693_v12 = vpop.f32.mrf.mxu1 }
 0x307   :  { %v1694_v19 = vadd.f32 %v1693_v12, %v4860_v58  ;;  %v2030_v25 = vadd.f32 %v2029_v22, %v1861_v57 }
 0x308   :  { %v2200_v14 = vpop.f32.mrf.mxu0 }
 0x309   :  { %v2199_v6 = vadd.f32 %v2198_v49, %v2030_v25  ;;  %v2405_v49 = vrot.slane %v2404_v16, 2 }
 0x30b   :  { %v2436_v12 = vadd.f32 %v2435_v1, %v2199_v6  ;;  %v2406_v10 = vadd.f32 %v2405_v49, %v2404_v16 }
 0x30c   :  { %v1862_v36 = vpop.f32.mrf.mxu2 }
 0x30d   :  { %v2031_v39 = vpop.f32.mrf.mxu3  ;;  %v1863_v54 = vadd.f32 %v1862_v36, %v1694_v19  ;;  %v2407_v43 = vrot.slane %v2406_v10, 1 }
 0x30e   :  { %v1696_v60 = vpop.f32.mrf.mxu1 }
 0x30f   :  { %v1697_v63 = vadd.f32 %v1696_v60, %v4861_v48  ;;  %v2032_v40 = vadd.f32 %v2031_v39, %v1863_v54  ;;  %v2408_v44 = vadd.f32 %v2407_v43, %v2406_v10  ;;  %v3493_v39 = vld [vmem:[%s4811_s2] ss:$0 sm:$0xff] }
 0x310   :  { %v2203_v55 = vpop.f32.mrf.mxu0 }
 0x311   :  { %v2201_v62 = vadd.f32 %v2200_v14, %v2032_v40 }
 0x313   :  { %v2437_v56 = vadd.f32 %v2436_v12, %v2201_v62 }
 0x314   :  { %v1865_v47 = vpop.f32.mrf.mxu2 }
 0x315   :  { %v1866_v32 = vadd.f32 %v1865_v47, %v1697_v63  ;;  %v2034_v46 = vpop.f32.mrf.mxu3 }
 0x316   :  { %v1698_v27 = vpop.f32.mrf.mxu1 }
 0x317   :  { %v2035_v38 = vadd.f32 %v2034_v46, %v1866_v32  ;;  %v1699_v7 = vadd.f32 %v1698_v27, %v4862_v50 }
 0x318   :  { %v2205_v37 = vpop.f32.mrf.mxu0 }
 0x319   :  { %v2204_v53 = vadd.f32 %v2203_v55, %v2035_v38 }
 0x31b   :  { %v2438_v59 = vadd.f32 %v2437_v56, %v2204_v53 }
 0x31c   :  { %v1867_v29 = vpop.f32.mrf.mxu2 }
 0x31d   :  { %v1868_v22 = vadd.f32 %v1867_v29, %v1699_v7  ;;  %v2036_v35 = vpop.f32.mrf.mxu3 }
 0x31f   :  { %v2037_v3 = vadd.f32 %v2036_v35, %v1868_v22 }
 0x321   :  { %v2206_v9 = vadd.f32 %v2205_v37, %v2037_v3 }
 0x323   :  { %v2439_v51 = vadd.f32 %v2438_v59, %v2206_v9 }
 0x325   :  { %v2440_v8 = vrot.slane %v2439_v51, 4 }
 0x327   :  { %v2441_v31 = vadd.f32 %v2440_v8, %v2439_v51 }
 0x329   :  { %v2442_v34 = vrot.slane %v2441_v31, 2 }
 0x32b   :  { %v2443_v14 = vadd.f32 %v2442_v34, %v2441_v31 }
 0x32d   :  { %v2444_v36 = vrot.slane %v2443_v14, 1 }
 0x32f   :  { %v2445_v18 = vadd.f32 %v2444_v36, %v2443_v14 }
 0x331   :  { %v2449_v17 = vsel %vm2448_vm0, %v2445_v18, %v2408_v44 }
 0x332   :  { %v2451_v41 = vadd.f32 %v2449_v17, %v2371_v13 }
 0x334   :  { %2452 = vst [vmem:[%s4812_s3] sm:$0x3] %v2451_v41 }
 0x33b   :  { %v2456_v15 = vld [vmem:[%s4812_s3] sm:$0x3] }
 0x33c   :  { %v2457_v52 = vmul.f32 0.00390625, %v2456_v15 }
 0x33e   :  { %v2462_v60 = vadd.f32 %v3493_v39, %v2457_v52 }
 0x340   :  { %2463 = vst [vmem:[%s4812_s3] sm:$0x3] %v2462_v60 }

// kernel: soft_binary.11
= control target key start
LH: loop header
LB: loop body
LE: loop exit
PB: predicated region body
PF: predicated region fallthrough
CT: control target
= control target key end

     0   :  { %vm2078_vm0 = vcmask 130112   ;;  %vm2082_vm1 = vcmask 195712   ;;  %vm2086_vm2 = vcmask 261312   ;;  %vm2090_vm3 = vcmask 326912   ;;  %s3354_s0 = inlined_call_operand.vmem [shape: bf16[2,256,128], index: 0, kind: input, shape index: {}]   ;;  %s3355_s1 = inlined_call_operand.vmem [shape: f32[2,128], index: 1, kind: input, shape index: {}]   ;;  %s3356_s2 = inlined_call_operand.vmem [shape: f32[2,256], index: 2, kind: output, shape index: {}]  }
   0x1   :  { %v2370_v0 = vld [vmem:[%s3354_s0 + $0x10] sm:$0xff]   ;;  %v2562_v1 = vld [vmem:[%s3355_s1] sm:$0x3]  ;;  %v2369_v2 = vld [vmem:[%s3354_s0 + $0x8] sm:$0xff]   ;;  %vm2094_vm4 = vcmask 392512   ;;  %vm2098_vm5 = vcmask 458112  }
   0x2   :  { %v2251_v3 = vunpack.c.l.bf16 %v2370_v0  ;;  %v2568_v4 = vperm.slane %v2562_v1, 0  ;;  %v2247_v5 = vunpack.c.l.bf16 %v2369_v2  ;;  %v2242_v6 = vld [vmem:[%s3354_s0] sm:$0xff]   ;;  %v2252_v11 = vunpack.c.h.bf16 %v2370_v0  ;;  %v2371_v18 = vld [vmem:[%s3354_s0 + $0x18] sm:$0xff]   ;;  %v2373_v25 = vld [vmem:[%s3354_s0 + $0x28] sm:$0xff]  }
   0x3   :  { %v2243_v7 = vunpack.c.l.bf16 %v2242_v6  ;;  %v2248_v12 = vunpack.c.h.bf16 %v2369_v2  ;;  %v2244_v13 = vunpack.c.h.bf16 %v2242_v6  ;;  %v2372_v17 = vld [vmem:[%s3354_s0 + $0x20] sm:$0xff]   ;;  %v2256_v20 = vunpack.c.h.bf16 %v2371_v18  ;;  %v2375_v32 = vld [vmem:[%s3354_s0 + $0x38] sm:$0xff]   ;;  %v2374_v33 = vld [vmem:[%s3354_s0 + $0x30] sm:$0xff]  }
   0x4   :  { %v150_v8 = vmul.f32 %v2251_v3, %v2568_v4  ;;  %v148_v9 = vmul.f32 %v2247_v5, %v2568_v4  ;;  %v151_v14 = vmul.f32 %v2252_v11, %v2568_v4  ;;  %v2259_v19 = vunpack.c.l.bf16 %v2372_v17  ;;  %v2376_v40 = vld [vmem:[%s3354_s0 + $0x40] sm:$0xff]   ;;  %v2378_v47 = vld [vmem:[%s3354_s0 + $0x50] sm:$0xff]   ;;  %v2377_v48 = vld [vmem:[%s3354_s0 + $0x48] sm:$0xff]  }
   0x5   :  { %v146_v10 = vmul.f32 %v2243_v7, %v2568_v4  ;;  %v149_v15 = vmul.f32 %v2248_v12, %v2568_v4  ;;  %v147_v16 = vmul.f32 %v2244_v13, %v2568_v4  ;;  %v2255_v21 = vunpack.c.l.bf16 %v2371_v18  ;;  %v2379_v55 = vld [vmem:[%s3354_s0 + $0x58] sm:$0xff]   ;;  %v2381_v62 = vld [vmem:[%s3354_s0 + $0x68] sm:$0xff]   ;;  %v2380_v63 = vld [vmem:[%s3354_s0 + $0x60] sm:$0xff]  }
   0x6   :  { %218 = vadd.xlane.f32.xlu2 %v150_v8  ;;  %214 = vadd.xlane.f32.xlu1 %v148_v9  ;;  %v154_v22 = vmul.f32 %v2259_v19, %v2568_v4  ;;  %v153_v23 = vmul.f32 %v2256_v20, %v2568_v4  ;;  %v2264_v26 = vunpack.c.h.bf16 %v2373_v25  ;;  %v2263_v27 = vunpack.c.l.bf16 %v2373_v25  ;;  %v2382_v8 = vld [vmem:[%s3354_s0 + $0x70] sm:$0xff]  }
   0x7   :  { %210 = vadd.xlane.f32.xlu0 %v146_v10  ;;  %v152_v24 = vmul.f32 %v2255_v21, %v2568_v4  ;;  %v2260_v28 = vunpack.c.h.bf16 %v2372_v17  ;;  %v2271_v34 = vunpack.c.l.bf16 %v2375_v32  ;;  %v2268_v35 = vunpack.c.h.bf16 %v2374_v33  ;;  %v2383_v17 = vld [vmem:[%s3354_s0 + $0x78] sm:$0xff]  }
   0x8   :  { %v157_v29 = vmul.f32 %v2264_v26, %v2568_v4  ;;  %v156_v30 = vmul.f32 %v2263_v27, %v2568_v4  ;;  %v2267_v36 = vunpack.c.l.bf16 %v2374_v33  ;;  %v2276_v41 = vunpack.c.h.bf16 %v2376_v40 }
   0x9   :  { %v155_v31 = vmul.f32 %v2260_v28, %v2568_v4  ;;  %v160_v37 = vmul.f32 %v2271_v34, %v2568_v4  ;;  %v159_v38 = vmul.f32 %v2268_v35, %v2568_v4  ;;  %v2275_v42 = vunpack.c.l.bf16 %v2376_v40 }
   0xa   :  { %v158_v39 = vmul.f32 %v2267_v36, %v2568_v4  ;;  %v2272_v43 = vunpack.c.h.bf16 %v2375_v32  ;;  %v163_v44 = vmul.f32 %v2276_v41, %v2568_v4  ;;  %v2283_v49 = vunpack.c.l.bf16 %v2378_v47 }
   0xb   :  { %v162_v45 = vmul.f32 %v2275_v42, %v2568_v4  ;;  %v2280_v50 = vunpack.c.h.bf16 %v2377_v48  ;;  %v2279_v51 = vunpack.c.l.bf16 %v2377_v48  ;;  %v2288_v56 = vunpack.c.h.bf16 %v2379_v55 }
   0xc   :  { %v161_v46 = vmul.f32 %v2272_v43, %v2568_v4  ;;  %v166_v52 = vmul.f32 %v2283_v49, %v2568_v4  ;;  %v2287_v57 = vunpack.c.l.bf16 %v2379_v55  ;;  %v2284_v58 = vunpack.c.h.bf16 %v2378_v47 }
   0xd   :  { %v165_v53 = vmul.f32 %v2280_v50, %v2568_v4  ;;  %v164_v54 = vmul.f32 %v2279_v51, %v2568_v4  ;;  %v169_v59 = vmul.f32 %v2288_v56, %v2568_v4  ;;  %v2295_v0 = vunpack.c.l.bf16 %v2381_v62 }
   0xe   :  { %220 = vadd.xlane.f32.xlu2 %v151_v14  ;;  %216 = vadd.xlane.f32.xlu1 %v149_v15  ;;  %v168_v60 = vmul.f32 %v2287_v57, %v2568_v4  ;;  %v167_v61 = vmul.f32 %v2284_v58, %v2568_v4  ;;  %v2292_v2 = vunpack.c.h.bf16 %v2380_v63  ;;  %v2291_v3 = vunpack.c.l.bf16 %v2380_v63  ;;  %v2392_v63 = vld [vmem:[%s3354_s0 + $0xc0] sm:$0xff]  }
   0xf   :  { %212 = vadd.xlane.f32.xlu0 %v147_v16  ;;  %v172_v5 = vmul.f32 %v2295_v0, %v2568_v4  ;;  %v2300_v9 = vunpack.c.h.bf16 %v2382_v8  ;;  %v2299_v10 = vunpack.c.l.bf16 %v2382_v8  ;;  %v2296_v11 = vunpack.c.h.bf16 %v2381_v62  ;;  %v2384_v16 = vld [vmem:[%s3354_s0 + $0x80] sm:$0xff]   ;;  %v2393_v62 = vld [vmem:[%s3354_s0 + $0xc8] sm:$0xff]  }
  0x10   :  { %v171_v6 = vmul.f32 %v2292_v2, %v2568_v4  ;;  %v170_v7 = vmul.f32 %v2291_v3, %v2568_v4  ;;  %v141_v14 = vrot.slane %v2562_v1, 1  ;;  %v2307_v18 = vunpack.c.l.bf16 %v2384_v16 }
  0x11   :  { %v175_v12 = vmul.f32 %v2300_v9, %v2568_v4  ;;  %v174_v13 = vmul.f32 %v2299_v10, %v2568_v4  ;;  %v173_v15 = vmul.f32 %v2296_v11, %v2568_v4  ;;  %v2304_v20 = vunpack.c.h.bf16 %v2383_v17 }
  0x12   :  { %v2646_v19 = vperm.slane %v141_v14, 0  ;;  %v2303_v21 = vunpack.c.l.bf16 %v2383_v17  ;;  %v2308_v27 = vunpack.c.h.bf16 %v2384_v16  ;;  %v2536_v0 = vmov 269488144  }
  0x13   :  { %v531_v2 = vunpack.c.l.s4 %v2536_v0  ;;  %v2537_v3 = vmov 842150450   ;;  %v2539_v8 = vmov 1987475062   ;;  %v2343_v11 = vunpack.c.l.bf16 %v2393_v62 }
  0x14   :  { %v178_v1 = vmul.f32 %v2307_v18, %v2646_v19  ;;  %v543_v9 = vunpack.c.l.s4 %v2539_v8  ;;  %vm2102_vm6 = vcmask 523712   ;;  %vm2106_vm7 = vcmask 589312  }
  0x15   :  { %v2693_v14 = vunpack.c.0.s8 %v531_v2  ;;  %vm2110_vm8 = vcmask 654912   ;;  %vm2114_vm9 = vcmask 720512   ;;  %vm2118_vm10 = vcmask 786112  }
  0x16   :  { %226 = vadd.xlane.f32.xlu2 %v154_v22  ;;  %224 = vadd.xlane.f32.xlu1 %v153_v23  ;;  %v177_v22 = vmul.f32 %v2304_v20, %v2568_v4  ;;  %v176_v23 = vmul.f32 %v2303_v21, %v2568_v4  ;;  %v2387_v4 = vld [vmem:[%s3354_s0 + $0x98] sm:$0xff]   ;;  %v2699_v18 = vunpack.c.0.s8 %v543_v9  ;;  %v196_v20 = vmul.f32 %v2343_v11, %v2646_v19 }
  0x17   :  { %222 = vadd.xlane.f32.xlu0 %v152_v24  ;;  %v2385_v24 = vld [vmem:[%s3354_s0 + $0x88] sm:$0xff]   ;;  %v2319_v32 = vunpack.c.l.bf16 %v2387_v4  ;;  %v2320_v41 = vunpack.c.h.bf16 %v2387_v4  ;;  %vm2122_vm11 = vcmask 851712   ;;  %vm2126_vm12 = vcmask 917312  }
  0x18   :  { %v2312_v25 = vunpack.c.h.bf16 %v2385_v24  ;;  %v2311_v26 = vunpack.c.l.bf16 %v2385_v24  ;;  %v2394_v24 = vld [vmem:[%s3354_s0 + $0xd0] sm:$0xff]   ;;  %vm2130_vm13 = vcmask 982912   ;;  %vm2134_vm14 = vcmask 1048512  }
  0x19   :  { %v184_v35 = vmul.f32 %v2319_v32, %v2646_v19  ;;  %v2348_v4 = vunpack.c.h.bf16 %v2394_v24  ;;  %v2344_v32 = vunpack.c.h.bf16 %v2393_v62  ;;  %vm2229_vm15 = vcmask 1041409  }
  0x1a   :  { %v181_v28 = vmul.f32 %v2312_v25, %v2646_v19 }
  0x1e   :  { %232 = vadd.xlane.f32.xlu2 %v157_v29  ;;  %230 = vadd.xlane.f32.xlu1 %v156_v30  ;;  %v180_v29 = vmul.f32 %v2311_v26, %v2646_v19  ;;  %v179_v30 = vmul.f32 %v2308_v27, %v2646_v19 }
  0x1f   :  { %228 = vadd.xlane.f32.xlu0 %v155_v31  ;;  %v2386_v31 = vld [vmem:[%s3354_s0 + $0x90] sm:$0xff]  }
  0x20   :  { %v2316_v33 = vunpack.c.h.bf16 %v2386_v31  ;;  %v2315_v34 = vunpack.c.l.bf16 %v2386_v31  ;;  %v2347_v31 = vunpack.c.l.bf16 %v2394_v24 }
  0x22   :  { %v183_v36 = vmul.f32 %v2316_v33, %v2646_v19 }
  0x26   :  { %238 = vadd.xlane.f32.xlu2 %v160_v37  ;;  %236 = vadd.xlane.f32.xlu1 %v159_v38  ;;  %v182_v37 = vmul.f32 %v2315_v34, %v2646_v19  ;;  %v2388_v38 = vld [vmem:[%s3354_s0 + $0xa0] sm:$0xff]   ;;  %v199_v34 = vmul.f32 %v2348_v4, %v2646_v19 }
  0x27   :  { %234 = vadd.xlane.f32.xlu0 %v158_v39  ;;  %v2324_v39 = vunpack.c.h.bf16 %v2388_v38  ;;  %v2323_v40 = vunpack.c.l.bf16 %v2388_v38  ;;  %v2396_v38 = vld [vmem:[%s3354_s0 + $0xe0] sm:$0xff]  }
  0x29   :  { %v187_v42 = vmul.f32 %v2324_v39, %v2646_v19  ;;  %v186_v43 = vmul.f32 %v2323_v40, %v2646_v19  ;;  %v2395_v39 = vld [vmem:[%s3354_s0 + $0xd8] sm:$0xff]  }
  0x2e   :  { %244 = vadd.xlane.f32.xlu2 %v163_v44  ;;  %242 = vadd.xlane.f32.xlu1 %v162_v45  ;;  %v185_v44 = vmul.f32 %v2320_v41, %v2646_v19  ;;  %v2390_v45 = vld [vmem:[%s3354_s0 + $0xb0] sm:$0xff]  }
  0x2f   :  { %240 = vadd.xlane.f32.xlu0 %v161_v46  ;;  %v2389_v46 = vld [vmem:[%s3354_s0 + $0xa8] sm:$0xff]   ;;  %v2331_v47 = vunpack.c.l.bf16 %v2390_v45  ;;  %v2332_v56 = vunpack.c.h.bf16 %v2390_v45  ;;  %v2355_v45 = vunpack.c.l.bf16 %v2396_v38 }
  0x30   :  { %v2328_v48 = vunpack.c.h.bf16 %v2389_v46  ;;  %v2327_v49 = vunpack.c.l.bf16 %v2389_v46  ;;  %v2352_v46 = vunpack.c.h.bf16 %v2395_v39 }
  0x31   :  { %v190_v50 = vmul.f32 %v2331_v47, %v2646_v19 }
  0x32   :  { %v189_v51 = vmul.f32 %v2328_v48, %v2646_v19 }
  0x36   :  { %250 = vadd.xlane.f32.xlu2 %v166_v52  ;;  %248 = vadd.xlane.f32.xlu1 %v165_v53  ;;  %v188_v52 = vmul.f32 %v2327_v49, %v2646_v19  ;;  %v2391_v53 = vld [vmem:[%s3354_s0 + $0xb8] sm:$0xff]   ;;  %v2351_v49 = vunpack.c.l.bf16 %v2395_v39 }
  0x37   :  { %246 = vadd.xlane.f32.xlu0 %v164_v54  ;;  %v2336_v54 = vunpack.c.h.bf16 %v2391_v53  ;;  %v2335_v55 = vunpack.c.l.bf16 %v2391_v53 }
  0x39   :  { %v193_v58 = vmul.f32 %v2336_v54, %v2646_v19  ;;  %v202_v54 = vmul.f32 %v2355_v45, %v2646_v19 }
  0x3e   :  { %256 = vadd.xlane.f32.xlu2 %v169_v59  ;;  %254 = vadd.xlane.f32.xlu1 %v168_v60  ;;  %v192_v59 = vmul.f32 %v2335_v55, %v2646_v19  ;;  %v201_v55 = vmul.f32 %v2352_v46, %v2646_v19 }
  0x3f   :  { %252 = vadd.xlane.f32.xlu0 %v167_v61  ;;  %v191_v61 = vmul.f32 %v2332_v56, %v2646_v19 }
  0x46   :  { %262 = vadd.xlane.f32.xlu2 %v172_v5  ;;  %260 = vadd.xlane.f32.xlu1 %v171_v6  ;;  %v535_v5 = vunpack.c.l.s4 %v2537_v3  ;;  %v2538_v6 = vmov 1414812756  }
  0x47   :  { %258 = vadd.xlane.f32.xlu0 %v170_v7  ;;  %v539_v7 = vunpack.c.l.s4 %v2538_v6 }
  0x49   :  { %v2697_v16 = vunpack.c.0.s8 %v539_v7  ;;  %v2356_v7 = vunpack.c.h.bf16 %v2396_v38 }
  0x4e   :  { %268 = vadd.xlane.f32.xlu2 %v175_v12  ;;  %266 = vadd.xlane.f32.xlu1 %v174_v13  ;;  %v2340_v12 = vunpack.c.h.bf16 %v2392_v63  ;;  %v2339_v13 = vunpack.c.l.bf16 %v2392_v63 }
  0x4f   :  { %264 = vadd.xlane.f32.xlu0 %v173_v15  ;;  %v2695_v15 = vunpack.c.0.s8 %v535_v5 }
  0x50   :  { %v195_v21 = vmul.f32 %v2340_v12, %v2646_v19 }
  0x56   :  { %274 = vadd.xlane.f32.xlu2 %v178_v1  ;;  %272 = vadd.xlane.f32.xlu1 %v177_v22 }
  0x57   :  { %270 = vadd.xlane.f32.xlu0 %v176_v23  ;;  %v194_v23 = vmul.f32 %v2339_v13, %v2646_v19 }
  0x5e   :  { %280 = vadd.xlane.f32.xlu2 %v181_v28  ;;  %278 = vadd.xlane.f32.xlu1 %v180_v29 }
  0x5f   :  { %276 = vadd.xlane.f32.xlu0 %v179_v30 }
  0x66   :  { %286 = vadd.xlane.f32.xlu2 %v184_v35  ;;  %284 = vadd.xlane.f32.xlu1 %v183_v36  ;;  %v198_v35 = vmul.f32 %v2347_v31, %v2646_v19 }
  0x67   :  { %282 = vadd.xlane.f32.xlu0 %v182_v37  ;;  %v197_v37 = vmul.f32 %v2344_v32, %v2646_v19 }
  0x6e   :  { %292 = vadd.xlane.f32.xlu2 %v187_v42  ;;  %290 = vadd.xlane.f32.xlu1 %v186_v43 }
  0x6f   :  { %288 = vadd.xlane.f32.xlu0 %v185_v44 }
  0x76   :  { %298 = vadd.xlane.f32.xlu2 %v190_v50  ;;  %296 = vadd.xlane.f32.xlu1 %v189_v51 }
  0x77   :  { %294 = vadd.xlane.f32.xlu0 %v188_v52 }
  0x79   :  { %v215_v10 = vpop.xlane.xlu1 %214  ;;  %v219_v25 = vpop.xlane.xlu2 %218 }
  0x7a   :  { %v211_v57 = vpop.xlane.xlu0 %210  ;;  %v340_v17 = vand.u32 2147483647, %v215_v10  ;;  %v342_v36 = vand.u32 2147483647, %v219_v25 }
  0x7b   :  { %v338_v60 = vand.u32 2147483647, %v211_v57 }
  0x7d   :  { %2408 = vtanh.f32 %v338_v60  ;;  %v2397_v60 = vld [vmem:[%s3354_s0 + $0xe8] sm:$0xff]  }
  0x7e   :  { %304 = vadd.xlane.f32.xlu2 %v193_v58  ;;  %302 = vadd.xlane.f32.xlu1 %v192_v59  ;;  %2410 = vtanh.f32 %v340_v17  ;;  %v200_v58 = vmul.f32 %v2351_v49, %v2646_v19  ;;  %v2360_v63 = vunpack.c.h.bf16 %v2397_v60  ;;  %v2359_v3 = vunpack.c.l.bf16 %v2397_v60 }
  0x7f   :  { %300 = vadd.xlane.f32.xlu0 %v191_v61 }
  0x80   :  { %v205_v12 = vmul.f32 %v2360_v63, %v2646_v19  ;;  %v204_v17 = vmul.f32 %v2359_v3, %v2646_v19 }
  0x81   :  { %v217_v40 = vpop.xlane.xlu1 %216  ;;  %v221_v43 = vpop.xlane.xlu2 %220 }
  0x82   :  { %v213_v22 = vpop.xlane.xlu0 %212  ;;  %v341_v48 = vand.u32 2147483647, %v217_v40  ;;  %v343_v9 = vand.u32 2147483647, %v221_v43 }
  0x83   :  { %v2409_v1 = vpop.eup %2408  ;;  %v339_v30 = vand.u32 2147483647, %v213_v22  ;;  %v2398_v22 = vld [vmem:[%s3354_s0 + $0xf0] sm:$0xff]  }
  0x84   :  { %v533_v26 = vperm.slane %v2409_v1, %v2693_v14  ;;  %v537_v27 = vperm.slane %v2409_v1, %v2695_v15  ;;  %v541_v28 = vperm.slane %v2409_v1, %v2697_v16  ;;  %v545_v29 = vperm.slane %v2409_v1, %v2699_v18  ;;  %v2411_v33 = vpop.eup %2410  ;;  %v2750_v1 = vld [vmem:[%s3354_s0 + $0xf8] sm:$0xff]  }
  0x85   :  { %2412 = vtanh.f32 %v339_v30  ;;  %v565_v41 = vperm.slane %v2411_v33, %v2693_v14  ;;  %v569_v44 = vperm.slane %v2411_v33, %v2695_v15  ;;  %v573_v47 = vperm.slane %v2411_v33, %v2697_v16 }
  0x86   :  { %1554 = vst [vmem:[#allocation1] ss:$4 sm:$0xff] %v533_v26  ;;  %310 = vadd.xlane.f32.xlu2 %v196_v20  ;;  %308 = vadd.xlane.f32.xlu1 %v195_v21  ;;  %2414 = vtanh.f32 %v342_v36  ;;  %v577_v51 = vperm.slane %v2411_v33, %v2699_v18  ;;  %v203_v20 = vmul.f32 %v2356_v7, %v2646_v19  ;;  %v2363_v4 = vunpack.c.l.bf16 %v2398_v22 }
  0x87   :  { %1556 = vst [vmem:[#allocation1 + $0x1] ss:$4 sm:$0xff] %v537_v27  ;;  %306 = vadd.xlane.f32.xlu0 %v194_v23  ;;  %2416 = vtanh.f32 %v341_v48 }
  0x88   :  { %1558 = vst [vmem:[#allocation1 + $0x2] ss:$4 sm:$0xff] %v541_v28  ;;  %v2367_v28 = vunpack.c.l.bf16 %v2750_v1  ;;  %v206_v39 = vmul.f32 %v2363_v4, %v2646_v19 }
  0x89   :  { %1560 = vst [vmem:[#allocation1 + $0x3] ss:$4 sm:$0xff] %v545_v29  ;;  %v227_v2 = vpop.xlane.xlu2 %226  ;;  %v225_v26 = vpop.xlane.xlu1 %224  ;;  %v2364_v29 = vunpack.c.h.bf16 %v2398_v22 }
  0x8a   :  { %v223_v57 = vpop.xlane.xlu0 %222  ;;  %v346_v30 = vand.u32 2147483647, %v227_v2  ;;  %v345_v38 = vand.u32 2147483647, %v225_v26 }
  0x8b   :  { %v2413_v42 = vpop.eup %2412  ;;  %v344_v62 = vand.u32 2147483647, %v223_v57  ;;  %v207_v36 = vmul.f32 %v2364_v29, %v2646_v19 }
  0x8c   :  { %v549_v52 = vperm.slane %v2413_v42, %v2693_v14  ;;  %v553_v53 = vperm.slane %v2413_v42, %v2695_v15  ;;  %v557_v56 = vperm.slane %v2413_v42, %v2697_v16  ;;  %v561_v59 = vperm.slane %v2413_v42, %v2699_v18  ;;  %v2415_v61 = vpop.eup %2414 }
  0x8d   :  { %v597_v0 = vperm.slane %v2415_v61, %v2693_v14  ;;  %v2417_v5 = vpop.eup %2416  ;;  %v601_v6 = vperm.slane %v2415_v61, %v2695_v15  ;;  %v605_v8 = vperm.slane %v2415_v61, %v2697_v16  ;;  %2418 = vtanh.f32 %v344_v62 }
  0x8e   :  { %316 = vadd.xlane.f32.xlu2 %v199_v34  ;;  %314 = vadd.xlane.f32.xlu1 %v198_v35  ;;  %1562 = vst [vmem:[#allocation1 + $0x20] ss:$4 sm:$0xff] %v549_v52  ;;  %v609_v10 = vperm.slane %v2415_v61, %v2699_v18  ;;  %v581_v13 = vperm.slane %v2417_v5, %v2693_v14  ;;  %2420 = vtanh.f32 %v343_v9 }
  0x8f   :  { %312 = vadd.xlane.f32.xlu0 %v197_v37  ;;  %1564 = vst [vmem:[#allocation1 + $0x21] ss:$4 sm:$0xff] %v553_v53  ;;  %v585_v21 = vperm.slane %v2417_v5, %v2695_v15  ;;  %v589_v23 = vperm.slane %v2417_v5, %v2697_v16  ;;  %v593_v25 = vperm.slane %v2417_v5, %v2699_v18  ;;  %2422 = vtanh.f32 %v346_v30 }
  0x90   :  { %v2723_v50 = vld.sshfl [vmem:[#allocation1] sm:$0xff pattern:$0x73625140]  ;;  %1566 = vst [vmem:[#allocation1 + $0x22] ss:$4 sm:$0xff] %v557_v56  ;;  %v208_v35 = vmul.f32 %v2367_v28, %v2646_v19  ;;  %2424 = vtanh.f32 %v345_v38  ;;  %v2368_v53 = vunpack.c.h.bf16 %v2750_v1 }
  0x91   :  { %1571 = vst [vmem:[#allocation1] ss:$4 sm:$0xff] %v565_v41  ;;  %v2760_v31 = vpop.xlane.xlu2 %232  ;;  %v231_v45 = vpop.xlane.xlu1 %230 }
  0x92   :  { %1572 = vst [vmem:[#allocation1 + $0x1] ss:$4 sm:$0xff] %v569_v44  ;;  %v348_v52 = vand.u32 2147483647, %v231_v45 }
  0x93   :  { %1573 = vst [vmem:[#allocation1 + $0x2] ss:$4 sm:$0xff] %v573_v47  ;;  %v2419_v27 = vpop.eup %2418 }
  0x94   :  { %1574 = vst [vmem:[#allocation1 + $0x3] ss:$4 sm:$0xff] %v577_v51  ;;  %v629_v32 = vperm.slane %v2419_v27, %v2693_v14  ;;  %v2421_v33 = vpop.eup %2420  ;;  %v633_v34 = vperm.slane %v2419_v27, %v2695_v15  ;;  %v637_v37 = vperm.slane %v2419_v27, %v2697_v16  ;;  %v641_v41 = vperm.slane %v2419_v27, %v2699_v18  ;;  %v229_v51 = vpop.xlane.xlu0 %228 }
  0x95   :  { %1568 = vst [vmem:[#allocation1 + $0x23] ss:$4 sm:$0xff] %v561_v59  ;;  %v613_v42 = vperm.slane %v2421_v33, %v2693_v14  ;;  %v617_v43 = vperm.slane %v2421_v33, %v2695_v15  ;;  %v621_v44 = vperm.slane %v2421_v33, %v2697_v16  ;;  %v625_v46 = vperm.slane %v2421_v33, %v2699_v18  ;;  %v2423_v48 = vpop.eup %2422 }
  0x96   :  { %322 = vadd.xlane.f32.xlu2 %v202_v54  ;;  %320 = vadd.xlane.f32.xlu1 %v201_v55  ;;  %v661_v54 = vperm.slane %v2423_v48, %v2693_v14  ;;  %v2425_v55 = vpop.eup %2424  ;;  %v665_v56 = vperm.slane %v2423_v48, %v2695_v15  ;;  %v669_v57 = vperm.slane %v2423_v48, %v2697_v16  ;;  %2426 = vtanh.f32 %v348_v52 }
  0x97   :  { %318 = vadd.xlane.f32.xlu0 %v200_v58  ;;  %v347_v58 = vand.u32 2147483647, %v229_v51  ;;  %v209_v59 = vmul.f32 %v2368_v53, %v2646_v19  ;;  %v673_v60 = vperm.slane %v2423_v48, %v2699_v18  ;;  %v645_v62 = vperm.slane %v2425_v55, %v2693_v14 }
  0x98   :  { %v649_v63 = vperm.slane %v2425_v55, %v2695_v15  ;;  %v657_v19 = vperm.slane %v2425_v55, %v2699_v18 }
  0x99   :  { %v2777_v49 = vpop.xlane.xlu2 %238  ;;  %2428 = vtanh.f32 %v347_v58  ;;  %v237_v27 = vpop.xlane.xlu1 %236 }
  0x9a   :  { %v352_v29 = vand.u32 2147483647, %v2777_v49 }
  0x9b   :  { %v2740_v11 = vld.sshfl [vmem:[#allocation1] sm:$0xff pattern:$0x73625140] }
  0x9c   :  { %1581 = vst [vmem:[#allocation1] ss:$4 sm:$0xff] %v597_v0  ;;  %v2756_v24 = vld.sshfl [vmem:[#allocation1 + $0x20] sm:$0xff pattern:$0x73625140]  ;;  %v653_v0 = vperm.slane %v2425_v55, %v2697_v16  ;;  %v2427_v3 = vpop.eup %2426 }
  0x9d   :  { %1582 = vst [vmem:[#allocation1 + $0x1] ss:$4 sm:$0xff] %v601_v6  ;;  %v235_v6 = vpop.xlane.xlu0 %234 }
  0x9e   :  { %1583 = vst [vmem:[#allocation1 + $0x2] ss:$4 sm:$0xff] %v605_v8  ;;  %328 = vadd.xlane.f32.xlu2 %v205_v12  ;;  %326 = vadd.xlane.f32.xlu1 %v204_v17  ;;  %v350_v7 = vand.u32 2147483647, %v235_v6  ;;  %v693_v8 = vperm.slane %v2427_v3, %v2693_v14  ;;  %v349_v12 = vand.u32 2147483647, %v2760_v31 }
  0x9f   :  { %1584 = vst [vmem:[#allocation1 + $0x3] ss:$4 sm:$0xff] %v609_v10  ;;  %324 = vadd.xlane.f32.xlu0 %v203_v20  ;;  %v2429_v9 = vpop.eup %2428  ;;  %v697_v10 = vperm.slane %v2427_v3, %v2695_v15  ;;  %v705_v20 = vperm.slane %v2427_v3, %v2699_v18 }
  0xa0   :  { %1575 = vst [vmem:[#allocation1 + $0x20] ss:$4 sm:$0xff] %v581_v13  ;;  %v701_v13 = vperm.slane %v2427_v3, %v2697_v16  ;;  %2430 = vtanh.f32 %v350_v7  ;;  %v681_v1 = vperm.slane %v2429_v9, %v2695_v15  ;;  %v685_v22 = vperm.slane %v2429_v9, %v2697_v16 }
  0xa1   :  { %1576 = vst [vmem:[#allocation1 + $0x21] ss:$4 sm:$0xff] %v585_v21  ;;  %v2793_v5 = vpop.xlane.xlu2 %244  ;;  %v677_v21 = vperm.slane %v2429_v9, %v2693_v14  ;;  %2432 = vtanh.f32 %v349_v12 }
  0xa2   :  { %1577 = vst [vmem:[#allocation1 + $0x22] ss:$4 sm:$0xff] %v589_v23  ;;  %2434 = vtanh.f32 %v352_v29  ;;  %v355_v6 = vand.u32 2147483647, %v2793_v5 }
  0xa3   :  { %1578 = vst [vmem:[#allocation1 + $0x23] ss:$4 sm:$0xff] %v593_v25  ;;  %v689_v25 = vperm.slane %v2429_v9, %v2699_v18 }
  0xa5   :  { %v241_v30 = vpop.xlane.xlu0 %240 }
  0xa6   :  { %v2768_v40 = vld.sshfl [vmem:[#allocation1] sm:$0xff pattern:$0x73625140]  ;;  %334 = vadd.xlane.f32.xlu2 %v208_v35  ;;  %332 = vadd.xlane.f32.xlu1 %v207_v36  ;;  %v2431_v28 = vpop.eup %2430 }
  0xa7   :  { %1591 = vst [vmem:[#allocation1] ss:$4 sm:$0xff] %v629_v32  ;;  %330 = vadd.xlane.f32.xlu0 %v206_v39  ;;  %v725_v4 = vperm.slane %v2431_v28, %v2693_v14  ;;  %v2433_v31 = vpop.eup %2432  ;;  %v729_v32 = vperm.slane %v2431_v28, %v2695_v15  ;;  %v733_v33 = vperm.slane %v2431_v28, %v2697_v16 }
  0xa8   :  { %1592 = vst [vmem:[#allocation1 + $0x1] ss:$4 sm:$0xff] %v633_v34  ;;  %v351_v34 = vand.u32 2147483647, %v237_v27  ;;  %v737_v36 = vperm.slane %v2431_v28, %v2699_v18  ;;  %v713_v38 = vperm.slane %v2433_v31, %v2695_v15  ;;  %v717_v39 = vperm.slane %v2433_v31, %v2697_v16 }
  0xa9   :  { %1593 = vst [vmem:[#allocation1 + $0x2] ss:$4 sm:$0xff] %v637_v37  ;;  %v2808_v26 = vpop.xlane.xlu2 %250  ;;  %v709_v37 = vperm.slane %v2433_v31, %v2693_v14 }
  0xaa   :  { %v2775_v47 = vld.sshfl [vmem:[#allocation1 + $0x20] sm:$0xff pattern:$0x73625140]  ;;  %1594 = vst [vmem:[#allocation1 + $0x3] ss:$4 sm:$0xff] %v641_v41  ;;  %2436 = vtanh.f32 %v351_v34 }
  0xab   :  { %1585 = vst [vmem:[#allocation1 + $0x20] ss:$4 sm:$0xff] %v613_v42  ;;  %v243_v42 = vpop.xlane.xlu1 %242 }
  0xac   :  { %1586 = vst [vmem:[#allocation1 + $0x21] ss:$4 sm:$0xff] %v617_v43  ;;  %v2540_v43 = vmov 0   ;;  %v354_v48 = vand.u32 2147483647, %v243_v42 }
  0xad   :  { %1587 = vst [vmem:[#allocation1 + $0x22] ss:$4 sm:$0xff] %v621_v44  ;;  %2406 = vset.pattern.permute.xlu2 %v2540_v43  ;;  %2405 = vset.pattern.permute.xlu1 %v2540_v43  ;;  %v721_v44 = vperm.slane %v2433_v31, %v2699_v18  ;;  %v247_v49 = vpop.xlane.xlu0 %246 }
  0xae   :  { %1588 = vst [vmem:[#allocation1 + $0x23] ss:$4 sm:$0xff] %v625_v46  ;;  %v2435_v46 = vpop.eup %2434  ;;  %2407 = vset.pattern.permute.xlu0 %v2540_v43  ;;  %2438 = vtanh.f32 %v354_v48 }
  0xaf   :  { %336 = vadd.xlane.f32.xlu0 %v209_v59  ;;  %v757_v51 = vperm.slane %v2435_v46, %v2693_v14  ;;  %v761_v53 = vperm.slane %v2435_v46, %v2695_v15 }
  0xb0   :  { %v2437_v52 = vpop.eup %2436 }
  0xb1   :  { %v2785_v61 = vld.sshfl [vmem:[#allocation1] sm:$0xff pattern:$0x73625140]  ;;  %v2820_v41 = vpop.xlane.xlu2 %256  ;;  %v749_v59 = vperm.slane %v2437_v52, %v2697_v16 }
  0xb2   :  { %1601 = vst [vmem:[#allocation1] ss:$4 sm:$0xff] %v661_v54  ;;  %v765_v54 = vperm.slane %v2435_v46, %v2697_v16 }
  0xb3   :  { %1602 = vst [vmem:[#allocation1 + $0x1] ss:$4 sm:$0xff] %v665_v56  ;;  %v741_v56 = vperm.slane %v2437_v52, %v2693_v14  ;;  %v2836_v58 = vpop.xlane.xlu1 %248 }
  0xb4   :  { %1603 = vst [vmem:[#allocation1 + $0x2] ss:$4 sm:$0xff] %v669_v57 }
  0xb5   :  { %v2790_v2 = vld.sshfl [vmem:[#allocation1 + $0x20] sm:$0xff pattern:$0x73625140]  ;;  %1604 = vst [vmem:[#allocation1 + $0x3] ss:$4 sm:$0xff] %v673_v60 }
  0xb6   :  { %1595 = vst [vmem:[#allocation1 + $0x20] ss:$4 sm:$0xff] %v645_v62  ;;  %v753_v62 = vperm.slane %v2437_v52, %v2699_v18 }
  0xb7   :  { %1596 = vst [vmem:[#allocation1 + $0x21] ss:$4 sm:$0xff] %v649_v63  ;;  %v2439_v63 = vpop.eup %2438 }
  0xb8   :  { %1597 = vst [vmem:[#allocation1 + $0x22] ss:$4 sm:$0xff] %v653_v0  ;;  %v789_v0 = vperm.slane %v2439_v63, %v2693_v14  ;;  %v793_v3 = vperm.slane %v2439_v63, %v2695_v15  ;;  %v797_v7 = vperm.slane %v2439_v63, %v2697_v16  ;;  %v801_v9 = vperm.slane %v2439_v63, %v2699_v18 }
  0xb9   :  { %1598 = vst [vmem:[#allocation1 + $0x23] ss:$4 sm:$0xff] %v657_v19  ;;  %v2834_v57 = vpop.xlane.xlu2 %262 }
  0xbc   :  { %v2799_v17 = vld.sshfl [vmem:[#allocation1] sm:$0xff pattern:$0x73625140] }
  0xbd   :  { %1611 = vst [vmem:[#allocation1] ss:$4 sm:$0xff] %v693_v8 }
  0xbe   :  { %1612 = vst [vmem:[#allocation1 + $0x1] ss:$4 sm:$0xff] %v697_v10  ;;  %1885 = vperm.xlu2 %2406, %v2756_v24   ;;  %v353_v24 = vand.u32 2147483647, %v241_v30  ;;  %v357_v30 = vand.u32 2147483647, %v2836_v58 }
  0xbf   :  { %1613 = vst [vmem:[#allocation1 + $0x2] ss:$4 sm:$0xff] %v701_v13  ;;  %1882 = vperm.xlu1 %2405, %v2723_v50   ;;  %v769_v50 = vperm.slane %v2435_v46, %v2699_v18  ;;  %v255_v13 = vpop.xlane.xlu1 %254 }
  0xc0   :  { %v2805_v23 = vld.sshfl [vmem:[#allocation1 + $0x20] sm:$0xff pattern:$0x73625140]  ;;  %1614 = vst [vmem:[#allocation1 + $0x3] ss:$4 sm:$0xff] %v705_v20  ;;  %2440 = vtanh.f32 %v353_v24 }
  0xc1   :  { %1605 = vst [vmem:[#allocation1 + $0x20] ss:$4 sm:$0xff] %v677_v21  ;;  %v2852_v12 = vpop.xlane.xlu2 %268 }
  0xc2   :  { %1606 = vst [vmem:[#allocation1 + $0x21] ss:$4 sm:$0xff] %v681_v1 }
  0xc3   :  { %1607 = vst [vmem:[#allocation1 + $0x22] ss:$4 sm:$0xff] %v685_v22  ;;  %1888 = vperm.xlu0 %2407, %v2740_v11   ;;  %v745_v11 = vperm.slane %v2437_v52, %v2695_v15  ;;  %v358_v22 = vand.u32 2147483647, %v2808_v26 }
  0xc4   :  { %1608 = vst [vmem:[#allocation1 + $0x23] ss:$4 sm:$0xff] %v689_v25 }
  0xc6   :  { %1891 = vperm.xlu2 %2406, %v2775_v47   ;;  %v2840_v47 = vpop.xlane.xlu0 %252  ;;  %v2441_v19 = vpop.eup %2440 }
  0xc7   :  { %v2814_v35 = vld.sshfl [vmem:[#allocation1] sm:$0xff pattern:$0x73625140]  ;;  %1894 = vperm.xlu1 %2405, %v2768_v40   ;;  %v356_v40 = vand.u32 2147483647, %v247_v49  ;;  %v773_v10 = vperm.slane %v2441_v19, %v2693_v14  ;;  %v785_v20 = vperm.slane %v2441_v19, %v2699_v18 }
  0xc8   :  { %1621 = vst [vmem:[#allocation1] ss:$4 sm:$0xff] %v725_v4 }
  0xc9   :  { %1622 = vst [vmem:[#allocation1 + $0x1] ss:$4 sm:$0xff] %v729_v32  ;;  %2442 = vtanh.f32 %v356_v40  ;;  %v2867_v31 = vpop.xlane.xlu2 %274 }
  0xca   :  { %1623 = vst [vmem:[#allocation1 + $0x2] ss:$4 sm:$0xff] %v733_v33  ;;  %2444 = vtanh.f32 %v355_v6 }
  0xcb   :  { %v1610_v45 = vld.sshfl [vmem:[#allocation1 + $0x20] sm:$0xff pattern:$0x73625140]  ;;  %1624 = vst [vmem:[#allocation1 + $0x3] ss:$4 sm:$0xff] %v737_v36  ;;  %2446 = vtanh.f32 %v358_v22 }
  0xcc   :  { %1615 = vst [vmem:[#allocation1 + $0x20] ss:$4 sm:$0xff] %v709_v37  ;;  %1909 = vperm.xlu0 %2407, %v1610_v45   ;;  %2448 = vtanh.f32 %v357_v30 }
  0xcd   :  { %1616 = vst [vmem:[#allocation1 + $0x21] ss:$4 sm:$0xff] %v713_v38 }
  0xce   :  { %1617 = vst [vmem:[#allocation1 + $0x22] ss:$4 sm:$0xff] %v717_v39  ;;  %1897 = vperm.xlu2 %2406, %v2790_v2   ;;  %v777_v2 = vperm.slane %v2441_v19, %v2695_v15  ;;  %v2857_v21 = vpop.xlane.xlu0 %258  ;;  %v360_v39 = vand.u32 2147483647, %v255_v13  ;;  %v364_v13 = vand.u32 2147483647, %v2834_v57 }
  0xcf   :  { %1618 = vst [vmem:[#allocation1 + $0x23] ss:$4 sm:$0xff] %v721_v44  ;;  %1900 = vperm.xlu1 %2405, %v2785_v61   ;;  %v781_v61 = vperm.slane %v2441_v19, %v2697_v16  ;;  %v2443_v1 = vpop.eup %2442 }
  0xd0   :  { %v821_v25 = vperm.slane %v2443_v1, %v2693_v14  ;;  %v2445_v27 = vpop.eup %2444  ;;  %v825_v28 = vperm.slane %v2443_v1, %v2695_v15  ;;  %v829_v29 = vperm.slane %v2443_v1, %v2697_v16  ;;  %v833_v26 = vperm.slane %v2443_v1, %v2699_v18 }
  0xd1   :  { %v809_v32 = vperm.slane %v2445_v27, %v2695_v15  ;;  %v813_v33 = vperm.slane %v2445_v27, %v2697_v16  ;;  %v817_v36 = vperm.slane %v2445_v27, %v2699_v18  ;;  %v2447_v38 = vpop.eup %2446  ;;  %2450 = vtanh.f32 %v360_v39  ;;  %v2882_v46 = vpop.xlane.xlu2 %280 }
  0xd2   :  { %v1629_v55 = vld.sshfl [vmem:[#allocation1] sm:$0xff pattern:$0x73625140]  ;;  %v853_v42 = vperm.slane %v2447_v38, %v2693_v14  ;;  %v2449_v43 = vpop.eup %2448  ;;  %v857_v44 = vperm.slane %v2447_v38, %v2695_v15  ;;  %v861_v45 = vperm.slane %v2447_v38, %v2697_v16  ;;  %v865_v49 = vperm.slane %v2447_v38, %v2699_v18 }
  0xd3   :  { %1631 = vst [vmem:[#allocation1] ss:$4 sm:$0xff] %v757_v51  ;;  %v837_v52 = vperm.slane %v2449_v43, %v2693_v14  ;;  %v845_v24 = vperm.slane %v2449_v43, %v2697_v16 }
  0xd4   :  { %1632 = vst [vmem:[#allocation1 + $0x1] ss:$4 sm:$0xff] %v761_v53  ;;  %1918 = vperm.xlu0 %2407, %v1629_v55   ;;  %v841_v53 = vperm.slane %v2449_v43, %v2695_v15  ;;  %v849_v55 = vperm.slane %v2449_v43, %v2699_v18 }
  0xd5   :  { %1633 = vst [vmem:[#allocation1 + $0x2] ss:$4 sm:$0xff] %v765_v54 }
  0xd6   :  { %v1620_v60 = vld.sshfl [vmem:[#allocation1 + $0x20] sm:$0xff pattern:$0x73625140]  ;;  %1634 = vst [vmem:[#allocation1 + $0x3] ss:$4 sm:$0xff] %v769_v50  ;;  %1903 = vperm.xlu2 %2406, %v2805_v23   ;;  %v2869_v23 = vpop.xlane.xlu1 %260  ;;  %v2874_v34 = vpop.xlane.xlu0 %264 }
  0xd7   :  { %1625 = vst [vmem:[#allocation1 + $0x20] ss:$4 sm:$0xff] %v741_v56  ;;  %1906 = vperm.xlu1 %2405, %v2799_v17   ;;  %v805_v17 = vperm.slane %v2445_v27, %v2693_v14  ;;  %v2451_v56 = vpop.eup %2450  ;;  %v365_v39 = vand.u32 2147483647, %v2874_v34 }
  0xd8   :  { %1626 = vst [vmem:[#allocation1 + $0x21] ss:$4 sm:$0xff] %v745_v11  ;;  %v362_v11 = vand.u32 2147483647, %v2857_v21  ;;  %v885_v58 = vperm.slane %v2451_v56, %v2693_v14  ;;  %v893_v40 = vperm.slane %v2451_v56, %v2697_v16  ;;  %v897_v19 = vperm.slane %v2451_v56, %v2699_v18 }
  0xd9   :  { %1627 = vst [vmem:[#allocation1 + $0x22] ss:$4 sm:$0xff] %v749_v59 }
  0xda   :  { %1628 = vst [vmem:[#allocation1 + $0x23] ss:$4 sm:$0xff] %v753_v62  ;;  %v2897_v62 = vpop.xlane.xlu2 %286 }
  0xdd   :  { %v2848_v8 = vld.sshfl [vmem:[#allocation1] sm:$0xff pattern:$0x73625140] }
  0xde   :  { %1641 = vst [vmem:[#allocation1] ss:$4 sm:$0xff] %v789_v0  ;;  %1912 = vperm.xlu2 %2406, %v2814_v35   ;;  %v359_v35 = vand.u32 2147483647, %v2840_v47  ;;  %v2884_v48 = vpop.xlane.xlu1 %266  ;;  %v2890_v54 = vpop.xlane.xlu0 %270  ;;  %v361_v47 = vand.u32 2147483647, %v2820_v41 }
  0xdf   :  { %1642 = vst [vmem:[#allocation1 + $0x1] ss:$4 sm:$0xff] %v793_v3  ;;  %1915 = vperm.xlu1 %2405, %v1620_v60   ;;  %v889_v60 = vperm.slane %v2451_v56, %v2695_v15 }
  0xe0   :  { %1643 = vst [vmem:[#allocation1 + $0x2] ss:$4 sm:$0xff] %v797_v7  ;;  %2452 = vtanh.f32 %v359_v35 }
  0xe1   :  { %v1630_v5 = vld.sshfl [vmem:[#allocation1 + $0x20] sm:$0xff pattern:$0x73625140]  ;;  %1644 = vst [vmem:[#allocation1 + $0x3] ss:$4 sm:$0xff] %v801_v9  ;;  %2454 = vtanh.f32 %v362_v11 }
  0xe2   :  { %1635 = vst [vmem:[#allocation1 + $0x20] ss:$4 sm:$0xff] %v773_v10  ;;  %2456 = vtanh.f32 %v361_v47  ;;  %v367_v11 = vand.u32 2147483647, %v2852_v12 }
  0xe3   :  { %1636 = vst [vmem:[#allocation1 + $0x21] ss:$4 sm:$0xff] %v777_v2  ;;  %2458 = vtanh.f32 %v364_v13 }
  0xe4   :  { %1637 = vst [vmem:[#allocation1 + $0x22] ss:$4 sm:$0xff] %v781_v61  ;;  %v2912_v61 = vpop.xlane.xlu2 %292 }
  0xe5   :  { %1638 = vst [vmem:[#allocation1 + $0x23] ss:$4 sm:$0xff] %v785_v20 }
  0xe6   :  { %1921 = vperm.xlu2 %2406, %v1630_v5   ;;  %v2453_v59 = vpop.eup %2452  ;;  %v2899_v63 = vpop.xlane.xlu1 %272 }
  0xe7   :  { %1924 = vperm.xlu1 %2405, %v2848_v8   ;;  %v869_v3 = vperm.slane %v2453_v59, %v2693_v14  ;;  %v2905_v6 = vpop.xlane.xlu0 %276  ;;  %v873_v7 = vperm.slane %v2453_v59, %v2695_v15  ;;  %v877_v8 = vperm.slane %v2453_v59, %v2697_v16  ;;  %v881_v41 = vperm.slane %v2453_v59, %v2699_v18  ;;  %v2455_v10 = vpop.eup %2454 }
  0xe8   :  { %v1649_v4 = vld.sshfl [vmem:[#allocation1] sm:$0xff pattern:$0x73625140]  ;;  %v917_v2 = vperm.slane %v2455_v10, %v2693_v14  ;;  %v2457_v20 = vpop.eup %2456  ;;  %v921_v21 = vperm.slane %v2455_v10, %v2695_v15  ;;  %v925_v1 = vperm.slane %v2455_v10, %v2697_v16 }
  0xe9   :  { %1651 = vst [vmem:[#allocation1] ss:$4 sm:$0xff] %v821_v25  ;;  %v929_v25 = vperm.slane %v2455_v10, %v2699_v18  ;;  %v901_v57 = vperm.slane %v2457_v20, %v2693_v14  ;;  %v909_v30 = vperm.slane %v2457_v20, %v2697_v16 }
  0xea   :  { %1652 = vst [vmem:[#allocation1 + $0x1] ss:$4 sm:$0xff] %v825_v28  ;;  %v363_v28 = vand.u32 2147483647, %v2869_v23 }
  0xeb   :  { %1653 = vst [vmem:[#allocation1 + $0x2] ss:$4 sm:$0xff] %v829_v29  ;;  %v905_v29 = vperm.slane %v2457_v20, %v2695_v15 }
  0xec   :  { %v1640_v37 = vld.sshfl [vmem:[#allocation1 + $0x20] sm:$0xff pattern:$0x73625140]  ;;  %1654 = vst [vmem:[#allocation1 + $0x3] ss:$4 sm:$0xff] %v833_v26  ;;  %2460 = vtanh.f32 %v363_v28 }
  0xed   :  { %1645 = vst [vmem:[#allocation1 + $0x20] ss:$4 sm:$0xff] %v805_v17  ;;  %1927 = vperm.xlu0 %2407, %v1640_v37   ;;  %v2459_v17 = vpop.eup %2458 }
  0xee   :  { %1646 = vst [vmem:[#allocation1 + $0x21] ss:$4 sm:$0xff] %v809_v32  ;;  %1930 = vperm.xlu2 %2406, %v1649_v4   ;;  %v2914_v5 = vpop.xlane.xlu1 %278  ;;  %v913_v4 = vperm.slane %v2457_v20, %v2699_v18  ;;  %v2926_v32 = vpop.xlane.xlu2 %298  ;;  %v953_v37 = vperm.slane %v2459_v17, %v2695_v15  ;;  %v957_v38 = vperm.slane %v2459_v17, %v2697_v16 }
  0xef   :  { %1647 = vst [vmem:[#allocation1 + $0x22] ss:$4 sm:$0xff] %v813_v33  ;;  %v2919_v27 = vpop.xlane.xlu0 %282  ;;  %v949_v33 = vperm.slane %v2459_v17, %v2693_v14 }
  0xf0   :  { %1648 = vst [vmem:[#allocation1 + $0x23] ss:$4 sm:$0xff] %v817_v36  ;;  %v366_v36 = vand.u32 2147483647, %v2884_v48 }
  0xf2   :  { %v2461_v43 = vpop.eup %2460  ;;  %2462 = vtanh.f32 %v366_v36  ;;  %v372_v36 = vand.u32 2147483647, %v2914_v5 }
  0xf3   :  { %v1659_v51 = vld.sshfl [vmem:[#allocation1] sm:$0xff pattern:$0x73625140]  ;;  %v933_v35 = vperm.slane %v2461_v43, %v2693_v14  ;;  %2464 = vtanh.f32 %v365_v39  ;;  %v941_v34 = vperm.slane %v2461_v43, %v2697_v16  ;;  %v371_v39 = vand.u32 2147483647, %v2905_v6 }
  0xf4   :  { %1661 = vst [vmem:[#allocation1] ss:$4 sm:$0xff] %v853_v42 }
  0xf5   :  { %1662 = vst [vmem:[#allocation1 + $0x1] ss:$4 sm:$0xff] %v857_v44  ;;  %1936 = vperm.xlu0 %2407, %v1659_v51   ;;  %v961_v44 = vperm.slane %v2459_v17, %v2699_v18  ;;  %v945_v51 = vperm.slane %v2461_v43, %v2699_v18 }
  0xf6   :  { %1663 = vst [vmem:[#allocation1 + $0x2] ss:$4 sm:$0xff] %v861_v45  ;;  %v2928_v23 = vpop.xlane.xlu1 %284 }
  0xf7   :  { %v1650_v50 = vld.sshfl [vmem:[#allocation1 + $0x20] sm:$0xff pattern:$0x73625140]  ;;  %1664 = vst [vmem:[#allocation1 + $0x3] ss:$4 sm:$0xff] %v865_v49  ;;  %v2935_v42 = vpop.xlane.xlu0 %288  ;;  %v937_v49 = vperm.slane %v2461_v43, %v2695_v15 }
  0xf8   :  { %1655 = vst [vmem:[#allocation1 + $0x20] ss:$4 sm:$0xff] %v837_v52  ;;  %1933 = vperm.xlu1 %2405, %v1650_v50   ;;  %v368_v52 = vand.u32 2147483647, %v2890_v54  ;;  %v2463_v50 = vpop.eup %2462 }
  0xf9   :  { %1656 = vst [vmem:[#allocation1 + $0x21] ss:$4 sm:$0xff] %v841_v53  ;;  %v2943_v53 = vpop.xlane.xlu2 %304  ;;  %v989_v47 = vperm.slane %v2463_v50, %v2697_v16 }
  0xfa   :  { %1657 = vst [vmem:[#allocation1 + $0x22] ss:$4 sm:$0xff] %v845_v24  ;;  %2466 = vtanh.f32 %v368_v52 }
  0xfb   :  { %1658 = vst [vmem:[#allocation1 + $0x23] ss:$4 sm:$0xff] %v849_v55  ;;  %v2465_v55 = vpop.eup %2464  ;;  %2468 = vtanh.f32 %v367_v11 }
  0xfc   :  { %v965_v54 = vperm.slane %v2465_v55, %v2693_v14  ;;  %v973_v12 = vperm.slane %v2465_v55, %v2697_v16 }
  0xfe   :  { %v1669_v0 = vld.sshfl [vmem:[#allocation1] sm:$0xff pattern:$0x73625140]  ;;  %v2945_v24 = vpop.xlane.xlu1 %290 }
  0xff   :  { %1671 = vst [vmem:[#allocation1] ss:$4 sm:$0xff] %v885_v58  ;;  %v2947_v56 = vpop.xlane.xlu0 %294  ;;  %v981_v58 = vperm.slane %v2463_v50, %v2693_v14 }
 0x100   :  { %1672 = vst [vmem:[#allocation1 + $0x1] ss:$4 sm:$0xff] %v889_v60  ;;  %1942 = vperm.xlu1 %2405, %v1669_v0   ;;  %v985_v60 = vperm.slane %v2463_v50, %v2695_v15  ;;  %v993_v0 = vperm.slane %v2463_v50, %v2699_v18  ;;  %v374_v50 = vand.u32 2147483647, %v2919_v27 }
 0x101   :  { %1673 = vst [vmem:[#allocation1 + $0x2] ss:$4 sm:$0xff] %v893_v40  ;;  %v969_v40 = vperm.slane %v2465_v55, %v2695_v15 }
 0x102   :  { %v1660_v9 = vld.sshfl [vmem:[#allocation1 + $0x20] sm:$0xff pattern:$0x73625140]  ;;  %1674 = vst [vmem:[#allocation1 + $0x3] ss:$4 sm:$0xff] %v897_v19 }
 0x103   :  { %1665 = vst [vmem:[#allocation1 + $0x20] ss:$4 sm:$0xff] %v869_v3  ;;  %1939 = vperm.xlu2 %2406, %v1660_v9   ;;  %v977_v3 = vperm.slane %v2465_v55, %v2699_v18 }
 0x104   :  { %1666 = vst [vmem:[#allocation1 + $0x21] ss:$4 sm:$0xff] %v873_v7  ;;  %v2467_v7 = vpop.eup %2466 }
 0x105   :  { %1667 = vst [vmem:[#allocation1 + $0x22] ss:$4 sm:$0xff] %v877_v8  ;;  %v2958_v8 = vpop.xlane.xlu2 %310  ;;  %v1013_v10 = vperm.slane %v2467_v7, %v2693_v14  ;;  %v1017_v20 = vperm.slane %v2467_v7, %v2695_v15 }
 0x106   :  { %1668 = vst [vmem:[#allocation1 + $0x23] ss:$4 sm:$0xff] %v881_v41  ;;  %v2960_v9 = vpop.xlane.xlu1 %296  ;;  %v370_v41 = vand.u32 2147483647, %v2867_v31  ;;  %v369_v31 = vand.u32 2147483647, %v2899_v63 }
 0x107   :  { %v2964_v13 = vpop.xlane.xlu0 %300 }
 0x108   :  { %2470 = vtanh.f32 %v370_v41 }
 0x109   :  { %v1679_v22 = vld.sshfl [vmem:[#allocation1] sm:$0xff pattern:$0x73625140]  ;;  %2472 = vtanh.f32 %v369_v31 }
 0x10a   :  { %1681 = vst [vmem:[#allocation1] ss:$4 sm:$0xff] %v917_v2  ;;  %v2469_v2 = vpop.eup %2468  ;;  %2474 = vtanh.f32 %v372_v36 }
 0x10b   :  { %1682 = vst [vmem:[#allocation1 + $0x1] ss:$4 sm:$0xff] %v921_v21  ;;  %1948 = vperm.xlu2 %2406, %v1679_v22   ;;  %v1021_v21 = vperm.slane %v2467_v7, %v2697_v16  ;;  %v1025_v22 = vperm.slane %v2467_v7, %v2699_v18  ;;  %v1005_v28 = vperm.slane %v2469_v2, %v2697_v16  ;;  %2476 = vtanh.f32 %v371_v39 }
 0x10c   :  { %1683 = vst [vmem:[#allocation1 + $0x2] ss:$4 sm:$0xff] %v925_v1  ;;  %2478 = vtanh.f32 %v374_v50 }
 0x10d   :  { %v1670_v26 = vld.sshfl [vmem:[#allocation1 + $0x20] sm:$0xff pattern:$0x73625140]  ;;  %1684 = vst [vmem:[#allocation1 + $0x3] ss:$4 sm:$0xff] %v929_v25  ;;  %v997_v25 = vperm.slane %v2469_v2, %v2693_v14 }
 0x10e   :  { %1675 = vst [vmem:[#allocation1 + $0x20] ss:$4 sm:$0xff] %v901_v57  ;;  %1945 = vperm.xlu0 %2407, %v1670_v26   ;;  %v1001_v57 = vperm.slane %v2469_v2, %v2695_v15  ;;  %v2976_v26 = vpop.xlane.xlu1 %302  ;;  %v2471_v17 = vpop.eup %2470 }
 0x10f   :  { %1676 = vst [vmem:[#allocation1 + $0x21] ss:$4 sm:$0xff] %v905_v29  ;;  %v1009_v29 = vperm.slane %v2469_v2, %v2699_v18  ;;  %v2978_v63 = vpop.xlane.xlu0 %306  ;;  %v2473_v43 = vpop.eup %2472 }
 0x110   :  { %1677 = vst [vmem:[#allocation1 + $0x22] ss:$4 sm:$0xff] %v909_v30  ;;  %v1029_v5 = vperm.slane %v2473_v43, %v2693_v14  ;;  %v1033_v6 = vperm.slane %v2473_v43, %v2695_v15  ;;  %v1041_v52 = vperm.slane %v2473_v43, %v2699_v18  ;;  %v2475_v55 = vpop.eup %2474 }
 0x111   :  { %1678 = vst [vmem:[#allocation1 + $0x23] ss:$4 sm:$0xff] %v913_v4  ;;  %v2974_v4 = vpop.xlane.xlu2 %316  ;;  %v2477_v11 = vpop.eup %2476 }
 0x112   :  { %v1069_v7 = vperm.slane %v2477_v11, %v2697_v16 }
 0x114   :  { %v1689_v45 = vld.sshfl [vmem:[#allocation1] sm:$0xff pattern:$0x73625140] }
 0x115   :  { %1691 = vst [vmem:[#allocation1] ss:$4 sm:$0xff] %v949_v33  ;;  %v1045_v33 = vperm.slane %v2471_v17, %v2693_v14 }
 0x116   :  { %1692 = vst [vmem:[#allocation1 + $0x1] ss:$4 sm:$0xff] %v953_v37  ;;  %1954 = vperm.xlu0 %2407, %v1689_v45   ;;  %v1049_v37 = vperm.slane %v2471_v17, %v2695_v15 }
 0x117   :  { %1693 = vst [vmem:[#allocation1 + $0x2] ss:$4 sm:$0xff] %v957_v38  ;;  %v1053_v38 = vperm.slane %v2471_v17, %v2697_v16 }
 0x118   :  { %v1680_v48 = vld.sshfl [vmem:[#allocation1 + $0x20] sm:$0xff pattern:$0x73625140]  ;;  %1694 = vst [vmem:[#allocation1 + $0x3] ss:$4 sm:$0xff] %v961_v44  ;;  %v1057_v44 = vperm.slane %v2471_v17, %v2699_v18 }
 0x119   :  { %1685 = vst [vmem:[#allocation1 + $0x20] ss:$4 sm:$0xff] %v933_v35  ;;  %1951 = vperm.xlu1 %2405, %v1680_v48   ;;  %v2986_v35 = vpop.xlane.xlu1 %308  ;;  %v2988_v48 = vpop.xlane.xlu2 %322 }
 0x11a   :  { %1686 = vst [vmem:[#allocation1 + $0x21] ss:$4 sm:$0xff] %v937_v49 }
 0x11b   :  { %1687 = vst [vmem:[#allocation1 + $0x22] ss:$4 sm:$0xff] %v941_v34  ;;  %v2992_v34 = vpop.xlane.xlu0 %312 }
 0x11c   :  { %1688 = vst [vmem:[#allocation1 + $0x23] ss:$4 sm:$0xff] %v945_v51  ;;  %v1037_v51 = vperm.slane %v2473_v43, %v2697_v16  ;;  %v378_v43 = vand.u32 2147483647, %v2945_v24 }
 0x11f   :  { %v1699_v59 = vld.sshfl [vmem:[#allocation1] sm:$0xff pattern:$0x73625140] }
 0x120   :  { %1701 = vst [vmem:[#allocation1] ss:$4 sm:$0xff] %v981_v58 }
 0x121   :  { %1702 = vst [vmem:[#allocation1 + $0x1] ss:$4 sm:$0xff] %v985_v60  ;;  %1960 = vperm.xlu1 %2405, %v1699_v59   ;;  %v2997_v58 = vpop.xlane.xlu1 %314  ;;  %v1077_v59 = vperm.slane %v2475_v55, %v2693_v14  ;;  %v3004_v27 = vpop.xlane.xlu2 %328 }
 0x122   :  { %1703 = vst [vmem:[#allocation1 + $0x2] ss:$4 sm:$0xff] %v989_v47  ;;  %v373_v47 = vand.u32 2147483647, %v2882_v46  ;;  %v1073_v46 = vperm.slane %v2477_v11, %v2699_v18 }
 0x123   :  { %v1690_v19 = vld.sshfl [vmem:[#allocation1 + $0x20] sm:$0xff pattern:$0x73625140]  ;;  %1704 = vst [vmem:[#allocation1 + $0x3] ss:$4 sm:$0xff] %v993_v0  ;;  %v1085_v0 = vperm.slane %v2475_v55, %v2697_v16 }
 0x124   :  { %1695 = vst [vmem:[#allocation1 + $0x20] ss:$4 sm:$0xff] %v965_v54  ;;  %1957 = vperm.xlu2 %2406, %v1690_v19   ;;  %v1081_v54 = vperm.slane %v2475_v55, %v2695_v15  ;;  %v1065_v19 = vperm.slane %v2477_v11, %v2695_v15  ;;  %2480 = vtanh.f32 %v373_v47 }
 0x125   :  { %1696 = vst [vmem:[#allocation1 + $0x21] ss:$4 sm:$0xff] %v969_v40  ;;  %v1061_v40 = vperm.slane %v2477_v11, %v2693_v14 }
 0x126   :  { %1697 = vst [vmem:[#allocation1 + $0x22] ss:$4 sm:$0xff] %v973_v12  ;;  %v3006_v12 = vpop.xlane.xlu0 %318 }
 0x127   :  { %1698 = vst [vmem:[#allocation1 + $0x23] ss:$4 sm:$0xff] %v977_v3  ;;  %v1089_v3 = vperm.slane %v2475_v55, %v2699_v18  ;;  %v377_v55 = vand.u32 2147483647, %v2935_v42 }
 0x129   :  { %v3012_v2 = vpop.xlane.xlu1 %320 }
 0x12a   :  { %v1709_v1 = vld.sshfl [vmem:[#allocation1] sm:$0xff pattern:$0x73625140] }
 0x12b   :  { %1711 = vst [vmem:[#allocation1] ss:$4 sm:$0xff] %v1013_v10  ;;  %v2479_v10 = vpop.eup %2478 }
 0x12c   :  { %1712 = vst [vmem:[#allocation1 + $0x1] ss:$4 sm:$0xff] %v1017_v20  ;;  %1966 = vperm.xlu2 %2406, %v1709_v1   ;;  %v376_v20 = vand.u32 2147483647, %v2897_v62  ;;  %v1113_v1 = vperm.slane %v2479_v10, %v2695_v15  ;;  %v2481_v31 = vpop.eup %2480 }
 0x12d   :  { %1713 = vst [vmem:[#allocation1 + $0x2] ss:$4 sm:$0xff] %v1021_v21  ;;  %v1109_v21 = vperm.slane %v2479_v10, %v2693_v14  ;;  %v1093_v62 = vperm.slane %v2481_v31, %v2693_v14 }
 0x12e   :  { %v1700_v30 = vld.sshfl [vmem:[#allocation1 + $0x20] sm:$0xff pattern:$0x73625140]  ;;  %1714 = vst [vmem:[#allocation1 + $0x3] ss:$4 sm:$0xff] %v1025_v22  ;;  %v3017_v22 = vpop.xlane.xlu0 %324  ;;  %2482 = vtanh.f32 %v376_v20 }
 0x12f   :  { %1705 = vst [vmem:[#allocation1 + $0x20] ss:$4 sm:$0xff] %v997_v25  ;;  %1963 = vperm.xlu0 %2407, %v1700_v30   ;;  %v1117_v25 = vperm.slane %v2479_v10, %v2697_v16  ;;  %v375_v30 = vand.u32 2147483647, %v2928_v23 }
 0x130   :  { %1706 = vst [vmem:[#allocation1 + $0x21] ss:$4 sm:$0xff] %v1001_v57 }
 0x131   :  { %1707 = vst [vmem:[#allocation1 + $0x22] ss:$4 sm:$0xff] %v1005_v28  ;;  %v1121_v28 = vperm.slane %v2479_v10, %v2699_v18  ;;  %v3025_v17 = vpop.xlane.xlu1 %326  ;;  %2484 = vtanh.f32 %v375_v30 }
 0x132   :  { %1708 = vst [vmem:[#allocation1 + $0x23] ss:$4 sm:$0xff] %v1009_v29  ;;  %v3021_v29 = vpop.xlane.xlu2 %334  ;;  %2486 = vtanh.f32 %v378_v43 }
 0x133   :  { %2488 = vtanh.f32 %v377_v55  ;;  %v382_v55 = vand.u32 2147483647, %v2926_v32 }
 0x134   :  { %v2483_v39 = vpop.eup %2482 }
 0x135   :  { %v1719_v45 = vld.sshfl [vmem:[#allocation1] sm:$0xff pattern:$0x73625140]  ;;  %v1149_v50 = vperm.slane %v2483_v39, %v2697_v16  ;;  %v1153_v11 = vperm.slane %v2483_v39, %v2699_v18 }
 0x136   :  { %1721 = vst [vmem:[#allocation1] ss:$4 sm:$0xff] %v1045_v33  ;;  %v1097_v33 = vperm.slane %v2481_v31, %v2695_v15  ;;  %v3030_v23 = vpop.xlane.xlu0 %330 }
 0x137   :  { %1722 = vst [vmem:[#allocation1 + $0x1] ss:$4 sm:$0xff] %v1049_v37  ;;  %1972 = vperm.xlu0 %2407, %v1719_v45   ;;  %v1101_v37 = vperm.slane %v2481_v31, %v2697_v16  ;;  %v1141_v45 = vperm.slane %v2483_v39, %v2693_v14 }
 0x138   :  { %1723 = vst [vmem:[#allocation1 + $0x2] ss:$4 sm:$0xff] %v1053_v38  ;;  %v1105_v38 = vperm.slane %v2481_v31, %v2699_v18 }
 0x139   :  { %v1710_v49 = vld.sshfl [vmem:[#allocation1 + $0x20] sm:$0xff pattern:$0x73625140]  ;;  %1724 = vst [vmem:[#allocation1 + $0x3] ss:$4 sm:$0xff] %v1057_v44  ;;  %v2073_v44 = vlaneseq }
 0x13a   :  { %1715 = vst [vmem:[#allocation1 + $0x20] ss:$4 sm:$0xff] %v1029_v5  ;;  %1969 = vperm.xlu1 %2405, %v1710_v49   ;;  %v1886_v5 = vpop.permute.xlu2 %1885  ;;  %v2485_v49 = vpop.eup %2484 }
 0x13b   :  { %1716 = vst [vmem:[#allocation1 + $0x21] ss:$4 sm:$0xff] %v1033_v6  ;;  %v1145_v6 = vperm.slane %v2483_v39, %v2695_v15  ;;  %v3040_v24 = vand.u32 127, %v2073_v44  ;;  %v1129_v47 = vperm.slane %v2485_v49, %v2695_v15  ;;  %v2487_v42 = vpop.eup %2486 }
 0x13c   :  { %1717 = vst [vmem:[#allocation1 + $0x22] ss:$4 sm:$0xff] %v1037_v51  ;;  %v1177_v31 = vperm.slane %v2487_v42, %v2695_v15  ;;  %v1181_v30 = vperm.slane %v2487_v42, %v2697_v16 }
 0x13d   :  { %1718 = vst [vmem:[#allocation1 + $0x23] ss:$4 sm:$0xff] %v1041_v52  ;;  %v3035_v52 = vpop.xlane.xlu1 %332  ;;  %v3055_v20 = vadd.s32 4294967272, %v3040_v24 }
 0x140   :  { %v1729_v60 = vld.sshfl [vmem:[#allocation1] sm:$0xff pattern:$0x73625140] }
 0x141   :  { %1731 = vst [vmem:[#allocation1] ss:$4 sm:$0xff] %v1077_v59  ;;  %v1125_v59 = vperm.slane %v2485_v49, %v2693_v14 }
 0x142   :  { %1732 = vst [vmem:[#allocation1 + $0x1] ss:$4 sm:$0xff] %v1081_v54  ;;  %1978 = vperm.xlu1 %2405, %v1729_v60   ;;  %v3043_v60 = vpop.xlane.xlu0 %336 }
 0x143   :  { %1733 = vst [vmem:[#allocation1 + $0x2] ss:$4 sm:$0xff] %v1085_v0  ;;  %v1137_v0 = vperm.slane %v2485_v49, %v2699_v18 }
 0x144   :  { %v1720_v41 = vld.sshfl [vmem:[#allocation1 + $0x20] sm:$0xff pattern:$0x73625140]  ;;  %1734 = vst [vmem:[#allocation1 + $0x3] ss:$4 sm:$0xff] %v1089_v3 }
 0x145   :  { %1725 = vst [vmem:[#allocation1 + $0x20] ss:$4 sm:$0xff] %v1061_v40  ;;  %1975 = vperm.xlu2 %2406, %v1720_v41   ;;  %v1133_v40 = vperm.slane %v2485_v49, %v2697_v16  ;;  %v380_v3 = vand.u32 2147483647, %v2947_v56  ;;  %v1173_v41 = vperm.slane %v2487_v42, %v2693_v14 }
 0x146   :  { %1726 = vst [vmem:[#allocation1 + $0x21] ss:$4 sm:$0xff] %v1065_v19  ;;  %v3049_v19 = vadd.s32 4294967288, %v3040_v24 }
 0x147   :  { %1727 = vst [vmem:[#allocation1 + $0x22] ss:$4 sm:$0xff] %v1069_v7  ;;  %v1883_v7 = vpop.permute.xlu1 %1882  ;;  %2490 = vtanh.f32 %v380_v3 }
 0x148   :  { %1728 = vst [vmem:[#allocation1 + $0x23] ss:$4 sm:$0xff] %v1073_v46  ;;  %v1892_v46 = vpop.permute.xlu2 %1891  ;;  %v2077_v10 = vperm.slane %v1886_v5, %v3049_v19 }
 0x14a   :  { %v1889_v56 = vpop.permute.xlu0 %1888 }
 0x14b   :  { %v1739_v57 = vld.sshfl [vmem:[#allocation1] sm:$0xff pattern:$0x73625140] }
 0x14c   :  { %1741 = vst [vmem:[#allocation1] ss:$4 sm:$0xff] %v1109_v21  ;;  %v2075_v21 = vperm.slane %v1883_v7, %v3040_v24  ;;  %v381_v7 = vand.u32 2147483647, %v2960_v9 }
 0x14d   :  { %1742 = vst [vmem:[#allocation1 + $0x1] ss:$4 sm:$0xff] %v1113_v1  ;;  %1984 = vperm.xlu2 %2406, %v1739_v57   ;;  %v2489_v1 = vpop.eup %2488  ;;  %v3060_v57 = vadd.s32 4294967280, %v3040_v24 }
 0x14e   :  { %1743 = vst [vmem:[#allocation1 + $0x2] ss:$4 sm:$0xff] %v1117_v25  ;;  %v1165_v44 = vperm.slane %v2489_v1, %v2697_v16 }
 0x14f   :  { %v1730_v36 = vld.sshfl [vmem:[#allocation1 + $0x20] sm:$0xff pattern:$0x73625140]  ;;  %1744 = vst [vmem:[#allocation1 + $0x3] ss:$4 sm:$0xff] %v1121_v28  ;;  %v1895_v5 = vpop.permute.xlu1 %1894 }
 0x150   :  { %1735 = vst [vmem:[#allocation1 + $0x20] ss:$4 sm:$0xff] %v1093_v62  ;;  %1981 = vperm.xlu0 %2407, %v1730_v36   ;;  %v379_v28 = vand.u32 2147483647, %v2912_v61  ;;  %v2079_v62 = vsel %vm2078_vm0, %v2077_v10, %v2075_v21  ;;  %v2081_v36 = vperm.slane %v1889_v56, %v3060_v57  ;;  %v1161_v61 = vperm.slane %v2489_v1, %v2695_v15 }
 0x151   :  { %1736 = vst [vmem:[#allocation1 + $0x21] ss:$4 sm:$0xff] %v1097_v33  ;;  %v1185_v33 = vperm.slane %v2487_v42, %v2699_v18 }
 0x152   :  { %1737 = vst [vmem:[#allocation1 + $0x22] ss:$4 sm:$0xff] %v1101_v37  ;;  %v1157_v37 = vperm.slane %v2489_v1, %v2693_v14  ;;  %v2083_v43 = vsel %vm2082_vm1, %v2081_v36, %v2079_v62  ;;  %2492 = vtanh.f32 %v379_v28  ;;  %v384_v62 = vand.u32 2147483647, %v2976_v26 }
 0x153   :  { %1738 = vst [vmem:[#allocation1 + $0x23] ss:$4 sm:$0xff] %v1105_v38  ;;  %v2085_v38 = vperm.slane %v1892_v46, %v3055_v20  ;;  %2494 = vtanh.f32 %v382_v55  ;;  %v3100_v36 = vadd.s32 4294967240, %v3040_v24 }
 0x154   :  { %2496 = vtanh.f32 %v381_v7 }
 0x155   :  { %v2087_v49 = vsel %vm2086_vm2, %v2085_v38, %v2083_v43  ;;  %v1910_v43 = vpop.permute.xlu0 %1909  ;;  %2498 = vtanh.f32 %v384_v62  ;;  %v385_v62 = vand.u32 2147483647, %v2943_v53 }
 0x156   :  { %v1749_v51 = vld.sshfl [vmem:[#allocation1] sm:$0xff pattern:$0x73625140] }
 0x157   :  { %1751 = vst [vmem:[#allocation1] ss:$4 sm:$0xff] %v1141_v45  ;;  %v3073_v45 = vadd.s32 4294967264, %v3040_v24 }
 0x158   :  { %1752 = vst [vmem:[#allocation1 + $0x1] ss:$4 sm:$0xff] %v1145_v6  ;;  %1990 = vperm.xlu0 %2407, %v1749_v51   ;;  %v1169_v6 = vperm.slane %v2489_v1, %v2699_v18  ;;  %v2491_v51 = vpop.eup %2490 }
 0x159   :  { %1753 = vst [vmem:[#allocation1 + $0x2] ss:$4 sm:$0xff] %v1149_v50  ;;  %v2089_v50 = vperm.slane %v1895_v5, %v3073_v45  ;;  %v1213_v3 = vperm.slane %v2491_v51, %v2697_v16  ;;  %v1217_v32 = vperm.slane %v2491_v51, %v2699_v18 }
 0x15a   :  { %v1740_v54 = vld.sshfl [vmem:[#allocation1 + $0x20] sm:$0xff pattern:$0x73625140]  ;;  %1754 = vst [vmem:[#allocation1 + $0x3] ss:$4 sm:$0xff] %v1153_v11  ;;  %v1898_v11 = vpop.permute.xlu2 %1897 }
 0x15b   :  { %1745 = vst [vmem:[#allocation1 + $0x20] ss:$4 sm:$0xff] %v1125_v59  ;;  %1987 = vperm.xlu1 %2405, %v1740_v54   ;;  %v2091_v59 = vsel %vm2090_vm3, %v2089_v50, %v2087_v49  ;;  %v1205_v54 = vperm.slane %v2491_v51, %v2693_v14  ;;  %v383_v49 = vand.u32 2147483647, %v2964_v13  ;;  %v3110_v50 = vadd.s32 4294967224, %v3040_v24 }
 0x15c   :  { %1746 = vst [vmem:[#allocation1 + $0x21] ss:$4 sm:$0xff] %v1129_v47  ;;  %v3082_v47 = vadd.s32 4294967256, %v3040_v24 }
 0x15d   :  { %1747 = vst [vmem:[#allocation1 + $0x22] ss:$4 sm:$0xff] %v1133_v40  ;;  %v2493_v40 = vpop.eup %2492  ;;  %2500 = vtanh.f32 %v383_v49 }
 0x15e   :  { %1748 = vst [vmem:[#allocation1 + $0x23] ss:$4 sm:$0xff] %v1137_v0  ;;  %v1209_v0 = vperm.slane %v2491_v51, %v2695_v15  ;;  %v1189_v46 = vperm.slane %v2493_v40, %v2693_v14  ;;  %v2093_v10 = vperm.slane %v1898_v11, %v3082_v47  ;;  %v1193_v21 = vperm.slane %v2493_v40, %v2695_v15  ;;  %v2495_v56 = vpop.eup %2494 }
 0x15f   :  { %v2497_v38 = vpop.eup %2496  ;;  %v1245_v5 = vperm.slane %v2495_v56, %v2697_v16  ;;  %v1249_v26 = vperm.slane %v2495_v56, %v2699_v18 }
 0x160   :  { %v2095_v9 = vsel %vm2094_vm4, %v2093_v10, %v2091_v59  ;;  %v1225_v11 = vperm.slane %v2497_v38, %v2695_v15  ;;  %v1229_v59 = vperm.slane %v2497_v38, %v2697_v16  ;;  %v2499_v7 = vpop.eup %2498  ;;  %v3127_v10 = vadd.s32 4294967200, %v3040_v24 }
 0x161   :  { %v1759_v25 = vld.sshfl [vmem:[#allocation1] sm:$0xff pattern:$0x73625140] }
 0x162   :  { %1761 = vst [vmem:[#allocation1] ss:$4 sm:$0xff] %v1173_v41  ;;  %v1901_v41 = vpop.permute.xlu1 %1900  ;;  %v1904_v28 = vpop.permute.xlu2 %1903 }
 0x163   :  { %1762 = vst [vmem:[#allocation1 + $0x1] ss:$4 sm:$0xff] %v1177_v31  ;;  %1996 = vperm.xlu1 %2405, %v1759_v25   ;;  %v1197_v25 = vperm.slane %v2493_v40, %v2697_v16  ;;  %v1201_v31 = vperm.slane %v2493_v40, %v2699_v18  ;;  %v2101_v51 = vperm.slane %v1904_v28, %v3100_v36 }
 0x164   :  { %1763 = vst [vmem:[#allocation1 + $0x2] ss:$4 sm:$0xff] %v1181_v30  ;;  %v3095_v30 = vadd.s32 4294967248, %v3040_v24 }
 0x165   :  { %v1750_v39 = vld.sshfl [vmem:[#allocation1 + $0x20] sm:$0xff pattern:$0x73625140]  ;;  %1764 = vst [vmem:[#allocation1 + $0x3] ss:$4 sm:$0xff] %v1185_v33  ;;  %v1237_v33 = vperm.slane %v2495_v56, %v2693_v14 }
 0x166   :  { %1755 = vst [vmem:[#allocation1 + $0x20] ss:$4 sm:$0xff] %v1157_v37  ;;  %1993 = vperm.xlu2 %2406, %v1750_v39   ;;  %v1241_v39 = vperm.slane %v2495_v56, %v2695_v15  ;;  %v1919_v56 = vpop.permute.xlu0 %1918 }
 0x167   :  { %1756 = vst [vmem:[#allocation1 + $0x21] ss:$4 sm:$0xff] %v1161_v61 }
 0x168   :  { %1757 = vst [vmem:[#allocation1 + $0x22] ss:$4 sm:$0xff] %v1165_v44  ;;  %v2097_v44 = vperm.slane %v1901_v41, %v3095_v30  ;;  %v386_v41 = vand.u32 2147483647, %v2978_v63  ;;  %v2501_v63 = vpop.eup %2500 }
 0x169   :  { %1758 = vst [vmem:[#allocation1 + $0x23] ss:$4 sm:$0xff] %v1169_v6  ;;  %v1221_v6 = vperm.slane %v2497_v38, %v2693_v14  ;;  %v1253_v53 = vperm.slane %v2501_v63, %v2693_v14 }
 0x16a   :  { %v1907_v37 = vpop.permute.xlu1 %1906  ;;  %v2099_v13 = vsel %vm2098_vm5, %v2097_v44, %v2095_v9  ;;  %v1269_v9 = vperm.slane %v2499_v7, %v2693_v14  ;;  %2502 = vtanh.f32 %v386_v41  ;;  %v2121_v44 = vperm.slane %v1919_v56, %v3127_v10 }
 0x16b   :  { %v2103_v40 = vsel %vm2102_vm6, %v2101_v51, %v2099_v13  ;;  %2504 = vtanh.f32 %v385_v62  ;;  %v1265_v13 = vperm.slane %v2501_v63, %v2699_v18 }
 0x16c   :  { %v1769_v42 = vld.sshfl [vmem:[#allocation1] sm:$0xff pattern:$0x73625140] }
 0x16d   :  { %1771 = vst [vmem:[#allocation1] ss:$4 sm:$0xff] %v1205_v54  ;;  %v3116_v54 = vadd.s32 4294967232, %v3040_v24 }
 0x16e   :  { %1772 = vst [vmem:[#allocation1 + $0x1] ss:$4 sm:$0xff] %v1209_v0  ;;  %2002 = vperm.xlu2 %2406, %v1769_v42   ;;  %v1233_v42 = vperm.slane %v2497_v38, %v2699_v18  ;;  %v3121_v0 = vadd.s32 4294967216, %v3040_v24 }
 0x16f   :  { %1773 = vst [vmem:[#allocation1 + $0x2] ss:$4 sm:$0xff] %v1213_v3  ;;  %v1913_v3 = vpop.permute.xlu2 %1912 }
 0x170   :  { %v1760_v1 = vld.sshfl [vmem:[#allocation1 + $0x20] sm:$0xff pattern:$0x73625140]  ;;  %1774 = vst [vmem:[#allocation1 + $0x3] ss:$4 sm:$0xff] %v1217_v32  ;;  %v2105_v32 = vperm.slane %v1907_v37, %v3116_v54  ;;  %v1277_v37 = vperm.slane %v2499_v7, %v2697_v16 }
 0x171   :  { %1765 = vst [vmem:[#allocation1 + $0x20] ss:$4 sm:$0xff] %v1189_v46  ;;  %1999 = vperm.xlu0 %2407, %v1760_v1   ;;  %v2109_v46 = vperm.slane %v1910_v43, %v3110_v50  ;;  %v3131_v1 = vadd.s32 4294967208, %v3040_v24  ;;  %v1281_v43 = vperm.slane %v2499_v7, %v2699_v18 }
 0x172   :  { %1766 = vst [vmem:[#allocation1 + $0x21] ss:$4 sm:$0xff] %v1193_v21  ;;  %v2107_v21 = vsel %vm2106_vm7, %v2105_v32, %v2103_v40  ;;  %v388_v40 = vand.u32 2147483647, %v2958_v8  ;;  %v3158_v32 = vadd.s32 4294967184, %v3040_v24 }
 0x173   :  { %1767 = vst [vmem:[#allocation1 + $0x22] ss:$4 sm:$0xff] %v1197_v25  ;;  %v1916_v25 = vpop.permute.xlu1 %1915  ;;  %v2111_v28 = vsel %vm2110_vm8, %v2109_v46, %v2107_v21 }
 0x174   :  { %1768 = vst [vmem:[#allocation1 + $0x23] ss:$4 sm:$0xff] %v1201_v31  ;;  %v2113_v31 = vperm.slane %v1913_v3, %v3121_v0  ;;  %v3155_v3 = vadd.s32 4294967176, %v3040_v24  ;;  %2506 = vtanh.f32 %v388_v40 }
 0x177   :  { %v1779_v61 = vld.sshfl [vmem:[#allocation1] sm:$0xff pattern:$0x73625140] }
 0x178   :  { %1781 = vst [vmem:[#allocation1] ss:$4 sm:$0xff] %v1237_v33  ;;  %v1273_v33 = vperm.slane %v2499_v7, %v2695_v15  ;;  %v1928_v7 = vpop.permute.xlu0 %1927 }
 0x179   :  { %1782 = vst [vmem:[#allocation1 + $0x1] ss:$4 sm:$0xff] %v1241_v39  ;;  %2008 = vperm.xlu0 %2407, %v1779_v61   ;;  %v2115_v39 = vsel %vm2114_vm9, %v2113_v31, %v2111_v28  ;;  %v2117_v61 = vperm.slane %v1916_v25, %v3131_v1  ;;  %v387_v28 = vand.u32 2147483647, %v2986_v35 }
 0x17a   :  { %1783 = vst [vmem:[#allocation1 + $0x2] ss:$4 sm:$0xff] %v1245_v5 }
 0x17b   :  { %v1770_v55 = vld.sshfl [vmem:[#allocation1 + $0x20] sm:$0xff pattern:$0x73625140]  ;;  %1784 = vst [vmem:[#allocation1 + $0x3] ss:$4 sm:$0xff] %v1249_v26  ;;  %v2119_v5 = vsel %vm2118_vm10, %v2117_v61, %v2115_v39  ;;  %v1257_v26 = vperm.slane %v2501_v63, %v2695_v15  ;;  %v1925_v41 = vpop.permute.xlu1 %1924  ;;  %2508 = vtanh.f32 %v387_v28 }
 0x17c   :  { %1775 = vst [vmem:[#allocation1 + $0x20] ss:$4 sm:$0xff] %v1221_v6  ;;  %2005 = vperm.xlu1 %2405, %v1770_v55   ;;  %v3147_v6 = vadd.s32 4294967192, %v3040_v24  ;;  %v2123_v51 = vsel %vm2122_vm11, %v2121_v44, %v2119_v5  ;;  %v1261_v55 = vperm.slane %v2501_v63, %v2697_v16  ;;  %v2129_v31 = vperm.slane %v1925_v41, %v3158_v32 }
 0x17d   :  { %1776 = vst [vmem:[#allocation1 + $0x21] ss:$4 sm:$0xff] %v1225_v11  ;;  %v1922_v11 = vpop.permute.xlu2 %1921  ;;  %v2133_v63 = vperm.slane %v1928_v7, %v3155_v3  ;;  %v390_v5 = vand.u32 2147483647, %v2997_v58  ;;  %v389_v41 = vand.u32 2147483647, %v2992_v34 }
 0x17e   :  { %1777 = vst [vmem:[#allocation1 + $0x22] ss:$4 sm:$0xff] %v1229_v59  ;;  %v2503_v59 = vpop.eup %2502 }
 0x17f   :  { %1778 = vst [vmem:[#allocation1 + $0x23] ss:$4 sm:$0xff] %v1233_v42  ;;  %v2125_v42 = vperm.slane %v1922_v11, %v3147_v6  ;;  %v1301_v46 = vperm.slane %v2503_v59, %v2693_v14  ;;  %v2505_v25 = vpop.eup %2504  ;;  %v1305_v8 = vperm.slane %v2503_v59, %v2695_v15  ;;  %v1309_v56 = vperm.slane %v2503_v59, %v2697_v16 }
 0x180   :  { %v1313_v62 = vperm.slane %v2503_v59, %v2699_v18  ;;  %v1289_v39 = vperm.slane %v2505_v25, %v2695_v15  ;;  %v1293_v35 = vperm.slane %v2505_v25, %v2697_v16  ;;  %v1297_v44 = vperm.slane %v2505_v25, %v2699_v18 }
 0x181   :  { %v2127_v21 = vsel %vm2126_vm12, %v2125_v42, %v2123_v51  ;;  %2510 = vtanh.f32 %v390_v5 }
 0x182   :  { %v1789_v38 = vld.sshfl [vmem:[#allocation1] sm:$0xff pattern:$0x73625140]  ;;  %2512 = vtanh.f32 %v389_v41 }
 0x183   :  { %1791 = vst [vmem:[#allocation1] ss:$4 sm:$0xff] %v1269_v9 }
 0x184   :  { %2014 = vperm.xlu1 %2405, %v1789_v38   ;;  %1792 = vst [vmem:[#allocation1 + $0x1] ss:$4 sm:$0xff] %v1273_v33  ;;  %v2131_v33 = vsel %vm2130_vm13, %v2129_v31, %v2127_v21 }
 0x185   :  { %1793 = vst [vmem:[#allocation1 + $0x2] ss:$4 sm:$0xff] %v1277_v37  ;;  %v1285_v37 = vperm.slane %v2505_v25, %v2693_v14  ;;  %v3171_v38 = vsel %vm2134_vm14, %v2133_v63, %v2131_v33 }
 0x186   :  { %v1780_v49 = vld.sshfl [vmem:[#allocation1 + $0x20] sm:$0xff pattern:$0x73625140]  ;;  %1794 = vst [vmem:[#allocation1 + $0x3] ss:$4 sm:$0xff] %v1281_v43  ;;  %v1931_v43 = vpop.permute.xlu2 %1930 }
 0x187   :  { %1785 = vst [vmem:[#allocation1 + $0x20] ss:$4 sm:$0xff] %v1253_v53  ;;  %2011 = vperm.xlu2 %2406, %v1780_v49   ;;  %v2507_v53 = vpop.eup %2506  ;;  %v1937_v49 = vpop.permute.xlu0 %1936 }
 0x188   :  { %1786 = vst [vmem:[#allocation1 + $0x21] ss:$4 sm:$0xff] %v1257_v26  ;;  %v1934_v26 = vpop.permute.xlu1 %1933  ;;  %v1333_v51 = vperm.slane %v2507_v53, %v2693_v14  ;;  %v1337_v59 = vperm.slane %v2507_v53, %v2695_v15  ;;  %v2139_v42 = vperm.slane %v1937_v49, %v3060_v57  ;;  %v1341_v7 = vperm.slane %v2507_v53, %v2697_v16 }
 0x189   :  { %1787 = vst [vmem:[#allocation1 + $0x22] ss:$4 sm:$0xff] %v1261_v55  ;;  %v2136_v55 = vperm.slane %v1931_v43, %v3040_v24  ;;  %v2137_v11 = vperm.slane %v1934_v26, %v3049_v19  ;;  %v391_v49 = vand.u32 2147483647, %v2974_v4 }
 0x18a   :  { %1788 = vst [vmem:[#allocation1 + $0x23] ss:$4 sm:$0xff] %v1265_v13  ;;  %v2509_v13 = vpop.eup %2508 }
 0x18b   :  { %v2138_v58 = vsel %vm2078_vm0, %v2137_v11, %v2136_v55  ;;  %v1317_v25 = vperm.slane %v2509_v13, %v2693_v14  ;;  %v1325_v34 = vperm.slane %v2509_v13, %v2697_v16  ;;  %v2511_v28 = vpop.eup %2510 }
 0x18c   :  { %v2140_v21 = vsel %vm2082_vm1, %v2139_v42, %v2138_v58  ;;  %v2513_v43 = vpop.eup %2512  ;;  %v1373_v26 = vperm.slane %v2511_v28, %v2697_v16  ;;  %v394_v58 = vand.u32 2147483647, %v2988_v48  ;;  %v393_v48 = vand.u32 2147483647, %v3012_v2 }
 0x18d   :  { %v1799_v9 = vld.sshfl [vmem:[#allocation1] sm:$0xff pattern:$0x73625140]  ;;  %v1349_v11 = vperm.slane %v2513_v43, %v2693_v14  ;;  %v1361_v42 = vperm.slane %v2513_v43, %v2699_v18 }
 0x18e   :  { %1801 = vst [vmem:[#allocation1] ss:$4 sm:$0xff] %v1301_v46  ;;  %v1345_v46 = vperm.slane %v2507_v53, %v2699_v18  ;;  %v1940_v31 = vpop.permute.xlu2 %1939 }
 0x18f   :  { %2020 = vperm.xlu2 %2406, %v1799_v9   ;;  %1802 = vst [vmem:[#allocation1 + $0x1] ss:$4 sm:$0xff] %v1305_v8  ;;  %v1321_v8 = vperm.slane %v2509_v13, %v2695_v15  ;;  %v2141_v63 = vperm.slane %v1940_v31, %v3055_v20  ;;  %v1946_v33 = vpop.permute.xlu0 %1945 }
 0x190   :  { %1803 = vst [vmem:[#allocation1 + $0x2] ss:$4 sm:$0xff] %v1309_v56  ;;  %v1329_v56 = vperm.slane %v2509_v13, %v2699_v18  ;;  %v2145_v5 = vperm.slane %v1946_v33, %v3082_v47  ;;  %v1353_v13 = vperm.slane %v2513_v43, %v2695_v15 }
 0x191   :  { %1804 = vst [vmem:[#allocation1 + $0x3] ss:$4 sm:$0xff] %v1313_v62  ;;  %v1790_v61 = vld.sshfl [vmem:[#allocation1 + $0x20] sm:$0xff pattern:$0x73625140] }
 0x192   :  { %2017 = vperm.xlu0 %2407, %v1790_v61   ;;  %1795 = vst [vmem:[#allocation1 + $0x20] ss:$4 sm:$0xff] %v1285_v37  ;;  %v392_v62 = vand.u32 2147483647, %v3006_v12  ;;  %v1943_v37 = vpop.permute.xlu1 %1942  ;;  %v1365_v61 = vperm.slane %v2511_v28, %v2693_v14 }
 0x193   :  { %1796 = vst [vmem:[#allocation1 + $0x21] ss:$4 sm:$0xff] %v1289_v39  ;;  %v2142_v39 = vsel %vm2086_vm2, %v2141_v63, %v2140_v21 }
 0x194   :  { %1797 = vst [vmem:[#allocation1 + $0x22] ss:$4 sm:$0xff] %v1293_v35  ;;  %v2143_v35 = vperm.slane %v1943_v37, %v3073_v45  ;;  %2514 = vtanh.f32 %v392_v62 }
 0x195   :  { %1798 = vst [vmem:[#allocation1 + $0x23] ss:$4 sm:$0xff] %v1297_v44  ;;  %v1369_v44 = vperm.slane %v2511_v28, %v2695_v15  ;;  %2516 = vtanh.f32 %v391_v49  ;;  %v396_v49 = vand.u32 2147483647, %v3025_v17 }
 0x196   :  { %v2144_v12 = vsel %vm2090_vm3, %v2143_v35, %v2142_v39  ;;  %v1949_v4 = vpop.permute.xlu2 %1948  ;;  %2518 = vtanh.f32 %v394_v58 }
 0x197   :  { %v2146_v55 = vsel %vm2094_vm4, %v2145_v5, %v2144_v12  ;;  %v2147_v41 = vperm.slane %v1949_v4, %v3095_v30  ;;  %2520 = vtanh.f32 %v393_v48 }
 0x198   :  { %v1809_v40 = vld.sshfl [vmem:[#allocation1] sm:$0xff pattern:$0x73625140]  ;;  %2522 = vtanh.f32 %v396_v49 }
 0x199   :  { %1811 = vst [vmem:[#allocation1] ss:$4 sm:$0xff] %v1333_v51  ;;  %v1377_v51 = vperm.slane %v2511_v28, %v2699_v18 }
 0x19a   :  { %2026 = vperm.xlu0 %2407, %v1809_v40   ;;  %1812 = vst [vmem:[#allocation1 + $0x1] ss:$4 sm:$0xff] %v1337_v59  ;;  %v1357_v40 = vperm.slane %v2513_v43, %v2697_v16  ;;  %v1952_v21 = vpop.permute.xlu1 %1951 }
 0x19b   :  { %1813 = vst [vmem:[#allocation1 + $0x2] ss:$4 sm:$0xff] %v1341_v7  ;;  %v2515_v7 = vpop.eup %2514 }
 0x19c   :  { %v1800_v9 = vld.sshfl [vmem:[#allocation1 + $0x20] sm:$0xff pattern:$0x73625140]  ;;  %1814 = vst [vmem:[#allocation1 + $0x3] ss:$4 sm:$0xff] %v1345_v46  ;;  %v1955_v46 = vpop.permute.xlu0 %1954  ;;  %v2517_v31 = vpop.eup %2516  ;;  %v1405_v63 = vperm.slane %v2515_v7, %v2697_v16  ;;  %v1409_v33 = vperm.slane %v2515_v7, %v2699_v18 }
 0x19d   :  { %2023 = vperm.xlu1 %2405, %v1800_v9   ;;  %1805 = vst [vmem:[#allocation1 + $0x20] ss:$4 sm:$0xff] %v1317_v25  ;;  %v2148_v25 = vsel %vm2098_vm5, %v2147_v41, %v2146_v55  ;;  %v2149_v9 = vperm.slane %v1952_v21, %v3100_v36  ;;  %v2151_v28 = vperm.slane %v1955_v46, %v3116_v54 }
 0x19e   :  { %1806 = vst [vmem:[#allocation1 + $0x21] ss:$4 sm:$0xff] %v1321_v8  ;;  %v1397_v8 = vperm.slane %v2515_v7, %v2693_v14  ;;  %v1381_v39 = vperm.slane %v2517_v31, %v2693_v14  ;;  %v1958_v43 = vpop.permute.xlu2 %1957  ;;  %v1393_v2 = vperm.slane %v2517_v31, %v2699_v18 }
 0x19f   :  { %1807 = vst [vmem:[#allocation1 + $0x22] ss:$4 sm:$0xff] %v1325_v34  ;;  %v1401_v34 = vperm.slane %v2515_v7, %v2695_v15  ;;  %v2150_v62 = vsel %vm2102_vm6, %v2149_v9, %v2148_v25  ;;  %v2153_v5 = vperm.slane %v1958_v43, %v3110_v50  ;;  %v395_v7 = vand.u32 2147483647, %v3017_v22 }
 0x1a0   :  { %1808 = vst [vmem:[#allocation1 + $0x23] ss:$4 sm:$0xff] %v1329_v56  ;;  %v2152_v37 = vsel %vm2106_vm7, %v2151_v28, %v2150_v62  ;;  %v397_v43 = vand.u32 2147483647, %v3004_v27 }
 0x1a1   :  { %2524 = vtanh.f32 %v395_v7 }
 0x1a2   :  { %v1961_v12 = vpop.permute.xlu1 %1960 }
 0x1a3   :  { %v1819_v53 = vld.sshfl [vmem:[#allocation1] sm:$0xff pattern:$0x73625140] }
 0x1a4   :  { %1821 = vst [vmem:[#allocation1] ss:$4 sm:$0xff] %v1365_v61  ;;  %v1385_v61 = vperm.slane %v2517_v31, %v2695_v15 }
 0x1a5   :  { %2032 = vperm.xlu1 %2405, %v1819_v53   ;;  %1822 = vst [vmem:[#allocation1 + $0x1] ss:$4 sm:$0xff] %v1369_v44  ;;  %v1389_v44 = vperm.slane %v2517_v31, %v2697_v16  ;;  %v2519_v53 = vpop.eup %2518 }
 0x1a6   :  { %1823 = vst [vmem:[#allocation1 + $0x2] ss:$4 sm:$0xff] %v1373_v26  ;;  %v1964_v26 = vpop.permute.xlu0 %1963  ;;  %v1429_v55 = vperm.slane %v2519_v53, %v2693_v14  ;;  %v1441_v41 = vperm.slane %v2519_v53, %v2699_v18 }
 0x1a7   :  { %v1810_v59 = vld.sshfl [vmem:[#allocation1 + $0x20] sm:$0xff pattern:$0x73625140]  ;;  %1824 = vst [vmem:[#allocation1 + $0x3] ss:$4 sm:$0xff] %v1377_v51  ;;  %v2154_v51 = vsel %vm2110_vm8, %v2153_v5, %v2152_v37 }
 0x1a8   :  { %2029 = vperm.xlu2 %2406, %v1810_v59   ;;  %1815 = vst [vmem:[#allocation1 + $0x20] ss:$4 sm:$0xff] %v1349_v11  ;;  %v2155_v11 = vperm.slane %v1961_v12, %v3121_v0  ;;  %v1433_v59 = vperm.slane %v2519_v53, %v2695_v15 }
 0x1a9   :  { %1816 = vst [vmem:[#allocation1 + $0x21] ss:$4 sm:$0xff] %v1353_v13  ;;  %v2521_v13 = vpop.eup %2520 }
 0x1aa   :  { %1817 = vst [vmem:[#allocation1 + $0x22] ss:$4 sm:$0xff] %v1357_v40  ;;  %v2157_v40 = vperm.slane %v1964_v26, %v3131_v1  ;;  %v2156_v17 = vsel %vm2114_vm9, %v2155_v11, %v2154_v51  ;;  %v1413_v46 = vperm.slane %v2521_v13, %v2693_v14  ;;  %v1417_v21 = vperm.slane %v2521_v13, %v2695_v15  ;;  %v2523_v31 = vpop.eup %2522 }
 0x1ab   :  { %1818 = vst [vmem:[#allocation1 + $0x23] ss:$4 sm:$0xff] %v1361_v42  ;;  %v1437_v42 = vperm.slane %v2519_v53, %v2697_v16  ;;  %v1421_v22 = vperm.slane %v2521_v13, %v2697_v16  ;;  %v1425_v9 = vperm.slane %v2521_v13, %v2699_v18  ;;  %v1461_v62 = vperm.slane %v2523_v31, %v2693_v14  ;;  %v2525_v37 = vpop.eup %2524 }
 0x1ac   :  { %v2158_v58 = vsel %vm2118_vm10, %v2157_v40, %v2156_v17  ;;  %v1445_v5 = vperm.slane %v2525_v37, %v2693_v14  ;;  %v1449_v49 = vperm.slane %v2525_v37, %v2695_v15  ;;  %v1453_v27 = vperm.slane %v2525_v37, %v2697_v16 }
 0x1ad   :  { %v1457_v51 = vperm.slane %v2525_v37, %v2699_v18  ;;  %v400_v11 = vand.u32 2147483647, %v3021_v29  ;;  %v401_v37 = vand.u32 2147483647, %v3043_v60 }
 0x1ae   :  { %v1829_v56 = vld.sshfl [vmem:[#allocation1] sm:$0xff pattern:$0x73625140]  ;;  %v1973_v28 = vpop.permute.xlu0 %1972 }
 0x1af   :  { %1831 = vst [vmem:[#allocation1] ss:$4 sm:$0xff] %v1397_v8  ;;  %v1967_v8 = vpop.permute.xlu2 %1966 }
 0x1b0   :  { %2038 = vperm.xlu2 %2406, %v1829_v56   ;;  %1832 = vst [vmem:[#allocation1 + $0x1] ss:$4 sm:$0xff] %v1401_v34  ;;  %v2159_v34 = vperm.slane %v1967_v8, %v3127_v10  ;;  %v398_v56 = vand.u32 2147483647, %v3030_v23 }
 0x1b1   :  { %1833 = vst [vmem:[#allocation1 + $0x2] ss:$4 sm:$0xff] %v1405_v63  ;;  %v1970_v63 = vpop.permute.xlu1 %1969 }
 0x1b2   :  { %1834 = vst [vmem:[#allocation1 + $0x3] ss:$4 sm:$0xff] %v1409_v33  ;;  %v1820_v35 = vld.sshfl [vmem:[#allocation1 + $0x20] sm:$0xff pattern:$0x73625140]  ;;  %v2160_v48 = vsel %vm2122_vm11, %v2159_v34, %v2158_v58  ;;  %v2161_v33 = vperm.slane %v1970_v63, %v3147_v6  ;;  %2526 = vtanh.f32 %v398_v56 }
 0x1b3   :  { %2035 = vperm.xlu0 %2407, %v1820_v35   ;;  %1825 = vst [vmem:[#allocation1 + $0x20] ss:$4 sm:$0xff] %v1381_v39  ;;  %v1465_v39 = vperm.slane %v2523_v31, %v2695_v15  ;;  %v2163_v35 = vperm.slane %v1973_v28, %v3158_v32  ;;  %2528 = vtanh.f32 %v397_v43 }
 0x1b4   :  { %1826 = vst [vmem:[#allocation1 + $0x21] ss:$4 sm:$0xff] %v1385_v61  ;;  %v2162_v23 = vsel %vm2126_vm12, %v2161_v33, %v2160_v48  ;;  %2530 = vtanh.f32 %v400_v11 }
 0x1b5   :  { %1827 = vst [vmem:[#allocation1 + $0x22] ss:$4 sm:$0xff] %v1389_v44  ;;  %v1469_v44 = vperm.slane %v2523_v31, %v2697_v16  ;;  %v2164_v53 = vsel %vm2130_vm13, %v2163_v35, %v2162_v23 }
 0x1b6   :  { %1828 = vst [vmem:[#allocation1 + $0x23] ss:$4 sm:$0xff] %v1393_v2  ;;  %v1473_v2 = vperm.slane %v2523_v31, %v2699_v18 }
 0x1b7   :  { %v1976_v12 = vpop.permute.xlu2 %1975 }
 0x1b8   :  { %v2165_v13 = vperm.slane %v1976_v12, %v3155_v3 }
 0x1b9   :  { %v1839_v4 = vld.sshfl [vmem:[#allocation1] sm:$0xff pattern:$0x73625140] }
 0x1ba   :  { %1841 = vst [vmem:[#allocation1] ss:$4 sm:$0xff] %v1429_v55  ;;  %v2527_v55 = vpop.eup %2526  ;;  %v3261_v17 = vsel %vm2134_vm14, %v2165_v13, %v2164_v53 }
 0x1bb   :  { %2044 = vperm.xlu0 %2407, %v1839_v4   ;;  %1842 = vst [vmem:[#allocation1 + $0x1] ss:$4 sm:$0xff] %v1433_v59  ;;  %v1979_v4 = vpop.permute.xlu1 %1978  ;;  %v1493_v40 = vperm.slane %v2527_v55, %v2693_v14  ;;  %v1497_v58 = vperm.slane %v2527_v55, %v2695_v15  ;;  %v1501_v29 = vperm.slane %v2527_v55, %v2697_v16 }
 0x1bc   :  { %1843 = vst [vmem:[#allocation1 + $0x2] ss:$4 sm:$0xff] %v1437_v42  ;;  %v2167_v7 = vperm.slane %v1979_v4, %v3040_v24  ;;  %v1505_v8 = vperm.slane %v2527_v55, %v2699_v18 }
 0x1bd   :  { %v1830_v25 = vld.sshfl [vmem:[#allocation1 + $0x20] sm:$0xff pattern:$0x73625140]  ;;  %1844 = vst [vmem:[#allocation1 + $0x3] ss:$4 sm:$0xff] %v1441_v41  ;;  %v2529_v41 = vpop.eup %2528 }
 0x1be   :  { %2041 = vperm.xlu1 %2405, %v1830_v25   ;;  %1835 = vst [vmem:[#allocation1 + $0x20] ss:$4 sm:$0xff] %v1413_v46  ;;  %v1485_v34 = vperm.slane %v2529_v41, %v2697_v16  ;;  %v2531_v56 = vpop.eup %2530 }
 0x1bf   :  { %1836 = vst [vmem:[#allocation1 + $0x21] ss:$4 sm:$0xff] %v1417_v21  ;;  %v399_v21 = vand.u32 2147483647, %v3035_v52  ;;  %v1489_v52 = vperm.slane %v2529_v41, %v2699_v18  ;;  %v1525_v28 = vperm.slane %v2531_v56, %v2693_v14  ;;  %v1529_v48 = vperm.slane %v2531_v56, %v2695_v15  ;;  %v1985_v60 = vpop.permute.xlu2 %1984 }
 0x1c0   :  { %1837 = vst [vmem:[#allocation1 + $0x22] ss:$4 sm:$0xff] %v1421_v22  ;;  %v1477_v22 = vperm.slane %v2529_v41, %v2693_v14  ;;  %v1533_v33 = vperm.slane %v2531_v56, %v2697_v16 }
 0x1c1   :  { %1838 = vst [vmem:[#allocation1 + $0x23] ss:$4 sm:$0xff] %v1425_v9  ;;  %v1481_v9 = vperm.slane %v2529_v41, %v2695_v15  ;;  %2532 = vtanh.f32 %v399_v21 }
 0x1c2   :  { %v1982_v59 = vpop.permute.xlu0 %1981  ;;  %2534 = vtanh.f32 %v401_v37 }
 0x1c3   :  { %v2168_v42 = vperm.slane %v1982_v59, %v3049_v19 }
 0x1c4   :  { %v1849_v61 = vld.sshfl [vmem:[#allocation1] sm:$0xff pattern:$0x73625140] }
 0x1c5   :  { %1851 = vst [vmem:[#allocation1] ss:$4 sm:$0xff] %v1461_v62  ;;  %v3267_v25 = vsel %vm2078_vm0, %v2168_v42, %v2167_v7 }
 0x1c6   :  { %2050 = vperm.xlu1 %2405, %v1849_v61   ;;  %1852 = vst [vmem:[#allocation1 + $0x1] ss:$4 sm:$0xff] %v1465_v39  ;;  %v1537_v39 = vperm.slane %v2531_v56, %v2699_v18 }
 0x1c7   :  { %1853 = vst [vmem:[#allocation1 + $0x2] ss:$4 sm:$0xff] %v1469_v44  ;;  %v2533_v63 = vpop.eup %2532  ;;  %v1994_v11 = vpop.permute.xlu2 %1993 }
 0x1c8   :  { %v1840_v26 = vld.sshfl [vmem:[#allocation1 + $0x20] sm:$0xff pattern:$0x73625140]  ;;  %1854 = vst [vmem:[#allocation1 + $0x3] ss:$4 sm:$0xff] %v1473_v2  ;;  %v1509_v61 = vperm.slane %v2533_v63, %v2693_v14  ;;  %v1513_v35 = vperm.slane %v2533_v63, %v2695_v15  ;;  %v1517_v44 = vperm.slane %v2533_v63, %v2697_v16  ;;  %v1521_v23 = vperm.slane %v2533_v63, %v2699_v18  ;;  %v2535_v2 = vpop.eup %2534 }
 0x1c9   :  { %2047 = vperm.xlu2 %2406, %v1840_v26   ;;  %1845 = vst [vmem:[#allocation1 + $0x20] ss:$4 sm:$0xff] %v1445_v5  ;;  %v1541_v5 = vperm.slane %v2535_v2, %v2693_v14 }
 0x1ca   :  { %1846 = vst [vmem:[#allocation1 + $0x21] ss:$4 sm:$0xff] %v1449_v49  ;;  %v1545_v49 = vperm.slane %v2535_v2, %v2695_v15  ;;  %v1991_v55 = vpop.permute.xlu0 %1990  ;;  %v2170_v15 = vperm.slane %v1985_v60, %v3060_v57 }
 0x1cb   :  { %1847 = vst [vmem:[#allocation1 + $0x22] ss:$4 sm:$0xff] %v1453_v27  ;;  %v1549_v27 = vperm.slane %v2535_v2, %v2697_v16 }
 0x1cc   :  { %1848 = vst [vmem:[#allocation1 + $0x23] ss:$4 sm:$0xff] %v1457_v51  ;;  %v1553_v51 = vperm.slane %v2535_v2, %v2699_v18  ;;  %v2171_v16 = vsel %vm2082_vm1, %v2170_v15, %v3267_v25  ;;  %v2174_v18 = vperm.slane %v1991_v55, %v3073_v45 }
 0x1cd   :  { %v1988_v12 = vpop.permute.xlu1 %1987 }
 0x1ce   :  { %v2172_v14 = vperm.slane %v1988_v12, %v3055_v20 }
 0x1cf   :  { %v1859_v46 = vld.sshfl [vmem:[#allocation1] sm:$0xff pattern:$0x73625140] }
 0x1d0   :  { %1861 = vst [vmem:[#allocation1] ss:$4 sm:$0xff] %v1493_v40  ;;  %v2003_v40 = vpop.permute.xlu2 %2002  ;;  %v2173_v42 = vsel %vm2086_vm2, %v2172_v14, %v2171_v16 }
 0x1d1   :  { %2056 = vperm.xlu2 %2406, %v1859_v46   ;;  %1862 = vst [vmem:[#allocation1 + $0x1] ss:$4 sm:$0xff] %v1497_v58  ;;  %v2175_v41 = vsel %vm2090_vm3, %v2174_v18, %v2173_v42  ;;  %v2176_v46 = vperm.slane %v1994_v11, %v3082_v47 }
 0x1d2   :  { %1863 = vst [vmem:[#allocation1 + $0x2] ss:$4 sm:$0xff] %v1501_v29 }
 0x1d3   :  { %1864 = vst [vmem:[#allocation1 + $0x3] ss:$4 sm:$0xff] %v1505_v8  ;;  %v1850_v31 = vld.sshfl [vmem:[#allocation1 + $0x20] sm:$0xff pattern:$0x73625140]  ;;  %v2177_v8 = vsel %vm2094_vm4, %v2176_v46, %v2175_v41 }
 0x1d4   :  { %2053 = vperm.xlu0 %2407, %v1850_v31   ;;  %1855 = vst [vmem:[#allocation1 + $0x20] ss:$4 sm:$0xff] %v1477_v22 }
 0x1d5   :  { %1856 = vst [vmem:[#allocation1 + $0x21] ss:$4 sm:$0xff] %v1481_v9  ;;  %v1997_v59 = vpop.permute.xlu1 %1996 }
 0x1d6   :  { %1857 = vst [vmem:[#allocation1 + $0x22] ss:$4 sm:$0xff] %v1485_v34  ;;  %v2178_v58 = vperm.slane %v1997_v59, %v3095_v30  ;;  %v2182_v34 = vperm.slane %v2003_v40, %v3116_v54 }
 0x1d7   :  { %1858 = vst [vmem:[#allocation1 + $0x23] ss:$4 sm:$0xff] %v1489_v52 }
 0x1d8   :  { %v2179_v22 = vsel %vm2098_vm5, %v2178_v58, %v2177_v8 }
 0x1da   :  { %v1869_v62 = vld.sshfl [vmem:[#allocation1] sm:$0xff pattern:$0x73625140] }
 0x1db   :  { %1871 = vst [vmem:[#allocation1] ss:$4 sm:$0xff] %v1525_v28 }
 0x1dc   :  { %2062 = vperm.xlu0 %2407, %v1869_v62   ;;  %1872 = vst [vmem:[#allocation1 + $0x1] ss:$4 sm:$0xff] %v1529_v48 }
 0x1dd   :  { %1873 = vst [vmem:[#allocation1 + $0x2] ss:$4 sm:$0xff] %v1533_v33 }
 0x1de   :  { %v1860_v43 = vld.sshfl [vmem:[#allocation1 + $0x20] sm:$0xff pattern:$0x73625140]  ;;  %1874 = vst [vmem:[#allocation1 + $0x3] ss:$4 sm:$0xff] %v1537_v39 }
 0x1df   :  { %2059 = vperm.xlu1 %2405, %v1860_v43   ;;  %1865 = vst [vmem:[#allocation1 + $0x20] ss:$4 sm:$0xff] %v1509_v61 }
 0x1e0   :  { %1866 = vst [vmem:[#allocation1 + $0x21] ss:$4 sm:$0xff] %v1513_v35 }
 0x1e1   :  { %1867 = vst [vmem:[#allocation1 + $0x22] ss:$4 sm:$0xff] %v1517_v44  ;;  %v2012_v9 = vpop.permute.xlu2 %2011 }
 0x1e2   :  { %1868 = vst [vmem:[#allocation1 + $0x23] ss:$4 sm:$0xff] %v1521_v23  ;;  %v2188_v37 = vperm.slane %v2012_v9, %v3131_v1 }
 0x1e3   :  { %v2000_v4 = vpop.permute.xlu0 %1999 }
 0x1e4   :  { %v2180_v29 = vperm.slane %v2000_v4, %v3100_v36 }
 0x1e5   :  { %v1879_v53 = vld.sshfl [vmem:[#allocation1] sm:$0xff pattern:$0x73625140] }
 0x1e6   :  { %v2181_v25 = vsel %vm2102_vm6, %v2180_v29, %v2179_v22 }
 0x1e7   :  { %2068 = vperm.xlu1 %2405, %v1879_v53   ;;  %v2183_v52 = vsel %vm2106_vm7, %v2182_v34, %v2181_v25 }
 0x1e9   :  { %v1870_v26 = vld.sshfl [vmem:[#allocation1 + $0x20] sm:$0xff pattern:$0x73625140]  ;;  %v2021_v61 = vpop.permute.xlu2 %2020 }
 0x1ea   :  { %2065 = vperm.xlu2 %2406, %v1870_v26   ;;  %1875 = vst [vmem:[#allocation1 + $0x20] ss:$4 sm:$0xff] %v1541_v5  ;;  %v2194_v23 = vperm.slane %v2021_v61, %v3158_v32 }
 0x1eb   :  { %1876 = vst [vmem:[#allocation1 + $0x21] ss:$4 sm:$0xff] %v1545_v49  ;;  %v2009_v21 = vpop.permute.xlu0 %2008 }
 0x1ec   :  { %1877 = vst [vmem:[#allocation1 + $0x22] ss:$4 sm:$0xff] %v1549_v27  ;;  %v2186_v56 = vperm.slane %v2009_v21, %v3121_v0 }
 0x1ed   :  { %1878 = vst [vmem:[#allocation1 + $0x23] ss:$4 sm:$0xff] %v1553_v51 }
 0x1ee   :  { %v2006_v7 = vpop.permute.xlu1 %2005 }
 0x1ef   :  { %v2184_v31 = vperm.slane %v2006_v7, %v3110_v50 }
 0x1f1   :  { %v2185_v28 = vsel %vm2110_vm8, %v2184_v31, %v2183_v52 }
 0x1f2   :  { %v2187_v62 = vsel %vm2114_vm9, %v2186_v56, %v2185_v28 }
 0x1f3   :  { %v2189_v35 = vsel %vm2118_vm10, %v2188_v37, %v2187_v62 }
 0x1f4   :  { %v1880_v13 = vld.sshfl [vmem:[#allocation1 + $0x20] sm:$0xff pattern:$0x73625140] }
 0x1f5   :  { %2071 = vperm.xlu0 %2407, %v1880_v13  }
 0x1f6   :  { %v2015_v63 = vpop.permute.xlu1 %2014 }
 0x1f7   :  { %v2190_v33 = vperm.slane %v2015_v63, %v3127_v10 }
 0x1f9   :  { %v2191_v43 = vsel %vm2122_vm11, %v2190_v33, %v2189_v35 }
 0x202   :  { %v2030_v12 = vpop.permute.xlu2 %2029 }
 0x203   :  { %v2199_v14 = vperm.slane %v2030_v12, %v3049_v19 }
 0x204   :  { %v2018_v48 = vpop.permute.xlu0 %2017 }
 0x205   :  { %v2192_v39 = vperm.slane %v2018_v48, %v3147_v6 }
 0x207   :  { %v2193_v44 = vsel %vm2126_vm12, %v2192_v39, %v2191_v43 }
 0x208   :  { %v2195_v53 = vsel %vm2130_vm13, %v2194_v23, %v2193_v44 }
 0x20a   :  { %v2039_v11 = vpop.permute.xlu2 %2038 }
 0x20b   :  { %v2205_v41 = vperm.slane %v2039_v11, %v3073_v45 }
 0x20c   :  { %v2027_v26 = vpop.permute.xlu0 %2026 }
 0x20d   :  { %v2198_v13 = vperm.slane %v2027_v26, %v3040_v24 }
 0x20f   :  { %v2024_v60 = vpop.permute.xlu1 %2023  ;;  %v2200_v40 = vsel %vm2078_vm0, %v2199_v14, %v2198_v13  ;;  %vm2233_vm0 = vcmask 1041408  }
 0x210   :  { %v2196_v2 = vperm.slane %v2024_v60, %v3155_v3 }
 0x212   :  { %v2197_v5 = vsel %vm2134_vm14, %v2196_v2, %v2195_v53 }
 0x213   :  { %v2230_v49 = vsel %vm2229_vm15, %v2197_v5, %v3171_v38 }
 0x217   :  { %v2033_v27 = vpop.permute.xlu1 %2032 }
 0x218   :  { %v2201_v4 = vperm.slane %v2033_v27, %v3060_v57 }
 0x21a   :  { %v2202_v38 = vsel %vm2082_vm1, %v2201_v4, %v2200_v40 }
 0x223   :  { %v2048_v42 = vpop.permute.xlu2 %2047 }
 0x224   :  { %v2211_v21 = vperm.slane %v2048_v42, %v3100_v36 }
 0x225   :  { %v2036_v51 = vpop.permute.xlu0 %2035 }
 0x226   :  { %v2203_v15 = vperm.slane %v2036_v51, %v3055_v20 }
 0x228   :  { %v2204_v18 = vsel %vm2086_vm2, %v2203_v15, %v2202_v38 }
 0x229   :  { %v2206_v58 = vsel %vm2090_vm3, %v2205_v41, %v2204_v18 }
 0x22b   :  { %v2057_v22 = vpop.permute.xlu2 %2056 }
 0x22c   :  { %v2217_v31 = vperm.slane %v2057_v22, %v3121_v0 }
 0x22d   :  { %v2045_v59 = vpop.permute.xlu0 %2044 }
 0x22e   :  { %v2209_v57 = vperm.slane %v2045_v59, %v3095_v30 }
 0x230   :  { %v2042_v55 = vpop.permute.xlu1 %2041 }
 0x231   :  { %v2207_v7 = vperm.slane %v2042_v55, %v3082_v47 }
 0x233   :  { %v2208_v19 = vsel %vm2094_vm4, %v2207_v7, %v2206_v58 }
 0x234   :  { %v2210_v46 = vsel %vm2098_vm5, %v2209_v57, %v2208_v19 }
 0x235   :  { %v2212_v47 = vsel %vm2102_vm6, %v2211_v21, %v2210_v46 }
 0x238   :  { %v2051_v16 = vpop.permute.xlu1 %2050 }
 0x239   :  { %v2213_v29 = vperm.slane %v2051_v16, %v3116_v54 }
 0x23b   :  { %v2214_v45 = vsel %vm2106_vm7, %v2213_v29, %v2212_v47 }
 0x246   :  { %v2054_v24 = vpop.permute.xlu0 %2053 }
 0x247   :  { %v2215_v8 = vperm.slane %v2054_v24, %v3110_v50  ;;  %v2066_v50 = vpop.permute.xlu2 %2065 }
 0x248   :  { %v2223_v63 = vperm.slane %v2066_v50, %v3147_v6 }
 0x249   :  { %v2216_v9 = vsel %vm2110_vm8, %v2215_v8, %v2214_v45 }
 0x24a   :  { %v2218_v34 = vsel %vm2114_vm9, %v2217_v31, %v2216_v9 }
 0x24e   :  { %v2063_v25 = vpop.permute.xlu0 %2062 }
 0x24f   :  { %v2221_v54 = vperm.slane %v2063_v25, %v3127_v10 }
 0x251   :  { %v2060_v20 = vpop.permute.xlu1 %2059 }
 0x252   :  { %v2219_v30 = vperm.slane %v2060_v20, %v3131_v1 }
 0x254   :  { %v2220_v36 = vsel %vm2118_vm10, %v2219_v30, %v2218_v34 }
 0x255   :  { %v2222_v56 = vsel %vm2122_vm11, %v2221_v54, %v2220_v36 }
 0x256   :  { %v2224_v1 = vsel %vm2126_vm12, %v2223_v63, %v2222_v56 }
 0x259   :  { %v2069_v52 = vpop.permute.xlu1 %2068 }
 0x25a   :  { %v2225_v28 = vperm.slane %v2069_v52, %v3158_v32 }
 0x25c   :  { %v2226_v0 = vsel %vm2130_vm13, %v2225_v28, %v2224_v1 }
 0x267   :  { %v2072_v48 = vpop.permute.xlu0 %2071 }
 0x268   :  { %v2227_v62 = vperm.slane %v2072_v48, %v3155_v3 }
 0x26a   :  { %v2228_v33 = vsel %vm2134_vm14, %v2227_v62, %v2226_v0 }
 0x26b   :  { %v2231_v10 = vsel %vm2229_vm15, %v2228_v33, %v3261_v17 }
 0x26c   :  { %v2232_v37 = vrot.slane %v2231_v10, 6 }
 0x26e   :  { %v2234_v39 = vsel %vm2233_vm0, %v2230_v49, %v2232_v37 }
 0x26f   :  { %2236 = vst [vmem:[%s3356_s2] sm:$0xf] %v2234_v39 }

</bundles_post_ra>
